<compile_context>
chip_gen: v6e
topology: v6e:2x2x1
jax: 0.10.0
libtpu: 0.0.40
codegen_flags: <defaults>
</compile_context>

<pallas_src>
import functools

import numpy as np
import jax
import jax.numpy as jnp
from jax.experimental import pallas as pl
from jax.experimental.pallas import tpu as pltpu

# ---------------------------------------------------------------------------
# constants copied from the PyTorch module
# ---------------------------------------------------------------------------
dynamic_class = [0, 1, 3, 4, 5, 7, 9, 10]

nusc_class_frequencies = np.array([
    1163161, 2309034, 188743, 2997643, 20317180, 852476, 243808, 2457947,
    497017, 2731022, 7224789, 214411435, 5565043, 63191967, 76098082,
    128860031, 141625221, 2307405309])

nusc_class_nums = np.array([
    2854504, 7291443, 141614, 4239939, 32248552, 1583610, 364372, 2346381,
    582961, 4829021, 14073691, 191019309, 6249651, 55095657, 58484771,
    193834360, 131378779], dtype=np.float64)


# ---------------------------------------------------------------------------
# glue helpers (plain numpy)
# ---------------------------------------------------------------------------
def _interp_matrix(out_size, in_size):
    """align_corners=True bilinear interpolation as a dense (out, in) matrix."""
    M = np.zeros((out_size, in_size), dtype=np.float32)
    if out_size == 1:
        src = np.zeros((1,), dtype=np.float64)
    else:
        src = np.arange(out_size, dtype=np.float64) * (in_size - 1) / (out_size - 1)
    i0 = np.clip(np.floor(src).astype(np.int64), 0, in_size - 1)
    i1 = np.clip(i0 + 1, 0, in_size - 1)
    frac = (src - i0).astype(np.float32)
    for r in range(out_size):
        M[r, i0[r]] += 1.0 - frac[r]
        M[r, i1[r]] += frac[r]
    return M


def _build_covariance_from_scaling_rotation(scales, rots):
    """Faithful numpy port of build_covariance_from_scaling_rotation (init-time only)."""
    norm = np.sqrt((rots ** 2).sum(axis=1, keepdims=True))
    q = rots / norm
    r, x, y, z = q[:, 0], q[:, 1], q[:, 2], q[:, 3]
    R = np.zeros((q.shape[0], 3, 3), np.float32)
    R[:, 0, 0] = 1 - 2 * (y * y + z * z)
    R[:, 0, 1] = 2 * (x * y - r * z)
    R[:, 0, 2] = 2 * (x * z + r * y)
    R[:, 1, 0] = 2 * (x * y + r * z)
    R[:, 1, 1] = 1 - 2 * (x * x + z * z)
    R[:, 1, 2] = 2 * (y * z - r * x)
    R[:, 2, 0] = 2 * (x * z - r * y)
    R[:, 2, 1] = 2 * (y * z + r * x)
    R[:, 2, 2] = 1 - 2 * (x * x + y * y)
    L = np.zeros_like(R)
    L[:, 0, 0] = scales[:, 0]
    L[:, 1, 1] = scales[:, 1]
    L[:, 2, 2] = scales[:, 2]
    L = R @ L
    cov = L @ np.transpose(L, (0, 2, 1))
    return np.stack([cov[:, 0, 0], cov[:, 0, 1], cov[:, 0, 2],
                     cov[:, 1, 1], cov[:, 1, 2], cov[:, 2, 2]], axis=1)


def _choose_tile_rows(rows_pad, cols, c, target_bytes=2 * 1024 * 1024):
    """Largest row tile TR (multiple of 8, dividing rows_pad) whose (TR, C, cols)
    f32 logits tile stays under ~target_bytes.  rows_pad is always a multiple of
    8 (the wrapper pads), so a valid tile always exists (worst case TR=8).
    Budget is conservative: several live f32 copies of the tile (t1, x, onehot,
    exp) plus double-buffered inputs must fit the scoped VMEM limit on v7x."""
    per_row = c * cols * 4
    if rows_pad * per_row <= target_bytes:
        return rows_pad
    best = 8
    for tr in range(8, rows_pad, 8):
        if rows_pad % tr == 0 and tr * per_row <= target_bytes:
            best = tr
    return best


# ---------------------------------------------------------------------------
# Fused Pallas kernel: bilinear resize (2 MXU matmuls) + masked/weighted CE
# ---------------------------------------------------------------------------
def _fused_sem_kernel(aux_ref,            # SMEM (N,) int32  scalar prefetch
                      fmap_ref,           # (1, HR, C, WR)   mm dtype (bf16)
                      ry_ref,             # (TR, HR)         mm dtype
                      rx_ref,             # (cols, WR)       mm dtype
                      gt_ref,             # (1, TR, cols)    int32
                      mask_ref,           # (1, TR, cols)    float32
                      tbl_ref,            # (C, 2)           float32
                      sum_ref,            # (1, 1, 1)        f32 accumulator
                      cnt_ref):           # (1, 1, 1)        f32 accumulator
    n = pl.program_id(0)
    t = pl.program_id(1)

    @pl.when(t == 0)
    def _():
        sum_ref[...] = jnp.zeros_like(sum_ref)
        cnt_ref[...] = jnp.zeros_like(cnt_ref)

    # ---- bilinear resize of this row tile: two lane-dense 2-D MXU matmuls ----
    f3 = fmap_ref[0]                                    # (HR, C, WR)
    ry = ry_ref[...]                                    # (TR, HR)
    rx = rx_ref[...]                                    # (cols, WR)
    # (TR, C, WR)  ==  (TR, HR) @ (HR, C*WR)   -- C folded into N
    t1 = jax.lax.dot_general(ry, f3, (((1,), (0,)), ((), ())),
                             preferred_element_type=jnp.float32)
    # (TR, C, cols) == (TR*C, WR) @ (WR, cols)  -- C folded into M
    x = jax.lax.dot_general(t1.astype(rx.dtype), rx, (((2,), (1,)), ((), ())),
                            preferred_element_type=jnp.float32)

    # ---- class-weighted, aux-weighted, masked cross entropy ------------------
    gt = gt_ref[0]                                      # (TR, cols) int32
    mask = mask_ref[0]                                  # (TR, cols) f32

    onehot = (jax.lax.broadcasted_iota(jnp.int32, x.shape, 1)
              == gt[:, None, :]).astype(jnp.float32)    # (TR, C, cols)

    m = jnp.max(x, axis=1, keepdims=True)               # (TR, 1, cols)  XLU reduce
    lse = m[:, 0, :] + jnp.log(jnp.sum(jnp.exp(x - m), axis=1))   # (TR, cols)
    logit_gt = jnp.sum(x * onehot, axis=1)              # (TR, cols)
    nll = lse - logit_gt                                # -log_softmax[gt]

    # per-class combined weight: col 0 = class_weight, col 1 = class_weight * aux
    tbl = tbl_ref[...]                                  # (C, 2)
    use_aux = (aux_ref[n] > 0).astype(jnp.float32)      # per-camera scalar flag
    w_cls = tbl[:, 0:1] * (1.0 - use_aux) + tbl[:, 1:2] * use_aux      # (C, 1)
    pix_w = jnp.sum(w_cls[None, :, :] * onehot, axis=1) * mask         # (TR, cols)

    sum_ref[...] += jnp.sum(pix_w * nll).reshape(1, 1, 1)
    cnt_ref[...] += jnp.sum(mask).reshape(1, 1, 1)


@functools.partial(jax.jit, static_argnames=("tile_rows",))
def _fused_sem_loss_sums(aux_flags, fmap_t, ry, rx, gt3, mask3, tables, *, tile_rows):
    """Per-camera (weighted CE sum, mask count) for all cameras in one pallas_call."""
    N, HR, C, WR = fmap_t.shape
    rows = ry.shape[0]
    cols = rx.shape[0]
    assert rows % tile_rows == 0
    num_row_tiles = rows // tile_rows
    sums, cnts = pl.pallas_call(
        _fused_sem_kernel,
        out_shape=(jax.ShapeDtypeStruct((N, 1, 1), jnp.float32),
                   jax.ShapeDtypeStruct((N, 1, 1), jnp.float32)),
        grid_spec=pltpu.PrefetchScalarGridSpec(
            num_scalar_prefetch=1,                       # per-camera aux flags (SMEM)
            grid=(N, num_row_tiles),
            in_specs=[
                # full rendered map of camera n, pre-transposed to (HR, C, WR);
                # index is invariant in t -> stays VMEM-resident across row tiles
                pl.BlockSpec((1, HR, C, WR), lambda n, t, aux: (n, 0, 0, 0)),
                # row tile of the H-interpolation matrix
                pl.BlockSpec((tile_rows, HR), lambda n, t, aux: (t, 0)),
                # full W-interpolation matrix (grid-invariant -> resident)
                pl.BlockSpec((cols, WR), lambda n, t, aux: (0, 0)),
                # lane-dense gt / mask tiles
                pl.BlockSpec((1, tile_rows, cols), lambda n, t, aux: (n, t, 0)),
                pl.BlockSpec((1, tile_rows, cols), lambda n, t, aux: (n, t, 0)),
                # tiny combined class-weight table
                pl.BlockSpec((C, 2), lambda n, t, aux: (0, 0)),
            ],
            out_specs=(pl.BlockSpec((1, 1, 1), lambda n, t, aux: (n, 0, 0)),
                       pl.BlockSpec((1, 1, 1), lambda n, t, aux: (n, 0, 0)))),
        compiler_params=pltpu.CompilerParams(
            dimension_semantics=("parallel", "arbitrary"),
            vmem_limit_bytes=48 * 1024 * 1024),
    )(aux_flags, fmap_t, ry, rx, gt3, mask3, tables)
    return sums[:, 0, 0], cnts[:, 0, 0]


# ---------------------------------------------------------------------------
# Head
# ---------------------------------------------------------------------------
class GausSplatingHeadPallas:
    def __init__(self, point_cloud_range, voxel_size, use_aux_weight=False,
                 voxel_feature_dim=17, num_classes=18, render_img_shape=None,
                 balance_cls_weight=True, gaussian_sem_weight=1.0,
                 weight_adj=0.3, weight_dyn=0.0,
                 x_lim_num=200, y_lim_num=200, z_lim_num=16,
                 mm_dtype=jnp.bfloat16):
        self.use_aux_weight = use_aux_weight
        self.weight_adj = float(weight_adj)
        self.weight_dyn = float(weight_dyn)
        self.voxel_size = voxel_size
        self.voxel_feature_dim = voxel_feature_dim
        self.num_classes = num_classes
        self.gaussian_sem_weight = gaussian_sem_weight
        self.render_image_height, self.render_image_width = render_img_shape
        self.x_lim_num, self.y_lim_num, self.z_lim_num = x_lim_num, y_lim_num, z_lim_num
        self.xyz_min = np.asarray(point_cloud_range[:3], np.float32)
        self.xyz_max = np.asarray(point_cloud_range[3:], np.float32)
        self.mm_dtype = mm_dtype
        self._interp_cache = {}

        # per-class tables (kept 1-D for the pure-JAX reference)
        dyn_w = np.exp(0.005 * (nusc_class_nums.max() / nusc_class_nums - 1.0)
                       ).astype(np.float32)
        dyn_m = np.zeros((nusc_class_nums.shape[0],), np.float32)
        dyn_m[np.asarray(dynamic_class)] = 1.0
        if balance_cls_weight:
            cw = (1.0 / np.log(nusc_class_frequencies[:17] + 0.001)).astype(np.float32)
        else:
            cw = (np.ones(17, np.float32) / 17.0)
        self.class_weights = jnp.asarray(cw)
        self.dynamic_weight_tbl = jnp.asarray(dyn_w)
        self.dynamic_mask_tbl = jnp.asarray(dyn_m)
        # combined kernel table: col 0 = class weight, col 1 = class weight * aux weight
        aux_per_class = np.where(dyn_m > 0.5, self.weight_dyn, self.weight_adj) * dyn_w
        self.ce_tables = jnp.asarray(
            np.stack([cw, cw * aux_per_class], axis=1).astype(np.float32))   # (17, 2)

        # --- pseudo voxel centers + precomputed 3D covariance (rasterizer params) ---
        pc_xyz = self._get_presudo_xyz()
        self.pc_xyz = jnp.asarray(pc_xyz)
        # TODO(synk): distCUDA2 uses a scipy KDTree k-NN query (no Pallas equivalent);
        # for a regular voxel grid the mean squared NN distance is voxel_size^2.
        dist = max(self.voxel_size ** 2, 1e-7)
        scales = np.full((pc_xyz.shape[0], 3), np.sqrt(dist) / 2.0, np.float32)
        rots = np.zeros((pc_xyz.shape[0], 4), np.float32)
        rots[:, 0] = 1.0
        self.cov3D_precomp = jnp.asarray(
            _build_covariance_from_scaling_rotation(scales, rots))

    def _get_presudo_xyz(self):
        def centers(lo, hi, lim):
            g = np.arange(lo, hi + self.voxel_size - 0.1, self.voxel_size,
                          dtype=np.float32)
            return (g[:lim] + g[1:]) / 2.0
        vx = centers(self.xyz_min[0], self.xyz_max[0], self.x_lim_num)
        vy = centers(self.xyz_min[1], self.xyz_max[1], self.y_lim_num)
        vz = centers(self.xyz_min[2], self.xyz_max[2], self.z_lim_num)
        X, Y, Z = np.meshgrid(vx, vy, vz, indexing='ij')
        return np.stack([X, Y, Z], axis=-1).reshape(-1, 3).astype(np.float32)

    def _interp(self, out_size, in_size):
        key = (int(out_size), int(in_size))
        if key not in self._interp_cache:
            self._interp_cache[key] = jnp.asarray(
                _interp_matrix(key[0], key[1]), dtype=self.mm_dtype)
        return self._interp_cache[key]

    def forward(self, semantic_features, cameras, opacity, rendered_feature_maps=None):
        C = self.num_classes - 1
        gt_sem = cameras[-2]            # (B, NCAM, HM, WM)
        sem_mask = cameras[-1]          # (B, NCAM, HM, WM)
        B = int(semantic_features.shape[0])
        NCAM = int(gt_sem.shape[1])
        N = B * NCAM

        # TODO(synk): render_feature_map is an external CUDA gaussian-splatting
        # rasterizer (consumes opacity, self.pc_xyz, self.cov3D_precomp, the voxel
        # features and camera matrices); no Pallas equivalent — its output is taken
        # as the `rendered_feature_maps` input instead.
        rendered = rendered_feature_maps                 # (B, NCAM, C, HR, WR)
        HR, WR = int(rendered.shape[-2]), int(rendered.shape[-1])
        HM, WM = int(sem_mask.shape[-2]), int(sem_mask.shape[-1])
        # torch: F.interpolate(..., size=(mask.shape[1], mask.shape[0]))
        rows, cols = WM, HM
        rows_pad = ((rows + 7) // 8) * 8                 # (8,·) sublane divisibility

        ry = self._interp(rows, HR)                      # (rows, HR)
        rx = self._interp(cols, WR)                      # (cols, WR)

        # feature maps pre-transposed to (N, HR, C, WR): the in-kernel resize then
        # needs no transpose and lowers to two plain 2-D matmuls.
        fmap_t = jnp.transpose(rendered.reshape(N, C, HR, WR),
                               (0, 2, 1, 3)).astype(self.mm_dtype)
        # gt / mask flattened per camera and re-gridded to the resized (rows, cols)
        # pixel order — same flat pairing as the PyTorch code.
        gt3 = gt_sem.reshape(N, rows, cols).astype(jnp.int32)
        mask3 = sem_mask.reshape(N, rows, cols).astype(jnp.float32)

        if rows_pad != rows:
            # zero interp rows -> zero logits; zero mask -> zero loss/count.
            pad = rows_pad - rows
            ry = jnp.concatenate([ry, jnp.zeros((pad, HR), ry.dtype)], axis=0)
            gt3 = jnp.pad(gt3, ((0, 0), (0, pad), (0, 0)))
            mask3 = jnp.pad(mask3, ((0, 0), (0, pad), (0, 0)))

        aux = np.zeros((N,), np.int32)
        if self.use_aux_weight:
            for n in range(N):
                if (n % NCAM) not in (0, 1, 2, 3, 4, 5):
                    aux[n] = 1
        aux_flags = jnp.asarray(aux)

        tile_rows = _choose_tile_rows(rows_pad, cols, C)
        sums, cnts = _fused_sem_loss_sums(aux_flags, fmap_t, ry, rx, gt3, mask3,
                                          self.ce_tables, tile_rows=tile_rows)
        # per-camera mean CE, summed over cameras, averaged over the batch.
        # (no cnt==0 guard: an all-masked-out camera yields NaN, same as PyTorch)
        loss = jnp.sum(sums / cnts) / B * self.gaussian_sem_weight
        return {'render_sem_loss': loss}


# ---------------------------------------------------------------------------
# pure-JAX reference (correctness check of the fused Pallas path)
# ---------------------------------------------------------------------------
def _reference_loss(head, rendered, gt_sem, sem_mask):
    B, NCAM, C, HR, WR = rendered.shape
    total = 0.0
    for b in range(B):
        for c_id in range(NCAM):
            mask_c = sem_mask[b, c_id]
            gt_c = gt_sem[b, c_id]
            rows, cols = int(mask_c.shape[1]), int(mask_c.shape[0])
            ry = head._interp(rows, HR)
            rx = head._interp(cols, WR)
            # same resize math (bf16 inputs, f32 accumulation) as the kernel
            f3 = jnp.transpose(rendered[b, c_id], (1, 0, 2)).astype(head.mm_dtype)
            t1 = jax.lax.dot_general(ry, f3, (((1,), (0,)), ((), ())),
                                     preferred_element_type=jnp.float32)
            x = jax.lax.dot_general(t1.astype(head.mm_dtype), rx,
                                    (((2,), (1,)), ((), ())),
                                    preferred_element_type=jnp.float32)  # (rows, C, cols)
            logits = jnp.transpose(x, (0, 2, 1)).reshape(-1, C)
            gt = gt_c.reshape(-1).astype(jnp.int32)
            m = mask_c.reshape(-1).astype(jnp.float32)
            logp = jax.nn.log_softmax(logits, axis=-1)
            nll = -jnp.take_along_axis(logp, gt[:, None], axis=-1)[:, 0]
            ce = head.class_weights[gt] * nll
            if head.use_aux_weight and c_id not in [0, 1, 2, 3, 4, 5]:
                is_dyn = head.dynamic_mask_tbl[gt] > 0.5
                aux = jnp.where(is_dyn, head.weight_dyn, head.weight_adj) \
                      * head.dynamic_weight_tbl[gt]
            else:
                aux = jnp.ones_like(ce)
            total = total + jnp.sum(ce * aux * m) / jnp.sum(m)
    return total / B * head.gaussian_sem_weight


# ---------------------------------------------------------------------------
if __name__ == "__main__":
    key = jax.random.PRNGKey(0)
    B, NCAM, C = 2, 7, 17
    HR = WR = 8            # rendered feature map spatial size
    HM = WM = 16           # semantic label / mask spatial size

    head = GausSplatingHeadPallas(
        point_cloud_range=[-2.0, -2.0, -1.0, 2.0, 2.0, 1.0], voxel_size=0.5,
        use_aux_weight=True, voxel_feature_dim=17, num_classes=18,
        render_img_shape=(HR, WR), gaussian_sem_weight=1.0,
        weight_adj=0.3, weight_dyn=0.0, x_lim_num=8, y_lim_num=8, z_lim_num=4)

    k1, k2, k3, k4, k5 = jax.random.split(key, 5)
    semantic_features = jax.random.normal(k1, (B, 8, 8, 4, 17), jnp.float32)
    opacity = jax.nn.sigmoid(jax.random.normal(k2, (B, 8, 8, 4, 1), jnp.float32))
    rendered = jax.random.normal(k3, (B, NCAM, C, HR, WR), jnp.float32)
    gt_sem = jax.random.randint(k4, (B, NCAM, HM, WM), 0, 17).astype(jnp.int32)
    sem_mask = jax.random.uniform(k5, (B, NCAM, HM, WM)) > 0.3

    view_dummy = jnp.tile(jnp.eye(4, dtype=jnp.float32)[None, None], (B, NCAM, 1, 1))
    # cameras[:-4] -> view point params, cameras[-2] -> gt sem, cameras[-1] -> label mask
    cameras = [view_dummy, view_dummy, view_dummy, gt_sem, sem_mask]

    out = head.forward(semantic_features, cameras, opacity,
                       rendered_feature_maps=rendered)
    loss = jax.block_until_ready(out['render_sem_loss'])

    ref = jax.block_until_ready(_reference_loss(head, rendered, gt_sem, sem_mask))
    assert np.isfinite(float(loss)), "loss is not finite"
    np.testing.assert_allclose(float(loss), float(ref), rtol=1e-3, atol=1e-5)

    print("KERNEL_OK")
</pallas_src>

<mosaic_0001>
module attributes {stable_mosaic.version = 11 : i64} {
  func.func @_fused_sem_kernel(%arg0: i32, %arg1: i32, %arg2: memref<14xi32, #tpu.memory_space<smem>>, %arg3: memref<1x8x17x8xbf16, #tpu.memory_space<vmem>>, %arg4: memref<16x8xbf16, #tpu.memory_space<vmem>>, %arg5: memref<16x8xbf16, #tpu.memory_space<vmem>>, %arg6: memref<1x16x16xi32, #tpu.memory_space<vmem>>, %arg7: memref<1x16x16xf32, #tpu.memory_space<vmem>>, %arg8: memref<17x2xf32, #tpu.memory_space<vmem>>, %arg9: memref<1x1x1xf32, #tpu.memory_space<vmem>>, %arg10: memref<1x1x1xf32, #tpu.memory_space<vmem>>) attributes {dimension_semantics = [#tpu.dimension_semantics<parallel>, #tpu.dimension_semantics<arbitrary>], iteration_bounds = array<i64: 14, 1>, scalar_prefetch = 1 : i64, scratch_operands = 0 : i64, tpu.core_type = #tpu.core_type<tc>, window_params = [{transform_indices = @transform_0, window_bounds = array<i64: 1, 8, 17, 8>}, {transform_indices = @transform_1, window_bounds = array<i64: 16, 8>}, {pipeline_mode = #tpu.pipeline_mode<synchronous>, transform_indices = @transform_2, window_bounds = array<i64: 16, 8>}, {transform_indices = @transform_3, window_bounds = array<i64: 1, 16, 16>}, {transform_indices = @transform_4, window_bounds = array<i64: 1, 16, 16>}, {pipeline_mode = #tpu.pipeline_mode<synchronous>, transform_indices = @transform_5, window_bounds = array<i64: 17, 2>}, {transform_indices = @transform_6, window_bounds = array<i64: 1, 1, 1>}, {transform_indices = @transform_7, window_bounds = array<i64: 1, 1, 1>}]} {
    %c0_i32 = arith.constant 0 : i32
    %0 = arith.cmpi eq, %arg1, %c0_i32 : i32
    %1 = arith.extui %0 : i1 to i32
    %c0_i32_0 = arith.constant 0 : i32
    %2 = arith.cmpi ne, %1, %c0_i32_0 : i32
    scf.if %2 {
      %cst_37 = arith.constant 0.000000e+00 : f32
      %68 = vector.broadcast %cst_37 : f32 to vector<1x1x1xf32>
      %c0_38 = arith.constant 0 : index
      %c0_39 = arith.constant 0 : index
      %c0_40 = arith.constant 0 : index
      %69 = vector.load %arg9[%c0_38, %c0_39, %c0_40] : memref<1x1x1xf32, #tpu.memory_space<vmem>>, vector<1x1x1xf32>
      tpu.vector_store %arg9[%c0_38, %c0_39, %c0_40], %68 {strides = array<i32>} : memref<1x1x1xf32, #tpu.memory_space<vmem>>, vector<1x1x1xf32>,
      %cst_41 = arith.constant 0.000000e+00 : f32
      %70 = vector.broadcast %cst_41 : f32 to vector<1x1x1xf32>
      %c0_42 = arith.constant 0 : index
      %c0_43 = arith.constant 0 : index
      %c0_44 = arith.constant 0 : index
      %71 = vector.load %arg10[%c0_42, %c0_43, %c0_44] : memref<1x1x1xf32, #tpu.memory_space<vmem>>, vector<1x1x1xf32>
      tpu.vector_store %arg10[%c0_42, %c0_43, %c0_44], %70 {strides = array<i32>} : memref<1x1x1xf32, #tpu.memory_space<vmem>>, vector<1x1x1xf32>,
    } else {
    }
    %c0 = arith.constant 0 : index
    %c0_1 = arith.constant 0 : index
    %c0_2 = arith.constant 0 : index
    %c0_3 = arith.constant 0 : index
    %3 = vector.load %arg3[%c0, %c0_1, %c0_2, %c0_3] : memref<1x8x17x8xbf16, #tpu.memory_space<vmem>>, vector<1x8x17x8xbf16>
    %4 = vector.shape_cast %3 : vector<1x8x17x8xbf16> to vector<8x17x8xbf16>
    %c0_4 = arith.constant 0 : index
    %c0_5 = arith.constant 0 : index
    %5 = vector.load %arg4[%c0_4, %c0_5] : memref<16x8xbf16, #tpu.memory_space<vmem>>, vector<16x8xbf16>
    %c0_6 = arith.constant 0 : index
    %c0_7 = arith.constant 0 : index
    %6 = vector.load %arg5[%c0_6, %c0_7] : memref<16x8xbf16, #tpu.memory_space<vmem>>, vector<16x8xbf16>
    %cst = arith.constant dense<0.000000e+00> : vector<16x17x8xf32>
    %7 = tpu.matmul %5, %4, %cst {dimension_numbers = #tpu.dot_dimension_numbers<[1], [0], [0], [1, 2], [0, 0, 1, 1, 1, 2], [], []>} : vector<16x8xbf16>, vector<8x17x8xbf16>, vector<16x17x8xf32> -> vector<16x17x8xf32>
    %8 = arith.truncf %7 : vector<16x17x8xf32> to vector<16x17x8xbf16>
    %cst_8 = arith.constant dense<0.000000e+00> : vector<16x17x16xf32>
    %9 = tpu.matmul %8, %6, %cst_8 {dimension_numbers = #tpu.dot_dimension_numbers<[2], [1], [0, 1], [0], [0, 0, 0, 1, 1, 0], [], []>} : vector<16x17x8xbf16>, vector<16x8xbf16>, vector<16x17x16xf32> -> vector<16x17x16xf32>
    %c0_9 = arith.constant 0 : index
    %c0_10 = arith.constant 0 : index
    %c0_11 = arith.constant 0 : index
    %10 = vector.load %arg6[%c0_9, %c0_10, %c0_11] : memref<1x16x16xi32, #tpu.memory_space<vmem>>, vector<1x16x16xi32>
    %11 = vector.shape_cast %10 : vector<1x16x16xi32> to vector<16x16xi32>
    %c0_12 = arith.constant 0 : index
    %c0_13 = arith.constant 0 : index
    %c0_14 = arith.constant 0 : index
    %12 = vector.load %arg7[%c0_12, %c0_13, %c0_14] : memref<1x16x16xf32, #tpu.memory_space<vmem>>, vector<1x16x16xf32>
    %13 = vector.shape_cast %12 : vector<1x16x16xf32> to vector<16x16xf32>
    %14 = tpu.iota {dimensions = array<i32: 1>} : vector<16x17x16xi32>
    %15 = vector.shape_cast %11 : vector<16x16xi32> to vector<16x1x16xi32>
    %16 = vector.broadcast %15 : vector<16x1x16xi32> to vector<16x17x16xi32>
    %17 = arith.cmpi eq, %14, %16 : vector<16x17x16xi32>
    %18 = arith.extui %17 : vector<16x17x16xi1> to vector<16x17x16xi32>
    %19 = arith.sitofp %18 : vector<16x17x16xi32> to vector<16x17x16xf32>
    %cst_15 = arith.constant dense<0xFF800000> : vector<16x16xf32>
    %20 = vector.multi_reduction <maximumf>, %9, %cst_15 [1] : vector<16x17x16xf32> to vector<16x16xf32>
    %21 = vector.shape_cast %20 : vector<16x16xf32> to vector<16x1x16xf32>
    %22 = vector.shape_cast %21 : vector<16x1x16xf32> to vector<16x16xf32>
    %23 = vector.broadcast %21 : vector<16x1x16xf32> to vector<16x17x16xf32>
    %24 = arith.subf %9, %23 : vector<16x17x16xf32>
    %25 = math.exp %24 : vector<16x17x16xf32>
    %cst_16 = arith.constant dense<0.000000e+00> : vector<16x16xf32>
    %26 = vector.multi_reduction <add>, %25, %cst_16 [1] : vector<16x17x16xf32> to vector<16x16xf32>
    %27 = math.log %26 : vector<16x16xf32>
    %28 = arith.addf %22, %27 : vector<16x16xf32>
    %29 = arith.mulf %9, %19 : vector<16x17x16xf32>
    %cst_17 = arith.constant dense<0.000000e+00> : vector<16x16xf32>
    %30 = vector.multi_reduction <add>, %29, %cst_17 [1] : vector<16x17x16xf32> to vector<16x16xf32>
    %31 = arith.subf %28, %30 : vector<16x16xf32>
    %c0_18 = arith.constant 0 : index
    %c0_19 = arith.constant 0 : index
    %32 = vector.load %arg8[%c0_18, %c0_19] : memref<17x2xf32, #tpu.memory_space<vmem>>, vector<17x2xf32>
    %33 = arith.index_cast %arg0 : i32 to index
    %34 = memref.load %arg2[%33] : memref<14xi32, #tpu.memory_space<smem>>
    %c0_i32_20 = arith.constant 0 : i32
    %35 = arith.cmpi sgt, %34, %c0_i32_20 : i32
    %36 = arith.extui %35 : i1 to i32
    %37 = arith.sitofp %36 : i32 to f32
    %38 = vector.extract_strided_slice %32 {offsets = [0, 0], sizes = [17, 1], strides = [1, 1]} : vector<17x2xf32> to vector<17x1xf32>
    %cst_21 = arith.constant 1.000000e+00 : f32
    %39 = arith.subf %cst_21, %37 : f32
    %40 = vector.broadcast %39 : f32 to vector<17x1xf32>
    %41 = arith.mulf %38, %40 : vector<17x1xf32>
    %42 = vector.extract_strided_slice %32 {offsets = [0, 1], sizes = [17, 1], strides = [1, 1]} : vector<17x2xf32> to vector<17x1xf32>
    %43 = vector.broadcast %37 : f32 to vector<17x1xf32>
    %44 = arith.mulf %42, %43 : vector<17x1xf32>
    %45 = arith.addf %41, %44 : vector<17x1xf32>
    %46 = vector.shape_cast %45 : vector<17x1xf32> to vector<1x17x1xf32>
    %47 = vector.broadcast %46 : vector<1x17x1xf32> to vector<16x17x16xf32>
    %48 = arith.mulf %47, %19 : vector<16x17x16xf32>
    %cst_22 = arith.constant dense<0.000000e+00> : vector<16x16xf32>
    %49 = vector.multi_reduction <add>, %48, %cst_22 [1] : vector<16x17x16xf32> to vector<16x16xf32>
    %50 = arith.mulf %49, %13 : vector<16x16xf32>
    %c0_23 = arith.constant 0 : index
    %c0_24 = arith.constant 0 : index
    %c0_25 = arith.constant 0 : index
    %51 = vector.load %arg9[%c0_23, %c0_24, %c0_25] : memref<1x1x1xf32, #tpu.memory_space<vmem>>, vector<1x1x1xf32>
    %52 = arith.mulf %50, %31 : vector<16x16xf32>
    %53 = vector.shape_cast %52 : vector<16x16xf32> to vector<1x16x16xf32>
    %cst_26 = arith.constant dense<0.000000e+00> : vector<1xf32>
    %54 = vector.multi_reduction <add>, %53, %cst_26 [1, 2] : vector<1x16x16xf32> to vector<1xf32>
    %55 = vector.shape_cast %54 : vector<1xf32> to vector<1x1x1xf32>
    %56 = vector.extract %55[0, 0, 0] : f32 from vector<1x1x1xf32>
    %57 = vector.broadcast %56 : f32 to vector<1x1x1xf32>
    %58 = arith.addf %51, %57 : vector<1x1x1xf32>
    %c0_27 = arith.constant 0 : index
    %c0_28 = arith.constant 0 : index
    %c0_29 = arith.constant 0 : index
    %59 = vector.load %arg9[%c0_27, %c0_28, %c0_29] : memref<1x1x1xf32, #tpu.memory_space<vmem>>, vector<1x1x1xf32>
    tpu.vector_store %arg9[%c0_27, %c0_28, %c0_29], %58 {strides = array<i32>} : memref<1x1x1xf32, #tpu.memory_space<vmem>>, vector<1x1x1xf32>,
    %c0_30 = arith.constant 0 : index
    %c0_31 = arith.constant 0 : index
    %c0_32 = arith.constant 0 : index
    %60 = vector.load %arg10[%c0_30, %c0_31, %c0_32] : memref<1x1x1xf32, #tpu.memory_space<vmem>>, vector<1x1x1xf32>
    %61 = vector.shape_cast %13 : vector<16x16xf32> to vector<1x16x16xf32>
    %cst_33 = arith.constant dense<0.000000e+00> : vector<1xf32>
    %62 = vector.multi_reduction <add>, %61, %cst_33 [1, 2] : vector<1x16x16xf32> to vector<1xf32>
    %63 = vector.shape_cast %62 : vector<1xf32> to vector<1x1x1xf32>
    %64 = vector.extract %63[0, 0, 0] : f32 from vector<1x1x1xf32>
    %65 = vector.broadcast %64 : f32 to vector<1x1x1xf32>
    %66 = arith.addf %60, %65 : vector<1x1x1xf32>
    %c0_34 = arith.constant 0 : index
    %c0_35 = arith.constant 0 : index
    %c0_36 = arith.constant 0 : index
    %67 = vector.load %arg10[%c0_34, %c0_35, %c0_36] : memref<1x1x1xf32, #tpu.memory_space<vmem>>, vector<1x1x1xf32>
    tpu.vector_store %arg10[%c0_34, %c0_35, %c0_36], %66 {strides = array<i32>} : memref<1x1x1xf32, #tpu.memory_space<vmem>>, vector<1x1x1xf32>,
    return
  }
  func.func @transform_0(%arg0: i32, %arg1: i32, %arg2: memref<14xi32, #tpu.memory_space<smem>>) -> (i32, i32, i32, i32) {
    %c0_i32 = arith.constant 0 : i32
    %c0_i32_0 = arith.constant 0 : i32
    %c0_i32_1 = arith.constant 0 : i32
    %c0_i32_2 = arith.constant 0 : i32
    return %arg0, %c0_i32, %c0_i32_0, %c0_i32_1 : i32, i32, i32, i32
  }
  func.func @transform_1(%arg0: i32, %arg1: i32, %arg2: memref<14xi32, #tpu.memory_space<smem>>) -> (i32, i32) {
    %c0_i32 = arith.constant 0 : i32
    %c0_i32_0 = arith.constant 0 : i32
    return %arg1, %c0_i32 : i32, i32
  }
  func.func @transform_2(%arg0: i32, %arg1: i32, %arg2: memref<14xi32, #tpu.memory_space<smem>>) -> (i32, i32) {
    %c0_i32 = arith.constant 0 : i32
    %c0_i32_0 = arith.constant 0 : i32
    %c0_i32_1 = arith.constant 0 : i32
    return %c0_i32, %c0_i32_0 : i32, i32
  }
  func.func @transform_3(%arg0: i32, %arg1: i32, %arg2: memref<14xi32, #tpu.memory_space<smem>>) -> (i32, i32, i32) {
    %c0_i32 = arith.constant 0 : i32
    %c0_i32_0 = arith.constant 0 : i32
    return %arg0, %arg1, %c0_i32 : i32, i32, i32
  }
  func.func @transform_4(%arg0: i32, %arg1: i32, %arg2: memref<14xi32, #tpu.memory_space<smem>>) -> (i32, i32, i32) {
    %c0_i32 = arith.constant 0 : i32
    %c0_i32_0 = arith.constant 0 : i32
    return %arg0, %arg1, %c0_i32 : i32, i32, i32
  }
  func.func @transform_5(%arg0: i32, %arg1: i32, %arg2: memref<14xi32, #tpu.memory_space<smem>>) -> (i32, i32) {
    %c0_i32 = arith.constant 0 : i32
    %c0_i32_0 = arith.constant 0 : i32
    %c0_i32_1 = arith.constant 0 : i32
    return %c0_i32, %c0_i32_0 : i32, i32
  }
  func.func @transform_6(%arg0: i32, %arg1: i32, %arg2: memref<14xi32, #tpu.memory_space<smem>>) -> (i32, i32, i32) {
    %c0_i32 = arith.constant 0 : i32
    %c0_i32_0 = arith.constant 0 : i32
    %c0_i32_1 = arith.constant 0 : i32
    return %arg0, %c0_i32, %c0_i32_0 : i32, i32, i32
  }
  func.func @transform_7(%arg0: i32, %arg1: i32, %arg2: memref<14xi32, #tpu.memory_space<smem>>) -> (i32, i32, i32) {
    %c0_i32 = arith.constant 0 : i32
    %c0_i32_0 = arith.constant 0 : i32
    %c0_i32_1 = arith.constant 0 : i32
    return %arg0, %c0_i32, %c0_i32_0 : i32, i32, i32
  }
}

</mosaic_0001>

<bundles_post_ra>
// kernel: _fused_sem_loss_sums.1
= control target key start
LH: loop header
LB: loop body
LE: loop exit
PB: predicated region body
PF: predicated region fallthrough
CT: control target
= control target key end

     0   :  { %s26471_s0 = inlined_call_operand.vmem [shape: s32[14], index: 0, kind: input, shape index: {}]   ;;  %s26472_s1 = inlined_call_operand.vmem [shape: bf16[14,8,17,8], index: 1, kind: input, shape index: {}]   ;;  %s26473_s2 = inlined_call_operand.vmem [shape: bf16[16,8], index: 2, kind: input, shape index: {}]   ;;  %s26474_s3 = inlined_call_operand.vmem [shape: bf16[16,8], index: 3, kind: input, shape index: {}]   ;;  %s26475_s4 = inlined_call_operand.vmem [shape: s32[14,16,16], index: 4, kind: input, shape index: {}]   ;;  %s26476_s5 = inlined_call_operand.vmem [shape: f32[14,16,16], index: 5, kind: input, shape index: {}]   ;;  %s26477_s6 = inlined_call_operand.vmem [shape: f32[17,2], index: 6, kind: input, shape index: {}]   ;;  %s26478_s7 = inlined_call_operand.vmem [shape: f32[14,1,1], index: 7, kind: output, shape index: {0}]   ;;  %s26479_s8 = inlined_call_operand.vmem [shape: f32[14,1,1], index: 8, kind: output, shape index: {1}]  }
   0x1   :  { %s14_s29 = sshll.u32 %s26471_s0, 4  ;;  %s15_s29 = int_to_ptr.vmem [resolvable:$true] %s14_s29 }
   0x2   :  { %s18773_s30 = scalar_lea.vmem %s15_s29, 16  ;;  %p18778_p1 = scmp.lt.s32.totalorder %s15_s29, %s15_s29 }
   0x3   :  { %p18774_p0 = scmp.ne.s32.totalorder %s15_s29, %s18773_s30  ;;  %p18779_p2 = scmp.lt.s32.totalorder %s18773_s30, %s18773_s30 }
   0x5   :  { %p18780_p3 = por %p18779_p2, %p18778_p1 }
   0x7   :  { %p18781_p4 = pnand %p18780_p3, %p18774_p0 }
   0x9   :  { %18784 = shalt.err (!%p18781_p4)  }
   0xa   :  { %s18811_s9 = smov [#allocation3]  }
   0xb   :  { %17 = dma.vmem_to_smem %s15_s29, 16, %s18811_s9, [#allocation2] }
   0xc   :  { %18797 = dma.done.wait [#allocation2], 16 }
   0xd   :  { %18798 = vsyncadd [#allocation2], 4294967280 }
   0xe   :  { %19 = sfence }
   0xf   :  { %s18882_s10 = smov 0   ;;  %s18884_s11 = smov 0  }
  0x10   :  { %s18886_s12 = smov 0  }
  0x11 LB: > { %s37_s0 = sadd.s32 1, %s18805_s11  ;;  %p17813_p5 = scmp.ge.s32.totalorder %s18809_s12, 1  ;;  %s18809_s12 = sphi %s18886_s12, %s25_s12   ;;  %s18805_s11 = sphi %s18884_s11, %s27959_s11   ;;  %s18801_s10 = sphi %s18882_s10, %s27958_s10  }
  0x12   : > { %p39_p6 = scmp.ge.s32.totalorder %s37_s0, 14  ;;  %p304_p7 = scmp.lt.s32.totalorder %s18809_s12, 15 }
  0x14   : > { %s27961_s0 = smov (%p39_p6, %s37_s0), 0  ;;  %p305_p8 = pnand %p17813_p5, %p304_p7 }
  0x16   : > { %308 = sbr.rel (%p305_p8) target bundleno = 2146 (0x862), region = 44 }
  0x1b   : > { %p360_p9 = scmp.lt.s32.totalorder %s18801_s10, 13  ;;  %v437_v0 = vlaneseq  ;;  %v18812_v1 = vmov 1983009808   ;;  %v18813_v3 = vmov 0   ;;  %v18814_v6 = vmov 1934713408  }
  0x1c   : > { %v435_v2 = vunpack.c.l.s4 %v18812_v1  ;;  %899 = vmatprep.mubr.bf16.mxu0 %v18813_v3  ;;  %18177 = vset.pattern.permute.xlu1 %v18813_v3  ;;  %v452_v7 = vunpack.c.l.s4 %v18814_v6  ;;  %s18815_s18 = smov 32   ;;  %s18816_s19 = smov 8   ;;  %vm861_vm0 = vcmask 1043456   ;;  %vm728_vm1 = vcmask 64512  }
  0x1d   : > { %s18904_s13 = scalar_select %p360_p9, %s18801_s10, 13  ;;  %v18908_v5 = vshrl.u32 %v437_v0, 7  ;;  %18178 = vset.pattern.permute.xlu0 %v18813_v3  ;;  %vm732_vm2 = vcmask 130048   ;;  %vm735_vm3 = vcmask 195584   ;;  %vm738_vm4 = vcmask 261120  }
  0x1e   : > { %v436_v4 = vunpack.c.0.s8 %v435_v2  ;;  %v453_v9 = vunpack.c.0.s8 %v452_v7  ;;  %s18817_s20 = smov 64   ;;  %s18818_s21 = smov 16   ;;  %vm741_vm5 = vcmask 326656   ;;  %vm744_vm6 = vcmask 392192  }
  0x1f   : > { %26890 = vst [vmem:[#allocation5_spill] sm:$0xff] %v18908_v5  ;;  %s18125_s14 = smul.u32 96, %s18904_s13  ;;  %s18819_s22 = smov 48   ;;  %vm747_vm7 = vcmask 457728   ;;  %vm750_vm8 = vcmask 523264   ;;  %vm753_vm9 = vcmask 588800  }
  0x20   : > { %v18918_v8 = vsub.s32 %v436_v4, %v18908_v5  ;;  %v18927_v16 = vsub.s32 %v453_v9, %v18908_v5  ;;  %s18820_s23 = smov 40   ;;  %s18821_s24 = smov 24   ;;  %vm756_vm10 = vcmask 654336   ;;  %vm759_vm11 = vcmask 719872  }
  0x21   : > { %s18915_s17 = scalar_lea.vmem %s26472_s1, %s18125_s14  ;;  %s18822_s25 = smov 72   ;;  %vm762_vm12 = vcmask 785408   ;;  %vm765_vm13 = vcmask 850944   ;;  %vm768_vm14 = vcmask 916480   ;;  %vm771_vm15 = vcmask 982016  }
  0x22   : > { %v18179_v10 = vld [vmem:[%s18915_s17] ss:$48 sps:$4 sm:$0xff]   ;;  %v18180_v11 = vld [vmem:[%s18915_s17 + $0x18] ss:$48 sps:$4 sm:$0xff]   ;;  %v18181_v12 = vld [vmem:[%s18915_s17 + $0xc] ss:$48 sps:$4 sm:$0xff]  }
  0x23   : > { %v18182_v13 = vld [vmem:[%s18915_s17 + $0x24] ss:$48 sps:$4 sm:$0xff]   ;;  %v440_v14 = vrot.slane %v18179_v10, %v18918_v8  ;;  %v448_v15 = vrot.slane %v18180_v11, %v18918_v8  ;;  %v474_v17 = vrot.slane %v18181_v12, %v18918_v8  ;;  %v18184_v24 = vld [vmem:[%s18915_s17 + $0x1c] ss:$48 sps:$4 sm:$0xff]   ;;  %v18185_v25 = vld [vmem:[%s18915_s17 + $0x10] ss:$48 sps:$4 sm:$0xff]  }
  0x24   : > { %v482_v18 = vrot.slane %v18182_v13, %v18918_v8  ;;  %v18183_v19 = vld [vmem:[%s18915_s17 + $0x4] ss:$48 sps:$4 sm:$0xff]   ;;  %v18186_v26 = vld [vmem:[%s18915_s17 + $0x28] ss:$48 sps:$4 sm:$0xff]   ;;  %v516_v32 = vrot.slane %v18184_v24, %v18918_v8  ;;  %v542_v33 = vrot.slane %v18185_v25, %v18918_v8  ;;  %s18823_s26 = smov 80   ;;  %s18824_s27 = smov 104  }
  0x25   : > { %v450_v20 = vcombine.high %v440_v14, %v448_v15  ;;  %v449_v22 = vcombine.low %v440_v14, %v448_v15  ;;  %v508_v27 = vrot.slane %v18183_v19, %v18918_v8  ;;  %v550_v34 = vrot.slane %v18186_v26, %v18918_v8  ;;  %v18190_v24 = vld [vmem:[%s18915_s17 + $0x2c] ss:$48 sps:$4 sm:$0x11]   ;;  %s18825_s28 = smov 96   ;;  %s18826_s29 = smov 56  }
  0x26   : > { %v484_v21 = vcombine.high %v474_v17, %v482_v18  ;;  %v483_v23 = vcombine.low %v474_v17, %v482_v18  ;;  %s18828_s30 = smov 112   ;;  %s18829_s9 = smov 88  }
  0x27   : > { %v464_v28 = vrot.slane %v450_v20, %v18927_v16  ;;  %v18939_v30 = vrot.slane %v449_v22, %v18927_v16  ;;  %v517_v39 = vcombine.low %v508_v27, %v516_v32  ;;  %v551_v40 = vcombine.low %v542_v33, %v550_v34  ;;  %v18187_v20 = vld [vmem:[%s18915_s17 + $0x8] ss:$48 sps:$4 sm:$0x11]   ;;  %v18189_v22 = vld [vmem:[%s18915_s17 + $0x14] ss:$48 sps:$4 sm:$0x11]  }
  0x28   : > { %v498_v29 = vrot.slane %v484_v21, %v18927_v16  ;;  %v18942_v31 = vrot.slane %v483_v23, %v18927_v16  ;;  %v518_v60 = vcombine.high %v508_v27, %v516_v32  ;;  %v552_v62 = vcombine.high %v542_v33, %v550_v34  ;;  %v18188_v21 = vld [vmem:[%s18915_s17 + $0x20] ss:$48 sps:$4 sm:$0x11]   ;;  %s18830_s14 = smov 120  }
  0x29   : > { %v620_v36 = vshrl.u32 %v18939_v30, 16  ;;  %v465_v38 = vcombine.high %v18939_v30, %v18813_v3  ;;  %v18954_v42 = vcombine.high %v464_v28, %v18813_v3  ;;  %v632_v46 = vshrl.u32 %v464_v28, 16 }
  0x2a   : > { %v631_v35 = vpack.i.b16 %v498_v29, %v464_v28  ;;  %v621_v37 = vshrl.u32 %v18942_v31, 16  ;;  %v499_v41 = vcombine.high %v18942_v31, %v18813_v3  ;;  %v500_v45 = vcombine.high %v498_v29, %v18813_v3 }
  0x2b   : > { %v525_v47 = vrot.slane %v517_v39, %v18927_v16  ;;  %v559_v48 = vrot.slane %v551_v40, %v18927_v16  ;;  %v633_v50 = vshrl.u32 %v498_v29, 16  ;;  %v626_v55 = vshrl.u32 %v465_v38, 16 }
  0x2c   : > { %v17822_v43 = vcombine.low %v631_v35, %v631_v35  ;;  %v622_v44 = vpack.i.b16 %v621_v37, %v620_v36  ;;  %v625_v49 = vpack.i.b16 %v499_v41, %v465_v38  ;;  %v637_v52 = vpack.i.b16 %v500_v45, %v18954_v42 }
  0x2d   : > { %v643_v53 = vpack.i.b16 %v559_v48, %v525_v47  ;;  %v627_v56 = vshrl.u32 %v499_v41, 16  ;;  %v634_v57 = vpack.i.b16 %v633_v50, %v632_v46  ;;  %v644_v58 = vshrl.u32 %v525_v47, 16 }
  0x2e   : > { %682 = vrot.lane.b32.xlu1 %v17822_v43, %s18815_s18  ;;  %v17819_v51 = vcombine.low %v622_v44, %v622_v44  ;;  %v17820_v54 = vcombine.low %v625_v49, %v625_v49  ;;  %v645_v59 = vshrl.u32 %v559_v48, 16  ;;  %v17824_v63 = vcombine.low %v637_v52, %v637_v52 }
  0x2f   : > { %v17826_v61 = vcombine.low %v643_v53, %v643_v53  ;;  %v532_v0 = vrot.slane %v518_v60, %v18927_v16  ;;  %v628_v1 = vpack.i.b16 %v627_v56, %v626_v55  ;;  %v566_v2 = vrot.slane %v552_v62, %v18927_v16 }
  0x30   : > { %670 = vrot.lane.b32.xlu0 %v17819_v51, %s18816_s19  ;;  %v533_v4 = vcombine.high %v525_v47, %v18813_v3  ;;  %v567_v6 = vcombine.high %v559_v48, %v18813_v3  ;;  %v17823_v7 = vcombine.low %v634_v57, %v634_v57  ;;  %v646_v9 = vpack.i.b16 %v645_v59, %v644_v58 }
  0x31   : > { %v656_v10 = vshrl.u32 %v532_v0, 16  ;;  %v657_v11 = vshrl.u32 %v566_v2, 16  ;;  %v619_v12 = vpack.i.b16 %v18942_v31, %v18939_v30  ;;  %v17821_v13 = vcombine.low %v628_v1, %v628_v1 }
  0x32   : > { %698 = vrot.lane.b32.xlu1 %v17826_v61, %s18817_s20  ;;  %v649_v14 = vpack.i.b16 %v567_v6, %v533_v4  ;;  %v17827_v15 = vcombine.low %v646_v9, %v646_v9  ;;  %v638_v18 = vshrl.u32 %v18954_v42, 16  ;;  %v639_v19 = vshrl.u32 %v500_v45, 16 }
  0x33   : > { %v658_v17 = vpack.i.b16 %v657_v11, %v656_v10  ;;  %v650_v23 = vshrl.u32 %v533_v4, 16  ;;  %v655_v26 = vpack.i.b16 %v566_v2, %v532_v0  ;;  %v534_v27 = vcombine.high %v532_v0, %v18813_v3 }
  0x34   : > { %674 = vrot.lane.b32.xlu0 %v17820_v54, %s18818_s21  ;;  %v17828_v25 = vcombine.low %v649_v14, %v649_v14  ;;  %v568_v28 = vcombine.high %v566_v2, %v18813_v3  ;;  %v640_v32 = vpack.i.b16 %v639_v19, %v638_v18  ;;  %v651_v33 = vshrl.u32 %v567_v6, 16 }
  0x35   : > { %v17831_v29 = vcombine.low %v658_v17, %v658_v17  ;;  %v576_v34 = vrot.slane %v18187_v20, %v18918_v8  ;;  %v584_v35 = vrot.slane %v18188_v21, %v18918_v8  ;;  %v600_v36 = vrot.slane %v18189_v22, %v18918_v8 }
  0x36   : > { %690 = vrot.lane.b32.xlu1 %v17824_v63, %s18819_s22  ;;  %v608_v37 = vrot.slane %v18190_v24, %v18918_v8  ;;  %v17830_v38 = vcombine.low %v655_v26, %v655_v26  ;;  %v661_v39 = vpack.i.b16 %v568_v28, %v534_v27  ;;  %v17825_v41 = vcombine.low %v640_v32, %v640_v32 }
  0x37   : > { %v585_v3 = vcombine.low %v576_v34, %v584_v35  ;;  %v652_v42 = vpack.i.b16 %v651_v33, %v650_v23  ;;  %v662_v43 = vshrl.u32 %v534_v27, 16  ;;  %v663_v44 = vshrl.u32 %v568_v28, 16  ;;  %v18191_v28 = vld [vmem:[%s26473_s2] sm:$0xff]  }
  0x38   : > { %686 = vrot.lane.b32.xlu0 %v17823_v7, %s18820_s23  ;;  %v609_v40 = vcombine.low %v600_v36, %v608_v37  ;;  %v17832_v47 = vcombine.low %v661_v39, %v661_v39  ;;  %v26480_v51 = vmov 0.0  }
  0x39   : > { %v592_v45 = vrot.slane %v585_v3, %v18927_v16  ;;  %v17829_v49 = vcombine.low %v652_v42, %v652_v42  ;;  %v664_v50 = vpack.i.b16 %v663_v44, %v662_v43  ;;  %18123 = vmatprep.subr.bf16.mxu1 %v26480_v51  ;;  %v774_v53 = vcombine.low %v26480_v51, %v26480_v51 }
  0x3a   : > { %678 = vrot.lane.b32.xlu1 %v17821_v13, %s18821_s24  ;;  %v616_v46 = vrot.slane %v609_v40, %v18927_v16 }
  0x3b   : > { %v17833_v52 = vcombine.low %v664_v50, %v664_v50  ;;  %v781_v54 = vrot.slane %v774_v53, %v18918_v8 }
  0x3c   : > { %702 = vrot.lane.b32.xlu0 %v17827_v15, %s18822_s25  ;;  %v667_v48 = vpack.i.b16 %v616_v46, %v592_v45 }
  0x3d   : > { %v782_v55 = vcombine.low %v781_v54, %v781_v54 }
  0x3e   : > { %706 = vrot.lane.b32.xlu1 %v17828_v25, %s18823_s26  ;;  %17835 = vmatprep.subr.msk.bf16.mxu0 %vm861_vm0, %v667_v48 }
  0x3f   : > { %v789_v56 = vrot.slane %v782_v55, %v18927_v16 }
  0x40   : > { %718 = vrot.lane.b32.xlu0 %v17831_v29, %s18824_s27 }
  0x41   : > { %v19014_v57 = vcombine.low %v789_v56, %v789_v56 }
  0x42   : > { %714 = vrot.lane.b32.xlu1 %v17830_v38, %s18825_s28 }
  0x44   : > { %694 = vrot.lane.b32.xlu0 %v17825_v41, %s18826_s29 }
  0x46   : > { %722 = vrot.lane.b32.xlu1 %v17832_v47, %s18828_s30 }
  0x48   : > { %710 = vrot.lane.b32.xlu0 %v17829_v49, %s18829_s9 }
  0x4a   : > { %792 = vrot.lane.b32.xlu1 %v26480_v51, %s18816_s19 }
  0x4c   : > { %726 = vrot.lane.b32.xlu0 %v17833_v52, %s18830_s14 }
  0x4e   : > { %798 = vrot.lane.b32.xlu1 %v26480_v51, %s18821_s24 }
  0x50   : > { %795 = vrot.lane.b32.xlu0 %v26480_v51, %s18818_s21 }
  0x52   : > { %804 = vrot.lane.b32.xlu1 %v26480_v51, %s18820_s23 }
  0x54   : > { %801 = vrot.lane.b32.xlu0 %v26480_v51, %s18815_s18 }
  0x56   : > { %810 = vrot.lane.b32.xlu1 %v26480_v51, %s18826_s29 }
  0x58   : > { %807 = vrot.lane.b32.xlu0 %v26480_v51, %s18819_s22 }
  0x5a   : > { %817 = vrot.lane.b32.xlu1 %v26480_v51, %s18822_s25 }
  0x5c   : > { %814 = vrot.lane.b32.xlu0 %v19014_v57, %s18817_s20 }
  0x5e   : > { %823 = vrot.lane.b32.xlu1 %v26480_v51, %s18829_s9 }
  0x60   : > { %820 = vrot.lane.b32.xlu0 %v26480_v51, %s18823_s26 }
  0x62   : > { %829 = vrot.lane.b32.xlu1 %v26480_v51, %s18824_s27 }
  0x64   : > { %826 = vrot.lane.b32.xlu0 %v26480_v51, %s18825_s28 }
  0x66   : > { %835 = vrot.lane.b32.xlu1 %v26480_v51, %s18830_s14 }
  0x68   : > { %832 = vrot.lane.b32.xlu0 %v26480_v51, %s18828_s30 }
  0xa0   : > { %v683_v58 = vpop.permute.xlu1 %682 }
  0xa2   : > { %v671_v59 = vpop.permute.xlu0 %670 }
  0xa3   : > { %v731_v0 = vsel %vm728_vm1, %v619_v12, %v671_v59 }
  0xa4   : > { %v699_v60 = vpop.permute.xlu1 %698 }
  0xa6   : > { %v675_v61 = vpop.permute.xlu0 %674 }
  0xa7   : > { %v734_v1 = vsel %vm732_vm2, %v731_v0, %v675_v61 }
  0xa8   : > { %v691_v62 = vpop.permute.xlu1 %690 }
  0xaa   : > { %v687_v63 = vpop.permute.xlu0 %686 }
  0xac   : > { %v679_v2 = vpop.permute.xlu1 %678 }
  0xad   : > { %v737_v4 = vsel %vm735_vm3, %v734_v1, %v679_v2  ;;  %v18192_v2 = vld [vmem:[%s26474_s3] sm:$0xff]  }
  0xae   : > { %v703_v6 = vpop.permute.xlu0 %702  ;;  %v740_v7 = vsel %vm738_vm4, %v737_v4, %v683_v58  ;;  %v4014_v4 = vsel %vm728_vm1, %v18192_v2, 0 }
  0xaf   : > { %v743_v11 = vsel %vm741_vm5, %v740_v7, %v687_v63  ;;  %18124 = vmatpush3.bf16.xpose.msra.mxu1 %v4014_v4 }
  0xb0   : > { %v707_v9 = vpop.permute.xlu1 %706  ;;  %v746_v31 = vsel %vm744_vm6, %v743_v11, %v691_v62 }
  0xb2   : > { %v719_v10 = vpop.permute.xlu0 %718 }
  0xb4   : > { %v715_v30 = vpop.permute.xlu1 %714 }
  0xb6   : > { %v695_v12 = vpop.permute.xlu0 %694 }
  0xb7   : > { %v749_v13 = vsel %vm747_vm7, %v746_v31, %v695_v12 }
  0xb8   : > { %v752_v14 = vsel %vm750_vm8, %v749_v13, %v699_v60  ;;  %v723_v17 = vpop.permute.xlu1 %722 }
  0xb9   : > { %v755_v15 = vsel %vm753_vm9, %v752_v14, %v703_v6 }
  0xba   : > { %v758_v18 = vsel %vm756_vm10, %v755_v15, %v707_v9  ;;  %v711_v19 = vpop.permute.xlu0 %710 }
  0xbb   : > { %v761_v20 = vsel %vm759_vm11, %v758_v18, %v711_v19 }
  0xbc   : > { %v764_v21 = vsel %vm762_vm12, %v761_v20, %v715_v30  ;;  %v793_v23 = vpop.permute.xlu1 %792  ;;  %v18832_v30 = vmov 1966171168  }
  0xbd   : > { %v767_v22 = vsel %vm765_vm13, %v764_v21, %v719_v10  ;;  %v838_v29 = vsel %vm728_vm1, %v19014_v57, %v793_v23  ;;  %v1710_v31 = vunpack.c.l.s4 %v18832_v30 }
  0xbe   : > { %v770_v24 = vsel %vm768_vm14, %v767_v22, %v723_v17  ;;  %v727_v25 = vpop.permute.xlu0 %726 }
  0xbf   : > { %v773_v26 = vsel %vm771_vm15, %v770_v24, %v727_v25  ;;  %v1711_v17 = vunpack.c.0.s8 %v1710_v31 }
  0xc0   : > { %v862_v27 = vsel %vm861_vm0, %v773_v26, 0  ;;  %v799_v32 = vpop.permute.xlu1 %798  ;;  %vm18831_vm0 = vmmov 0  }
  0xc1   : > { %882 = vmatpush1.bf16.msra.mxu0 %v862_v27  ;;  %18087 = vmatprep.mubr.msk.bf16.mxu1 %vm18831_vm0, %v26480_v51 }
  0xc2   : > { %v796_v33 = vpop.permute.xlu0 %795  ;;  %18053 = vmatprep.subr.bf16.mxu0 %v26480_v51 }
  0xc3   : > { %v839_v34 = vsel %vm732_vm2, %v838_v29, %v796_v33 }
  0xc4   : > { %17836 = vmatmul.mubr.msk.bf16.vlgmr.msra.gmra.mxu0 %vm728_vm1, %v18191_v28  ;;  %v840_v35 = vsel %vm735_vm3, %v839_v34, %v799_v32  ;;  %v805_v36 = vpop.permute.xlu1 %804 }
  0xc5   : > { %18054 = vmatpush3.bf16.xpose.msra.mxu0 %v4014_v4  ;;  %18055 = vmatprep.mubr.msk.bf16.mxu0 %vm18831_vm0, %v26480_v51 }
  0xc6   : > { %v802_v37 = vpop.permute.xlu0 %801 }
  0xc7   : > { %v841_v38 = vsel %vm738_vm4, %v840_v35, %v802_v37 }
  0xc8   : > { %v842_v39 = vsel %vm741_vm5, %v841_v38, %v805_v36  ;;  %v811_v3 = vpop.permute.xlu1 %810 }
  0xca   : > { %v808_v40 = vpop.permute.xlu0 %807 }
  0xcb   : > { %v843_v41 = vsel %vm744_vm6, %v842_v39, %v808_v40 }
  0xcc   : > { %v844_v42 = vsel %vm747_vm7, %v843_v41, %v811_v3  ;;  %v818_v43 = vpop.permute.xlu1 %817 }
  0xce   : > { %v815_v44 = vpop.permute.xlu0 %814 }
  0xcf   : > { %v845_v45 = vsel %vm750_vm8, %v844_v42, %v815_v44 }
  0xd0   : > { %v846_v46 = vsel %vm753_vm9, %v845_v45, %v818_v43  ;;  %v824_v47 = vpop.permute.xlu1 %823 }
  0xd2   : > { %v821_v48 = vpop.permute.xlu0 %820 }
  0xd3   : > { %v847_v49 = vsel %vm756_vm10, %v846_v46, %v821_v48  ;;  %vm8314_vm10 = vcmask 122880  }
  0xd4   : > { %v848_v50 = vsel %vm759_vm11, %v847_v49, %v824_v47  ;;  %v830_v52 = vpop.permute.xlu1 %829 }
  0xd6   : > { %v827_v53 = vpop.permute.xlu0 %826 }
  0xd7   : > { %v849_v54 = vsel %vm762_vm12, %v848_v50, %v827_v53 }
  0xd8   : > { %v850_v55 = vsel %vm765_vm13, %v849_v54, %v830_v52  ;;  %v836_v56 = vpop.permute.xlu1 %835 }
  0xda   : > { %v833_v58 = vpop.permute.xlu0 %832 }
  0xdb   : > { %v851_v59 = vsel %vm768_vm14, %v850_v55, %v833_v58 }
  0xdc   : > { %v852_v60 = vsel %vm771_vm15, %v851_v59, %v836_v56 }
 0x184   : > { %v901_v61 = vpop.f32.mrf.mxu0 }
 0x185   : > { %v19072_v62 = vadd.f32 %v901_v61, %v852_v60 }
 0x186   : > { %v903_v63 = vpop.f32.mrf.mxu0 }
 0x187   : > { %960 = vrot.lane.b32.xlu1 %v19072_v62, %s18826_s29  ;;  %954 = vrot.lane.b32.xlu0 %v19072_v62, %s18817_s20  ;;  %v904_v6 = vadd.f32 %v903_v63, %v19014_v57 }
 0x188   : > { %v905_v0 = vpop.f32.mrf.mxu0 }
 0x189   : > { %v19094_v1 = vadd.f32 %v905_v0, %v852_v60  ;;  %v1274_v7 = vcombine.high %v904_v6, %v26480_v51  ;;  %v1281_v9 = vrot.slane %v904_v6, %v18918_v8 }
 0x18a   : > { %v907_v10 = vpop.f32.mrf.mxu0 }
 0x18b   : > { %972 = vrot.lane.b32.xlu1 %v19072_v62, %s18820_s23  ;;  %966 = vrot.lane.b32.xlu0 %v19072_v62, %s18819_s22  ;;  %v1288_v11 = vrot.slane %v1274_v7, %v18918_v8  ;;  %v1289_v12 = vcombine.high %v1281_v9, %v26480_v51  ;;  %v908_v13 = vadd.f32 %v907_v10, %v19014_v57 }
 0x18c   : > { %v1296_v14 = vrot.slane %v1281_v9, %v18927_v16  ;;  %v19159_v57 = vsub.s32 %v1711_v17, %v18908_v5 }
 0x18d   : > { %v1304_v15 = vcombine.high %v1288_v11, %v26480_v51  ;;  %v1303_v18 = vrot.slane %v1289_v12, %v18927_v16  ;;  %v1311_v19 = vrot.slane %v1288_v11, %v18927_v16  ;;  %v1595_v20 = vcombine.high %v908_v13, %v26480_v51 }
 0x18e   : > { %v1602_v21 = vrot.slane %v908_v13, %v18918_v8  ;;  %v1319_v22 = vcombine.high %v1296_v14, %v26480_v51  ;;  %v1645_v24 = vpack.c.bf16 %v1296_v14, %v1296_v14 }
 0x18f   : > { %984 = vrot.lane.b32.xlu1 %v19072_v62, %s18821_s24  ;;  %978 = vrot.lane.b32.xlu0 %v19072_v62, %s18815_s18  ;;  %v1318_v23 = vrot.slane %v1304_v15, %v18927_v16  ;;  %v1320_v25 = vcombine.high %v1303_v18, %v26480_v51  ;;  %v1321_v26 = vcombine.high %v1311_v19, %v26480_v51 }
 0x190   : > { %v1609_v27 = vrot.slane %v1595_v20, %v18918_v8  ;;  %v1610_v28 = vcombine.high %v1602_v21, %v26480_v51  ;;  %v1647_v29 = vpack.c.bf16 %v1319_v22, %v1319_v22  ;;  %v1649_v32 = vpack.c.bf16 %v1303_v18, %v1303_v18 }
 0x191   : > { %v1653_v33 = vpack.c.bf16 %v1311_v19, %v1311_v19  ;;  %v1322_v34 = vcombine.high %v1318_v23, %v26480_v51  ;;  %v19167_v35 = vrot.slane %v1645_v24, %v19159_v57  ;;  %v1617_v36 = vrot.slane %v1602_v21, %v18927_v16 }
 0x192   : > { %v1651_v37 = vpack.c.bf16 %v1320_v25, %v1320_v25  ;;  %v1655_v38 = vpack.c.bf16 %v1321_v26, %v1321_v26  ;;  %v1624_v39 = vrot.slane %v1610_v28, %v18927_v16  ;;  %v1625_v3 = vcombine.high %v1609_v27, %v26480_v51 }
 0x193   : > { %996 = vrot.lane.b32.xlu1 %v19072_v62, %s18816_s19  ;;  %990 = vrot.lane.b32.xlu0 %v19072_v62, %s18818_s21  ;;  %v1657_v40 = vpack.c.bf16 %v1318_v23, %v1318_v23  ;;  %v1632_v41 = vrot.slane %v1609_v27, %v18927_v16  ;;  %v19174_v44 = vrot.slane %v1647_v29, %v19159_v57 }
 0x194   : > { %v19177_v45 = vrot.slane %v1649_v32, %v19159_v57  ;;  %v19180_v46 = vrot.slane %v1653_v33, %v19159_v57  ;;  %v1659_v47 = vpack.c.bf16 %v1322_v34, %v1322_v34  ;;  %v1640_v49 = vcombine.high %v1617_v36, %v26480_v51 }
 0x195   : > { %26891 = vst [vmem:[#allocation6_spill] sm:$0xff] %v19174_v44  ;;  %v19186_v50 = vrot.slane %v1651_v37, %v19159_v57  ;;  %v19189_v52 = vrot.slane %v1655_v38, %v19159_v57  ;;  %v1639_v53 = vrot.slane %v1625_v3, %v18927_v16  ;;  %v1641_v54 = vcombine.high %v1624_v39, %v26480_v51 }
 0x196   : > { %26892 = vst [vmem:[#allocation7_spill] sm:$0xff] %v19177_v45  ;;  %26893 = vst [vmem:[#allocation8_spill] sm:$0xff] %v19180_v46  ;;  %v19194_v55 = vrot.slane %v1657_v40, %v19159_v57  ;;  %v1642_v56 = vcombine.high %v1632_v41, %v26480_v51  ;;  %v1661_v58 = vpack.c.bf16 %v1617_v36, %v1617_v36 }
 0x197   : > { %912 = vrot.lane.b32.xlu1 %v19072_v62, %s18830_s14  ;;  %918 = vrot.lane.b32.xlu0 %v19072_v62, %s18828_s30  ;;  %26894 = vst [vmem:[#allocation9_spill] sm:$0xff] %v19186_v50  ;;  %26895 = vst [vmem:[#allocation10_spill] sm:$0xff] %v19189_v52  ;;  %v1665_v59 = vpack.c.bf16 %v1624_v39, %v1624_v39  ;;  %v19204_v6 = vrot.slane %v1659_v47, %v19159_v57 }
 0x198   : > { %26896 = vst [vmem:[#allocation11_spill] sm:$0xff] %v19194_v55  ;;  %v1663_v7 = vpack.c.bf16 %v1640_v49, %v1640_v49  ;;  %v1669_v9 = vpack.c.bf16 %v1632_v41, %v1632_v41  ;;  %v1643_v11 = vcombine.high %v1639_v53, %v26480_v51  ;;  %v1667_v30 = vpack.c.bf16 %v1641_v54, %v1641_v54 }
 0x199   : > { %v1671_v13 = vpack.c.bf16 %v1642_v56, %v1642_v56  ;;  %v1673_v14 = vpack.c.bf16 %v1639_v53, %v1639_v53  ;;  %v19208_v15 = vrot.slane %v1661_v58, %v19159_v57  ;;  %v19211_v17 = vrot.slane %v1665_v59, %v19159_v57 }
 0x19a   : > { %v19224_v26 = vrot.slane %v1663_v7, %v19159_v57  ;;  %v19227_v27 = vrot.slane %v1669_v9, %v19159_v57  ;;  %v1675_v28 = vpack.c.bf16 %v1643_v11, %v1643_v11  ;;  %v19230_v29 = vrot.slane %v1667_v30, %v19159_v57 }
 0x19b   : > { %924 = vrot.lane.b32.xlu1 %v19072_v62, %s18824_s27  ;;  %914 = vrot.lane.b32.xlu0 %v19094_v1, %s18830_s14  ;;  %26897 = vst [vmem:[#allocation12_spill] sm:$0xff] %v19211_v17  ;;  %v19239_v37 = vrot.slane %v1671_v13, %v19159_v57  ;;  %v19242_v38 = vrot.slane %v1673_v14, %v19159_v57 }
 0x19c   : > { %26898 = vst [vmem:[#allocation13_spill] sm:$0xff] %v19227_v27  ;;  %26899 = vst [vmem:[#allocation14_spill] sm:$0xff] %v19230_v29  ;;  %v19261_v30 = vrot.slane %v1675_v28, %v19159_v57 }
 0x19d   : > { %26900 = vst [vmem:[#allocation15_spill] sm:$0xff] %v19239_v37  ;;  %26901 = vst [vmem:[#allocation16_spill] sm:$0xff] %v19242_v38 }
 0x19e   : > { %26902 = vst [vmem:[#allocation17_spill] sm:$0xff] %v19261_v30 }
 0x19f   : > { %920 = vrot.lane.b32.xlu1 %v19094_v1, %s18828_s30  ;;  %926 = vrot.lane.b32.xlu0 %v19094_v1, %s18824_s27 }
 0x1a3   : > { %932 = vrot.lane.b32.xlu1 %v19094_v1, %s18825_s28  ;;  %938 = vrot.lane.b32.xlu0 %v19094_v1, %s18829_s9 }
 0x1a7   : > { %944 = vrot.lane.b32.xlu1 %v19094_v1, %s18823_s26  ;;  %950 = vrot.lane.b32.xlu0 %v19094_v1, %s18822_s25 }
 0x1ab   : > { %956 = vrot.lane.b32.xlu1 %v19094_v1, %s18817_s20  ;;  %962 = vrot.lane.b32.xlu0 %v19094_v1, %s18826_s29 }
 0x1af   : > { %968 = vrot.lane.b32.xlu1 %v19094_v1, %s18819_s22  ;;  %974 = vrot.lane.b32.xlu0 %v19094_v1, %s18820_s23  ;;  %s18833_s23 = smov 127   ;;  %s396_s22 = scalar_lea.vmem %s26479_s8, %s18904_s13 }
 0x1b3   : > { %980 = vrot.lane.b32.xlu1 %v19094_v1, %s18815_s18  ;;  %986 = vrot.lane.b32.xlu0 %v19094_v1, %s18821_s24 }
 0x1b7   : > { %992 = vrot.lane.b32.xlu1 %v19094_v1, %s18818_s21  ;;  %998 = vrot.lane.b32.xlu0 %v19094_v1, %s18816_s19  ;;  %s19917_s19 = sld [smem:[#allocation3 + %s18801_s10]] }
 0x1bb   : > { %936 = vrot.lane.b32.xlu1 %v19072_v62, %s18829_s9  ;;  %930 = vrot.lane.b32.xlu0 %v19072_v62, %s18825_s28  ;;  %s18033_s28 = sshll.u32 %s18904_s13, 4 }
 0x1bc   : > { %s379_s9 = scalar_lea.vmem %s26475_s4, %s18033_s28  ;;  %s25360_s17 = scalar_lea.vmem %s26476_s5, %s18033_s28 }
 0x1bd   : > { %p17260_p10 = scmp.gt.s32.totalorder %s19917_s19, 0 }
 0x1bf   : > { %948 = vrot.lane.b32.xlu1 %v19072_v62, %s18822_s25  ;;  %942 = vrot.lane.b32.xlu0 %v19072_v62, %s18823_s26  ;;  %s19974_s10 = scalar_select %p17260_p10, 1, 0 }
 0x1c1   : > { %s17262_s20 = scvt.s32.f32 %s19974_s10  ;;  %s393_s10 = scalar_lea.vmem %s26478_s7, %s18904_s13 }
 0x1c3   : > { %s17263_s14 = ssub.f32 1.0, %s17262_s20 }
 0x1f9   : > { %v961_v42 = vpop.permute.xlu1 %960  ;;  %v955_v43 = vpop.permute.xlu0 %954 }
 0x1fd   : > { %v973_v60 = vpop.permute.xlu1 %972  ;;  %v967_v4 = vpop.permute.xlu0 %966 }
 0x1fe   : > { %v1154_v2 = vcombine.low %v961_v42, %v973_v60  ;;  %v1138_v10 = vcombine.low %v955_v43, %v967_v4  ;;  %v1155_v31 = vcombine.high %v961_v42, %v973_v60  ;;  %v1139_v12 = vcombine.high %v955_v43, %v967_v4 }
 0x200   : > { %v1162_v21 = vrot.slane %v1154_v2, %v18918_v8  ;;  %v1146_v22 = vrot.slane %v1138_v10, %v18918_v8  ;;  %v1169_v32 = vrot.slane %v1155_v31, %v18918_v8  ;;  %v1153_v33 = vrot.slane %v1139_v12, %v18918_v8 }
 0x201   : > { %v985_v18 = vpop.permute.xlu1 %984  ;;  %v979_v23 = vpop.permute.xlu0 %978 }
 0x202   : > { %v1202_v3 = vcombine.low %v1146_v22, %v1162_v21  ;;  %v1203_v40 = vcombine.high %v1146_v22, %v1162_v21  ;;  %v1218_v56 = vcombine.low %v1153_v33, %v1169_v32  ;;  %v1219_v58 = vcombine.high %v1153_v33, %v1169_v32 }
 0x204   : > { %v1210_v31 = vrot.slane %v1202_v3, %v18927_v16  ;;  %v1217_v12 = vrot.slane %v1203_v40, %v18927_v16  ;;  %v1233_v32 = vrot.slane %v1219_v58, %v18927_v16 }
 0x205   : > { %v997_v39 = vpop.permute.xlu1 %996  ;;  %v991_v43 = vpop.permute.xlu0 %990 }
 0x206   : > { %v1186_v41 = vcombine.low %v985_v18, %v997_v39  ;;  %v1187_v42 = vcombine.high %v985_v18, %v997_v39  ;;  %v1170_v53 = vcombine.low %v979_v23, %v991_v43  ;;  %v1171_v54 = vcombine.high %v979_v23, %v991_v43 }
 0x207   : > { %v1226_v23 = vrot.slane %v1218_v56, %v18927_v16 }
 0x208   : > { %v1194_v59 = vrot.slane %v1186_v41, %v18918_v8  ;;  %v1201_v60 = vrot.slane %v1187_v42, %v18918_v8  ;;  %v1178_v7 = vrot.slane %v1170_v53, %v18918_v8  ;;  %v1185_v9 = vrot.slane %v1171_v54, %v18918_v8 }
 0x209   : > { %v19256_v10 = vpop.permute.xlu1 %912  ;;  %v919_v13 = vpop.permute.xlu0 %918 }
 0x20a   : > { %v1234_v14 = vcombine.low %v1178_v7, %v1194_v59  ;;  %v1235_v18 = vcombine.high %v1178_v7, %v1194_v59  ;;  %v1250_v21 = vcombine.low %v1185_v9, %v1201_v60  ;;  %v1251_v22 = vcombine.high %v1185_v9, %v1201_v60 }
 0x20b   : > { %v1002_v33 = vcombine.low %v19072_v62, %v919_v13  ;;  %v1003_v39 = vcombine.high %v19072_v62, %v919_v13 }
 0x20c   : > { %v1242_v28 = vrot.slane %v1234_v14, %v18927_v16  ;;  %v1249_v41 = vrot.slane %v1235_v18, %v18927_v16  ;;  %v1258_v3 = vrot.slane %v1250_v21, %v18927_v16  ;;  %v1265_v40 = vrot.slane %v1251_v22, %v18927_v16 }
 0x20d   : > { %v925_v42 = vpop.permute.xlu1 %924  ;;  %v19274_v43 = vrot.slane %v1002_v33, %v18918_v8  ;;  %v19277_v53 = vrot.slane %v1003_v39, %v18918_v8  ;;  %v19281_v62 = vpop.permute.xlu0 %914 }
 0x20e   : > { %v1018_v54 = vcombine.low %v19256_v10, %v925_v42  ;;  %v1019_v56 = vcombine.high %v19256_v10, %v925_v42  ;;  %v19283_v58 = vcombine.low %v1210_v31, %v1242_v28  ;;  %v19285_v59 = vcombine.high %v1210_v31, %v1242_v28 }
 0x20f   : > { %v19287_v60 = vcombine.low %v1217_v12, %v1249_v41  ;;  %v19289_v7 = vcombine.high %v1217_v12, %v1249_v41  ;;  %v19291_v9 = vcombine.low %v1226_v23, %v1258_v3  ;;  %v19293_v13 = vcombine.high %v1226_v23, %v1258_v3 }
 0x210   : > { %v19295_v14 = vcombine.low %v1233_v32, %v1265_v40  ;;  %v19297_v18 = vcombine.high %v1233_v32, %v1265_v40  ;;  %v17837_v10 = vpack.c.bf16 %v19283_v58, %v19283_v58  ;;  %v17838_v21 = vpack.c.bf16 %v19285_v59, %v19285_v59 }
 0x211   : > { %v17839_v31 = vpack.c.bf16 %v19287_v60, %v19287_v60  ;;  %v17840_v12 = vpack.c.bf16 %v19289_v7, %v19289_v7  ;;  %v921_v22 = vpop.permute.xlu1 %920  ;;  %v17841_v23 = vpack.c.bf16 %v19291_v9, %v19291_v9  ;;  %v17842_v32 = vpack.c.bf16 %v19293_v13, %v19293_v13  ;;  %v927_v28 = vpop.permute.xlu0 %926 }
 0x212   : > { %v17843_v33 = vpack.c.bf16 %v19295_v14, %v19295_v14  ;;  %v17844_v39 = vpack.c.bf16 %v19297_v18, %v19297_v18  ;;  %v1722_v41 = vrot.slane %v17837_v10, %v19159_v57  ;;  %v1785_v3 = vrot.slane %v17838_v21, %v19159_v57 }
 0x213   : > { %v19318_v40 = vrot.slane %v17839_v31, %v19159_v57  ;;  %v1911_v42 = vrot.slane %v17840_v12, %v19159_v57  ;;  %v19322_v24 = vrot.slane %v17841_v23, %v19159_v57  ;;  %v2037_v11 = vrot.slane %v17842_v32, %v19159_v57 }
 0x214   : > { %v19326_v20 = vrot.slane %v17843_v33, %v19159_v57  ;;  %v2163_v4 = vrot.slane %v17844_v39, %v19159_v57  ;;  %v1724_v0 = vcombine.high %v1722_v41, %v1722_v41  ;;  %v19330_v10 = vrot.slane %v1722_v41, %v19159_v57 }
 0x215   : > { %26903 = vst [vmem:[#allocation18_spill] sm:$0xff] %v19322_v24  ;;  %v1787_v21 = vcombine.high %v1785_v3, %v1785_v3  ;;  %v19333_v31 = vrot.slane %v1785_v3, %v19159_v57  ;;  %v933_v49 = vpop.permute.xlu1 %932  ;;  %v19339_v23 = vrot.slane %v19318_v40, %v19159_v57  ;;  %v1913_v32 = vcombine.high %v1911_v42, %v1911_v42  ;;  %v939_v39 = vpop.permute.xlu0 %938 }
 0x216   : > { %26904 = vst [vmem:[#allocation19_spill] sm:$0xff] %v19326_v20  ;;  %v19342_v33 = vrot.slane %v1911_v42, %v19159_v57  ;;  %v19345_v41 = vrot.slane %v1724_v0, %v19159_v57  ;;  %v19354_v2 = vrot.slane %v19322_v24, %v19159_v57  ;;  %v2039_v36 = vcombine.high %v2037_v11, %v2037_v11 }
 0x217   : > { %26905 = vst [vmem:[#allocation20_spill] sm:$0xff] %v19339_v23  ;;  %v19348_v19 = vrot.slane %v1787_v21, %v19159_v57  ;;  %v19357_v63 = vrot.slane %v1913_v32, %v19159_v57  ;;  %v19360_v42 = vrot.slane %v2037_v11, %v19159_v57  ;;  %v19366_v21 = vrot.slane %v19326_v20, %v19159_v57 }
 0x218   : > { %26906 = vst [vmem:[#allocation21_spill] sm:$0xff] %v19342_v33  ;;  %26907 = vst [vmem:[#allocation22_spill] sm:$0xff] %v19354_v2  ;;  %v2165_v61 = vcombine.high %v2163_v4, %v2163_v4  ;;  %v19369_v3 = vrot.slane %v2163_v4, %v19159_v57  ;;  %v19374_v47 = vrot.slane %v2039_v36, %v19159_v57 }
 0x219   : > { %26908 = vst [vmem:[#allocation23_spill] sm:$0xff] %v19357_v63  ;;  %26909 = vst [vmem:[#allocation24_spill] sm:$0xff] %v19360_v42  ;;  %v945_v32 = vpop.permute.xlu1 %944  ;;  %v1026_v0 = vrot.slane %v1018_v54, %v18918_v8  ;;  %v1033_v48 = vrot.slane %v1019_v56, %v18918_v8  ;;  %v951_v51 = vpop.permute.xlu0 %950  ;;  %v1323_v4 = vcombine.low %v19094_v1, %v921_v22 }
 0x21a   : > { %26910 = vst [vmem:[#allocation25_spill] sm:$0xff] %v19366_v21  ;;  %26911 = vst [vmem:[#allocation26_spill] sm:$0xff] %v19369_v3  ;;  %v19381_v34 = vrot.slane %v2165_v61, %v19159_v57  ;;  %v1324_v25 = vcombine.high %v19094_v1, %v921_v22  ;;  %v1339_v12 = vcombine.low %v19281_v62, %v927_v28 }
 0x21b   : > { %26912 = vst [vmem:[#allocation27_spill] sm:$0xff] %v19374_v47  ;;  %v1066_v36 = vcombine.low %v19274_v43, %v1026_v0  ;;  %v1067_v5 = vcombine.high %v19274_v43, %v1026_v0  ;;  %v1082_v11 = vcombine.low %v19277_v53, %v1033_v48  ;;  %v1083_v54 = vcombine.high %v19277_v53, %v1033_v48 }
 0x21c   : > { %v1331_v56 = vrot.slane %v1323_v4, %v18918_v8  ;;  %v1338_v30 = vrot.slane %v1324_v25, %v18918_v8  ;;  %v1340_v61 = vcombine.high %v19281_v62, %v927_v28  ;;  %v1347_v55 = vrot.slane %v1339_v12, %v18918_v8 }
 0x21d   : > { %v957_v20 = vpop.permute.xlu1 %956  ;;  %v19395_v1 = vrot.slane %v1066_v36, %v18927_v16  ;;  %v19398_v22 = vrot.slane %v1067_v5, %v18927_v16  ;;  %v19401_v43 = vrot.slane %v1082_v11, %v18927_v16  ;;  %v19404_v48 = vrot.slane %v1083_v54, %v18927_v16  ;;  %v963_v53 = vpop.permute.xlu0 %962 }
 0x21e   : > { %v1354_v25 = vrot.slane %v1340_v61, %v18918_v8  ;;  %v1387_v0 = vcombine.low %v1331_v56, %v1347_v55  ;;  %v1388_v62 = vcombine.high %v1331_v56, %v1347_v55  ;;  %v1355_v28 = vcombine.low %v933_v49, %v945_v32 }
 0x21f   : > { %v1356_v12 = vcombine.high %v933_v49, %v945_v32  ;;  %v1371_v4 = vcombine.low %v939_v39, %v951_v51  ;;  %v1372_v38 = vcombine.high %v939_v39, %v951_v51  ;;  %v19409_v36 = vcombine.high %v19369_v3, %v19369_v3 }
 0x220   : > { %v19412_v5 = vrot.slane %v1387_v0, %v18927_v16  ;;  %v19415_v11 = vrot.slane %v1388_v62, %v18927_v16  ;;  %v1403_v54 = vcombine.low %v1338_v30, %v1354_v25  ;;  %v1404_v21 = vcombine.high %v1338_v30, %v1354_v25 }
 0x221   : > { %v969_v52 = vpop.permute.xlu1 %968  ;;  %v1363_v61 = vrot.slane %v1355_v28, %v18918_v8  ;;  %v1370_v55 = vrot.slane %v1356_v12, %v18918_v8  ;;  %v1379_v49 = vrot.slane %v1371_v4, %v18918_v8  ;;  %v1386_v51 = vrot.slane %v1372_v38, %v18918_v8  ;;  %v975_v39 = vpop.permute.xlu0 %974 }
 0x222   : > { %v19422_v32 = vrot.slane %v1403_v54, %v18927_v16  ;;  %v19425_v56 = vrot.slane %v1404_v21, %v18927_v16  ;;  %v1459_v0 = vcombine.low %v957_v20, %v969_v52  ;;  %v1460_v62 = vcombine.high %v957_v20, %v969_v52 }
 0x223   : > { %v1419_v37 = vcombine.low %v1363_v61, %v1379_v49  ;;  %v1420_v30 = vcombine.high %v1363_v61, %v1379_v49  ;;  %v1435_v25 = vcombine.low %v1370_v55, %v1386_v51  ;;  %v1436_v47 = vcombine.high %v1370_v55, %v1386_v51 }
 0x224   : > { %v1467_v28 = vrot.slane %v1459_v0, %v18918_v8  ;;  %v1474_v12 = vrot.slane %v1460_v62, %v18918_v8  ;;  %v1475_v4 = vcombine.low %v963_v53, %v975_v39  ;;  %v1476_v46 = vcombine.high %v963_v53, %v975_v39 }
 0x225   : > { %v981_v38 = vpop.permute.xlu1 %980  ;;  %v19430_v42 = vrot.slane %v1419_v37, %v18927_v16  ;;  %v19433_v54 = vrot.slane %v1420_v30, %v18927_v16  ;;  %v19436_v21 = vrot.slane %v1435_v25, %v18927_v16  ;;  %v19439_v52 = vrot.slane %v1436_v47, %v18927_v16  ;;  %v987_v20 = vpop.permute.xlu0 %986 }
 0x226   : > { %v1483_v61 = vrot.slane %v1475_v4, %v18918_v8  ;;  %v1490_v55 = vrot.slane %v1476_v46, %v18918_v8  ;;  %v2197_v53 = vcombine.high %v19381_v34, %v19381_v34  ;;  %v2844_v37 = vunpack.i.h.s16 %v19369_v3 }
 0x227   : > { %v1451_v49 = vcombine.low %v19412_v5, %v19430_v42  ;;  %v1452_v51 = vcombine.high %v19412_v5, %v19430_v42  ;;  %v1453_v47 = vcombine.low %v19415_v11, %v19433_v54  ;;  %v1454_v39 = vcombine.high %v19415_v11, %v19433_v54 }
 0x228   : > { %v1455_v46 = vcombine.low %v19422_v32, %v19436_v21  ;;  %v1456_v0 = vcombine.high %v19422_v32, %v19436_v21  ;;  %v1457_v62 = vcombine.low %v19425_v56, %v19439_v52  ;;  %v1458_v30 = vcombine.high %v19425_v56, %v19439_v52 }
 0x229   : > { %v993_v25 = vpop.permute.xlu1 %992  ;;  %v1523_v42 = vcombine.low %v1467_v28, %v1483_v61  ;;  %v1524_v5 = vcombine.high %v1467_v28, %v1483_v61  ;;  %v1539_v4 = vcombine.low %v1474_v12, %v1490_v55  ;;  %v1540_v3 = vcombine.high %v1474_v12, %v1490_v55  ;;  %v999_v27 = vpop.permute.xlu0 %998 }
 0x22a   : > { %v1491_v50 = vcombine.low %v981_v38, %v993_v25  ;;  %v1492_v11 = vcombine.high %v981_v38, %v993_v25  ;;  %v1507_v54 = vcombine.low %v987_v20, %v999_v27  ;;  %v1508_v2 = vcombine.high %v987_v20, %v999_v27 }
 0x22b   : > { %v1531_v24 = vrot.slane %v1523_v42, %v18927_v16  ;;  %v1538_v32 = vrot.slane %v1524_v5, %v18927_v16  ;;  %v1547_v21 = vrot.slane %v1539_v4, %v18927_v16  ;;  %v1554_v29 = vrot.slane %v1540_v3, %v18927_v16 }
 0x22c   : > { %v1499_v56 = vrot.slane %v1491_v50, %v18918_v8  ;;  %v1506_v52 = vrot.slane %v1492_v11, %v18918_v8  ;;  %v1515_v28 = vrot.slane %v1507_v54, %v18918_v8  ;;  %v1522_v12 = vrot.slane %v1508_v2, %v18918_v8 }
 0x22d   : > { %v19470_v61 = vpop.permute.xlu1 %936  ;;  %v2846_v27 = vunpack.i.h.s16 %v19381_v34  ;;  %v2848_v38 = vunpack.i.h.s16 %v19409_v36  ;;  %v2850_v20 = vunpack.i.h.s16 %v2197_v53  ;;  %v19475_v55 = vpack.i.b16 %v19381_v34, %v2844_v37 }
 0x22e   : > { %v1555_v25 = vcombine.low %v1499_v56, %v1515_v28  ;;  %v1556_v3 = vcombine.high %v1499_v56, %v1515_v28  ;;  %v1571_v42 = vcombine.low %v1506_v52, %v1522_v12  ;;  %v1572_v50 = vcombine.high %v1506_v52, %v1522_v12 }
 0x22f   : > { %v19478_v5 = vpack.i.b16 %v19409_v36, %v2846_v27  ;;  %v19480_v4 = vpack.i.b16 %v2197_v53, %v2848_v38  ;;  %v26913_v2 = vrot.slane %v19204_v6, %v19159_v57  ;;  %v26914_v54 = vcombine.low %v19330_v10, %v19345_v41 }
 0x230   : > { %v1563_v37 = vrot.slane %v1555_v25, %v18927_v16  ;;  %v1570_v56 = vrot.slane %v1556_v3, %v18927_v16  ;;  %v1579_v36 = vrot.slane %v1571_v42, %v18927_v16  ;;  %v1586_v53 = vrot.slane %v1572_v50, %v18927_v16 }
 0x231   : > { %v19485_v11 = vpack.i.b16 %v26913_v2, %v2850_v20  ;;  %v19491_v34 = vrot.slane %v26914_v54, %v19159_v57  ;;  %v19497_v52 = vpop.permute.xlu1 %948 }
 0x232   : > { %v1587_v38 = vcombine.low %v1531_v24, %v1563_v37  ;;  %v1588_v20 = vcombine.high %v1531_v24, %v1563_v37  ;;  %v1589_v25 = vcombine.low %v1538_v32, %v1570_v56  ;;  %v1590_v3 = vcombine.high %v1538_v32, %v1570_v56 }
 0x233   : > { %v1591_v42 = vcombine.low %v1547_v21, %v1579_v36  ;;  %v1592_v50 = vcombine.high %v1547_v21, %v1579_v36  ;;  %v1593_v2 = vcombine.low %v1554_v29, %v1586_v53  ;;  %v19507_v54 = vcombine.high %v1554_v29, %v1586_v53 }
 0x234   : > { %v1660_v45 = vpack.c.bf16 %v1587_v38, %v1451_v49  ;;  %v1662_v6 = vpack.c.bf16 %v1588_v20, %v1452_v51  ;;  %v1664_v63 = vpack.c.bf16 %v1589_v25, %v1453_v47  ;;  %v1666_v33 = vpack.c.bf16 %v1590_v3, %v1454_v39 }
 0x235   : > { %v1668_v28 = vpack.c.bf16 %v1591_v42, %v1455_v46  ;;  %v1670_v17 = vpack.c.bf16 %v1592_v50, %v1456_v0  ;;  %v1672_v44 = vpack.c.bf16 %v1593_v2, %v1457_v62  ;;  %v1674_v12 = vpack.c.bf16 %v19507_v54, %v1458_v30 }
 0x236   : > { %v17845_v23 = vpack.c.bf16 %v1587_v38, %v1587_v38  ;;  %v19511_v27 = vrot.slane %v1660_v45, %v19159_v57  ;;  %v17846_v24 = vpack.c.bf16 %v1588_v20, %v1588_v20  ;;  %v2282_v32 = vrot.slane %v1662_v6, %v19159_v57  ;;  %v931_v38 = vpop.permute.xlu0 %930 }
 0x237   : > { %v17847_v21 = vpack.c.bf16 %v1589_v25, %v1589_v25  ;;  %v19515_v29 = vrot.slane %v1664_v63, %v19159_v57  ;;  %v17848_v49 = vpack.c.bf16 %v1590_v3, %v1590_v3  ;;  %v2408_v51 = vrot.slane %v1666_v33, %v19159_v57 }
 0x238   : > { %v19519_v47 = vrot.slane %v17845_v23, %v19159_v57  ;;  %v2227_v39 = vcombine.high %v19511_v27, %v19511_v27  ;;  %v19525_v45 = vrot.slane %v19511_v27, %v19159_v57  ;;  %v2289_v46 = vrot.slane %v17846_v24, %v19159_v57 }
 0x239   : > { %v2290_v0 = vcombine.high %v2282_v32, %v2282_v32  ;;  %v19529_v62 = vrot.slane %v2282_v32, %v19159_v57  ;;  %v19532_v63 = vrot.slane %v17847_v21, %v19159_v57  ;;  %v19552_v6 = vrot.slane %v19515_v29, %v19159_v57 }
 0x23a   : > { %v19540_v30 = vrot.slane %v19519_v47, %v19159_v57  ;;  %v2291_v37 = vcombine.high %v2289_v46, %v2289_v46  ;;  %v19543_v56 = vrot.slane %v2289_v46, %v19159_v57  ;;  %v2415_v25 = vrot.slane %v17848_v49, %v19159_v57 }
 0x23b   : > { %v19546_v36 = vrot.slane %v2290_v0, %v19159_v57  ;;  %v19556_v27 = vrot.slane %v19532_v63, %v19159_v57  ;;  %v2416_v3 = vcombine.high %v2408_v51, %v2408_v51  ;;  %v19563_v24 = vrot.slane %v2408_v51, %v19159_v57 }
 0x23c   : > { %v19559_v20 = vrot.slane %v2291_v37, %v19159_v57  ;;  %v17849_v32 = vpack.c.bf16 %v1591_v42, %v1591_v42  ;;  %v19566_v21 = vrot.slane %v1668_v28, %v19159_v57  ;;  %v17850_v46 = vpack.c.bf16 %v1592_v50, %v1592_v50 }
 0x23d   : > { %v2534_v0 = vrot.slane %v1670_v17, %v19159_v57  ;;  %v2417_v53 = vcombine.high %v2415_v25, %v2415_v25  ;;  %v19570_v23 = vrot.slane %v2415_v25, %v19159_v57  ;;  %v19573_v37 = vrot.slane %v2416_v3, %v19159_v57 }
 0x23e   : > { %v17851_v33 = vpack.c.bf16 %v1593_v2, %v1593_v2  ;;  %v19576_v49 = vrot.slane %v17849_v32, %v19159_v57  ;;  %v19582_v28 = vrot.slane %v19566_v21, %v19159_v57  ;;  %v2541_v17 = vrot.slane %v17850_v46, %v19159_v57 }
 0x23f   : > { %v19586_v50 = vrot.slane %v2417_v53, %v19159_v57  ;;  %v2542_v51 = vcombine.high %v2534_v0, %v2534_v0  ;;  %v19589_v25 = vrot.slane %v2534_v0, %v19159_v57  ;;  %v19592_v2 = vrot.slane %v1672_v44, %v19159_v57  ;;  %v943_v53 = vpop.permute.xlu0 %942 }
 0x240   : > { %26915 = vst [vmem:[#allocation28_spill] sm:$0xff] %v19582_v28  ;;  %v19598_v32 = vrot.slane %v19576_v49, %v19159_v57  ;;  %v2543_v42 = vcombine.high %v2541_v17, %v2541_v17  ;;  %v19601_v46 = vrot.slane %v2541_v17, %v19159_v57  ;;  %v19607_v0 = vrot.slane %v17851_v33, %v19159_v57 }
 0x241   : > { %26916 = vst [vmem:[#allocation29_spill] sm:$0xff] %v19589_v25  ;;  %26917 = vst [vmem:[#allocation30_spill] sm:$0xff] %v19592_v2  ;;  %v19604_v28 = vrot.slane %v2542_v51, %v19159_v57  ;;  %v19613_v3 = vrot.slane %v19592_v2, %v19159_v57  ;;  %v17852_v17 = vpack.c.bf16 %v19507_v54, %v19507_v54 }
 0x242   : > { %26918 = vst [vmem:[#allocation31_spill] sm:$0xff] %v19598_v32  ;;  %26919 = vst [vmem:[#allocation32_spill] sm:$0xff] %v19601_v46  ;;  %v19616_v32 = vrot.slane %v2543_v42, %v19159_v57  ;;  %v2660_v46 = vrot.slane %v1674_v12, %v19159_v57  ;;  %v26924_v33 = vcombine.low %v19470_v61, %v19497_v52 }
 0x243   : > { %26920 = vst [vmem:[#allocation33_spill] sm:$0xff] %v19604_v28  ;;  %26921 = vst [vmem:[#allocation34_spill] sm:$0xff] %v19607_v0  ;;  %v19629_v2 = vrot.slane %v19607_v0, %v19159_v57  ;;  %v26926_v42 = vcombine.high %v19470_v61, %v19497_v52  ;;  %v1034_v54 = vcombine.low %v931_v38, %v943_v53 }
 0x244   : > { %26922 = vst [vmem:[#allocation35_spill] sm:$0xff] %v19613_v3  ;;  %26923 = vst [vmem:[#allocation36_spill] sm:$0xff] %v19616_v32  ;;  %v1058_v51 = vrot.slane %v26924_v33, %v18918_v8  ;;  %v2667_v12 = vrot.slane %v17852_v17, %v19159_v57  ;;  %v2668_v32 = vcombine.high %v2660_v46, %v2660_v46 }
 0x245   : > { %26925 = vst [vmem:[#allocation37_spill] sm:$0xff] %v19629_v2  ;;  %v1065_v3 = vrot.slane %v26926_v42, %v18918_v8  ;;  %v19637_v28 = vrot.slane %v2660_v46, %v19159_v57  ;;  %v1035_v33 = vcombine.high %v931_v38, %v943_v53  ;;  %v1042_v25 = vrot.slane %v1034_v54, %v18918_v8 }
 0x246   : > { %v2249_v44 = vrot.slane %v2227_v39, %v19159_v57  ;;  %v26927_v2 = vcombine.low %v19475_v55, %v19478_v5  ;;  %v26928_v61 = vcombine.low %v19480_v4, %v19485_v11  ;;  %v2669_v17 = vcombine.high %v2667_v12, %v2667_v12 }
 0x247   : > { %v19650_v42 = vrot.slane %v2667_v12, %v19159_v57  ;;  %v19653_v38 = vrot.slane %v2668_v32, %v19159_v57  ;;  %v1049_v46 = vrot.slane %v1035_v33, %v18918_v8  ;;  %v1098_v39 = vcombine.low %v1042_v25, %v1058_v51 }
 0x248   : > { %v3526_v0 = vrot.slane %v26927_v2, %v19159_v57  ;;  %v3533_v52 = vrot.slane %v26928_v61, %v19159_v57  ;;  %v1099_v53 = vcombine.high %v1042_v25, %v1058_v51  ;;  %v3518_v54 = vcombine.low %v19525_v45, %v2249_v44 }
 0x249   : > { %v17929_v55 = vcombine.high %v19525_v45, %v2249_v44  ;;  %v19659_v5 = vrot.slane %v2669_v17, %v19159_v57  ;;  %v1114_v4 = vcombine.low %v1049_v46, %v1065_v3  ;;  %v1115_v11 = vcombine.high %v1049_v46, %v1065_v3 }
 0x24a   : > { %v3548_v2 = vcombine.low %v3526_v0, %v3533_v52  ;;  %v1106_v12 = vrot.slane %v1098_v39, %v18927_v16  ;;  %v1113_v61 = vrot.slane %v1099_v53, %v18927_v16  ;;  %v3540_v32 = vrot.slane %v3518_v54, %v19159_v57 }
 0x24b   : > { %v3547_v8 = vrot.slane %v17929_v55, %v19159_v57  ;;  %v1122_v25 = vrot.slane %v1114_v4, %v18927_v16  ;;  %v1129_v51 = vrot.slane %v1115_v11, %v18927_v16  ;;  %v26929_v3 = vcombine.high %v19330_v10, %v19345_v41 }
 0x24c   : > { %v19668_v45 = vrot.slane %v3548_v2, %v19159_v57  ;;  %v1130_v44 = vcombine.low %v19395_v1, %v1106_v12  ;;  %v1131_v33 = vcombine.high %v19395_v1, %v1106_v12  ;;  %v1132_v52 = vcombine.low %v19398_v22, %v1113_v61 }
 0x24d   : > { %v3155_v0 = vrot.slane %v26929_v3, %v19159_v57  ;;  %v1133_v17 = vcombine.high %v19398_v22, %v1113_v61  ;;  %v1134_v46 = vcombine.low %v19401_v43, %v1122_v25  ;;  %v1135_v16 = vcombine.high %v19401_v43, %v1122_v25 }
 0x24e   : > { %v1136_v39 = vcombine.low %v19404_v48, %v1129_v51  ;;  %v1137_v53 = vcombine.high %v19404_v48, %v1129_v51  ;;  %v1644_v54 = vpack.c.bf16 %v19283_v58, %v1130_v44  ;;  %v1646_v10 = vpack.c.bf16 %v19285_v59, %v1131_v33 }
 0x24f   : > { %v1648_v41 = vpack.c.bf16 %v19287_v60, %v1132_v52  ;;  %v1650_v1 = vpack.c.bf16 %v19289_v7, %v1133_v17  ;;  %v1652_v55 = vpack.c.bf16 %v19291_v9, %v1134_v46  ;;  %v1654_v22 = vpack.c.bf16 %v19293_v13, %v1135_v16 }
 0x250   : > { %v1656_v4 = vpack.c.bf16 %v19295_v14, %v1136_v39  ;;  %v1658_v43 = vpack.c.bf16 %v19297_v18, %v1137_v53  ;;  %v1715_v11 = vrot.slane %v1644_v54, %v19159_v57  ;;  %v1778_v48 = vrot.slane %v1646_v10, %v19159_v57 }
 0x251   : > { %v19693_v58 = vrot.slane %v1648_v41, %v19159_v57  ;;  %v1904_v59 = vrot.slane %v1650_v1, %v19159_v57  ;;  %v19697_v60 = vrot.slane %v1652_v55, %v19159_v57  ;;  %v2030_v7 = vrot.slane %v1654_v22, %v19159_v57 }
 0x252   : > { %v19701_v9 = vrot.slane %v1656_v4, %v19159_v57  ;;  %v2156_v13 = vrot.slane %v1658_v43, %v19159_v57  ;;  %v1723_v14 = vcombine.high %v1715_v11, %v1715_v11  ;;  %v1731_v18 = vrot.slane %v1715_v11, %v19159_v57 }
 0x253   : > { %v1786_v2 = vcombine.high %v1778_v48, %v1778_v48  ;;  %v19706_v12 = vrot.slane %v1778_v48, %v19159_v57  ;;  %v19712_v25 = vrot.slane %v19693_v58, %v19159_v57  ;;  %v1912_v51 = vcombine.high %v1904_v59, %v1904_v59 }
 0x254   : > { %v19715_v3 = vrot.slane %v1904_v59, %v19159_v57  ;;  %v1745_v44 = vrot.slane %v1723_v14, %v19159_v57  ;;  %v19725_v17 = vrot.slane %v19697_v60, %v19159_v57  ;;  %v2038_v16 = vcombine.high %v2030_v7, %v2030_v7 }
 0x255   : > { %v19719_v33 = vrot.slane %v1786_v2, %v19159_v57  ;;  %v19728_v46 = vrot.slane %v1912_v51, %v19159_v57  ;;  %v19731_v39 = vrot.slane %v2030_v7, %v19159_v57  ;;  %v19737_v54 = vrot.slane %v19701_v9, %v19159_v57 }
 0x256   : > { %v2164_v10 = vcombine.high %v2156_v13, %v2156_v13  ;;  %v19740_v41 = vrot.slane %v2156_v13, %v19159_v57  ;;  %v3124_v1 = vcombine.low %v1731_v18, %v1745_v44  ;;  %v19743_v55 = vrot.slane %v2038_v16, %v19159_v57 }
 0x257   : > { %v17925_v22 = vcombine.high %v1731_v18, %v1745_v44  ;;  %v3549_v4 = vcombine.low %v3540_v32, %v3547_v8  ;;  %v3157_v43 = vcombine.low %v19491_v34, %v3155_v0  ;;  %v26930_v59 = vcombine.high %v19519_v47, %v19519_v47 }
 0x258   : > { %v19747_v11 = vrot.slane %v2164_v10, %v19159_v57  ;;  %v3134_v48 = vrot.slane %v3124_v1, %v19159_v57  ;;  %v2320_v13 = vcombine.high %v19529_v62, %v19529_v62  ;;  %v19761_v34 = vcombine.high %v19546_v36, %v19546_v36 }
 0x259   : > { %v2256_v7 = vrot.slane %v26930_v59, %v19159_v57  ;;  %v3563_v14 = vrot.slane %v3549_v4, %v19159_v57  ;;  %v3141_v18 = vrot.slane %v17925_v22, %v19159_v57  ;;  %v3171_v32 = vrot.slane %v3157_v43, %v19159_v57 }
 0x25a   : > { %v2870_v8 = vunpack.i.h.s16 %v19529_v62  ;;  %v2872_v0 = vunpack.i.h.s16 %v19546_v36  ;;  %v2874_v2 = vunpack.i.h.s16 %v2320_v13  ;;  %v26931_v47 = vrot.slane %v19208_v15, %v19159_v57 }
 0x25b   : > { %v3564_v44 = vcombine.low %v19668_v45, %v3563_v14  ;;  %v3156_v16 = vcombine.low %v3134_v48, %v3141_v18  ;;  %v3565_v10 = vcombine.low %v19540_v30, %v2256_v7  ;;  %v17930_v1 = vcombine.high %v19540_v30, %v2256_v7 }
 0x25c   : > { %v17889_v51 = vpack.i.b16 %v19529_v62, %v26931_v47  ;;  %v17890_v22 = vpack.i.b16 %v19546_v36, %v2870_v8  ;;  %v17891_v4 = vpack.i.b16 %v2320_v13, %v2872_v0  ;;  %v17892_v43 = vpack.i.b16 %v19761_v34, %v2874_v2 }
 0x25d   : > { %v1816_v59 = vcombine.high %v19706_v12, %v19706_v12  ;;  %18088 = vmatmul.mubr.msk.bf16.vlgmr.msra.gmra.mxu1 %vm728_vm1, %v3564_v44  ;;  %v3164_v15 = vrot.slane %v3156_v16, %v19159_v57  ;;  %v3575_v62 = vrot.slane %v3565_v10, %v19159_v57  ;;  %v3582_v45 = vrot.slane %v17930_v1, %v19159_v57 }
 0x25e   : > { %v1817_v48 = vcombine.high %v19333_v31, %v19333_v31  ;;  %v26932_v30 = vmov 0.0   ;;  %v3567_v36 = vcombine.low %v17889_v51, %v17890_v22  ;;  %v3568_v7 = vcombine.low %v17891_v4, %v17892_v43 }
 0x25f   : > { %18091 = vmatprep.mubr.msk.bf16.mxu1 %vm18831_vm0, %v26932_v30  ;;  %v1818_v13 = vcombine.high %v19719_v33, %v19719_v33  ;;  %v19788_v14 = vcombine.high %v19348_v19, %v19348_v19  ;;  %v3172_v18 = vcombine.low %v3164_v15, %v3171_v32  ;;  %v3597_v8 = vcombine.low %v3575_v62, %v3582_v45 }
 0x260   : > { %v2734_v0 = vunpack.i.h.s16 %v19706_v12  ;;  %v2736_v2 = vunpack.i.h.s16 %v19719_v33  ;;  %v3589_v47 = vrot.slane %v3567_v36, %v19159_v57  ;;  %v3596_v44 = vrot.slane %v3568_v7, %v19159_v57 }
 0x261   : > { %v2738_v16 = vunpack.i.h.s16 %v1816_v59  ;;  %v2740_v51 = vunpack.i.h.s16 %v1818_v13  ;;  %18056 = vmatmul.mubr.msk.bf16.vlgmr.msra.gmra.mxu0 %vm728_vm1, %v3172_v18  ;;  %v3605_v10 = vrot.slane %v3597_v8, %v19159_v57  ;;  %v2742_v1 = vunpack.i.h.s16 %v19333_v31 }
 0x262   : > { %v2744_v22 = vunpack.i.h.s16 %v19348_v19  ;;  %v2746_v32 = vunpack.i.h.s16 %v1817_v48  ;;  %v3598_v4 = vcombine.low %v3589_v47, %v3596_v44  ;;  %18059 = vmatprep.mubr.msk.bf16.mxu0 %vm18831_vm0, %v26932_v30  ;;  %v26933_v43 = vrot.slane %v19167_v35, %v19159_v57 }
 0x263   : > { %v17854_v62 = vpack.i.b16 %v19719_v33, %v2734_v0  ;;  %v17855_v45 = vpack.i.b16 %v1816_v59, %v2736_v2  ;;  %v17856_v36 = vpack.i.b16 %v1818_v13, %v2738_v16  ;;  %v17857_v7 = vpack.i.b16 %v19333_v31, %v2740_v51 }
 0x264   : > { %v17853_v15 = vpack.i.b16 %v19706_v12, %v26933_v43  ;;  %v17858_v18 = vpack.i.b16 %v19348_v19, %v2742_v1  ;;  %v17859_v8 = vpack.i.b16 %v1817_v48, %v2744_v22  ;;  %v3612_v53 = vrot.slane %v3598_v4, %v19159_v57 }
 0x265   : > { %v17860_v47 = vpack.i.b16 %v19788_v14, %v2746_v32  ;;  %v2321_v52 = vcombine.high %v19543_v56, %v19543_v56  ;;  %v3174_v35 = vcombine.low %v17855_v45, %v17856_v36  ;;  %v2323_v12 = vcombine.high %v19559_v20, %v19559_v20 }
 0x266   : > { %v3173_v44 = vcombine.low %v17853_v15, %v17854_v62  ;;  %v3175_v61 = vcombine.low %v17857_v7, %v17858_v18  ;;  %v26934_v31 = vcombine.high %v19515_v29, %v19515_v29  ;;  %v3613_v19 = vcombine.low %v3605_v10, %v3612_v53 }
 0x267   : > { %v3176_v59 = vcombine.low %v17859_v8, %v17860_v47  ;;  %v2383_v13 = vcombine.high %v19552_v6, %v19552_v6  ;;  %v3190_v0 = vrot.slane %v3174_v35, %v19159_v57  ;;  %v2876_v16 = vunpack.i.h.s16 %v19761_v34 }
 0x268   : > { %v19817_v33 = vrot.slane %v26934_v31, %v19159_v57  ;;  %v3183_v48 = vrot.slane %v3173_v44, %v19159_v57  ;;  %v3197_v2 = vrot.slane %v3175_v61, %v19159_v57  ;;  %v2878_v51 = vunpack.i.h.s16 %v19543_v56  ;;  %18092 = vmatmul.mubr.msk.bf16.gmra.mxu1 %vm728_vm1, %v3613_v19  ;;  %v26938_v31 = vld [vmem:[#allocation20_spill] sm:$0xff] }
 0x269   : > { %v3204_v29 = vrot.slane %v3176_v59, %v19159_v57  ;;  %v2880_v53 = vunpack.i.h.s16 %v19559_v20  ;;  %v2882_v10 = vunpack.i.h.s16 %v2321_v52  ;;  %v2884_v1 = vunpack.i.h.s16 %v2323_v12  ;;  %18095 = vmatprep.mubr.msk.bf16.mxu1 %vm18831_vm0, %v26932_v30 }
 0x26a   : > { %v3205_v22 = vcombine.low %v3183_v48, %v3190_v0  ;;  %v17893_v32 = vpack.i.b16 %v19543_v56, %v2876_v16  ;;  %v17894_v61 = vpack.i.b16 %v19559_v20, %v2878_v51  ;;  %v3617_v34 = vcombine.low %v19817_v33, %v2383_v13 }
 0x26b   : > { %v3206_v4 = vcombine.low %v3197_v2, %v3204_v29  ;;  %v17895_v43 = vpack.i.b16 %v2321_v52, %v2880_v53  ;;  %v17896_v15 = vpack.i.b16 %v2323_v12, %v2882_v10  ;;  %v26935_v62 = vrot.slane %v19224_v26, %v19159_v57  ;;  %v26940_v10 = vld [vmem:[#allocation6_spill] sm:$0xff] }
 0x26c   : > { %v3213_v36 = vrot.slane %v3205_v22, %v19159_v57  ;;  %v3614_v7 = vcombine.low %v17893_v32, %v17894_v61  ;;  %v3645_v18 = vrot.slane %v3617_v34, %v19159_v57  ;;  %v26936_v56 = vcombine.high %v19693_v58, %v19693_v58 }
 0x26d   : > { %v17897_v45 = vpack.i.b16 %v26935_v62, %v2884_v1  ;;  %v3220_v20 = vrot.slane %v3206_v4, %v19159_v57  ;;  %v3615_v47 = vcombine.low %v17895_v43, %v17896_v15  ;;  %v26937_v26 = vcombine.high %v19318_v40, %v19318_v40 }
 0x26e   : > { %v1871_v8 = vrot.slane %v26936_v56, %v19159_v57  ;;  %v3624_v35 = vrot.slane %v3614_v7, %v19159_v57  ;;  %v1879_v12 = vcombine.high %v19712_v25, %v19712_v25  ;;  %v1880_v58 = vcombine.high %v26938_v31, %v26938_v31 }
 0x26f   : > { %v3616_v52 = vcombine.low %v17897_v45, %v19552_v6  ;;  %v19849_v44 = vrot.slane %v26937_v26, %v19159_v57  ;;  %v3221_v59 = vcombine.low %v3213_v36, %v3220_v20  ;;  %v3631_v48 = vrot.slane %v3615_v47, %v19159_v57 }
 0x270   : > { %v1881_v19 = vcombine.high %v1871_v8, %v1871_v8  ;;  %v2748_v13 = vunpack.i.h.s16 %v19788_v14  ;;  %v3223_v0 = vcombine.low %v1871_v8, %v1879_v12  ;;  %v26939_v16 = vcombine.high %v19532_v63, %v19532_v63 }
 0x271   : > { %v3638_v6 = vrot.slane %v3616_v52, %v19159_v57  ;;  %v3225_v2 = vcombine.low %v19849_v44, %v1880_v58  ;;  %18060 = vmatmul.mubr.msk.bf16.gmra.mxu0 %vm728_vm1, %v3221_v59  ;;  %v3646_v29 = vcombine.low %v3624_v35, %v3631_v48  ;;  %v26941_v1 = vrot.slane %v26940_v10, %v19159_v57 }
 0x272   : > { %v3224_v40 = vcombine.low %v1881_v19, %v26938_v31  ;;  %v2382_v51 = vrot.slane %v26939_v16, %v19159_v57  ;;  %v2384_v14 = vcombine.high %v19556_v27, %v19556_v27  ;;  %18063 = vmatprep.mubr.msk.bf16.mxu0 %vm18831_vm0, %v26932_v30  ;;  %v3239_v32 = vrot.slane %v3223_v0, %v19159_v57 }
 0x273   : > { %v3647_v53 = vcombine.low %v3638_v6, %v3645_v18  ;;  %v17861_v22 = vpack.i.b16 %v26941_v1, %v2748_v13  ;;  %v3253_v63 = vrot.slane %v3225_v2, %v19159_v57  ;;  %v2385_v34 = vcombine.high %v19817_v33, %v19817_v33  ;;  %v26942_v33 = vld [vmem:[#allocation12_spill] sm:$0xff]  ;;  %v26944_v6 = vld [vmem:[#allocation21_spill] sm:$0xff] }
 0x274   : > { %v3246_v61 = vrot.slane %v3224_v40, %v19159_v57  ;;  %v3654_v4 = vrot.slane %v3646_v29, %v19159_v57  ;;  %v2386_v62 = vcombine.high %v2382_v51, %v2382_v51  ;;  %v19883_v36 = vcombine.high %v19563_v24, %v19563_v24 }
 0x275   : > { %v3661_v43 = vrot.slane %v3647_v53, %v19159_v57  ;;  %v3222_v15 = vcombine.low %v17861_v22, %v19712_v25  ;;  %v2904_v7 = vunpack.i.h.s16 %v19563_v24  ;;  %v2906_v18 = vunpack.i.h.s16 %v19573_v37 }
 0x276   : > { %v3255_v45 = vcombine.low %v3246_v61, %v3253_v63  ;;  %v26943_v20 = vrot.slane %v26942_v33, %v19159_v57  ;;  %v3663_v25 = vcombine.low %v2385_v34, %v19556_v27  ;;  %v3664_v12 = vcombine.low %v2382_v51, %v2384_v14  ;;  %v26945_v14 = vld [vmem:[#allocation23_spill] sm:$0xff] }
 0x277   : > { %v3662_v56 = vcombine.low %v3654_v4, %v3661_v43  ;;  %v3232_v8 = vrot.slane %v3222_v15, %v19159_v57  ;;  %v17899_v26 = vpack.i.b16 %v19573_v37, %v2904_v7  ;;  %v17900_v35 = vpack.i.b16 %v19883_v36, %v2906_v18  ;;  %v26946_v34 = vld [vmem:[#allocation7_spill] sm:$0xff] }
 0x278   : > { %v17898_v47 = vpack.i.b16 %v19563_v24, %v26943_v20  ;;  %v3269_v52 = vrot.slane %v3255_v45, %v19159_v57  ;;  %v3673_v19 = vrot.slane %v3663_v25, %v19159_v57  ;;  %v1882_v59 = vcombine.high %v19849_v44, %v19849_v44 }
 0x279   : > { %18096 = vmatmul.mubr.msk.bf16.gmra.mxu1 %vm728_vm1, %v3662_v56  ;;  %v3254_v31 = vcombine.low %v3232_v8, %v3239_v32  ;;  %v3666_v27 = vcombine.low %v17899_v26, %v17900_v35  ;;  %v3680_v24 = vrot.slane %v3664_v12, %v19159_v57  ;;  %v1942_v48 = vcombine.high %v19715_v3, %v19715_v3 }
 0x27a   : > { %v3665_v58 = vcombine.low %v2386_v62, %v17898_v47  ;;  %18099 = vmatprep.mubr.msk.bf16.mxu1 %vm18831_vm0, %v26932_v30  ;;  %v19907_v13 = vcombine.high %v26944_v6, %v26944_v6  ;;  %v1944_v44 = vcombine.high %v19728_v46, %v19728_v46  ;;  %v2768_v2 = vunpack.i.h.s16 %v19715_v3 }
 0x27b   : > { %v3262_v0 = vrot.slane %v3254_v31, %v19159_v57  ;;  %v3694_v16 = vrot.slane %v3666_v27, %v19159_v57  ;;  %v3695_v51 = vcombine.low %v3673_v19, %v3680_v24  ;;  %v2770_v29 = vunpack.i.h.s16 %v19728_v46 }
 0x27c   : > { %v3687_v40 = vrot.slane %v3665_v58, %v19159_v57  ;;  %v2772_v53 = vunpack.i.h.s16 %v1942_v48  ;;  %v2774_v1 = vunpack.i.h.s16 %v1944_v44  ;;  %v2776_v22 = vunpack.i.h.s16 %v26944_v6 }
 0x27d   : > { %v3270_v10 = vcombine.low %v3262_v0, %v3269_v52  ;;  %v2778_v32 = vunpack.i.h.s16 %v26945_v14  ;;  %v3703_v63 = vrot.slane %v3695_v51, %v19159_v57  ;;  %v26947_v4 = vrot.slane %v26946_v34, %v19159_v57 }
 0x27e   : > { %v3696_v61 = vcombine.low %v3687_v40, %v3694_v16  ;;  %v17863_v15 = vpack.i.b16 %v19728_v46, %v2768_v2  ;;  %v17864_v62 = vpack.i.b16 %v1942_v48, %v2770_v29  ;;  %v17865_v45 = vpack.i.b16 %v1944_v44, %v2772_v53  ;;  %v26949_v53 = vld [vmem:[#allocation14_spill] sm:$0xff] }
 0x27f   : > { %v17862_v43 = vpack.i.b16 %v19715_v3, %v26947_v4  ;;  %18064 = vmatmul.mubr.msk.bf16.gmra.mxu0 %vm728_vm1, %v3270_v10  ;;  %v17866_v7 = vpack.i.b16 %v26944_v6, %v2774_v1  ;;  %v17867_v18 = vpack.i.b16 %v26945_v14, %v2776_v22  ;;  %v17868_v8 = vpack.i.b16 %v19907_v13, %v2778_v32  ;;  %v26951_v32 = vld [vmem:[#allocation28_spill] sm:$0xff] }
 0x280   : > { %v3710_v56 = vrot.slane %v3696_v61, %v19159_v57  ;;  %18067 = vmatprep.mubr.msk.bf16.mxu0 %vm18831_vm0, %v26932_v30  ;;  %v2447_v3 = vcombine.high %v19570_v23, %v19570_v23  ;;  %v3272_v46 = vcombine.low %v17863_v15, %v17864_v62  ;;  %v2448_v47 = vcombine.high %v19573_v37, %v19573_v37 }
 0x281   : > { %v3271_v33 = vcombine.low %v1882_v59, %v17862_v43  ;;  %v3273_v20 = vcombine.low %v17865_v45, %v17866_v7  ;;  %v2449_v25 = vcombine.high %v19586_v50, %v19586_v50  ;;  %v3274_v26 = vcombine.low %v17867_v18, %v17868_v8  ;;  %v26953_v45 = vld [vmem:[#allocation18_spill] sm:$0xff] }
 0x282   : > { %v3711_v52 = vcombine.low %v3703_v63, %v3710_v56  ;;  %v26948_v12 = vcombine.high %v19566_v21, %v19566_v21  ;;  %v3288_v58 = vrot.slane %v3272_v46, %v19159_v57  ;;  %v2908_v59 = vunpack.i.h.s16 %v19883_v36 }
 0x283   : > { %v3281_v35 = vrot.slane %v3271_v33, %v19159_v57  ;;  %v3295_v19 = vrot.slane %v3273_v20, %v19159_v57  ;;  %v2910_v37 = vunpack.i.h.s16 %v2448_v47  ;;  %v3302_v27 = vrot.slane %v3274_v26, %v19159_v57  ;;  %v26955_v20 = vld [vmem:[#allocation22_spill] sm:$0xff]  ;;  %v26956_v26 = vld [vmem:[#allocation9_spill] sm:$0xff] }
 0x284   : > { %v19945_v31 = vrot.slane %v26948_v12, %v19159_v57  ;;  %18100 = vmatmul.mubr.msk.bf16.gmra.mxu1 %vm728_vm1, %v3711_v52  ;;  %v2912_v24 = vunpack.i.h.s16 %v19570_v23  ;;  %v2914_v48 = vunpack.i.h.s16 %v19586_v50  ;;  %v2916_v6 = vunpack.i.h.s16 %v2447_v3 }
 0x285   : > { %18103 = vmatprep.mubr.msk.bf16.mxu1 %vm18831_vm0, %v26932_v30  ;;  %v3303_v21 = vcombine.low %v3281_v35, %v3288_v58  ;;  %v2918_v0 = vunpack.i.h.s16 %v2449_v25  ;;  %v17901_v40 = vpack.i.b16 %v2448_v47, %v2908_v59  ;;  %v17902_v36 = vpack.i.b16 %v19570_v23, %v2910_v37 }
 0x286   : > { %v3304_v44 = vcombine.low %v3295_v19, %v3302_v27  ;;  %v17903_v2 = vpack.i.b16 %v19586_v50, %v2912_v24  ;;  %v17904_v16 = vpack.i.b16 %v2447_v3, %v2914_v48  ;;  %v17905_v51 = vpack.i.b16 %v2449_v25, %v2916_v6  ;;  %v26959_v48 = vld [vmem:[#allocation29_spill] sm:$0xff] }
 0x287   : > { %v3311_v29 = vrot.slane %v3303_v21, %v19159_v57  ;;  %v26950_v10 = vrot.slane %v26949_v53, %v19159_v57  ;;  %v3712_v22 = vcombine.low %v17901_v40, %v17902_v36  ;;  %v3715_v61 = vcombine.low %v26951_v32, %v19945_v31  ;;  %v26960_v21 = vld [vmem:[#allocation13_spill] sm:$0xff] }
 0x288   : > { %v3318_v63 = vrot.slane %v3304_v44, %v19159_v57  ;;  %v3713_v34 = vcombine.low %v17903_v2, %v17904_v16  ;;  %v1945_v23 = vcombine.high %v26945_v14, %v26945_v14  ;;  %v26952_v50 = vcombine.high %v19697_v60, %v19697_v60  ;;  %v26962_v2 = vld [vmem:[#allocation31_spill] sm:$0xff]  ;;  %v26963_v53 = vld [vmem:[#allocation33_spill] sm:$0xff] }
 0x289   : > { %v17906_v1 = vpack.i.b16 %v26950_v10, %v2918_v0  ;;  %v3722_v15 = vrot.slane %v3712_v22, %v19159_v57  ;;  %v3743_v62 = vrot.slane %v3715_v61, %v19159_v57  ;;  %v26954_v7 = vcombine.high %v26953_v45, %v26953_v45 }
 0x28a   : > { %v1997_v4 = vrot.slane %v26952_v50, %v19159_v57  ;;  %v3319_v14 = vcombine.low %v3311_v29, %v3318_v63  ;;  %v3729_v56 = vrot.slane %v3713_v34, %v19159_v57  ;;  %v2780_v60 = vunpack.i.h.s16 %v19907_v13 }
 0x28b   : > { %v3714_v43 = vcombine.low %v17905_v51, %v17906_v1  ;;  %v19982_v18 = vrot.slane %v26954_v7, %v19159_v57  ;;  %v2782_v8 = vunpack.i.h.s16 %v1945_v23  ;;  %v26957_v35 = vrot.slane %v26956_v26, %v19159_v57  ;;  %v20018_v51 = vld [vmem:[%s26477_s6] sm:$0xff] }
 0x28c   : > { %v3321_v3 = vcombine.low %v19725_v17, %v1997_v4  ;;  %v17927_v46 = vcombine.high %v19725_v17, %v1997_v4  ;;  %18068 = vmatmul.mubr.msk.bf16.gmra.mxu0 %vm728_vm1, %v3319_v14  ;;  %v3744_v25 = vcombine.low %v3722_v15, %v3729_v56  ;;  %v17869_v52 = vpack.i.b16 %v1945_v23, %v2780_v60  ;;  %v26964_v60 = vld [vmem:[#allocation24_spill] sm:$0xff] }
 0x28d   : > { %v3736_v33 = vrot.slane %v3714_v43, %v19159_v57  ;;  %v3323_v47 = vcombine.low %v26955_v20, %v19982_v18  ;;  %v17870_v12 = vpack.i.b16 %v26957_v35, %v2782_v8  ;;  %v26958_v13 = vcombine.high %v19576_v49, %v19576_v49  ;;  %18071 = vmatprep.mubr.msk.bf16.mxu0 %vm18831_vm0, %v26932_v30 }
 0x28e   : > { %v3337_v17 = vrot.slane %v3321_v3, %v19159_v57  ;;  %v3344_v59 = vrot.slane %v17927_v46, %v19159_v57  ;;  %v3752_v27 = vrot.slane %v3744_v25, %v19159_v57  ;;  %v2938_v6 = vunpack.i.h.s16 %v26959_v48 }
 0x28f   : > { %v2508_v58 = vrot.slane %v26958_v13, %v19159_v57  ;;  %v3745_v19 = vcombine.low %v3736_v33, %v3743_v62  ;;  %v3351_v37 = vrot.slane %v3323_v47, %v19159_v57  ;;  %v3320_v24 = vcombine.low %v17869_v52, %v17870_v12  ;;  %v26965_v47 = vld [vmem:[#allocation8_spill] sm:$0xff] }
 0x290   : > { %v26961_v49 = vrot.slane %v26960_v21, %v19159_v57  ;;  %v17931_v44 = vcombine.high %v26951_v32, %v19945_v31  ;;  %v17908_v10 = vpack.i.b16 %v26963_v53, %v2938_v6  ;;  %v20025_v22 = vstv %s17262_s20  ;;  %v26968_v6 = vld [vmem:[#allocation32_spill] sm:$0xff] }
 0x291   : > { %v3759_v40 = vrot.slane %v3745_v19, %v19159_v57  ;;  %v3353_v36 = vcombine.low %v3344_v59, %v3351_v37  ;;  %v3762_v16 = vcombine.low %v26962_v2, %v2508_v58  ;;  %v3330_v29 = vrot.slane %v3320_v24, %v19159_v57 }
 0x292   : > { %v17907_v0 = vpack.i.b16 %v26959_v48, %v26961_v49  ;;  %v17932_v1 = vcombine.high %v26962_v2, %v2508_v58  ;;  %v3771_v31 = vrot.slane %v17931_v44, %v19159_v57  ;;  %v17269_v4 = vmul.f32 %v20025_v22, %v20018_v51 }
 0x293   : > { %v3760_v61 = vcombine.low %v3752_v27, %v3759_v40  ;;  %v3367_v63 = vrot.slane %v3353_v36, %v19159_v57  ;;  %v3778_v32 = vrot.slane %v3762_v16, %v19159_v57  ;;  %v3352_v34 = vcombine.low %v3330_v29, %v3337_v17  ;;  %v26967_v17 = vld [vmem:[#allocation27_spill] sm:$0xff]  ;;  %v26969_v36 = vld [vmem:[#allocation36_spill] sm:$0xff] }
 0x294   : > { %v3764_v23 = vcombine.low %v17907_v0, %v17908_v10  ;;  %v3785_v50 = vrot.slane %v17932_v1, %v19159_v57  ;;  %v2068_v15 = vcombine.high %v19731_v39, %v19731_v39  ;;  %v2070_v62 = vcombine.high %v19743_v55, %v19743_v55  ;;  %17275 = vrot.lane.b32.xlu0 %v17269_v4, %s18833_s23  ;;  %v20086_v4 = vld [vmem:[%s26477_s6 + $0x10] sm:$0x1] }
 0x295   : > { %18104 = vmatmul.mubr.msk.bf16.gmra.mxu1 %vm728_vm1, %v3760_v61  ;;  %v3793_v43 = vcombine.low %v3771_v31, %v3778_v32  ;;  %v2802_v45 = vunpack.i.h.s16 %v19731_v39  ;;  %v3360_v7 = vrot.slane %v3352_v34, %v19159_v57  ;;  %v2804_v56 = vunpack.i.h.s16 %v19743_v55 }
 0x296   : > { %18107 = vmatprep.mubr.msk.bf16.mxu1 %vm18831_vm0, %v26932_v30  ;;  %v3792_v14 = vrot.slane %v3764_v23, %v19159_v57  ;;  %v2810_v8 = vunpack.i.h.s16 %v26964_v60  ;;  %v2806_v3 = vunpack.i.h.s16 %v2068_v15  ;;  %v2808_v46 = vunpack.i.h.s16 %v2070_v62 }
 0x297   : > { %v3801_v33 = vrot.slane %v3793_v43, %v19159_v57  ;;  %v26966_v25 = vrot.slane %v26965_v47, %v19159_v57  ;;  %v3368_v26 = vcombine.low %v3360_v7, %v3367_v63  ;;  %v17872_v12 = vpack.i.b16 %v19743_v55, %v2802_v45 }
 0x298   : > { %v3794_v35 = vcombine.low %v3785_v50, %v3792_v14  ;;  %v17873_v13 = vpack.i.b16 %v2068_v15, %v2804_v56  ;;  %v17874_v58 = vpack.i.b16 %v2070_v62, %v2806_v3  ;;  %v17875_v19 = vpack.i.b16 %v26964_v60, %v2808_v46  ;;  %v20081_v50 = vld [vmem:[%s26477_s6 + $0x8] sm:$0xff]  ;;  %v26970_v56 = vld [vmem:[#allocation15_spill] sm:$0xff] }
 0x299   : > { %v17871_v52 = vpack.i.b16 %v19731_v39, %v26966_v25  ;;  %v17876_v59 = vpack.i.b16 %v26967_v17, %v2810_v8  ;;  %v17928_v37 = vcombine.high %v26955_v20, %v19982_v18  ;;  %18072 = vmatmul.mubr.msk.bf16.gmra.mxu0 %vm728_vm1, %v3368_v26  ;;  %v2572_v39 = vcombine.high %v26959_v48, %v26959_v48 }
 0x29a   : > { %v3808_v27 = vrot.slane %v3794_v35, %v19159_v57  ;;  %v2573_v55 = vcombine.high %v26968_v6, %v26968_v6  ;;  %18075 = vmatprep.mubr.msk.bf16.mxu0 %vm18831_vm0, %v26932_v30  ;;  %v3371_v21 = vcombine.low %v17873_v13, %v17874_v58  ;;  %v2574_v18 = vcombine.high %v26963_v53, %v26963_v53 }
 0x29b   : > { %v3370_v24 = vcombine.low %v17871_v52, %v17872_v12  ;;  %v3372_v49 = vcombine.low %v17875_v19, %v17876_v59  ;;  %v3379_v0 = vrot.slane %v17928_v37, %v19159_v57  ;;  %v2575_v44 = vcombine.high %v26969_v36, %v26969_v36  ;;  %v26972_v12 = vld [vmem:[#allocation35_spill] sm:$0xff] }
 0x29c   : > { %v3809_v20 = vcombine.low %v3801_v33, %v3808_v27  ;;  %v2940_v48 = vunpack.i.h.s16 %v26963_v53  ;;  %v3393_v2 = vrot.slane %v3371_v21, %v19159_v57  ;;  %v2942_v29 = vunpack.i.h.s16 %v2572_v39 }
 0x29d   : > { %v3386_v40 = vrot.slane %v3370_v24, %v19159_v57  ;;  %v3400_v16 = vrot.slane %v3372_v49, %v19159_v57  ;;  %v2944_v10 = vunpack.i.h.s16 %v2574_v18  ;;  %v2946_v61 = vunpack.i.h.s16 %v26968_v6 }
 0x29e   : > { %18108 = vmatmul.mubr.msk.bf16.gmra.mxu1 %vm728_vm1, %v3809_v20  ;;  %v2948_v63 = vunpack.i.h.s16 %v26969_v36  ;;  %v2950_v31 = vunpack.i.h.s16 %v2573_v55  ;;  %v2952_v34 = vunpack.i.h.s16 %v2575_v44  ;;  %v17909_v53 = vpack.i.b16 %v2572_v39, %v2940_v48  ;;  %v26974_v20 = vld [vmem:[#allocation30_spill] sm:$0xff] }
 0x29f   : > { %v3401_v1 = vcombine.low %v3379_v0, %v3386_v40  ;;  %18111 = vmatprep.mubr.msk.bf16.mxu1 %vm18831_vm0, %v26932_v30  ;;  %v3402_v32 = vcombine.low %v3393_v2, %v3400_v16  ;;  %v17910_v23 = vpack.i.b16 %v2574_v18, %v2942_v29  ;;  %v17911_v15 = vpack.i.b16 %v26968_v6, %v2944_v10  ;;  %v26976_v48 = vld [vmem:[#allocation10_spill] sm:$0xff]  ;;  %v26978_v29 = vld [vmem:[#allocation25_spill] sm:$0xff] }
 0x2a0   : > { %v17912_v62 = vpack.i.b16 %v26969_v36, %v2946_v61  ;;  %v17913_v45 = vpack.i.b16 %v2573_v55, %v2948_v63  ;;  %v17914_v14 = vpack.i.b16 %v2575_v44, %v2950_v31  ;;  %v26971_v8 = vrot.slane %v26970_v56, %v19159_v57 }
 0x2a1   : > { %v3409_v43 = vrot.slane %v3401_v1, %v19159_v57  ;;  %v3416_v7 = vrot.slane %v3402_v32, %v19159_v57  ;;  %v3810_v3 = vcombine.low %v17909_v53, %v17910_v23  ;;  %v17270_v47 = vmul.f32 %v20025_v22, %v20081_v50  ;;  %v26979_v1 = vld [vmem:[#allocation34_spill] sm:$0xff] }
 0x2a2   : > { %v17915_v33 = vpack.i.b16 %v26971_v8, %v2952_v34  ;;  %v3811_v46 = vcombine.low %v17911_v15, %v17912_v62  ;;  %v17271_v25 = vmul.f32 %v20025_v22, %v20086_v4  ;;  %v2069_v52 = vcombine.high %v26964_v60, %v26964_v60  ;;  %v26981_v15 = vld [vmem:[#allocation37_spill] sm:$0xff]  ;;  %v26982_v8 = vld [vmem:[#allocation16_spill] sm:$0xff] }
 0x2a3   : > { %v3417_v26 = vcombine.low %v3409_v43, %v3416_v7  ;;  %v3812_v35 = vcombine.low %v17913_v45, %v17914_v14  ;;  %v3820_v58 = vrot.slane %v3810_v3, %v19159_v57  ;;  %17277 = vrot.lane.b32.xlu1 %v17270_v47, %s18833_s23  ;;  %v2071_v59 = vcombine.high %v26967_v17, %v26967_v17 }
 0x2a4   : > { %v3813_v13 = vcombine.low %v17915_v33, %v26972_v12  ;;  %v3827_v19 = vrot.slane %v3811_v46, %v19159_v57  ;;  %17279 = vrot.lane.b32.xlu0 %v17271_v25, %s18833_s23  ;;  %v26973_v22 = vcombine.high %v19701_v9, %v19701_v9  ;;  %v2812_v37 = vunpack.i.h.s16 %v26967_v17 }
 0x2a5   : > { %18076 = vmatmul.mubr.msk.bf16.gmra.mxu0 %vm728_vm1, %v3417_v26  ;;  %v3834_v27 = vrot.slane %v3812_v35, %v19159_v57  ;;  %v2131_v39 = vcombine.high %v19737_v54, %v19737_v54  ;;  %v2814_v6 = vunpack.i.h.s16 %v2069_v52  ;;  %v2816_v49 = vunpack.i.h.s16 %v2071_v59  ;;  %v26984_v35 = vld [vmem:[#allocation19_spill] sm:$0xff] }
 0x2a6   : > { %v2123_v60 = vrot.slane %v26973_v22, %v19159_v57  ;;  %v3841_v24 = vrot.slane %v3813_v13, %v19159_v57  ;;  %v3842_v55 = vcombine.low %v3820_v58, %v3827_v19  ;;  %18079 = vmatprep.mubr.msk.bf16.mxu0 %vm18831_vm0, %v26932_v30  ;;  %v17877_v9 = vpack.i.b16 %v2069_v52, %v2812_v37 }
 0x2a7   : > { %v17878_v18 = vpack.i.b16 %v2071_v59, %v2814_v6  ;;  %v26975_v40 = vcombine.high %v26974_v20, %v26974_v20  ;;  %v26977_v2 = vrot.slane %v26976_v48, %v19159_v57  ;;  %v26980_v61 = vcombine.high %v26979_v1, %v26979_v1 }
 0x2a8   : > { %v2133_v21 = vcombine.high %v2123_v60, %v2123_v60  ;;  %v3843_v0 = vcombine.low %v3834_v27, %v3841_v24  ;;  %v3420_v17 = vcombine.low %v2123_v60, %v2131_v39  ;;  %v3850_v44 = vrot.slane %v3842_v55, %v19159_v57 }
 0x2a9   : > { %v2627_v36 = vrot.slane %v26975_v40, %v19159_v57  ;;  %v17879_v16 = vpack.i.b16 %v26977_v2, %v2816_v49  ;;  %v2634_v63 = vrot.slane %v26980_v61, %v19159_v57  ;;  %v3418_v32 = vcombine.low %v17877_v9, %v17878_v18  ;;  %v26988_v61 = vld [vmem:[#allocation26_spill] sm:$0xff] }
 0x2aa   : > { %v3421_v10 = vcombine.low %v2133_v21, %v26978_v29  ;;  %v3857_v31 = vrot.slane %v3843_v0, %v19159_v57  ;;  %v3442_v34 = vrot.slane %v3420_v17, %v19159_v57  ;;  %v2635_v53 = vcombine.high %v26972_v12, %v26972_v12  ;;  %v26986_v17 = vld [vmem:[#allocation11_spill] sm:$0xff] }
 0x2ab   : > { %v3419_v23 = vcombine.low %v17879_v16, %v19737_v54  ;;  %v2636_v62 = vcombine.high %v26981_v15, %v26981_v15  ;;  %v2637_v45 = vcombine.high %v2627_v36, %v2627_v36  ;;  %v3428_v14 = vrot.slane %v3418_v32, %v19159_v57 }
 0x2ac   : > { %v3449_v43 = vrot.slane %v3421_v10, %v19159_v57  ;;  %v3858_v7 = vcombine.low %v3850_v44, %v3857_v31  ;;  %v2638_v56 = vcombine.high %v2634_v63, %v2634_v63  ;;  %v26983_v33 = vrot.slane %v26982_v8, %v19159_v57 }
 0x2ad   : > { %v3435_v46 = vrot.slane %v3419_v23, %v19159_v57  ;;  %v3859_v25 = vcombine.low %v2627_v36, %v2635_v53  ;;  %v3860_v54 = vcombine.low %v2637_v45, %v26981_v15  ;;  %v3861_v52 = vcombine.low %v2634_v63, %v2636_v62 }
 0x2ae   : > { %v17916_v3 = vpack.i.b16 %v19637_v28, %v26983_v33  ;;  %v3451_v47 = vcombine.low %v3442_v34, %v3449_v43  ;;  %18112 = vmatmul.mubr.msk.bf16.gmra.mxu1 %vm728_vm1, %v3858_v7  ;;  %v26985_v12 = vcombine.high %v26984_v35, %v26984_v35  ;;  %v2132_v58 = vcombine.high %v26978_v29, %v26978_v29 }
 0x2af   : > { %18115 = vmatprep.mubr.msk.bf16.mxu1 %vm18831_vm0, %v26932_v30  ;;  %v3450_v19 = vcombine.low %v3428_v14, %v3435_v46  ;;  %v3869_v22 = vrot.slane %v3859_v25, %v19159_v57  ;;  %v3876_v60 = vrot.slane %v3860_v54, %v19159_v57  ;;  %v3883_v37 = vrot.slane %v3861_v52, %v19159_v57 }
 0x2b0   : > { %v3862_v26 = vcombine.low %v2638_v56, %v17916_v3  ;;  %v2130_v13 = vrot.slane %v26985_v12, %v19159_v57  ;;  %v3465_v59 = vrot.slane %v3451_v47, %v19159_v57  ;;  %v2194_v39 = vcombine.high %v19740_v41, %v19740_v41 }
 0x2b1   : > { %v3458_v6 = vrot.slane %v3450_v19, %v19159_v57  ;;  %v3891_v55 = vcombine.low %v3869_v22, %v3876_v60  ;;  %v2196_v21 = vcombine.high %v19747_v11, %v19747_v11  ;;  %v2836_v49 = vunpack.i.h.s16 %v19740_v41 }
 0x2b2   : > { %v3890_v27 = vrot.slane %v3862_v26, %v19159_v57  ;;  %v2134_v24 = vcombine.high %v2130_v13, %v2130_v13  ;;  %v2838_v0 = vunpack.i.h.s16 %v19747_v11  ;;  %v2840_v18 = vunpack.i.h.s16 %v2194_v39 }
 0x2b3   : > { %v26987_v20 = vrot.slane %v26986_v17, %v19159_v57  ;;  %v3466_v36 = vcombine.low %v3458_v6, %v3465_v59  ;;  %v3899_v44 = vrot.slane %v3891_v55, %v19159_v57  ;;  %v2842_v48 = vunpack.i.h.s16 %v2196_v21 }
 0x2b4   : > { %v3892_v9 = vcombine.low %v3883_v37, %v3890_v27  ;;  %v17881_v2 = vpack.i.b16 %v19747_v11, %v2836_v49  ;;  %v17882_v29 = vpack.i.b16 %v2194_v39, %v2838_v0  ;;  %v17883_v10 = vpack.i.b16 %v2196_v21, %v2840_v18 }
 0x2b5   : > { %v17880_v40 = vpack.i.b16 %v19740_v41, %v26987_v20  ;;  %v3467_v1 = vcombine.low %v2130_v13, %v2132_v58  ;;  %18080 = vmatmul.mubr.msk.bf16.gmra.mxu0 %vm728_vm1, %v3466_v36  ;;  %v17884_v63 = vpack.i.b16 %v26988_v61, %v2842_v48  ;;  %v2698_v32 = vcombine.high %v19637_v28, %v19637_v28 }
 0x2b6   : > { %v3906_v16 = vrot.slane %v3892_v9, %v19159_v57  ;;  %v2699_v41 = vcombine.high %v19650_v42, %v19650_v42  ;;  %18083 = vmatprep.mubr.msk.bf16.mxu0 %vm18831_vm0, %v26932_v30  ;;  %v3469_v11 = vcombine.low %v17881_v2, %v17882_v29  ;;  %v2700_v23 = vcombine.high %v19653_v38, %v19653_v38 }
 0x2b7   : > { %v3468_v31 = vcombine.low %v2134_v24, %v17880_v40  ;;  %v3477_v53 = vrot.slane %v3467_v1, %v19159_v57  ;;  %v3470_v43 = vcombine.low %v17883_v10, %v17884_v63  ;;  %v2701_v62 = vcombine.high %v19659_v5, %v19659_v5  ;;  %v6157_v40 = vld [vmem:[%s379_s9] sm:$0xff] }
 0x2b8   : > { %v3907_v34 = vcombine.low %v3899_v44, %v3906_v16  ;;  %v2972_v45 = vunpack.i.h.s16 %v19637_v28  ;;  %v3491_v7 = vrot.slane %v3469_v11, %v19159_v57  ;;  %v2974_v14 = vunpack.i.h.s16 %v19653_v38  ;;  %v26989_v28 = vld [vmem:[#allocation17_spill] sm:$0xff]  ;;  %v20220_v44 = vld [vmem:[%s379_s9 + $0x8] sm:$0xff] }
 0x2b9   : > { %v3484_v15 = vrot.slane %v3468_v31, %v19159_v57  ;;  %v2976_v56 = vunpack.i.h.s16 %v2698_v32  ;;  %v2978_v8 = vunpack.i.h.s16 %v2700_v23  ;;  %v3498_v33 = vrot.slane %v3470_v43, %v19159_v57  ;;  %26990 = vst [vmem:[#allocation20_spill] sm:$0xff] %v20220_v44  ;;  %v26993_v1 = vld [vmem:[#allocation5_spill] sm:$0xff] }
 0x2ba   : > { %18116 = vmatmul.mubr.msk.bf16.gmra.mxu1 %vm728_vm1, %v3907_v34  ;;  %v2980_v46 = vunpack.i.h.s16 %v19650_v42  ;;  %v2982_v47 = vunpack.i.h.s16 %v19659_v5  ;;  %v2715_v25 = vrot.slane %v26989_v28, %v19159_v57  ;;  %v2984_v54 = vunpack.i.h.s16 %v2699_v41 }
 0x2bb   : > { %18119 = vmatprep.mubr.msk.bf16.mxu1 %vm18831_vm0, %v26932_v30  ;;  %v3499_v3 = vcombine.low %v3477_v53, %v3484_v15  ;;  %v2986_v52 = vunpack.i.h.s16 %v2701_v62  ;;  %v17918_v26 = vpack.i.b16 %v2698_v32, %v2974_v14  ;;  %v3500_v35 = vcombine.low %v3491_v7, %v3498_v33 }
 0x2bc   : > { %v17917_v12 = vpack.i.b16 %v19653_v38, %v2972_v45  ;;  %v17919_v13 = vpack.i.b16 %v2700_v23, %v2976_v56  ;;  %v17920_v58 = vpack.i.b16 %v19650_v42, %v2978_v8  ;;  %v17921_v19 = vpack.i.b16 %v19659_v5, %v2980_v46 }
 0x2bd   : > { %v17922_v59 = vpack.i.b16 %v2699_v41, %v2982_v47  ;;  %v17923_v22 = vpack.i.b16 %v2701_v62, %v2984_v54  ;;  %v17924_v60 = vpack.i.b16 %v2715_v25, %v2986_v52  ;;  %v3507_v37 = vrot.slane %v3499_v3, %v19159_v57 }
 0x2be   : > { %v3514_v27 = vrot.slane %v3500_v35, %v19159_v57  ;;  %v3908_v24 = vcombine.low %v17917_v12, %v17918_v26  ;;  %v3909_v39 = vcombine.low %v17919_v13, %v17920_v58  ;;  %v6165_v36 = vcombine.high %v6157_v40, %v6157_v40 }
 0x2bf   : > { %v3910_v6 = vcombine.low %v17921_v19, %v17922_v59  ;;  %v3911_v55 = vcombine.low %v17923_v22, %v17924_v60  ;;  %v20227_v2 = vrot.slane %v20220_v44, %v19159_v57  ;;  %v20238_v10 = vrot.slane %v6157_v40, %v19159_v57 }
 0x2c0   : > { %v3515_v21 = vcombine.low %v3507_v37, %v3514_v27  ;;  %v3918_v38 = vrot.slane %v3908_v24, %v19159_v57  ;;  %v3925_v42 = vrot.slane %v3909_v39, %v19159_v57  ;;  %v20223_v48 = vrot.slane %v6165_v36, %v19159_v57 }
 0x2c1   : > { %v3932_v5 = vrot.slane %v3910_v6, %v19159_v57  ;;  %v3939_v49 = vrot.slane %v3911_v55, %v19159_v57  ;;  %v20235_v29 = vrot.slane %v20227_v2, %v19159_v57  ;;  %v20241_v61 = vsub.s32 0, %v26993_v1 }
 0x2c2   : > { %18084 = vmatmul.mubr.msk.bf16.gmra.mxu0 %vm728_vm1, %v3515_v21  ;;  %v3940_v9 = vcombine.low %v3918_v38, %v3925_v42  ;;  %26991 = vst [vmem:[#allocation6_spill] sm:$0xff] %v20223_v48  ;;  %v6181_v16 = vcombine.high %v20223_v48, %v20223_v48  ;;  %v17264_v31 = vstv %s17263_s14  ;;  %v20252_v41 = vrot.slane %v20238_v10, %v19159_v57 }
 0x2c3   : > { %v3941_v0 = vcombine.low %v3932_v5, %v3939_v49  ;;  %26992 = vst [vmem:[#allocation12_spill] sm:$0xff] %v20235_v29  ;;  %26994 = vst [vmem:[#allocation21_spill] sm:$0xff] %v20241_v61  ;;  %v20248_v32 = vrot.slane %v20235_v29, %v20241_v61  ;;  %v17265_v34 = vmul.f32 %v17264_v31, %v20018_v51  ;;  %v20264_v15 = vadd.s32 8, %v26993_v1 }
 0x2c4   : > { %v3948_v18 = vrot.slane %v3940_v9, %v19159_v57  ;;  %v20244_v63 = vrot.slane %v6181_v16, %v19159_v57  ;;  %26996 = vst [vmem:[#allocation7_spill] sm:$0xff] %v20252_v41  ;;  %v20261_v53 = vrot.slane %v20252_v41, %v20241_v61  ;;  %v20277_v7 = vadd.s32 16, %v26993_v1 }
 0x2c5   : > { %v3955_v17 = vrot.slane %v3941_v0, %v19159_v57  ;;  %26997 = vst [vmem:[#allocation14_spill] sm:$0xff] %v20264_v15  ;;  %vm6352_vm5 = vcmp.eq.s32.totalorder %v20264_v15, %v20248_v32  ;;  %v17266_v46 = vmul.f32 %v17264_v31, %v20081_v50  ;;  %v17267_v47 = vmul.f32 %v17264_v31, %v20086_v4 }
 0x2c6   : > { %26995 = vst [vmem:[#allocation23_spill] sm:$0xff] %v20244_v63  ;;  %v6213_v11 = vcombine.high %v20244_v63, %v20244_v63  ;;  %vm6327_vm3 = vcmp.eq.s32.totalorder %v26993_v1, %v20261_v53  ;;  %27000 = vst [vmem:[#allocation22_spill] sm:$0xff] %v20277_v7  ;;  %v20301_v25 = vsel %vm6352_vm5, 1.0, %v26932_v30  ;;  %vm6328_vm7 = vcmp.eq.s32.totalorder %v20264_v15, %v20261_v53 }
 0x2c7   : > { %v3956_v20 = vcombine.low %v3948_v18, %v3955_v17  ;;  %v20282_v14 = vsel %vm6327_vm3, 1.0, %v26932_v30  ;;  %27003 = vst [vmem:[#allocation13_spill] sm:$0xff] %v20301_v25  ;;  %v13561_v22 = vcombine.high %v20301_v25, %v20301_v25  ;;  %v20324_v60 = vsel %vm6328_vm7, 1.0, %v26932_v30 }
 0x2c8   : > { %v20267_v62 = vrot.slane %v6213_v11, %v20241_v61  ;;  %27001 = vst [vmem:[#allocation9_spill] sm:$0xff] %v20282_v14  ;;  %v12616_v3 = vcombine.high %v20282_v14, %v20282_v14  ;;  %v12623_v35 = vrot.slane %v20282_v14, %v19159_v57  ;;  %27005 = vst [vmem:[#allocation33_spill] sm:$0xff] %v20324_v60 }
 0x2c9   : > { %18120 = vmatmul.mubr.msk.bf16.gmra.mxu1 %vm728_vm1, %v3956_v20  ;;  %vm6351_vm1 = vcmp.eq.s32.totalorder %v26993_v1, %v20248_v32  ;;  %v12665_v49 = vcombine.high %v20324_v60, %v20324_v60  ;;  %v13568_v0 = vrot.slane %v20301_v25, %v19159_v57  ;;  %v13575_v18 = vrot.slane %v13561_v22, %v19159_v57 }
 0x2ca   : > { %26998 = vst [vmem:[#allocation28_spill] sm:$0xff] %v20267_v62  ;;  %v20270_v51 = vsel %vm6351_vm1, 1.0, %v26932_v30  ;;  %vm6349_vm4 = vcmp.eq.s32.totalorder %v20264_v15, %v20267_v62  ;;  %vm6350_vm6 = vcmp.eq.s32.totalorder %v20277_v7, %v20267_v62  ;;  %v12630_v12 = vrot.slane %v12616_v3, %v19159_v57 }
 0x2cb   : > { %26999 = vst [vmem:[#allocation18_spill] sm:$0xff] %v20270_v51  ;;  %v13512_v45 = vcombine.high %v20270_v51, %v20270_v51  ;;  %v20285_v56 = vsel %vm6349_vm4, 1.0, %v26932_v30  ;;  %v13519_v8 = vrot.slane %v20270_v51, %v19159_v57  ;;  %v20306_v54 = vsel %vm6350_vm6, 1.0, %v26932_v30 }
 0x2cc   : > { %27002 = vst [vmem:[#allocation29_spill] sm:$0xff] %v20285_v56  ;;  %v13449_v28 = vcombine.high %v20285_v56, %v20285_v56  ;;  %27004 = vst [vmem:[#allocation31_spill] sm:$0xff] %v20306_v54  ;;  %v13456_v50 = vrot.slane %v20285_v56, %v19159_v57  ;;  %v13504_v39 = vrot.slane %v20306_v54, %v19159_v57 }
 0x2cd   : > { %v13526_v33 = vrot.slane %v13512_v45, %v19159_v57  ;;  %v13527_v52 = vcombine.high %v13519_v8, %v13519_v8  ;;  %v20316_v19 = vrot.slane %v13519_v8, %v19159_v57  ;;  %v12631_v21 = vcombine.high %v12623_v35, %v12623_v35 }
 0x2ce   : > { %v13463_v24 = vrot.slane %v13449_v28, %v19159_v57  ;;  %v20336_v38 = vrot.slane %v12623_v35, %v19159_v57  ;;  %v13464_v42 = vcombine.high %v13456_v50, %v13456_v50  ;;  %v12632_v5 = vcombine.high %v12630_v12, %v12630_v12 }
 0x2cf   : > { %v13528_v26 = vcombine.high %v13526_v33, %v13526_v33  ;;  %v20319_v59 = vrot.slane %v13526_v33, %v19159_v57  ;;  %v20330_v6 = vrot.slane %v13527_v52, %v19159_v57  ;;  %v6229_v17 = vcombine.high %v20227_v2, %v20227_v2 }
 0x2d0   : > { %v13465_v20 = vcombine.high %v13463_v24, %v13463_v24  ;;  %v20348_v40 = vrot.slane %v13456_v50, %v19159_v57  ;;  %v20351_v36 = vrot.slane %v13504_v39, %v19159_v57  ;;  %v20361_v11 = vrot.slane %v12631_v21, %v19159_v57 }
 0x2d1   : > { %v20333_v55 = vrot.slane %v13528_v26, %v19159_v57  ;;  %v12672_v2 = vrot.slane %v20324_v60, %v19159_v57  ;;  %v20372_v45 = vrot.slane %v12632_v5, %v19159_v57  ;;  %v12679_v8 = vrot.slane %v12665_v49, %v19159_v57 }
 0x2d2   : > { %27006 = vst [vmem:[#allocation24_spill] sm:$0xff] %v20348_v40  ;;  %v13576_v3 = vcombine.high %v13568_v0, %v13568_v0  ;;  %v20381_v28 = vrot.slane %v13465_v20, %v19159_v57  ;;  %v13494_v52 = vcombine.high %v20348_v40, %v20348_v40  ;;  %v20388_v35 = vrot.slane %v13568_v0, %v19159_v57 }
 0x2d3   : > { %v20410_v5 = vrot.slane %v12672_v2, %v19159_v57  ;;  %vm6353_vm8 = vcmp.eq.s32.totalorder %v20277_v7, %v20248_v32  ;;  %vm6329_vm11 = vcmp.eq.s32.totalorder %v20277_v7, %v20261_v53 }
 0x2d4   : > { %v20404_v21 = vrot.slane %v13576_v3, %v19159_v57 }
 0x306   : > { %v17276_v23 = vpop.permute.xlu0 %17275 }
 0x307   : > { %v17284_v43 = vadd.f32 %v17276_v23, %v17265_v34  ;;  %v20358_v34 = vrot.slane %v12630_v12, %v19159_v57  ;;  %v20366_v23 = vrot.slane %v13463_v24, %v19159_v57  ;;  %v12681_v24 = vcombine.high %v12679_v8, %v12679_v8 }
 0x309   : > { %17289 = vperm.xlu1 %18177, %v17284_v43   ;;  %v20369_v43 = vrot.slane %v13464_v42, %v19159_v57  ;;  %v13495_v22 = vcombine.high %v20366_v23, %v20366_v23 }
 0x315   : > { %v17278_v13 = vpop.permute.xlu1 %17277 }
 0x316   : > { %v17280_v58 = vpop.permute.xlu0 %17279  ;;  %v17285_v37 = vadd.f32 %v17278_v13, %v17266_v46  ;;  %v13577_v46 = vcombine.high %v13575_v18, %v13575_v18  ;;  %v20395_v13 = vrot.slane %v13575_v18, %v19159_v57 }
 0x317   : > { %v17286_v27 = vadd.f32 %v17280_v58, %v17267_v47  ;;  %v20378_v47 = vrot.slane %v6229_v17, %v19159_v57  ;;  %v12680_v58 = vcombine.high %v12672_v2, %v12672_v2  ;;  %v13497_v17 = vcombine.high %v20381_v28, %v20381_v28 }
 0x318   : > { %17294 = vperm.xlu0 %18178, %v17285_v37   ;;  %v13496_v37 = vcombine.high %v20369_v43, %v20369_v43  ;;  %v20407_v42 = vrot.slane %v13577_v46, %v19159_v57  ;;  %v20424_v2 = vrot.slane %v12679_v8, %v19159_v57 }
 0x319   : > { %17299 = vperm.xlu1 %18177, %v17286_v27   ;;  %27007 = vst [vmem:[#allocation8_spill] sm:$0xff] %v20378_v47  ;;  %v20414_v49 = vrot.slane %v20378_v47, %v20241_v61  ;;  %v20427_v4 = vrot.slane %v12680_v58, %v19159_v57 }
 0x31b   : > { %27008 = vst [vmem:[#allocation27_spill] sm:$0xff] %v20414_v49  ;;  %vm6354_vm9 = vcmp.eq.s32.totalorder %v26993_v1, %v20414_v49 }
 0x31d   : > { %v4114_v39 = vpop.f32.mrf.mxu1 }
 0x31e   : > { %v5003_v0 = vcombine.high %v4114_v39, %v4114_v39  ;;  %v5010_v18 = vrot.slane %v4114_v39, %v19159_v57 }
 0x31f   : > { %v18089_v3 = vpop.f32.mrf.mxu1 }
 0x320   : > { %v5017_v39 = vrot.slane %v5003_v0, %v19159_v57  ;;  %v5018_v27 = vcombine.high %v5010_v18, %v5010_v18  ;;  %v20433_v50 = vrot.slane %v5010_v18, %v19159_v57  ;;  %v20436_v3 = vrot.slane %v12681_v24, %v19159_v57 }
 0x321   : > { %v4117_v20 = vpop.f32.mrf.mxu1  ;;  %v20438_v46 = vpop.f32.mrf.mxu0 }
 0x322   : > { %27009 = vst [vmem:[#allocation32_spill] sm:$0xff] %v20433_v50  ;;  %v5019_v0 = vcombine.high %v5017_v39, %v5017_v39  ;;  %v20449_v18 = vrot.slane %v5017_v39, %v19159_v57  ;;  %v20452_v24 = vrot.slane %v5018_v27, %v19159_v57  ;;  %v20456_v12 = vcombine.high %v20433_v50, %v20433_v50 }
 0x323   : > { %v5052_v8 = vcombine.high %v4117_v20, %v4117_v20  ;;  %v18090_v33 = vpop.f32.mrf.mxu1  ;;  %v18057_v58 = vpop.f32.mrf.mxu0  ;;  %v20466_v39 = vsel %vm6353_vm8, 1.0, %v26932_v30  ;;  %v5059_v16 = vrot.slane %v4117_v20, %v19159_v57 }
 0x324   : > { %27010 = vst [vmem:[#allocation36_spill] sm:$0xff] %v20449_v18  ;;  %27011 = vst [vmem:[#allocation15_spill] sm:$0xff] %v20452_v24  ;;  %v20469_v27 = vrot.slane %v5019_v0, %v19159_v57  ;;  %v20473_v9 = vcombine.high %v20449_v18, %v20449_v18  ;;  %v20477_v33 = vcombine.high %v20452_v24, %v20452_v24  ;;  %v20490_v0 = vsel %vm6354_vm9, 1.0, %v26932_v30 }
 0x325   : > { %27012 = vst [vmem:[#allocation35_spill] sm:$0xff] %v20456_v12  ;;  %27013 = vst [vmem:[#allocation30_spill] sm:$0xff] %v20466_v39  ;;  %v14809_v26 = vmul.f32 %v13494_v52, %v20452_v24  ;;  %v14810_v32 = vmul.f32 %v13496_v37, %v20456_v12  ;;  %v20484_v31 = vpop.f32.mrf.mxu0  ;;  %v5066_v37 = vrot.slane %v5052_v8, %v19159_v57 }
 0x326   : > { %27014 = vst [vmem:[#allocation10_spill] sm:$0xff] %v20469_v27  ;;  %27015 = vst [vmem:[#allocation25_spill] sm:$0xff] %v20473_v9  ;;  %v20494_v25 = vcombine.high %v20469_v27, %v20469_v27  ;;  %v7306_v58 = vcombine.low %v20477_v33, %v20449_v18  ;;  %v7307_v52 = vcombine.low %v20469_v27, %v20473_v9 }
 0x327   : > { %27016 = vst [vmem:[#allocation34_spill] sm:$0xff] %v20477_v33  ;;  %27017 = vst [vmem:[#allocation37_spill] sm:$0xff] %v20490_v0  ;;  %v14811_v20 = vmul.f32 %v20366_v23, %v20477_v33  ;;  %v14812_v51 = vmul.f32 %v20381_v28, %v20449_v18  ;;  %v14813_v54 = vmul.f32 %v13495_v22, %v20469_v27  ;;  %v18058_v60 = vpop.f32.mrf.mxu0 }
 0x328   : > { %27018 = vst [vmem:[#allocation16_spill] sm:$0xff] %v20494_v25  ;;  %v14814_v56 = vmul.f32 %v13497_v17, %v20473_v9  ;;  %v7305_v14 = vcombine.low %v20452_v24, %v20456_v12  ;;  %v7328_v40 = vrot.slane %v7306_v58, %v19159_v57  ;;  %v7335_v62 = vrot.slane %v7307_v52, %v19159_v57  ;;  %v20511_v63 = vpop.f32.mrf.mxu1 }
 0x329   : > { %v16058_v8 = vcombine.low %v14809_v26, %v14810_v32  ;;  %v7359_v23 = vrot.slane %v20494_v25, %v19159_v57  ;;  %v16059_v28 = vcombine.low %v14811_v20, %v14812_v51  ;;  %v5067_v22 = vcombine.high %v5059_v16, %v5059_v16 }
 0x32a   : > { %v16060_v18 = vcombine.low %v14813_v54, %v14814_v56  ;;  %v7337_v27 = vcombine.low %v7328_v40, %v7335_v62  ;;  %v20517_v60 = vmul.f32 %v20369_v43, %v20433_v50  ;;  %v20521_v17 = vmul.f32 %v20351_v36, %v20494_v25  ;;  %v18093_v52 = vpop.f32.mrf.mxu1 }
 0x32b   : > { %v5068_v58 = vcombine.high %v5066_v37, %v5066_v37  ;;  %v16081_v26 = vrot.slane %v16059_v28, %v19159_v57  ;;  %v20526_v9 = vrot.slane %v5059_v16, %v19159_v57  ;;  %v20529_v51 = vrot.slane %v5066_v37, %v19159_v57 }
 0x32c   : > { %27019 = vst [vmem:[#allocation19_spill] sm:$0xff] %v20517_v60  ;;  %27020 = vst [vmem:[#allocation11_spill] sm:$0xff] %v20521_v17  ;;  %v16088_v32 = vrot.slane %v16060_v18, %v19159_v57  ;;  %v20532_v62 = vrot.slane %v7305_v14, %v19159_v57  ;;  %v20535_v56 = vrot.slane %v5067_v22, %v19159_v57  ;;  %v20542_v36 = vpop.f32.mrf.mxu1 }
 0x32d   : > { %v20538_v54 = vrot.slane %v5068_v58, %v19159_v57  ;;  %v4219_v40 = vcombine.high %v20438_v46, %v20438_v46  ;;  %v7366_v16 = vrot.slane %v7359_v23, %v19159_v57  ;;  %v20546_v43 = vrot.slane %v16058_v8, %v19159_v57 }
 0x32e   : > { %27021 = vst [vmem:[#allocation26_spill] sm:$0xff] %v20532_v62  ;;  %v20550_v14 = vcombine.high %v20526_v9, %v20526_v9  ;;  %v20554_v18 = vcombine.high %v20529_v51, %v20529_v51  ;;  %v20558_v37 = vcombine.high %v20535_v56, %v20535_v56  ;;  %v7367_v8 = vcombine.low %v20526_v9, %v20535_v56  ;;  %v18094_v28 = vpop.f32.mrf.mxu1 }
 0x32f   : > { %27022 = vst [vmem:[#allocation17_spill] sm:$0xff] %v20546_v43  ;;  %v20562_v20 = vcombine.high %v20538_v54, %v20538_v54  ;;  %v18015_v23 = vcombine.high %v20526_v9, %v20535_v56  ;;  %v20569_v22 = vrot.slane %v7337_v27, %v19159_v57  ;;  %v16090_v58 = vcombine.low %v16081_v26, %v16088_v32 }
 0x330   : > { %27023 = vst [vmem:[#allocation38_spill] sm:$0xff] %v20554_v18  ;;  %v14817_v33 = vmul.f32 %v20330_v6, %v20535_v56  ;;  %v7369_v12 = vcombine.low %v20529_v51, %v20538_v54  ;;  %v18016_v24 = vcombine.high %v20529_v51, %v20538_v54  ;;  %v14816_v25 = vmul.f32 %v20316_v19, %v20526_v9 }
 0x331   : > { %27024 = vst [vmem:[#allocation39_spill] sm:$0xff] %v20562_v20  ;;  %27025 = vst [vmem:[#allocation40_spill] sm:$0xff] %v20569_v22  ;;  %v27026_v27 = vcombine.high %v20330_v6, %v20330_v6  ;;  %v20585_v32 = vpop.f32.mrf.mxu0  ;;  %v7377_v28 = vrot.slane %v7367_v8, %v19159_v57  ;;  %v27027_v52 = vcombine.high %v20316_v19, %v20316_v19  ;;  %v20606_v50 = vsel %vm8314_vm10, %v7366_v16, -inf }
 0x332   : > { %v14820_v43 = vmul.f32 %v20319_v59, %v20529_v51  ;;  %v14821_v60 = vmul.f32 %v20333_v55, %v20538_v54  ;;  %v7384_v22 = vrot.slane %v18015_v23, %v19159_v57  ;;  %v27028_v6 = vcombine.high %v20319_v59, %v20319_v59  ;;  %27030 = vst [vmem:[#allocation41_spill] sm:$0xff] %v20606_v50 }
 0x333   : > { %v14819_v26 = vmul.f32 %v27026_v27, %v20558_v37  ;;  %v14818_v17 = vmul.f32 %v27027_v52, %v20550_v14  ;;  %v27029_v8 = vcombine.high %v20333_v55, %v20333_v55  ;;  %v16120_v19 = vcombine.low %v14816_v25, %v14817_v33  ;;  %v18061_v52 = vpop.f32.mrf.mxu0 }
 0x334   : > { %v14822_v27 = vmul.f32 %v27028_v6, %v20554_v18  ;;  %v16122_v44 = vcombine.low %v14820_v43, %v14821_v60  ;;  %v4226_v23 = vrot.slane %v20438_v46, %v19159_v57  ;;  %v20611_v47 = vrot.slane %v16090_v58, %v19159_v57 }
 0x335   : > { %v14823_v62 = vmul.f32 %v27029_v8, %v20562_v20  ;;  %v16121_v48 = vcombine.low %v14818_v17, %v14819_v26  ;;  %v20614_v59 = vrot.slane %v7369_v12, %v19159_v57  ;;  %v4233_v55 = vrot.slane %v4219_v40, %v19159_v57  ;;  %v20617_v8 = vpop.f32.mrf.mxu0 }
 0x336   : > { %27031 = vst [vmem:[#allocation42_spill] sm:$0xff] %v20611_v47  ;;  %27032 = vst [vmem:[#allocation43_spill] sm:$0xff] %v20617_v8  ;;  %v20620_v25 = vrot.slane %v18016_v24, %v19159_v57  ;;  %v4234_v60 = vcombine.high %v4226_v23, %v4226_v23  ;;  %v20624_v17 = vrot.slane %v4226_v23, %v19159_v57 }
 0x337   : > { %v16123_v6 = vcombine.low %v14822_v27, %v14823_v62  ;;  %v16137_v33 = vrot.slane %v16121_v48, %v19159_v57  ;;  %v7399_v46 = vcombine.low %v7377_v28, %v7384_v22  ;;  %v16130_v16 = vrot.slane %v16120_v19, %v19159_v57  ;;  %v18062_v40 = vpop.f32.mrf.mxu0 }
 0x338   : > { %27033 = vst [vmem:[#allocation44_spill] sm:$0xff] %v20624_v17  ;;  %v4235_v43 = vcombine.high %v4233_v55, %v4233_v55  ;;  %v20628_v12 = vrot.slane %v4233_v55, %v19159_v57  ;;  %v20633_v58 = vrot.slane %v16122_v44, %v19159_v57  ;;  %v20639_v48 = vrot.slane %v4234_v60, %v19159_v57 }
 0x339   : > { %v20630_v62 = vpop.f32.mrf.mxu1  ;;  %v20636_v24 = vrot.slane %v16123_v6, %v19159_v57  ;;  %v5101_v22 = vcombine.high %v20511_v63, %v20511_v63  ;;  %v16152_v26 = vcombine.low %v16130_v16, %v16137_v33  ;;  %v20648_v27 = vcombine.high %v20624_v17, %v20624_v17 }
 0x33a   : > { %27034 = vst [vmem:[#allocation45_spill] sm:$0xff] %v20628_v12  ;;  %27035 = vst [vmem:[#allocation46_spill] sm:$0xff] %v20630_v62  ;;  %v20644_v28 = vrot.slane %v4235_v43, %v19159_v57  ;;  %v14680_v44 = vmul.f32 %v20336_v38, %v20624_v17  ;;  %v20654_v52 = vcombine.high %v20628_v12, %v20628_v12 }
 0x33b   : > { %27036 = vst [vmem:[#allocation47_spill] sm:$0xff] %v20639_v48  ;;  %27038 = vst [vmem:[#allocation49_spill] sm:$0xff] %v20648_v27  ;;  %v18097_v19 = vpop.f32.mrf.mxu1  ;;  %v20658_v23 = vcombine.high %v20639_v48, %v20639_v48  ;;  %v6471_v6 = vcombine.low %v20624_v17, %v20639_v48  ;;  %v17999_v55 = vcombine.high %v20624_v17, %v20639_v48 }
 0x33c   : > { %27037 = vst [vmem:[#allocation48_spill] sm:$0xff] %v20644_v28  ;;  %27039 = vst [vmem:[#allocation50_spill] sm:$0xff] %v20654_v52  ;;  %v20666_v33 = vcombine.high %v20644_v28, %v20644_v28  ;;  %v6473_v60 = vcombine.low %v20628_v12, %v20644_v28  ;;  %v18000_v16 = vcombine.high %v20628_v12, %v20644_v28 }
 0x33d   : > { %27040 = vst [vmem:[#allocation51_spill] sm:$0xff] %v20658_v23  ;;  %v14681_v43 = vmul.f32 %v20361_v11, %v20639_v48  ;;  %v6481_v40 = vrot.slane %v6471_v6, %v19159_v57  ;;  %v6488_v19 = vrot.slane %v17999_v55, %v19159_v57  ;;  %v27042_v47 = vcombine.high %v20361_v11, %v20361_v11 }
 0x33e   : > { %27041 = vst [vmem:[#allocation52_spill] sm:$0xff] %v20666_v33  ;;  %v14684_v41 = vmul.f32 %v20358_v34, %v20628_v12  ;;  %v20683_v29 = vrot.slane %v6473_v60, %v19159_v57  ;;  %v20686_v8 = vrot.slane %v18000_v16, %v19159_v57  ;;  %v27043_v6 = vcombine.high %v20336_v38, %v20336_v38 }
 0x33f   : > { %v14683_v50 = vmul.f32 %v27042_v47, %v20658_v23  ;;  %v14685_v55 = vmul.f32 %v20372_v45, %v20644_v28  ;;  %v6503_v49 = vcombine.low %v6481_v40, %v6488_v19  ;;  %v27044_v11 = vcombine.high %v20358_v34, %v20358_v34 }
 0x340   : > { %v14682_v15 = vmul.f32 %v27043_v6, %v20648_v27  ;;  %v27045_v60 = vcombine.high %v20372_v45, %v20372_v45  ;;  %v15224_v12 = vcombine.low %v14680_v44, %v14681_v43  ;;  %v5108_v6 = vrot.slane %v20511_v63, %v19159_v57 }
 0x341   : > { %v14686_v47 = vmul.f32 %v27044_v11, %v20654_v52  ;;  %v5115_v40 = vrot.slane %v5101_v22, %v19159_v57  ;;  %v20708_v19 = vrot.slane %v7399_v46, %v19159_v57  ;;  %v15226_v11 = vcombine.low %v14684_v41, %v14685_v55 }
 0x342   : > { %v14687_v16 = vmul.f32 %v27045_v60, %v20666_v33  ;;  %v15225_v38 = vcombine.low %v14682_v15, %v14683_v50  ;;  %v20713_v45 = vrot.slane %v16152_v26, %v19159_v57  ;;  %v5116_v44 = vcombine.high %v5108_v6, %v5108_v6 }
 0x343   : > { %v5117_v43 = vcombine.high %v5115_v40, %v5115_v40  ;;  %v20716_v15 = vrot.slane %v5108_v6, %v19159_v57  ;;  %v20721_v50 = vrot.slane %v6503_v49, %v19159_v57  ;;  %v20724_v46 = vrot.slane %v15224_v12, %v19159_v57 }
 0x344   : > { %v15227_v52 = vcombine.low %v14686_v47, %v14687_v16  ;;  %v20727_v41 = vrot.slane %v5115_v40, %v19159_v57  ;;  %v20730_v22 = vrot.slane %v15225_v38, %v19159_v57  ;;  %v20733_v26 = vrot.slane %v5116_v44, %v19159_v57 }
 0x345   : > { %v20736_v55 = vrot.slane %v5117_v43, %v19159_v57  ;;  %v20740_v47 = vcombine.high %v20716_v15, %v20716_v15  ;;  %v20743_v49 = vrot.slane %v15226_v11, %v19159_v57  ;;  %v4268_v16 = vcombine.high %v20484_v31, %v20484_v31 }
 0x346   : > { %27046 = vst [vmem:[#allocation53_spill] sm:$0xff] %v20727_v41  ;;  %27047 = vst [vmem:[#allocation54_spill] sm:$0xff] %v20733_v26  ;;  %v20746_v12 = vrot.slane %v15227_v52, %v19159_v57  ;;  %v20750_v60 = vcombine.high %v20727_v41, %v20727_v41  ;;  %v20756_v38 = vcombine.high %v20733_v26, %v20733_v26 }
 0x347   : > { %27048 = vst [vmem:[#allocation55_spill] sm:$0xff] %v20736_v55  ;;  %27049 = vst [vmem:[#allocation56_spill] sm:$0xff] %v20740_v47  ;;  %v20760_v6 = vcombine.high %v20736_v55, %v20736_v55  ;;  %v7416_v40 = vcombine.low %v20716_v15, %v20733_v26  ;;  %v18017_v52 = vcombine.high %v20716_v15, %v20733_v26 }
 0x348   : > { %27050 = vst [vmem:[#allocation57_spill] sm:$0xff] %v20750_v60  ;;  %27051 = vst [vmem:[#allocation58_spill] sm:$0xff] %v20756_v38  ;;  %v7418_v11 = vcombine.low %v20727_v41, %v20736_v55  ;;  %v14824_v44 = vmul.f32 %v20388_v35, %v20716_v15  ;;  %v14825_v43 = vmul.f32 %v20404_v21, %v20733_v26 }
 0x349   : > { %27052 = vst [vmem:[#allocation59_spill] sm:$0xff] %v20760_v6  ;;  %v14828_v63 = vmul.f32 %v20395_v13, %v20727_v41  ;;  %v18018_v34 = vcombine.high %v20727_v41, %v20736_v55  ;;  %v27053_v23 = vcombine.high %v20388_v35, %v20388_v35  ;;  %v27054_v28 = vcombine.high %v20404_v21, %v20404_v21 }
 0x34a   : > { %v14829_v48 = vmul.f32 %v20407_v42, %v20736_v55  ;;  %v15256_v17 = vcombine.low %v20724_v46, %v20730_v22  ;;  %v7426_v62 = vrot.slane %v7416_v40, %v19159_v57  ;;  %v27055_v41 = vcombine.high %v20395_v13, %v20395_v13  ;;  %v20802_v13 = vpop.f32.mrf.mxu1 }
 0x34b   : > { %v14826_v33 = vmul.f32 %v27053_v23, %v20740_v47  ;;  %v14827_v27 = vmul.f32 %v27054_v28, %v20756_v38  ;;  %v27056_v35 = vcombine.high %v20407_v42, %v20407_v42  ;;  %v7433_v21 = vrot.slane %v18017_v52, %v19159_v57  ;;  %27057 = vst [vmem:[#allocation60_spill] sm:$0xff] %v20802_v13 }
 0x34c   : > { %v14830_v20 = vmul.f32 %v27055_v41, %v20750_v60  ;;  %v16169_v28 = vcombine.low %v14824_v44, %v14825_v43  ;;  %v16171_v55 = vcombine.low %v14828_v63, %v14829_v48  ;;  %v7440_v47 = vrot.slane %v7418_v11, %v19159_v57 }
 0x34d   : > { %v14831_v23 = vmul.f32 %v27056_v35, %v20760_v6  ;;  %v16170_v38 = vcombine.low %v14826_v33, %v14827_v27  ;;  %v4275_v22 = vrot.slane %v20484_v31, %v19159_v57  ;;  %v4282_v40 = vrot.slane %v4268_v16, %v19159_v57  ;;  %v18098_v33 = vpop.f32.mrf.mxu1 }
 0x34e   : > { %v7447_v41 = vrot.slane %v18018_v34, %v19159_v57  ;;  %v16179_v42 = vrot.slane %v16169_v28, %v19159_v57  ;;  %v20808_v52 = vrot.slane %v16171_v55, %v19159_v57  ;;  %v7448_v63 = vcombine.low %v7426_v62, %v7433_v21 }
 0x34f   : > { %v16172_v46 = vcombine.low %v14830_v20, %v14831_v23  ;;  %v16186_v35 = vrot.slane %v16170_v38, %v19159_v57  ;;  %v4283_v20 = vcombine.high %v4275_v22, %v4275_v22  ;;  %v4284_v27 = vcombine.high %v4282_v40, %v4282_v40 }
 0x350   : > { %v20814_v31 = vrot.slane %v4275_v22, %v19159_v57  ;;  %v20817_v34 = vrot.slane %v4282_v40, %v19159_v57  ;;  %v5150_v38 = vcombine.high %v20542_v36, %v20542_v36  ;;  %v5157_v28 = vrot.slane %v20542_v36, %v19159_v57 }
 0x351   : > { %v20811_v48 = vrot.slane %v16172_v46, %v19159_v57  ;;  %v16201_v16 = vcombine.low %v16179_v42, %v16186_v35  ;;  %v20824_v11 = vrot.slane %v4283_v20, %v19159_v57  ;;  %v20827_v44 = vrot.slane %v4284_v27, %v19159_v57 }
 0x352   : > { %27058 = vst [vmem:[#allocation61_spill] sm:$0xff] %v20814_v31  ;;  %27059 = vst [vmem:[#allocation62_spill] sm:$0xff] %v20817_v34  ;;  %v20831_v43 = vcombine.high %v20814_v31, %v20814_v31  ;;  %v20835_v62 = vcombine.high %v20817_v34, %v20817_v34  ;;  %v14688_v23 = vmul.f32 %v20410_v5, %v20814_v31 }
 0x353   : > { %27060 = vst [vmem:[#allocation63_spill] sm:$0xff] %v20824_v11  ;;  %27061 = vst [vmem:[#allocation64_spill] sm:$0xff] %v20827_v44  ;;  %v14692_v21 = vmul.f32 %v20424_v2, %v20817_v34  ;;  %v20845_v46 = vcombine.high %v20824_v11, %v20824_v11  ;;  %v20849_v22 = vcombine.high %v20827_v44, %v20827_v44 }
 0x354   : > { %27062 = vst [vmem:[#allocation65_spill] sm:$0xff] %v20831_v43  ;;  %v6520_v40 = vcombine.low %v20814_v31, %v20824_v11  ;;  %v18001_v42 = vcombine.high %v20814_v31, %v20824_v11  ;;  %v6522_v35 = vcombine.low %v20817_v34, %v20827_v44  ;;  %v18002_v36 = vcombine.high %v20817_v34, %v20827_v44 }
 0x355   : > { %27063 = vst [vmem:[#allocation66_spill] sm:$0xff] %v20845_v46  ;;  %v14689_v20 = vmul.f32 %v20427_v4, %v20824_v11  ;;  %v27064_v27 = vcombine.high %v20410_v5, %v20410_v5  ;;  %v27065_v31 = vcombine.high %v20427_v4, %v20427_v4  ;;  %v14693_v34 = vmul.f32 %v20436_v3, %v20827_v44 }
 0x356   : > { %v6530_v55 = vrot.slane %v6520_v40, %v19159_v57  ;;  %v6537_v13 = vrot.slane %v18001_v42, %v19159_v57  ;;  %v20874_v60 = vrot.slane %v6522_v35, %v19159_v57  ;;  %v20877_v11 = vrot.slane %v18002_v36, %v19159_v57 }
 0x357   : > { %v14690_v33 = vmul.f32 %v27064_v27, %v20831_v43  ;;  %v14691_v6 = vmul.f32 %v27065_v31, %v20845_v46  ;;  %v27066_v5 = vcombine.high %v20424_v2, %v20424_v2  ;;  %v27067_v42 = vcombine.high %v20436_v3, %v20436_v3 }
 0x358   : > { %v7449_v27 = vcombine.low %v7440_v47, %v7447_v41  ;;  %v15273_v44 = vcombine.low %v14688_v23, %v14689_v20  ;;  %v15275_v46 = vcombine.low %v14692_v21, %v14693_v34  ;;  %v5164_v36 = vrot.slane %v5150_v38, %v19159_v57 }
 0x359   : > { %v14694_v40 = vmul.f32 %v27066_v5, %v20835_v62  ;;  %v14695_v4 = vmul.f32 %v27067_v42, %v20849_v22  ;;  %v15274_v35 = vcombine.low %v14690_v33, %v14691_v6  ;;  %v5165_v26 = vcombine.high %v5157_v28, %v5157_v28 }
 0x35a   : > { %v20891_v18 = vrot.slane %v15256_v17, %v19159_v57  ;;  %v7456_v2 = vrot.slane %v7448_v63, %v19159_v57  ;;  %v16209_v5 = vrot.slane %v16201_v16, %v19159_v57  ;;  %v6552_v3 = vcombine.low %v6530_v55, %v6537_v13 }
 0x35b   : > { %v15276_v43 = vcombine.low %v14694_v40, %v14695_v4  ;;  %v6553_v42 = vcombine.low %v20874_v60, %v20877_v11  ;;  %v15290_v47 = vrot.slane %v15274_v35, %v19159_v57  ;;  %v20902_v41 = vrot.slane %v5157_v28, %v19159_v57 }
 0x35c   : > { %v15283_v34 = vrot.slane %v15273_v44, %v19159_v57  ;;  %v20906_v17 = vrot.slane %v5165_v26, %v19159_v57  ;;  %v27069_v13 = vcombine.low %v20614_v59, %v20620_v25  ;;  %v7463_v16 = vrot.slane %v7449_v27, %v19159_v57 }
 0x35d   : > { %v20899_v6 = vrot.slane %v15276_v43, %v19159_v57  ;;  %v20914_v38 = vrot.slane %v15275_v46, %v19159_v57  ;;  %v5166_v55 = vcombine.high %v5164_v36, %v5164_v36  ;;  %v20917_v43 = vrot.slane %v5164_v36, %v19159_v57 }
 0x35e   : > { %27068 = vst [vmem:[#allocation67_spill] sm:$0xff] %v20906_v17  ;;  %v7414_v63 = vrot.slane %v27069_v13, %v19159_v57  ;;  %v20921_v44 = vcombine.high %v20902_v41, %v20902_v41  ;;  %v20924_v26 = vrot.slane %v6552_v3, %v19159_v57  ;;  %v20928_v59 = vcombine.high %v20906_v17, %v20906_v17 }
 0x35f   : > { %27070 = vst [vmem:[#allocation68_spill] sm:$0xff] %v20917_v43  ;;  %v7464_v23 = vcombine.low %v7456_v2, %v7463_v16  ;;  %v15305_v21 = vcombine.low %v15283_v34, %v15290_v47  ;;  %v7471_v46 = vrot.slane %v20902_v41, %v19159_v57  ;;  %v20944_v27 = vrot.slane %v5166_v55, %v19159_v57 }
 0x360   : > { %27071 = vst [vmem:[#allocation69_spill] sm:$0xff] %v20921_v44  ;;  %27072 = vst [vmem:[#allocation70_spill] sm:$0xff] %v20928_v59  ;;  %v7415_v25 = vcombine.low %v20708_v19, %v7414_v63  ;;  %v7479_v20 = vcombine.low %v20906_v17, %v20921_v44  ;;  %v7480_v33 = vcombine.low %v20928_v59, %v20917_v43 }
 0x361   : > { %v8401_v4 = vsel %vm732_vm2, %v7464_v23, -inf  ;;  %v13616_v19 = vrot.slane %v20466_v39, %v19159_v57  ;;  %v20948_v35 = vcombine.high %v20917_v43, %v20917_v43  ;;  %v7478_v36 = vrot.slane %v7471_v46, %v19159_v57 }
 0x362   : > { %v8400_v40 = vsel %vm732_vm2, %v7415_v25, -inf  ;;  %v13624_v47 = vcombine.high %v20490_v0, %v20490_v0  ;;  %v13631_v34 = vrot.slane %v20490_v0, %v19159_v57  ;;  %v27073_v13 = vcombine.low %v20633_v58, %v20636_v24 }
 0x363   : > { %v8402_v2 = vmax.f32 %v8400_v40, %v8401_v4  ;;  %v13623_v3 = vrot.slane %v13616_v19, %v19159_v57  ;;  %v20961_v16 = vrot.slane %v15305_v21, %v19159_v57  ;;  %v7496_v55 = vrot.slane %v7480_v33, %v19159_v57 }
 0x364   : > { %v16167_v63 = vrot.slane %v27073_v13, %v19159_v57  ;;  %v8403_v25 = vsel %vm8314_vm10, %v7478_v36, -inf  ;;  %v27074_v23 = vcombine.low %v20808_v52, %v20811_v48  ;;  %v7489_v40 = vrot.slane %v7479_v20, %v19159_v57 }
 0x365   : > { %v8404_v4 = vmax.f32 %v8402_v2, %v8403_v25  ;;  %v13639_v19 = vcombine.high %v13631_v34, %v13631_v34  ;;  %v13647_v28 = vrot.slane %v13631_v34, %v19159_v57  ;;  %v14832_v58 = vmul.f32 %v13623_v3, %v20902_v41 }
 0x366   : > { %v16216_v46 = vrot.slane %v27074_v23, %v19159_v57  ;;  %v16168_v24 = vcombine.low %v20713_v45, %v16167_v63  ;;  %v4317_v33 = vcombine.high %v20585_v32, %v20585_v32  ;;  %v20976_v13 = vrot.slane %v13624_v47, %v19159_v57 }
 0x367   : > { %v8405_v36 = vrot.slane %v8404_v4, 4  ;;  %v13661_v52 = vrot.slane %v13639_v19, %v19159_v57  ;;  %v13669_v48 = vcombine.high %v13647_v28, %v13647_v28  ;;  %v7511_v20 = vcombine.low %v7489_v40, %v7496_v55 }
 0x368   : > { %v16217_v21 = vcombine.low %v16209_v5, %v16216_v46  ;;  %27075 = vst [vmem:[#allocation71_spill] sm:$0xff] %v20976_v13  ;;  %v14833_v2 = vmul.f32 %v13647_v28, %v20906_v17  ;;  %v16224_v34 = vrot.slane %v14832_v58, %v19159_v57  ;;  %v17152_v3 = vsel %vm732_vm2, %v16168_v24, 0.0 }
 0x369   : > { %v8406_v25 = vmax.f32 %v8404_v4, %v8405_v36  ;;  %v13671_v45 = vcombine.high %v13661_v52, %v13661_v52  ;;  %v14834_v5 = vmul.f32 %v13661_v52, %v20921_v44  ;;  %v14835_v63 = vmul.f32 %v13669_v48, %v20928_v59  ;;  %v27091_v44 = vld [vmem:[#allocation54_spill] sm:$0xff] }
 0x36a   : > { %v16231_v23 = vrot.slane %v16224_v34, %v19159_v57  ;;  %v17153_v47 = vsel %vm732_vm2, %v16217_v21, 0.0  ;;  %v4324_v46 = vrot.slane %v20585_v32, %v19159_v57  ;;  %v4331_v55 = vrot.slane %v4317_v33, %v19159_v57 }
 0x36b   : > { %v8407_v28 = vrot.slane %v8406_v25, 2  ;;  %v20991_v40 = vrot.slane %v20976_v13, %v19159_v57  ;;  %v14836_v4 = vmul.f32 %v13671_v45, %v20917_v43  ;;  %v17154_v19 = vadd.f32 %v17153_v47, %v17152_v3  ;;  %v21010_v45 = vpop.f32.mrf.mxu0 }
 0x36c   : > { %v16232_v58 = vcombine.low %v14833_v2, %v14834_v5  ;;  %v17155_v24 = vsel %vm8314_vm10, %v16231_v23, 0.0  ;;  %v4332_v36 = vcombine.high %v4324_v46, %v4324_v46  ;;  %v4333_v52 = vcombine.high %v4331_v55, %v4331_v55  ;;  %27079 = vst [vmem:[#allocation75_spill] sm:$0xff] %v21010_v45  ;;  %v27092_v45 = vld [vmem:[#allocation39_spill] sm:$0xff] }
 0x36d   : > { %27076 = vst [vmem:[#allocation72_spill] sm:$0xff] %v20991_v40  ;;  %v20997_v21 = vcombine.high %v20944_v27, %v20944_v27  ;;  %v8408_v32 = vmax.f32 %v8406_v25, %v8407_v28  ;;  %v16233_v48 = vcombine.low %v14835_v63, %v14836_v4  ;;  %v17156_v33 = vadd.f32 %v17155_v24, %v17154_v19  ;;  %v18065_v28 = vpop.f32.mrf.mxu0 }
 0x36e   : > { %v21002_v31 = vrot.slane %v7511_v20, %v19159_v57  ;;  %v21005_v3 = vrot.slane %v4324_v46, %v19159_v57  ;;  %v21008_v2 = vrot.slane %v4331_v55, %v19159_v57  ;;  %v6180_v63 = vcombine.high %v20238_v10, %v20238_v10 }
 0x36f   : > { %v8409_v5 = vrot.slane %v8408_v32, 1  ;;  %v16249_v23 = vrot.slane %v16233_v48, %v19159_v57  ;;  %v17157_v25 = vrot.slane %v17156_v33, 4  ;;  %v21017_v47 = vmul.f32 %v20991_v40, %v20944_v27  ;;  %v27097_v40 = vld [vmem:[#allocation57_spill] sm:$0xff] }
 0x370   : > { %27077 = vst [vmem:[#allocation73_spill] sm:$0xff] %v21002_v31  ;;  %27078 = vst [vmem:[#allocation74_spill] sm:$0xff] %v21008_v2  ;;  %v16242_v20 = vrot.slane %v16232_v58, %v19159_v57  ;;  %v21021_v46 = vrot.slane %v4332_v36, %v19159_v57  ;;  %v21024_v55 = vrot.slane %v4333_v52, %v19159_v57 }
 0x371   : > { %27080 = vst [vmem:[#allocation76_spill] sm:$0xff] %v21017_v47  ;;  %v21026_v4 = vmax.f32 %v8408_v32, %v8409_v5  ;;  %v17158_v19 = vadd.f32 %v17157_v25, %v17156_v33  ;;  %v21029_v24 = vrot.slane %v6180_v63, %v19159_v57  ;;  %v27084_v58 = vcombine.low %v20683_v29, %v20686_v8 }
 0x372   : > { %27081 = vst [vmem:[#allocation77_spill] sm:$0xff] %v21024_v55  ;;  %v16264_v10 = vcombine.low %v16242_v20, %v16249_v23  ;;  %v21043_v52 = vrot.slane %v6553_v42, %v19159_v57  ;;  %v6575_v32 = vrot.slane %v21005_v3, %v19159_v57  ;;  %v21053_v29 = vcombine.high %v21005_v3, %v21005_v3 }
 0x373   : > { %27082 = vst [vmem:[#allocation78_spill] sm:$0xff] %v21026_v4  ;;  %27083 = vst [vmem:[#allocation79_spill] sm:$0xff] %v21029_v24  ;;  %v21037_v36 = vrot.slane %v27084_v58, %v19159_v57  ;;  %v8896_v48 = vcombine.high %v21026_v4, %v21026_v4  ;;  %v8903_v33 = vrot.slane %v21026_v4, %v19159_v57  ;;  %v17159_v60 = vrot.slane %v17158_v19, 2 }
 0x374   : > { %v21057_v8 = vcombine.high %v21008_v2, %v21008_v2  ;;  %v21061_v11 = vcombine.high %v21021_v46, %v21021_v46  ;;  %v21065_v42 = vcombine.high %v21024_v55, %v21024_v55  ;;  %v21069_v5 = vrot.slane %v21029_v24, %v20241_v61  ;;  %v27093_v61 = vld [vmem:[#allocation56_spill] sm:$0xff] }
 0x375   : > { %v8910_v23 = vrot.slane %v8896_v48, %v19159_v57  ;;  %v8911_v25 = vcombine.high %v8903_v33, %v8903_v33  ;;  %v21073_v63 = vrot.slane %v8903_v33, %v19159_v57  ;;  %v21079_v20 = vsel %vm6329_vm11, 1.0, %v26932_v30 }
 0x376   : > { %27085 = vst [vmem:[#allocation80_spill] sm:$0xff] %v21057_v8  ;;  %27086 = vst [vmem:[#allocation81_spill] sm:$0xff] %v21061_v11  ;;  %v21082_v28 = vrot.slane %v16264_v10, %v19159_v57  ;;  %v6519_v58 = vcombine.low %v20721_v50, %v21037_v36  ;;  %v6568_v34 = vcombine.low %v20924_v26, %v21043_v52 }
 0x377   : > { %27087 = vst [vmem:[#allocation82_spill] sm:$0xff] %v21065_v42  ;;  %27088 = vst [vmem:[#allocation83_spill] sm:$0xff] %v21079_v20  ;;  %v6582_v48 = vrot.slane %v6575_v32, %v19159_v57  ;;  %v8912_v0 = vcombine.high %v8910_v23, %v8910_v23  ;;  %v8926_v33 = vrot.slane %v8910_v23, %v19159_v57 }
 0x378   : > { %27089 = vst [vmem:[#allocation84_spill] sm:$0xff] %v21082_v28  ;;  %v8933_v39 = vrot.slane %v8911_v25, %v19159_v57  ;;  %v8941_v53 = vcombine.high %v21073_v63, %v21073_v63  ;;  %v9552_v10 = vsub.f32 %v20526_v9, %v21073_v63  ;;  %v21095_v4 = vadd.f32 %v17159_v60, %v17158_v19 }
 0x379   : > { %vm6330_vm12 = vcmp.eq.s32.totalorder %v26993_v1, %v21069_v5  ;;  %v6583_v50 = vcombine.low %v21021_v46, %v21053_v29  ;;  %v8940_v26 = vrot.slane %v8912_v0, %v19159_v57  ;;  %v8942_v36 = vcombine.high %v8926_v33, %v8926_v33 }
 0x37a   : > { %v8943_v52 = vcombine.high %v8933_v39, %v8933_v39  ;;  %v9553_v32 = vsub.f32 %v20535_v56, %v8933_v39  ;;  %v9554_v23 = vsub.f32 %v20550_v14, %v8941_v53  ;;  %v9560_v25 = vsub.f32 %v20716_v15, %v21073_v63  ;;  %v27090_v14 = vld [vmem:[#allocation38_spill] sm:$0xff] }
 0x37b   : > { %v6584_v9 = vcombine.low %v21061_v11, %v21008_v2  ;;  %v8944_v60 = vcombine.high %v8940_v26, %v8940_v26  ;;  %v9556_v0 = vsub.f32 %v20529_v51, %v8926_v33  ;;  %v9568_v43 = vsub.f32 %v20902_v41, %v21073_v63  ;;  %v27095_v51 = vld [vmem:[#allocation53_spill] sm:$0xff]  ;;  %v27096_v63 = vld [vmem:[#allocation55_spill] sm:$0xff] }
 0x37c   : > { %v9555_v24 = vsub.f32 %v20558_v37, %v8943_v52  ;;  %v9557_v56 = vsub.f32 %v20538_v54, %v8940_v26  ;;  %v9558_v59 = vsub.f32 %v27090_v14, %v8942_v36  ;;  %v9561_v15 = vsub.f32 %v27091_v44, %v8933_v39  ;;  %v27094_v37 = vld [vmem:[#allocation58_spill] sm:$0xff]  ;;  %v27098_v44 = vld [vmem:[#allocation59_spill] sm:$0xff] }
 0x37d   : > { %v9559_v7 = vsub.f32 %v27092_v45, %v8944_v60  ;;  %v9562_v19 = vsub.f32 %v27093_v61, %v8941_v53  ;;  %v9960_v8 = vmul.f32 1.442695, %v9552_v10  ;;  %v9962_v42 = vmul.f32 1.442695, %v9553_v32 }
 0x37e   : > { %v9563_v28 = vsub.f32 %v27094_v37, %v8943_v52  ;;  %v9564_v47 = vsub.f32 %v27095_v51, %v8926_v33  ;;  %v9964_v31 = vmul.f32 1.442695, %v9554_v23  ;;  %v9966_v41 = vmul.f32 1.442695, %v9555_v24 }
 0x37f   : > { %v9565_v54 = vsub.f32 %v27096_v63, %v8940_v26  ;;  %v9566_v14 = vsub.f32 %v27097_v40, %v8942_v36  ;;  %18195 = vpow2.f32 %v9960_v8  ;;  %v9968_v39 = vmul.f32 1.442695, %v9556_v0 }
 0x380   : > { %v9567_v17 = vsub.f32 %v27098_v44, %v8944_v60  ;;  %18197 = vpow2.f32 %v9962_v42  ;;  %v9970_v45 = vmul.f32 1.442695, %v9557_v56  ;;  %v9972_v13 = vmul.f32 1.442695, %v9558_v59 }
 0x381   : > { %18199 = vpow2.f32 %v9964_v31  ;;  %v9974_v61 = vmul.f32 1.442695, %v9559_v7  ;;  %v9976_v53 = vmul.f32 1.442695, %v9560_v25  ;;  %v9978_v10 = vmul.f32 1.442695, %v9561_v15 }
 0x382   : > { %18201 = vpow2.f32 %v9966_v41  ;;  %v9980_v52 = vmul.f32 1.442695, %v9562_v19  ;;  %v9982_v33 = vmul.f32 1.442695, %v9563_v28  ;;  %v9984_v32 = vmul.f32 1.442695, %v9564_v47 }
 0x383   : > { %18203 = vpow2.f32 %v9968_v39  ;;  %v9986_v24 = vmul.f32 1.442695, %v9565_v54  ;;  %v9988_v26 = vmul.f32 1.442695, %v9566_v14  ;;  %v21129_v40 = vsel %vm6330_vm12, 1.0, %v26932_v30 }
 0x384   : > { %27099 = vst [vmem:[#allocation38_spill] sm:$0xff] %v21129_v40  ;;  %18205 = vpow2.f32 %v9970_v45  ;;  %v9990_v8 = vmul.f32 1.442695, %v9567_v17  ;;  %v8311_v31 = vsel %vm732_vm2, %v6519_v58, -inf  ;;  %v8312_v7 = vsel %vm732_vm2, %v6568_v34, -inf }
 0x385   : > { %18207 = vpow2.f32 %v9972_v13  ;;  %v9992_v59 = vmul.f32 1.442695, %v9568_v43  ;;  %v8313_v42 = vmax.f32 %v8311_v31, %v8312_v7  ;;  %v12720_v47 = vrot.slane %v21079_v20, %v19159_v57  ;;  %v27119_v20 = vld [vmem:[#allocation64_spill] sm:$0xff] }
 0x386   : > { %18209 = vpow2.f32 %v9974_v61  ;;  %v8315_v28 = vsel %vm8314_vm10, %v6582_v48, -inf  ;;  %v12728_v36 = vcombine.high %v21129_v40, %v21129_v40  ;;  %v12735_v23 = vrot.slane %v21129_v40, %v19159_v57 }
 0x387   : > { %18211 = vpow2.f32 %v9976_v53  ;;  %v6593_v17 = vrot.slane %v6583_v50, %v19159_v57  ;;  %v8316_v58 = vmax.f32 %v8313_v42, %v8315_v28  ;;  %v12727_v13 = vrot.slane %v12720_v47, %v19159_v57 }
 0x388   : > { %18213 = vpow2.f32 %v9978_v10  ;;  %v6600_v43 = vrot.slane %v6584_v9, %v19159_v57  ;;  %v12743_v34 = vcombine.high %v12735_v23, %v12735_v23  ;;  %v12751_v25 = vrot.slane %v12735_v23, %v19159_v57 }
 0x389   : > { %18215 = vpow2.f32 %v9980_v52  ;;  %v8317_v48 = vrot.slane %v8316_v58, 4  ;;  %v21145_v19 = vrot.slane %v12728_v36, %v19159_v57  ;;  %v27100_v60 = vcombine.low %v20743_v49, %v20746_v12 }
 0x38a   : > { %18217 = vpow2.f32 %v9982_v33  ;;  %v12765_v50 = vrot.slane %v12743_v34, %v19159_v57  ;;  %v12773_v56 = vcombine.high %v12751_v25, %v12751_v25  ;;  %v14696_v15 = vmul.f32 %v12727_v13, %v21005_v3 }
 0x38b   : > { %v15271_v0 = vrot.slane %v27100_v60, %v19159_v57  ;;  %18219 = vpow2.f32 %v9984_v32  ;;  %v8318_v9 = vmax.f32 %v8316_v58, %v8317_v48  ;;  %v14697_v37 = vmul.f32 %v12751_v25, %v21021_v46 }
 0x38c   : > { %v27101_v51 = vcombine.low %v20914_v38, %v20899_v6  ;;  %v18196_v63 = vpop.eup %18195  ;;  %18221 = vpow2.f32 %v9986_v24  ;;  %v12775_v54 = vcombine.high %v12765_v50, %v12765_v50  ;;  %v14698_v49 = vmul.f32 %v12765_v50, %v21053_v29 }
 0x38d   : > { %v14699_v12 = vmul.f32 %v12773_v56, %v21061_v11  ;;  %v18198_v14 = vpop.eup %18197  ;;  %18223 = vpow2.f32 %v9988_v26  ;;  %v6615_v39 = vcombine.low %v6593_v17, %v6600_v43  ;;  %v8319_v44 = vrot.slane %v8318_v9, 2 }
 0x38e   : > { %v15320_v41 = vrot.slane %v27101_v51, %v19159_v57  ;;  %v18200_v61 = vpop.eup %18199  ;;  %18225 = vpow2.f32 %v9990_v8  ;;  %v21163_v53 = vrot.slane %v21145_v19, %v19159_v57  ;;  %v14700_v6 = vmul.f32 %v12775_v54, %v21008_v2 }
 0x38f   : > { %v15328_v38 = vrot.slane %v14696_v15, %v19159_v57  ;;  %v18202_v10 = vpop.eup %18201  ;;  %18227 = vpow2.f32 %v9992_v59  ;;  %v11400_v52 = vcombine.low %v18196_v63, %v18198_v14  ;;  %v8320_v33 = vmax.f32 %v8318_v9, %v8319_v44 }
 0x390   : > { %v15321_v45 = vcombine.low %v20961_v16, %v15320_v41  ;;  %v15272_v32 = vcombine.low %v20891_v18, %v15271_v0  ;;  %v18204_v24 = vpop.eup %18203  ;;  %v11401_v26 = vcombine.low %v18200_v61, %v18202_v10  ;;  %v27102_v16 = vrot.slane %v21095_v4, 1 }
 0x391   : > { %v15336_v31 = vcombine.low %v14697_v37, %v14698_v49  ;;  %v15337_v7 = vcombine.low %v14699_v12, %v14700_v6  ;;  %v18206_v42 = vpop.eup %18205  ;;  %v21174_v47 = vrot.slane %v6615_v39, %v19159_v57  ;;  %v8321_v28 = vrot.slane %v8320_v33, 1  ;;  %v21200_v49 = vpop.f32.mrf.mxu1 }
 0x392   : > { %v21171_v8 = vadd.f32 %v27102_v16, %v21095_v4  ;;  %v15335_v59 = vrot.slane %v15328_v38, %v19159_v57  ;;  %v17065_v36 = vsel %vm732_vm2, %v15321_v45, 0.0  ;;  %v18208_v23 = vpop.eup %18207  ;;  %v11402_v18 = vcombine.low %v18204_v24, %v18206_v42  ;;  %v27104_v4 = vld [vmem:[#allocation46_spill] sm:$0xff] }
 0x393   : > { %v11417_v17 = vrot.slane %v11401_v26, %v19159_v57  ;;  %v21181_v58 = vmul.f32 %v21163_v53, %v21024_v55  ;;  %v5199_v13 = vcombine.high %v27104_v4, %v27104_v4  ;;  %v18210_v43 = vpop.eup %18209  ;;  %v11410_v34 = vrot.slane %v11400_v52, %v19159_v57 }
 0x394   : > { %27103 = vst [vmem:[#allocation54_spill] sm:$0xff] %v21171_v8  ;;  %v21186_v25 = vmax.f32 %v8320_v33, %v8321_v28  ;;  %v15353_v48 = vrot.slane %v15337_v7, %v19159_v57  ;;  %v17064_v60 = vsel %vm732_vm2, %v15272_v32, 0.0  ;;  %v18212_v0 = vpop.eup %18211  ;;  %v11403_v50 = vcombine.low %v18208_v23, %v18210_v43  ;;  %v18101_v33 = vpop.f32.mrf.mxu1 }
 0x395   : > { %v15346_v56 = vrot.slane %v15336_v31, %v19159_v57  ;;  %v17066_v15 = vadd.f32 %v17065_v36, %v17064_v60  ;;  %v21193_v9 = vrot.slane %v27104_v4, %v19159_v57  ;;  %v18214_v37 = vpop.eup %18213  ;;  %v11432_v51 = vcombine.low %v11410_v34, %v11417_v17 }
 0x396   : > { %27105 = vst [vmem:[#allocation39_spill] sm:$0xff] %v21186_v25  ;;  %v8504_v41 = vcombine.high %v21186_v25, %v21186_v25  ;;  %v8511_v63 = vrot.slane %v21186_v25, %v19159_v57  ;;  %v17067_v54 = vsel %vm8314_vm10, %v15335_v59, 0.0  ;;  %v18216_v12 = vpop.eup %18215  ;;  %v11424_v14 = vrot.slane %v11402_v18, %v19159_v57 }
 0x397   : > { %v11431_v39 = vrot.slane %v11403_v50, %v19159_v57  ;;  %v11449_v44 = vcombine.low %v18212_v0, %v18214_v37  ;;  %v21205_v45 = vrot.slane %v5199_v13, %v19159_v57  ;;  %v18218_v61 = vpop.eup %18217  ;;  %v15368_v52 = vcombine.low %v15346_v56, %v15353_v48 }
 0x398   : > { %v8518_v6 = vrot.slane %v8504_v41, %v19159_v57  ;;  %v8519_v38 = vcombine.high %v8511_v63, %v8511_v63  ;;  %v21209_v10 = vrot.slane %v8511_v63, %v19159_v57  ;;  %v18220_v32 = vpop.eup %18219  ;;  %v11450_v26 = vcombine.low %v18216_v12, %v18218_v61  ;;  %v27118_v12 = vld [vmem:[#allocation62_spill] sm:$0xff] }
 0x399   : > { %v11433_v24 = vcombine.low %v11424_v14, %v11431_v39  ;;  %v17068_v16 = vadd.f32 %v17067_v54, %v17066_v15  ;;  %v18222_v7 = vpop.eup %18221  ;;  %v11440_v42 = vrot.slane %v11432_v51, %v19159_v57  ;;  %v11459_v4 = vrot.slane %v11449_v44, %v19159_v57  ;;  %v27106_v44 = vld [vmem:[#allocation44_spill] sm:$0xff] }
 0x39a   : > { %v8520_v28 = vcombine.high %v8518_v6, %v8518_v6  ;;  %v21215_v59 = vrot.slane %v8518_v6, %v19159_v57  ;;  %v8541_v36 = vrot.slane %v8519_v38, %v19159_v57  ;;  %v18224_v23 = vpop.eup %18223  ;;  %v11451_v17 = vcombine.low %v18220_v32, %v18222_v7  ;;  %v27107_v6 = vld [vmem:[#allocation47_spill] sm:$0xff]  ;;  %v27108_v32 = vld [vmem:[#allocation49_spill] sm:$0xff] }
 0x39b   : > { %v11447_v18 = vrot.slane %v11433_v24, %v19159_v57  ;;  %v11466_v13 = vrot.slane %v11450_v26, %v19159_v57  ;;  %v18226_v43 = vpop.eup %18225  ;;  %v8549_v48 = vcombine.high %v21209_v10, %v21209_v10  ;;  %v21227_v0 = vrot.slane %v15368_v52, %v19159_v57  ;;  %v27109_v26 = vld [vmem:[#allocation51_spill] sm:$0xff] }
 0x39c   : > { %v21222_v34 = vrot.slane %v8520_v28, %v19159_v57  ;;  %v8551_v60 = vcombine.high %v8541_v36, %v8541_v36  ;;  %v18228_v50 = vpop.eup %18227  ;;  %v11452_v15 = vcombine.low %v18224_v23, %v18226_v43  ;;  %v17069_v51 = vrot.slane %v17068_v16, 4  ;;  %v27110_v23 = vld [vmem:[#allocation45_spill] sm:$0xff] }
 0x39d   : > { %v11448_v56 = vcombine.low %v11440_v42, %v11447_v18  ;;  %v11481_v37 = vcombine.low %v11459_v4, %v11466_v13  ;;  %v11504_v41 = vrot.slane %v18228_v50, %v19159_v57  ;;  %v8550_v63 = vcombine.high %v21215_v59, %v21215_v59  ;;  %v27112_v13 = vld [vmem:[#allocation50_spill] sm:$0xff]  ;;  %v27113_v50 = vld [vmem:[#allocation52_spill] sm:$0xff] }
 0x39e   : > { %v8552_v54 = vcombine.high %v21222_v34, %v21222_v34  ;;  %v11473_v14 = vrot.slane %v11451_v17, %v19159_v57  ;;  %v11480_v39 = vrot.slane %v11452_v15, %v19159_v57  ;;  %v9416_v61 = vsub.f32 %v27106_v44, %v21209_v10  ;;  %v27111_v17 = vld [vmem:[#allocation48_spill] sm:$0xff]  ;;  %v27115_v44 = vld [vmem:[#allocation63_spill] sm:$0xff] }
 0x39f   : > { %v9417_v38 = vsub.f32 %v27107_v6, %v8541_v36  ;;  %v11489_v52 = vrot.slane %v11481_v37, %v19159_v57  ;;  %v11511_v33 = vrot.slane %v11504_v41, %v19159_v57  ;;  %v9418_v24 = vsub.f32 %v27108_v32, %v8549_v48  ;;  %v27114_v37 = vld [vmem:[#allocation61_spill] sm:$0xff] }
 0x3a0   : > { %v9419_v7 = vsub.f32 %v27109_v26, %v8551_v60  ;;  %v11482_v42 = vcombine.low %v11473_v14, %v11480_v39  ;;  %v12432_v28 = vsel %vm732_vm2, %v11448_v56, 0.0  ;;  %v9420_v18 = vsub.f32 %v27110_v23, %v21215_v59  ;;  %v27116_v56 = vld [vmem:[#allocation65_spill] sm:$0xff]  ;;  %v27117_v26 = vld [vmem:[#allocation66_spill] sm:$0xff] }
 0x3a1   : > { %v9421_v4 = vsub.f32 %v27111_v17, %v21222_v34  ;;  %v9422_v43 = vsub.f32 %v27112_v13, %v8550_v63  ;;  %v9423_v15 = vsub.f32 %v27113_v50, %v8552_v54  ;;  %v9424_v41 = vsub.f32 %v27114_v37, %v21209_v10 }
 0x3a2   : > { %v9425_v6 = vsub.f32 %v27115_v44, %v8541_v36  ;;  %v11496_v32 = vrot.slane %v11482_v42, %v19159_v57  ;;  %v12435_v14 = vsel %vm8314_vm10, %v11511_v33, 0.0  ;;  %v9426_v39 = vsub.f32 %v27116_v56, %v8549_v48 }
 0x3a3   : > { %v9427_v23 = vsub.f32 %v27117_v26, %v8551_v60  ;;  %v9428_v17 = vsub.f32 %v27118_v12, %v21215_v59  ;;  %v9688_v31 = vmul.f32 1.442695, %v9416_v61  ;;  %v9690_v13 = vmul.f32 1.442695, %v9417_v38 }
 0x3a4   : > { %v9692_v40 = vmul.f32 1.442695, %v9418_v24  ;;  %v11497_v50 = vcombine.low %v11489_v52, %v11496_v32  ;;  %v9429_v37 = vsub.f32 %v27119_v20, %v21222_v34  ;;  %v9430_v36 = vsub.f32 %v20835_v62, %v8550_v63  ;;  %v27123_v32 = vld [vmem:[#allocation14_spill] sm:$0xff] }
 0x3a5   : > { %v9694_v44 = vmul.f32 1.442695, %v9419_v7  ;;  %v9431_v42 = vsub.f32 %v20849_v22, %v8552_v54  ;;  %18229 = vpow2.f32 %v9688_v31  ;;  %v9696_v33 = vmul.f32 1.442695, %v9420_v18 }
 0x3a6   : > { %v17070_v48 = vadd.f32 %v17069_v51, %v17068_v16  ;;  %v12433_v60 = vsel %vm732_vm2, %v11497_v50, 0.0  ;;  %v9432_v59 = vsub.f32 %v21005_v3, %v21209_v10  ;;  %18231 = vpow2.f32 %v9690_v13 }
 0x3a7   : > { %v9698_v12 = vmul.f32 1.442695, %v9421_v4  ;;  %v12434_v61 = vadd.f32 %v12433_v60, %v12432_v28  ;;  %18233 = vpow2.f32 %v9692_v40  ;;  %v9700_v38 = vmul.f32 1.442695, %v9422_v43 }
 0x3a8   : > { %v9702_v52 = vmul.f32 1.442695, %v9423_v15  ;;  %18235 = vpow2.f32 %v9694_v44  ;;  %v9704_v20 = vmul.f32 1.442695, %v9424_v41  ;;  %v9706_v62 = vmul.f32 1.442695, %v9425_v6 }
 0x3a9   : > { %v9708_v34 = vmul.f32 1.442695, %v9426_v39  ;;  %v12436_v63 = vadd.f32 %v12435_v14, %v12434_v61  ;;  %18237 = vpow2.f32 %v9696_v33  ;;  %v9710_v22 = vmul.f32 1.442695, %v9427_v23  ;;  %v27122_v6 = vld [vmem:[#allocation27_spill] sm:$0xff] }
 0x3aa   : > { %v17071_v31 = vrot.slane %v17070_v48, 2  ;;  %18239 = vpow2.f32 %v9698_v12  ;;  %v21270_v16 = vrot.slane %v21193_v9, %v19159_v57  ;;  %v21274_v3 = vrot.slane %v21205_v45, %v19159_v57 }
 0x3ab   : > { %v27120_v40 = vcombine.high %v21193_v9, %v21193_v9  ;;  %18241 = vpow2.f32 %v9700_v38  ;;  %v9712_v51 = vmul.f32 1.442695, %v9428_v17  ;;  %v9714_v54 = vmul.f32 1.442695, %v9429_v37 }
 0x3ac   : > { %v9716_v24 = vmul.f32 1.442695, %v9430_v36  ;;  %18243 = vpow2.f32 %v9702_v52  ;;  %v9718_v7 = vmul.f32 1.442695, %v9431_v42  ;;  %v21284_v28 = vcombine.high %v21270_v16, %v21270_v16  ;;  %v27127_v36 = vld [vmem:[#allocation71_spill] sm:$0xff]  ;;  %v21328_v52 = vpop.f32.mrf.mxu0 }
 0x3ad   : > { %v21280_v10 = vrot.slane %v27120_v40, %v19159_v57  ;;  %v12437_v4 = vrot.slane %v12436_v63, 4  ;;  %18245 = vpow2.f32 %v9704_v20  ;;  %v17072_v43 = vadd.f32 %v17071_v31, %v17070_v48  ;;  %27128 = vst [vmem:[#allocation53_spill] sm:$0xff] %v21328_v52 }
 0x3ae   : > { %v27121_v9 = vcombine.high %v21205_v45, %v21205_v45  ;;  %18247 = vpow2.f32 %v9706_v62  ;;  %v21298_v41 = vcombine.high %v21274_v3, %v21274_v3  ;;  %vm6355_vm13 = vcmp.eq.s32.totalorder %v27123_v32, %v27122_v6 }
 0x3af   : > { %v21288_v18 = vcombine.high %v21280_v10, %v21280_v10  ;;  %v7482_v14 = vcombine.low %v20997_v21, %v21270_v16  ;;  %18249 = vpow2.f32 %v9708_v34  ;;  %v9720_v56 = vmul.f32 1.442695, %v9432_v59 }
 0x3b0   : > { %v21294_v15 = vrot.slane %v27121_v9, %v19159_v57  ;;  %v21305_v39 = vsel %vm6355_vm13, 1.0, %v26932_v30  ;;  %v27125_v45 = vcombine.low %v20944_v27, %v20948_v35  ;;  %18251 = vpow2.f32 %v9710_v22 }
 0x3b1   : > { %27124 = vst [vmem:[#allocation56_spill] sm:$0xff] %v21305_v39  ;;  %v7510_v23 = vrot.slane %v7482_v14, %v19159_v57  ;;  %v7528_v17 = vcombine.low %v21280_v10, %v21284_v28  ;;  %v7529_v13 = vcombine.low %v21288_v18, %v21274_v3  ;;  %v21316_v50 = vadd.f32 %v12437_v4, %v12436_v63  ;;  %v27130_v14 = vld [vmem:[#allocation72_spill] sm:$0xff] }
 0x3b2   : > { %v7503_v26 = vrot.slane %v27125_v45, %v19159_v57  ;;  %18253 = vpow2.f32 %v9712_v51  ;;  %v17073_v37 = vrot.slane %v17072_v43, 1  ;;  %v13640_v44 = vcombine.high %v27127_v36, %v27127_v36  ;;  %v18230_v42 = vpop.eup %18229 }
 0x3b3   : > { %27126 = vst [vmem:[#allocation58_spill] sm:$0xff] %v21316_v50  ;;  %18255 = vpow2.f32 %v9714_v54  ;;  %v7530_v48 = vcombine.low %v21294_v15, %v21298_v41  ;;  %v7545_v60 = vrot.slane %v7529_v13, %v19159_v57  ;;  %v18232_v59 = vpop.eup %18231  ;;  %v13673_v61 = vcombine.high %v21305_v39, %v21305_v39  ;;  %v18066_v54 = vpop.f32.mrf.mxu0 }
 0x3b4   : > { %v7512_v33 = vcombine.low %v7503_v26, %v7510_v23  ;;  %18257 = vpow2.f32 %v9716_v24  ;;  %v13668_v12 = vrot.slane %v13640_v44, %v19159_v57  ;;  %v13680_v38 = vrot.slane %v21305_v39, %v19159_v57  ;;  %v18234_v20 = vpop.eup %18233 }
 0x3b5   : > { %18259 = vpow2.f32 %v9718_v7  ;;  %v10504_v62 = vcombine.low %v18230_v42, %v18232_v59  ;;  %v7538_v63 = vrot.slane %v7528_v17, %v19159_v57  ;;  %v18236_v22 = vpop.eup %18235  ;;  %v21336_v31 = vcombine.high %v21294_v15, %v21294_v15 }
 0x3b6   : > { %v21331_v34 = vrot.slane %v7512_v33, %v19159_v57  ;;  %18261 = vpow2.f32 %v9720_v56  ;;  %v13687_v40 = vrot.slane %v13673_v61, %v19159_v57  ;;  %v13688_v51 = vcombine.high %v13680_v38, %v13680_v38  ;;  %v18238_v24 = vpop.eup %18237 }
 0x3b7   : > { %v10505_v4 = vcombine.low %v18234_v20, %v18236_v22  ;;  %v21339_v9 = vadd.f32 %v17073_v37, %v17072_v43  ;;  %v7560_v7 = vcombine.low %v7538_v63, %v7545_v60  ;;  %v13670_v45 = vcombine.high %v27130_v14, %v27130_v14  ;;  %v18240_v26 = vpop.eup %18239  ;;  %v27131_v43 = vld [vmem:[#allocation73_spill] sm:$0xff] }
 0x3b8   : > { %v21344_v23 = vrot.slane %v7530_v48, %v19159_v57  ;;  %v13672_v56 = vcombine.high %v13668_v12, %v13668_v12  ;;  %v13696_v17 = vrot.slane %v13680_v38, %v19159_v57  ;;  %v13710_v13 = vrot.slane %v13688_v51, %v19159_v57  ;;  %v18242_v36 = vpop.eup %18241 }
 0x3b9   : > { %27129 = vst [vmem:[#allocation55_spill] sm:$0xff] %v21339_v9  ;;  %v10506_v44 = vcombine.low %v18238_v24, %v18240_v26  ;;  %v10514_v42 = vrot.slane %v10504_v62, %v19159_v57  ;;  %v7527_v37 = vcombine.low %v27131_v43, %v21331_v34  ;;  %v13689_v33 = vcombine.high %v13687_v40, %v13687_v40  ;;  %v18244_v60 = vpop.eup %18243 }
 0x3ba   : > { %v10521_v59 = vrot.slane %v10505_v4, %v19159_v57  ;;  %v13718_v61 = vcombine.high %v13696_v17, %v13696_v17  ;;  %v13720_v20 = vcombine.high %v13710_v13, %v13710_v13  ;;  %v14838_v48 = vmul.f32 %v13668_v12, %v20948_v35  ;;  %v18246_v63 = vpop.eup %18245 }
 0x3bb   : > { %v10507_v22 = vcombine.low %v18242_v36, %v18244_v60  ;;  %v21354_v38 = vrot.slane %v7560_v7, %v19159_v57  ;;  %v21357_v51 = vrot.slane %v13687_v40, %v19159_v57  ;;  %v14839_v62 = vmul.f32 %v13670_v45, %v20997_v21  ;;  %v18248_v54 = vpop.eup %18247 }
 0x3bc   : > { %v14840_v34 = vmul.f32 %v13672_v56, %v21270_v16  ;;  %v14841_v24 = vmul.f32 %v13696_v17, %v21280_v10  ;;  %v14842_v4 = vmul.f32 %v13710_v13, %v21284_v28  ;;  %v14843_v14 = vmul.f32 %v13718_v61, %v21288_v18  ;;  %v18250_v12 = vpop.eup %18249  ;;  %v27132_v56 = vld [vmem:[#allocation76_spill] sm:$0xff] }
 0x3bd   : > { %v10528_v26 = vrot.slane %v10506_v44, %v19159_v57  ;;  %v10535_v7 = vrot.slane %v10507_v22, %v19159_v57  ;;  %v10553_v36 = vcombine.low %v18246_v63, %v18248_v54  ;;  %v21367_v40 = vrot.slane %v13689_v33, %v19159_v57  ;;  %v18252_v43 = vpop.eup %18251 }
 0x3be   : > { %v10536_v45 = vcombine.low %v10514_v42, %v10521_v59  ;;  %v14844_v60 = vmul.f32 %v13720_v20, %v21274_v3  ;;  %v16234_v39 = vcombine.low %v27132_v56, %v14838_v48  ;;  %v16235_v17 = vcombine.low %v14839_v62, %v14840_v34 }
 0x3bf   : > { %v18254_v8 = vpop.eup %18253  ;;  %v10537_v13 = vcombine.low %v10528_v26, %v10535_v7  ;;  %v10554_v9 = vcombine.low %v18250_v12, %v18252_v43  ;;  %v14845_v61 = vmul.f32 %v21357_v51, %v21294_v15  ;;  %v14846_v44 = vmul.f32 %v21367_v40, %v21298_v41 }
 0x3c0   : > { %v18256_v63 = vpop.eup %18255  ;;  %v16256_v33 = vrot.slane %v16234_v39, %v19159_v57  ;;  %v16263_v22 = vrot.slane %v16235_v17, %v19159_v57  ;;  %v16281_v42 = vcombine.low %v14841_v24, %v14842_v4  ;;  %v16282_v59 = vcombine.low %v14843_v14, %v14844_v60  ;;  %v27133_v39 = vld [vmem:[#allocation43_spill] sm:$0xff]  ;;  %v21386_v24 = vpop.f32.mrf.mxu1 }
 0x3c1   : > { %v18258_v20 = vpop.eup %18257  ;;  %v10555_v54 = vcombine.low %v18254_v8, %v18256_v63  ;;  %v10563_v48 = vrot.slane %v10553_v36, %v19159_v57  ;;  %v10570_v62 = vrot.slane %v10554_v9, %v19159_v57  ;;  %v21380_v34 = vsel %vm732_vm2, %v7527_v37, -inf  ;;  %27134 = vst [vmem:[#allocation57_spill] sm:$0xff] %v21386_v24 }
 0x3c2   : > { %v18260_v12 = vpop.eup %18259  ;;  %v10551_v26 = vrot.slane %v10537_v13, %v19159_v57  ;;  %v16265_v7 = vcombine.low %v16256_v33, %v16263_v22  ;;  %v16298_v43 = vrot.slane %v16282_v59, %v19159_v57  ;;  %v4366_v56 = vcombine.high %v27133_v39, %v27133_v39  ;;  %v18102_v63 = vpop.f32.mrf.mxu1 }
 0x3c3   : > { %v18262_v4 = vpop.eup %18261  ;;  %v10544_v8 = vrot.slane %v10536_v45, %v19159_v57  ;;  %v10556_v14 = vcombine.low %v18258_v20, %v18260_v12  ;;  %v16283_v37 = vcombine.low %v14845_v61, %v14846_v44  ;;  %v10585_v36 = vcombine.low %v10563_v48, %v10570_v62 }
 0x3c4   : > { %v10608_v60 = vrot.slane %v18262_v4, %v19159_v57  ;;  %v16291_v17 = vrot.slane %v16281_v42, %v19159_v57  ;;  %v4373_v13 = vrot.slane %v27133_v39, %v19159_v57  ;;  %v10577_v33 = vrot.slane %v10555_v54, %v19159_v57 }
 0x3c5   : > { %v10584_v22 = vrot.slane %v10556_v14, %v19159_v57  ;;  %v16279_v45 = vrot.slane %v16265_v7, %v19159_v57  ;;  %v4380_v59 = vrot.slane %v4366_v56, %v19159_v57  ;;  %v10552_v20 = vcombine.low %v10544_v8, %v10551_v26 }
 0x3c6   : > { %v10615_v61 = vrot.slane %v10608_v60, %v19159_v57  ;;  %v16313_v44 = vcombine.low %v16291_v17, %v16298_v43  ;;  %v4381_v48 = vcombine.high %v4373_v13, %v4373_v13  ;;  %v21401_v42 = vrot.slane %v4373_v13, %v19159_v57  ;;  %v27138_v43 = vld [vmem:[#allocation84_spill] sm:$0xff]  ;;  %v27144_v17 = vld [vmem:[#allocation82_spill] sm:$0xff] }
 0x3c7   : > { %v10586_v62 = vcombine.low %v10577_v33, %v10584_v22  ;;  %v4382_v12 = vcombine.high %v4380_v59, %v4380_v59  ;;  %v21404_v39 = vrot.slane %v4380_v59, %v19159_v57  ;;  %v10593_v54 = vrot.slane %v10585_v36, %v19159_v57 }
 0x3c8   : > { %27135 = vst [vmem:[#allocation59_spill] sm:$0xff] %v21401_v42  ;;  %v21408_v4 = vrot.slane %v16283_v37, %v19159_v57  ;;  %v21411_v7 = vrot.slane %v4381_v48, %v19159_v57  ;;  %vm6331_vm14 = vcmp.eq.s32.totalorder %v27123_v32, %v21069_v5  ;;  %v16280_v56 = vcombine.low %v27138_v43, %v16279_v45 }
 0x3c9   : > { %27136 = vst [vmem:[#allocation46_spill] sm:$0xff] %v21404_v39  ;;  %v10600_v26 = vrot.slane %v10586_v62, %v19159_v57  ;;  %v21418_v8 = vrot.slane %v4382_v12, %v19159_v57  ;;  %v21422_v14 = vcombine.high %v21401_v42, %v21401_v42  ;;  %v21426_v37 = vcombine.high %v21404_v39, %v21404_v39 }
 0x3ca   : > { %27137 = vst [vmem:[#allocation44_spill] sm:$0xff] %v21411_v7  ;;  %v21430_v36 = vcombine.high %v21411_v7, %v21411_v7  ;;  %v21433_v60 = vsel %vm6331_vm14, 1.0, %v26932_v30  ;;  %v6586_v13 = vcombine.low %v27144_v17, %v21401_v42  ;;  %v12344_v33 = vsel %vm732_vm2, %v10552_v20, 0.0 }
 0x3cb   : > { %27139 = vst [vmem:[#allocation47_spill] sm:$0xff] %v21418_v8  ;;  %27140 = vst [vmem:[#allocation49_spill] sm:$0xff] %v21422_v14  ;;  %v10601_v63 = vcombine.low %v10593_v54, %v10600_v26  ;;  %v12347_v22 = vsel %vm8314_vm10, %v10615_v61, 0.0  ;;  %v21440_v45 = vrot.slane %v16313_v44, %v19159_v57  ;;  %v6632_v48 = vcombine.low %v21411_v7, %v21422_v14  ;;  %v27145_v61 = vld [vmem:[#allocation80_spill] sm:$0xff] }
 0x3cc   : > { %27141 = vst [vmem:[#allocation51_spill] sm:$0xff] %v21426_v37  ;;  %27142 = vst [vmem:[#allocation45_spill] sm:$0xff] %v21430_v36  ;;  %v6614_v59 = vrot.slane %v6586_v13, %v19159_v57  ;;  %v6633_v62 = vcombine.low %v21430_v36, %v21404_v39  ;;  %v12744_v12 = vcombine.high %v21145_v19, %v21145_v19  ;;  %v21451_v20 = vsel %vm732_vm2, %v16280_v56, 0.0 }
 0x3cd   : > { %27143 = vst [vmem:[#allocation48_spill] sm:$0xff] %v21433_v60  ;;  %v12345_v54 = vsel %vm732_vm2, %v10601_v63, 0.0  ;;  %v27146_v44 = vcombine.low %v21024_v55, %v27145_v61  ;;  %v12777_v43 = vcombine.high %v21433_v60, %v21433_v60  ;;  %v6634_v9 = vcombine.low %v21418_v8, %v21426_v37 }
 0x3ce   : > { %v12346_v13 = vadd.f32 %v12345_v54, %v12344_v33  ;;  %v12772_v25 = vrot.slane %v12744_v12, %v19159_v57  ;;  %v12774_v19 = vcombine.high %v21163_v53, %v21163_v53  ;;  %v6649_v56 = vrot.slane %v6633_v62, %v19159_v57 }
 0x3cf   : > { %v6607_v26 = vrot.slane %v27146_v44, %v19159_v57  ;;  %v12784_v50 = vrot.slane %v21433_v60, %v19159_v57  ;;  %v12791_v44 = vrot.slane %v12777_v43, %v19159_v57  ;;  %v21470_v33 = vcombine.high %v21418_v8, %v21418_v8  ;;  %v27147_v43 = vld [vmem:[#allocation60_spill] sm:$0xff] }
 0x3d0   : > { %v12348_v24 = vadd.f32 %v12347_v22, %v12346_v13  ;;  %v6642_v54 = vrot.slane %v6632_v48, %v19159_v57  ;;  %v12776_v52 = vcombine.high %v12772_v25, %v12772_v25  ;;  %v21478_v62 = vrot.slane %v6634_v9, %v19159_v57 }
 0x3d1   : > { %v6616_v63 = vcombine.low %v6607_v26, %v6614_v59  ;;  %v12792_v12 = vcombine.high %v12784_v50, %v12784_v50  ;;  %v12793_v32 = vcombine.high %v12791_v44, %v12791_v44  ;;  %v12800_v53 = vrot.slane %v12784_v50, %v19159_v57 }
 0x3d2   : > { %v21475_v59 = vrot.slane %v12791_v44, %v19159_v57  ;;  %v14702_v26 = vmul.f32 %v12772_v25, %v27145_v61  ;;  %v14703_v22 = vmul.f32 %v12774_v19, %v27144_v17  ;;  %v5248_v13 = vcombine.high %v27147_v43, %v27147_v43 }
 0x3d3   : > { %v6630_v48 = vrot.slane %v6616_v63, %v19159_v57  ;;  %v6664_v60 = vcombine.low %v6642_v54, %v6649_v56  ;;  %v12814_v2 = vrot.slane %v12792_v12, %v19159_v57  ;;  %v12822_v55 = vcombine.high %v12800_v53, %v12800_v53 }
 0x3d4   : > { %v12349_v50 = vrot.slane %v12348_v24, 4  ;;  %v21487_v44 = vrot.slane %v12793_v32, %v19159_v57  ;;  %v14704_v9 = vmul.f32 %v12776_v52, %v21401_v42  ;;  %v14705_v11 = vmul.f32 %v12800_v53, %v21411_v7  ;;  %v27165_v7 = vld [vmem:[#allocation75_spill] sm:$0xff] }
 0x3d5   : > { %v12824_v25 = vcombine.high %v12814_v2, %v12814_v2  ;;  %v14706_v19 = vmul.f32 %v12814_v2, %v21422_v14  ;;  %v14707_v17 = vmul.f32 %v12822_v55, %v21430_v36  ;;  %v14709_v63 = vmul.f32 %v21475_v59, %v21418_v8  ;;  %v27148_v2 = vld [vmem:[#allocation12_spill] sm:$0xff] }
 0x3d6   : > { %v14710_v56 = vmul.f32 %v21487_v44, %v21426_v37  ;;  %v15338_v54 = vcombine.low %v21181_v58, %v14702_v26  ;;  %v15339_v12 = vcombine.low %v14703_v22, %v14704_v9  ;;  %v5255_v32 = vrot.slane %v27147_v43, %v19159_v57 }
 0x3d7   : > { %v14708_v52 = vmul.f32 %v12824_v25, %v21404_v39  ;;  %v15385_v53 = vcombine.low %v14705_v11, %v14706_v19  ;;  %v5262_v42 = vrot.slane %v5248_v13, %v19159_v57  ;;  %v6259_v55 = vcombine.high %v27148_v2, %v27148_v2 }
 0x3d8   : > { %v6631_v36 = vcombine.low %v21174_v47, %v6630_v48  ;;  %v15360_v8 = vrot.slane %v15338_v54, %v19159_v57  ;;  %v15367_v37 = vrot.slane %v15339_v12, %v19159_v57  ;;  %v5263_v14 = vcombine.high %v5255_v32, %v5255_v32 }
 0x3d9   : > { %v21508_v58 = vrot.slane %v6664_v60, %v19159_v57  ;;  %v15386_v26 = vcombine.low %v14707_v17, %v14708_v52  ;;  %v15387_v22 = vcombine.low %v14709_v63, %v14710_v56  ;;  %v5264_v43 = vcombine.high %v5262_v42, %v5262_v42  ;;  %v27150_v17 = vld [vmem:[#allocation21_spill] sm:$0xff]  ;;  %v27154_v56 = vld [vmem:[#allocation22_spill] sm:$0xff] }
 0x3da   : > { %v15369_v13 = vcombine.low %v15360_v8, %v15367_v37  ;;  %v15395_v9 = vrot.slane %v15385_v53, %v19159_v57  ;;  %v21514_v25 = vrot.slane %v5255_v32, %v19159_v57  ;;  %v21518_v48 = vrot.slane %v5262_v42, %v19159_v57 }
 0x3db   : > { %v15402_v47 = vrot.slane %v15386_v26, %v19159_v57  ;;  %v21521_v60 = vrot.slane %v5263_v14, %v19159_v57  ;;  %v21524_v19 = vrot.slane %v6259_v55, %v27150_v17  ;;  %v21526_v63 = vadd.f32 %v12349_v50, %v12348_v24 }
 0x3dc   : > { %27149 = vst [vmem:[#allocation50_spill] sm:$0xff] %v21518_v48  ;;  %v15383_v8 = vrot.slane %v15369_v13, %v19159_v57  ;;  %v21530_v37 = vrot.slane %v5264_v43, %v19159_v57  ;;  %vm6356_vm15 = vcmp.eq.s32.totalorder %v27154_v56, %v27122_v6  ;;  %v21535_v54 = vsel %vm732_vm2, %v6631_v36, -inf }
 0x3dd   : > { %27151 = vst [vmem:[#allocation52_spill] sm:$0xff] %v21524_v19  ;;  %27152 = vst [vmem:[#allocation61_spill] sm:$0xff] %v21526_v63  ;;  %v21538_v42 = vrot.slane %v15387_v22, %v19159_v57  ;;  %v15417_v14 = vcombine.low %v15395_v9, %v15402_v47  ;;  %vm6357_vm0 = vcmp.eq.s32.totalorder %v26993_v1, %v21524_v19  ;;  %v21548_v12 = vsel %vm6356_vm15, 1.0, %v26932_v30  ;;  %v21583_v47 = vpop.f32.mrf.mxu0 }
 0x3de   : > { %27153 = vst [vmem:[#allocation63_spill] sm:$0xff] %v21530_v37  ;;  %v15384_v24 = vcombine.low %v21227_v0, %v15383_v8  ;;  %v21545_v50 = vcombine.high %v21514_v25, %v21514_v25  ;;  %27156 = vst [vmem:[#allocation66_spill] sm:$0xff] %v21548_v12  ;;  %v7531_v6 = vcombine.low %v21336_v31, %v21514_v25  ;;  %v21561_v0 = vsel %vm6357_vm0, 1.0, %v26932_v30 }
 0x3df   : > { %v21554_v36 = vcombine.high %v21518_v48, %v21518_v48  ;;  %v21558_v32 = vcombine.high %v21521_v60, %v21521_v60  ;;  %27159 = vst [vmem:[#allocation27_spill] sm:$0xff] %v21561_v0  ;;  %v7583_v52 = vrot.slane %v21521_v60, %v19159_v57  ;;  %v21566_v53 = vrot.slane %v15417_v14, %v19159_v57  ;;  %v18069_v19 = vpop.f32.mrf.mxu0 }
 0x3e0   : > { %27155 = vst [vmem:[#allocation65_spill] sm:$0xff] %v21545_v50  ;;  %v21570_v2 = vcombine.high %v21530_v37, %v21530_v37  ;;  %v7559_v55 = vrot.slane %v7531_v6, %v19159_v57  ;;  %v13721_v26 = vcombine.high %v21367_v40, %v21367_v40  ;;  %v18019_v22 = vcombine.high %v21514_v25, %v21521_v60 }
 0x3e1   : > { %27157 = vst [vmem:[#allocation62_spill] sm:$0xff] %v21554_v36  ;;  %27158 = vst [vmem:[#allocation64_spill] sm:$0xff] %v21558_v32  ;;  %v7592_v43 = vcombine.low %v21518_v48, %v21530_v37  ;;  %v18020_v13 = vcombine.high %v21518_v48, %v21530_v37  ;;  %v13728_v9 = vrot.slane %v21548_v12, %v19159_v57  ;;  %v21586_v8 = vsel %vm732_vm2, %v15384_v24, 0.0 }
 0x3e2   : > { %27160 = vst [vmem:[#allocation71_spill] sm:$0xff] %v21570_v2  ;;  %27161 = vst [vmem:[#allocation72_spill] sm:$0xff] %v21583_v47  ;;  %v7561_v14 = vcombine.low %v21344_v23, %v7559_v55  ;;  %v13736_v40 = vcombine.high %v21561_v0, %v21561_v0  ;;  %v13743_v6 = vrot.slane %v21561_v0, %v19159_v57 }
 0x3e3   : > { %27162 = vst [vmem:[#allocation73_spill] sm:$0xff] %v21586_v8  ;;  %v7590_v11 = vrot.slane %v7583_v52, %v19159_v57  ;;  %v13735_v63 = vrot.slane %v13728_v9, %v19159_v57  ;;  %v27163_v12 = vcombine.high %v21357_v51, %v21357_v51  ;;  %v14848_v24 = vmul.f32 %v13721_v26, %v21514_v25 }
 0x3e4   : > { %v7575_v23 = vrot.slane %v7561_v14, %v19159_v57  ;;  %v13750_v55 = vrot.slane %v13736_v40, %v19159_v57  ;;  %v13751_v8 = vcombine.high %v13743_v6, %v13743_v6  ;;  %v13759_v39 = vrot.slane %v13743_v6, %v19159_v57 }
 0x3e5   : > { %v14847_v47 = vmul.f32 %v27163_v12, %v21336_v31  ;;  %v7601_v0 = vrot.slane %v18019_v22, %v19159_v57  ;;  %v7608_v52 = vrot.slane %v7592_v43, %v19159_v57  ;;  %v14849_v9 = vmul.f32 %v13735_v63, %v21521_v60 }
 0x3e6   : > { %v7576_v51 = vcombine.low %v21354_v38, %v7575_v23  ;;  %v21608_v12 = vrot.slane %v18020_v13, %v19159_v57  ;;  %v13752_v19 = vcombine.high %v13750_v55, %v13750_v55  ;;  %v13773_v26 = vrot.slane %v13751_v8, %v19159_v57 }
 0x3e7   : > { %v16284_v61 = vcombine.low %v14847_v47, %v14848_v24  ;;  %v13781_v14 = vcombine.high %v13759_v39, %v13759_v39  ;;  %v14850_v40 = vmul.f32 %v13759_v39, %v21545_v50  ;;  %v4415_v22 = vcombine.high %v27165_v7, %v27165_v7 }
 0x3e8   : > { %27164 = vst [vmem:[#allocation76_spill] sm:$0xff] %v21608_v12  ;;  %v8412_v43 = vsel %vm732_vm2, %v7576_v51, -inf  ;;  %v13783_v63 = vcombine.high %v13773_v26, %v13773_v26  ;;  %v14851_v47 = vmul.f32 %v13773_v26, %v21558_v32  ;;  %v16336_v38 = vrot.slane %v14849_v9, %v19159_v57  ;;  %v27182_v32 = vld [vmem:[#allocation67_spill] sm:$0xff] }
 0x3e9   : > { %v16312_v6 = vrot.slane %v16284_v61, %v19159_v57  ;;  %v7623_v13 = vcombine.low %v7601_v0, %v7608_v52  ;;  %v8413_v24 = vmax.f32 %v21380_v34, %v8412_v43  ;;  %v8414_v8 = vsel %vm8314_vm10, %v7590_v11, -inf  ;;  %v27168_v43 = vld [vmem:[#allocation7_spill] sm:$0xff] }
 0x3ea   : > { %v21622_v39 = vrot.slane %v13752_v19, %v19159_v57  ;;  %v14852_v61 = vmul.f32 %v13781_v14, %v21518_v48  ;;  %v14853_v50 = vmul.f32 %v13783_v63, %v21530_v37  ;;  %v16344_v51 = vcombine.low %v14850_v40, %v14851_v47 }
 0x3eb   : > { %v16314_v23 = vcombine.low %v21408_v4, %v16312_v6  ;;  %v8415_v12 = vmax.f32 %v8413_v24, %v8414_v8  ;;  %v4422_v0 = vrot.slane %v27165_v7, %v19159_v57  ;;  %v4429_v34 = vrot.slane %v4415_v22, %v19159_v57 }
 0x3ec   : > { %v21631_v11 = vrot.slane %v13750_v55, %v19159_v57  ;;  %v21635_v4 = vmul.f32 %v21622_v39, %v21570_v2  ;;  %v16343_v52 = vrot.slane %v16336_v38, %v19159_v57  ;;  %v16345_v9 = vcombine.low %v14852_v61, %v14853_v50 }
 0x3ed   : > { %v16328_v26 = vrot.slane %v16314_v23, %v19159_v57  ;;  %v8416_v19 = vrot.slane %v8415_v12, 4  ;;  %v4430_v40 = vcombine.high %v4422_v0, %v4422_v0  ;;  %v4431_v6 = vcombine.high %v4429_v34, %v4429_v34 }
 0x3ee   : > { %27166 = vst [vmem:[#allocation43_spill] sm:$0xff] %v21635_v4  ;;  %v21641_v7 = vmul.f32 %v21631_v11, %v21554_v36  ;;  %v16354_v22 = vrot.slane %v16344_v51, %v19159_v57  ;;  %v16361_v55 = vrot.slane %v16345_v9, %v19159_v57  ;;  %v6210_v63 = vcombine.high %v27168_v43, %v27168_v43 }
 0x3ef   : > { %v16329_v14 = vcombine.low %v21440_v45, %v16328_v26  ;;  %v8417_v47 = vmax.f32 %v8415_v12, %v8416_v19  ;;  %v21649_v50 = vrot.slane %v4422_v0, %v19159_v57  ;;  %v21652_v45 = vrot.slane %v4430_v40, %v19159_v57 }
 0x3f0   : > { %27167 = vst [vmem:[#allocation84_spill] sm:$0xff] %v21641_v7  ;;  %v21655_v24 = vrot.slane %v7623_v13, %v19159_v57  ;;  %v21661_v61 = vrot.slane %v4429_v34, %v19159_v57  ;;  %v17166_v51 = vsel %vm8314_vm10, %v16343_v52, 0.0  ;;  %v21665_v26 = vrot.slane %v4431_v6, %v19159_v57 }
 0x3f1   : > { %v17164_v38 = vsel %vm732_vm2, %v16329_v14, 0.0  ;;  %v8418_v12 = vrot.slane %v8417_v47, 2  ;;  %v21668_v0 = vrot.slane %v6210_v63, %v27150_v17  ;;  %v16376_v9 = vcombine.low %v16354_v22, %v16361_v55 }
 0x3f2   : > { %27169 = vst [vmem:[#allocation60_spill] sm:$0xff] %v21655_v24  ;;  %v17165_v23 = vadd.f32 %v17164_v38, %v21451_v20  ;;  %27170 = vst [vmem:[#allocation12_spill] sm:$0xff] %v21661_v61  ;;  %vm6332_vm1 = vcmp.eq.s32.totalorder %v27154_v56, %v21069_v5  ;;  %v6635_v20 = vcombine.low %v21470_v33, %v21649_v50  ;;  %v27183_v56 = vld [vmem:[#allocation69_spill] sm:$0xff] }
 0x3f3   : > { %27171 = vst [vmem:[#allocation75_spill] sm:$0xff] %v21665_v26  ;;  %27172 = vst [vmem:[#allocation7_spill] sm:$0xff] %v21668_v0  ;;  %v8419_v19 = vmax.f32 %v8417_v47, %v8418_v12  ;;  %v21676_v34 = vcombine.high %v21649_v50, %v21649_v50  ;;  %vm6333_vm3 = vcmp.eq.s32.totalorder %v26993_v1, %v21668_v0  ;;  %v21687_v5 = vsel %vm6332_vm1, 1.0, %v26932_v30  ;;  %v27185_v0 = vld [vmem:[#allocation68_spill] sm:$0xff] }
 0x3f4   : > { %v17167_v13 = vadd.f32 %v17166_v51, %v17165_v23  ;;  %v6687_v52 = vrot.slane %v21652_v45, %v19159_v57  ;;  %v21684_v40 = vcombine.high %v21661_v61, %v21661_v61  ;;  %27174 = vst [vmem:[#allocation86_spill] sm:$0xff] %v21687_v5  ;;  %v6663_v6 = vrot.slane %v6635_v20, %v19159_v57 }
 0x3f5   : > { %v8420_v22 = vrot.slane %v8419_v19, 1  ;;  %v21691_v55 = vsel %vm6333_vm3, 1.0, %v26932_v30  ;;  %v18003_v43 = vcombine.high %v21649_v50, %v21652_v45  ;;  %v6696_v63 = vcombine.low %v21661_v61, %v21665_v26 }
 0x3f6   : > { %v17168_v14 = vrot.slane %v17167_v13, 4  ;;  %27173 = vst [vmem:[#allocation85_spill] sm:$0xff] %v21684_v40  ;;  %27175 = vst [vmem:[#allocation87_spill] sm:$0xff] %v21691_v55  ;;  %v21699_v47 = vcombine.high %v21652_v45, %v21652_v45  ;;  %v21703_v38 = vcombine.high %v21665_v26, %v21665_v26  ;;  %v6665_v23 = vcombine.low %v21478_v62, %v6663_v6 }
 0x3f7   : > { %v18004_v12 = vcombine.high %v21661_v61, %v21665_v26  ;;  %v21708_v51 = vmax.f32 %v8419_v19, %v8420_v22  ;;  %v21711_v20 = vrot.slane %v16376_v9, %v19159_v57  ;;  %v6694_v2 = vrot.slane %v6687_v52, %v19159_v57 }
 0x3f8   : > { %27176 = vst [vmem:[#allocation88_spill] sm:$0xff] %v21703_v38  ;;  %v21713_v8 = vadd.f32 %v17168_v14, %v17167_v13  ;;  %v6679_v36 = vrot.slane %v6665_v23, %v19159_v57  ;;  %v21718_v37 = vrot.slane %v6696_v63, %v19159_v57  ;;  %v12832_v62 = vrot.slane %v21687_v5, %v19159_v57 }
 0x3f9   : > { %27177 = vst [vmem:[#allocation89_spill] sm:$0xff] %v21708_v51  ;;  %27178 = vst [vmem:[#allocation90_spill] sm:$0xff] %v21711_v20  ;;  %v12840_v6 = vcombine.high %v21691_v55, %v21691_v55  ;;  %v8945_v19 = vcombine.high %v21708_v51, %v21708_v51  ;;  %v8952_v9 = vrot.slane %v21708_v51, %v19159_v57  ;;  %v8326_v48 = vsel %vm8314_vm10, %v6694_v2, -inf }
 0x3fa   : > { %27179 = vst [vmem:[#allocation91_spill] sm:$0xff] %v21713_v8  ;;  %v21729_v13 = vrot.slane %v18003_v43, %v19159_v57  ;;  %v6680_v14 = vcombine.low %v21508_v58, %v6679_v36  ;;  %v21735_v22 = vrot.slane %v18004_v12, %v19159_v57  ;;  %v21739_v63 = vrot.slane %v21691_v55, %v19159_v57 }
 0x3fb   : > { %v21742_v23 = vrot.slane %v12840_v6, %v19159_v57  ;;  %v8959_v5 = vrot.slane %v8945_v19, %v19159_v57  ;;  %v8960_v51 = vcombine.high %v8952_v9, %v8952_v9  ;;  %v8968_v43 = vrot.slane %v8952_v9, %v19159_v57 }
 0x3fc   : > { %27180 = vst [vmem:[#allocation92_spill] sm:$0xff] %v21735_v22  ;;  %v21751_v36 = vrot.slane %v12832_v62, %v19159_v57  ;;  %v27181_v12 = vcombine.high %v21475_v59, %v21475_v59  ;;  %v8324_v8 = vsel %vm732_vm2, %v6680_v14, -inf  ;;  %v12855_v62 = vcombine.high %v21739_v63, %v21739_v63 }
 0x3fd   : > { %v8961_v19 = vcombine.high %v8959_v5, %v8959_v5  ;;  %v8975_v55 = vrot.slane %v8959_v5, %v19159_v57  ;;  %v8982_v9 = vrot.slane %v8960_v51, %v19159_v57  ;;  %v8990_v2 = vcombine.high %v8968_v43, %v8968_v43  ;;  %v27184_v5 = vld [vmem:[#allocation70_spill] sm:$0xff] }
 0x3fe   : > { %v21757_v6 = vmul.f32 %v27181_v12, %v21470_v33  ;;  %v9569_v52 = vsub.f32 %v27182_v32, %v8968_v43  ;;  %v9577_v51 = vsub.f32 %v21280_v10, %v8968_v43  ;;  %v9585_v32 = vsub.f32 %v21521_v60, %v8968_v43 }
 0x3ff   : > { %v8989_v59 = vrot.slane %v8961_v19, %v19159_v57  ;;  %v8991_v12 = vcombine.high %v8975_v55, %v8975_v55  ;;  %v8992_v1 = vcombine.high %v8982_v9, %v8982_v9  ;;  %v9570_v17 = vsub.f32 %v27183_v56, %v8982_v9 }
 0x400   : > { %v9571_v22 = vsub.f32 %v27184_v5, %v8990_v2  ;;  %v12863_v14 = vrot.slane %v21739_v63, %v19159_v57  ;;  %v9573_v58 = vsub.f32 %v20944_v27, %v8975_v55  ;;  %v8325_v19 = vmax.f32 %v21535_v54, %v8324_v8 }
 0x401   : > { %v8993_v20 = vcombine.high %v8989_v59, %v8989_v59  ;;  %v9572_v24 = vsub.f32 %v27185_v0, %v8992_v1  ;;  %v9574_v4 = vsub.f32 %v20948_v35, %v8989_v59  ;;  %v9575_v56 = vsub.f32 %v20997_v21, %v8991_v12 }
 0x402   : > { %v9578_v5 = vsub.f32 %v21284_v28, %v8982_v9  ;;  %v9579_v10 = vsub.f32 %v21288_v18, %v8990_v2  ;;  %v9580_v43 = vsub.f32 %v21274_v3, %v8992_v1  ;;  %v9994_v63 = vmul.f32 1.442695, %v9569_v52  ;;  %v21789_v1 = vpop.f32.mrf.mxu1 }
 0x403   : > { %v9576_v60 = vsub.f32 %v21270_v16, %v8993_v20  ;;  %v9996_v7 = vmul.f32 1.442695, %v9570_v17  ;;  %v9581_v0 = vsub.f32 %v21294_v15, %v8975_v55  ;;  %v9582_v27 = vsub.f32 %v21298_v41, %v8989_v59 }
 0x404   : > { %v9583_v54 = vsub.f32 %v21336_v31, %v8991_v12  ;;  %v9998_v8 = vmul.f32 1.442695, %v9571_v22  ;;  %v9584_v35 = vsub.f32 %v21514_v25, %v8993_v20  ;;  %v21787_v21 = vmul.f32 1.442695, %v9572_v24  ;;  %v18105_v52 = vpop.f32.mrf.mxu1 }
 0x405   : > { %v10002_v28 = vmul.f32 1.442695, %v9573_v58  ;;  %v8327_v9 = vmax.f32 %v8325_v19, %v8326_v48  ;;  %18263 = vpow2.f32 %v9994_v63  ;;  %v10004_v18 = vmul.f32 1.442695, %v9574_v4 }
 0x406   : > { %v10006_v16 = vmul.f32 1.442695, %v9575_v56  ;;  %v10008_v2 = vmul.f32 1.442695, %v9576_v60  ;;  %18265 = vpow2.f32 %v9996_v7  ;;  %v10010_v3 = vmul.f32 1.442695, %v9577_v51 }
 0x407   : > { %v10012_v15 = vmul.f32 1.442695, %v9578_v5  ;;  %v10014_v17 = vmul.f32 1.442695, %v9579_v10  ;;  %18267 = vpow2.f32 %v9998_v8  ;;  %v10016_v41 = vmul.f32 1.442695, %v9580_v43 }
 0x408   : > { %v10018_v31 = vmul.f32 1.442695, %v9581_v0  ;;  %v10020_v55 = vmul.f32 1.442695, %v9582_v27  ;;  %18269 = vpow2.f32 %v10002_v28  ;;  %v10022_v25 = vmul.f32 1.442695, %v9583_v54 }
 0x409   : > { %v8328_v24 = vrot.slane %v8327_v9, 4  ;;  %v12877_v48 = vrot.slane %v12855_v62, %v19159_v57  ;;  %18271 = vpow2.f32 %v10004_v18  ;;  %v10024_v4 = vmul.f32 1.442695, %v9584_v35 }
 0x40a   : > { %v10026_v20 = vmul.f32 1.442695, %v9585_v32  ;;  %v12885_v22 = vcombine.high %v12863_v14, %v12863_v14  ;;  %18273 = vpow2.f32 %v10006_v16  ;;  %v14713_v59 = vmul.f32 %v21751_v36, %v21652_v45 }
 0x40b   : > { %v8329_v58 = vmax.f32 %v8327_v9, %v8328_v24  ;;  %v12887_v7 = vcombine.high %v12877_v48, %v12877_v48  ;;  %18275 = vpow2.f32 %v10008_v2  ;;  %v27186_v12 = vcombine.high %v21487_v44, %v21487_v44 }
 0x40c   : > { %v14714_v19 = vmul.f32 %v12863_v14, %v21676_v34  ;;  %v14715_v62 = vmul.f32 %v12877_v48, %v21699_v47  ;;  %18277 = vpow2.f32 %v10010_v3  ;;  %v14716_v32 = vmul.f32 %v12885_v22, %v21661_v61 }
 0x40d   : > { %v14712_v51 = vmul.f32 %v27186_v12, %v21649_v50  ;;  %v8330_v56 = vrot.slane %v8329_v58, 2  ;;  %v14717_v5 = vmul.f32 %v12887_v7, %v21665_v26  ;;  %18279 = vpow2.f32 %v10012_v15 }
 0x40e   : > { %v27187_v36 = vcombine.high %v21742_v23, %v21742_v23  ;;  %v15440_v60 = vrot.slane %v14713_v59, %v19159_v57  ;;  %18281 = vpow2.f32 %v10014_v17  ;;  %v15448_v43 = vcombine.low %v14714_v19, %v14715_v62 }
 0x40f   : > { %v15388_v44 = vcombine.low %v21757_v6, %v14712_v51  ;;  %v8331_v14 = vmax.f32 %v8329_v58, %v8330_v56  ;;  %v15449_v63 = vcombine.low %v14716_v32, %v14717_v5  ;;  %18283 = vpow2.f32 %v10016_v41 }
 0x410   : > { %v21806_v10 = vrot.slane %v27187_v36, %v19159_v57  ;;  %v21812_v0 = vrot.slane %v21742_v23, %v19159_v57  ;;  %18285 = vpow2.f32 %v10018_v31  ;;  %v15458_v6 = vrot.slane %v15448_v43, %v19159_v57 }
 0x411   : > { %v15416_v54 = vrot.slane %v15388_v44, %v19159_v57  ;;  %v8332_v8 = vrot.slane %v8331_v14, 1  ;;  %v15465_v35 = vrot.slane %v15449_v63, %v19159_v57  ;;  %18287 = vpow2.f32 %v10020_v55 }
 0x412   : > { %v21816_v27 = vmul.f32 %v21806_v10, %v21703_v38  ;;  %v15447_v9 = vrot.slane %v15440_v60, %v19159_v57  ;;  %v5297_v23 = vcombine.high %v21200_v49, %v21200_v49  ;;  %v21825_v18 = vpop.eup %18263  ;;  %18289 = vpow2.f32 %v10022_v25 }
 0x413   : > { %v15418_v28 = vcombine.low %v21538_v42, %v15416_v54  ;;  %27188 = vst [vmem:[#allocation67_spill] sm:$0xff] %v21825_v18  ;;  %v21827_v16 = vmax.f32 %v8331_v14, %v8332_v8  ;;  %v21831_v2 = vmul.f32 %v21812_v0, %v21684_v40  ;;  %v5304_v3 = vrot.slane %v21200_v49, %v19159_v57  ;;  %v21835_v15 = vpop.eup %18265 }
 0x414   : > { %27190 = vst [vmem:[#allocation70_spill] sm:$0xff] %v21835_v15  ;;  %18291 = vpow2.f32 %v10024_v4  ;;  %v15480_v17 = vcombine.low %v15458_v6, %v15465_v35  ;;  %v5311_v41 = vrot.slane %v5297_v23, %v19159_v57  ;;  %v21839_v31 = vpop.eup %18267  ;;  %v27192_v55 = vcombine.low %v21729_v13, %v21718_v37  ;;  %v27202_v4 = vld [vmem:[#allocation46_spill] sm:$0xff] }
 0x415   : > { %27189 = vst [vmem:[#allocation69_spill] sm:$0xff] %v21827_v16  ;;  %v15432_v42 = vrot.slane %v15418_v28, %v19159_v57  ;;  %27191 = vst [vmem:[#allocation68_spill] sm:$0xff] %v21839_v31  ;;  %18293 = vpow2.f32 %v10026_v20  ;;  %v8553_v49 = vcombine.high %v21827_v16, %v21827_v16  ;;  %v8560_v25 = vrot.slane %v21827_v16, %v19159_v57  ;;  %v18270_v24 = vpop.eup %18269  ;;  %v27203_v16 = vld [vmem:[#allocation47_spill] sm:$0xff] }
 0x416   : > { %v21845_v52 = vrot.slane %v27192_v55, %v19159_v57  ;;  %18295 = vpow2.f32 %v21787_v21  ;;  %v21856_v20 = vsel %vm8314_vm10, %v15447_v9, 0.0  ;;  %v18272_v37 = vpop.eup %18271  ;;  %v5312_v7 = vcombine.high %v5304_v3, %v5304_v3  ;;  %v27201_v21 = vld [vmem:[#allocation45_spill] sm:$0xff] }
 0x417   : > { %v15433_v48 = vcombine.low %v21566_v53, %v15432_v42  ;;  %v8567_v13 = vrot.slane %v8553_v49, %v19159_v57  ;;  %v8568_v22 = vcombine.high %v8560_v25, %v8560_v25  ;;  %v21860_v58 = vrot.slane %v8560_v25, %v19159_v57  ;;  %v18274_v59 = vpop.eup %18273  ;;  %v27193_v25 = vld [vmem:[#allocation44_spill] sm:$0xff] }
 0x418   : > { %v11514_v12 = vcombine.low %v18270_v24, %v18272_v37  ;;  %v21865_v53 = vrot.slane %v15480_v17, %v19159_v57  ;;  %v5313_v51 = vcombine.high %v5311_v41, %v5311_v41  ;;  %v18276_v19 = vpop.eup %18275  ;;  %v21874_v5 = vrot.slane %v5304_v3, %v19159_v57 }
 0x419   : > { %v8569_v62 = vcombine.high %v8567_v13, %v8567_v13  ;;  %v21868_v56 = vrot.slane %v8567_v13, %v19159_v57  ;;  %v21871_v32 = vrot.slane %v8568_v22, %v19159_v57  ;;  %v18278_v36 = vpop.eup %18277  ;;  %v11515_v44 = vcombine.low %v18274_v59, %v18276_v19  ;;  %v27194_v22 = vld [vmem:[#allocation81_spill] sm:$0xff] }
 0x41a   : > { %v21878_v60 = vcombine.high %v21860_v58, %v21860_v58  ;;  %v21881_v14 = vsel %vm732_vm2, %v15433_v48, 0.0  ;;  %v21884_v43 = vrot.slane %v5311_v41, %v19159_v57  ;;  %v18280_v63 = vpop.eup %18279  ;;  %v21898_v35 = vrot.slane %v5312_v7, %v19159_v57  ;;  %v27195_v59 = vld [vmem:[#allocation77_spill] sm:$0xff] }
 0x41b   : > { %v21887_v54 = vrot.slane %v8569_v62, %v19159_v57  ;;  %v21891_v8 = vcombine.high %v21868_v56, %v21868_v56  ;;  %v21895_v6 = vcombine.high %v21871_v32, %v21871_v32  ;;  %v18282_v28 = vpop.eup %18281  ;;  %v11536_v9 = vrot.slane %v11514_v12, %v19159_v57 }
 0x41c   : > { %v11543_v23 = vrot.slane %v11515_v44, %v19159_v57  ;;  %v11561_v3 = vcombine.low %v18278_v36, %v18280_v63  ;;  %v21903_v42 = vrot.slane %v5313_v51, %v19159_v57  ;;  %v18284_v17 = vpop.eup %18283  ;;  %v9433_v55 = vsub.f32 %v21021_v46, %v21860_v58  ;;  %v27196_v46 = vld [vmem:[#allocation74_spill] sm:$0xff] }
 0x41d   : > { %v21907_v41 = vcombine.high %v21887_v54, %v21887_v54  ;;  %v9434_v49 = vsub.f32 %v21053_v29, %v21871_v32  ;;  %v9441_v24 = vsub.f32 %v27193_v25, %v21860_v58  ;;  %v18286_v48 = vpop.eup %18285  ;;  %v11562_v13 = vcombine.low %v18282_v28, %v18284_v17  ;;  %v27197_v29 = vld [vmem:[#allocation80_spill] sm:$0xff]  ;;  %v27198_v44 = vld [vmem:[#allocation82_spill] sm:$0xff]  ;;  %v27199_v17 = vld [vmem:[#allocation59_spill] sm:$0xff] }
 0x41e   : > { %v11545_v37 = vcombine.low %v11536_v9, %v11543_v23  ;;  %v9435_v7 = vsub.f32 %v27194_v22, %v21878_v60  ;;  %v9437_v12 = vsub.f32 %v27195_v59, %v21868_v56  ;;  %v18288_v51 = vpop.eup %18287  ;;  %v11571_v19 = vrot.slane %v11561_v3, %v19159_v57  ;;  %v27200_v22 = vld [vmem:[#allocation49_spill] sm:$0xff] }
 0x41f   : > { %v9436_v62 = vsub.f32 %v27196_v46, %v21895_v6  ;;  %v9438_v36 = vsub.f32 %v27197_v29, %v21887_v54  ;;  %v9439_v63 = vsub.f32 %v27198_v44, %v21891_v8  ;;  %v18290_v9 = vpop.eup %18289  ;;  %v11563_v28 = vcombine.low %v18286_v48, %v18288_v51 }
 0x420   : > { %v11578_v23 = vrot.slane %v11562_v13, %v19159_v57  ;;  %v9440_v25 = vsub.f32 %v27199_v17, %v21907_v41  ;;  %v9442_v59 = vsub.f32 %v27200_v22, %v21871_v32  ;;  %v9443_v46 = vsub.f32 %v27201_v21, %v21878_v60 }
 0x421   : > { %v18292_v3 = vpop.eup %18291  ;;  %v9444_v29 = vsub.f32 %v27202_v4, %v21895_v6  ;;  %v9445_v44 = vsub.f32 %v27203_v16, %v21868_v56  ;;  %v9722_v15 = vmul.f32 1.442695, %v9433_v55  ;;  %v21938_v13 = vrot.slane %v11545_v37, %v19159_v57 }
 0x422   : > { %v18294_v48 = vpop.eup %18293  ;;  %v11564_v51 = vcombine.low %v18290_v9, %v18292_v3  ;;  %v11585_v17 = vrot.slane %v11563_v28, %v19159_v57  ;;  %v9724_v18 = vmul.f32 1.442695, %v9434_v49  ;;  %v9726_v21 = vmul.f32 1.442695, %v9435_v7  ;;  %v27206_v49 = vld [vmem:[#allocation51_spill] sm:$0xff] }
 0x423   : > { %27204 = vst [vmem:[#allocation44_spill] sm:$0xff] %v21938_v13  ;;  %v21941_v32 = vpop.eup %18295  ;;  %v11616_v22 = vrot.slane %v18294_v48, %v19159_v57  ;;  %18297 = vpow2.f32 %v9722_v15  ;;  %v9728_v60 = vmul.f32 1.442695, %v9436_v62  ;;  %v11593_v6 = vcombine.low %v11571_v19, %v11578_v23  ;;  %v27212_v48 = vld [vmem:[#allocation52_spill] sm:$0xff] }
 0x424   : > { %27205 = vst [vmem:[#allocation81_spill] sm:$0xff] %v21941_v32  ;;  %v11592_v4 = vrot.slane %v11564_v51, %v19159_v57  ;;  %18299 = vpow2.f32 %v9724_v18  ;;  %v9730_v16 = vmul.f32 1.442695, %v9437_v12  ;;  %v9732_v55 = vmul.f32 1.442695, %v9438_v36 }
 0x425   : > { %v11623_v56 = vrot.slane %v11616_v22, %v19159_v57  ;;  %18301 = vpow2.f32 %v9726_v21  ;;  %v9734_v37 = vmul.f32 1.442695, %v9439_v63  ;;  %v9446_v28 = vsub.f32 %v27206_v49, %v21887_v54  ;;  %v27217_v49 = vld [vmem:[#allocation76_spill] sm:$0xff] }
 0x426   : > { %v11594_v9 = vcombine.low %v11585_v17, %v11592_v4  ;;  %18303 = vpow2.f32 %v9728_v60  ;;  %v9736_v3 = vmul.f32 1.442695, %v9440_v25  ;;  %v9447_v15 = vsub.f32 %v21470_v33, %v21891_v8 }
 0x427   : > { %v9448_v7 = vsub.f32 %v21649_v50, %v21907_v41  ;;  %18305 = vpow2.f32 %v9730_v16  ;;  %v9738_v18 = vmul.f32 1.442695, %v9441_v24  ;;  %v9449_v19 = vsub.f32 %v21652_v45, %v21860_v58  ;;  %v27210_v41 = vld [vmem:[#allocation73_spill] sm:$0xff]  ;;  %v21965_v58 = vpop.f32.mrf.mxu0 }
 0x428   : > { %v21953_v12 = vrot.slane %v11594_v9, %v19159_v57  ;;  %18307 = vpow2.f32 %v9732_v55  ;;  %v9740_v62 = vmul.f32 1.442695, %v9442_v59  ;;  %v21958_v54 = vrot.slane %v11593_v6, %v19159_v57  ;;  %27211 = vst [vmem:[#allocation82_spill] sm:$0xff] %v21965_v58 }
 0x429   : > { %v21961_v36 = vsel %vm8314_vm10, %v11623_v56, 0.0  ;;  %18309 = vpow2.f32 %v9734_v37  ;;  %v9742_v33 = vmul.f32 1.442695, %v9443_v46  ;;  %v9744_v50 = vmul.f32 1.442695, %v9444_v29  ;;  %v27213_v46 = vld [vmem:[#allocation14_spill] sm:$0xff]  ;;  %v18070_v51 = vpop.f32.mrf.mxu0 }
 0x42a   : > { %27207 = vst [vmem:[#allocation77_spill] sm:$0xff] %v21953_v12  ;;  %27208 = vst [vmem:[#allocation74_spill] sm:$0xff] %v21958_v54  ;;  %18311 = vpow2.f32 %v9736_v3  ;;  %v9746_v8 = vmul.f32 1.442695, %v9445_v44  ;;  %v17077_v24 = vadd.f32 %v21881_v14, %v27210_v41  ;;  %v9748_v63 = vmul.f32 1.442695, %v9446_v28 }
 0x42b   : > { %27209 = vst [vmem:[#allocation80_spill] sm:$0xff] %v21961_v36  ;;  %18313 = vpow2.f32 %v9738_v18  ;;  %v9750_v23 = vmul.f32 1.442695, %v9447_v15  ;;  %v9752_v45 = vmul.f32 1.442695, %v9448_v7  ;;  %vm6358_vm4 = vcmp.eq.s32.totalorder %v27213_v46, %v27212_v48 }
 0x42c   : > { %18315 = vpow2.f32 %v9740_v62  ;;  %v17079_v59 = vadd.f32 %v21856_v20, %v17077_v24  ;;  %v9754_v29 = vmul.f32 1.442695, %v9449_v19  ;;  %v21974_v14 = vcombine.high %v21874_v5, %v21874_v5  ;;  %v27221_v24 = vld [vmem:[#allocation53_spill] sm:$0xff] }
 0x42d   : > { %18317 = vpow2.f32 %v9742_v33  ;;  %v7594_v44 = vcombine.low %v21874_v5, %v21898_v35  ;;  %v21979_v22 = vsel %vm6358_vm4, 1.0, %v26932_v30  ;;  %v18021_v20 = vcombine.high %v21874_v5, %v21898_v35 }
 0x42e   : > { %18319 = vpow2.f32 %v9744_v50  ;;  %v17080_v17 = vrot.slane %v17079_v59, 4  ;;  %27214 = vst [vmem:[#allocation59_spill] sm:$0xff] %v21979_v22  ;;  %v21985_v21 = vcombine.high %v21884_v43, %v21884_v43  ;;  %v7641_v4 = vcombine.low %v21884_v43, %v21903_v42 }
 0x42f   : > { %18321 = vpow2.f32 %v9746_v8  ;;  %v7622_v60 = vrot.slane %v7594_v44, %v19159_v57  ;;  %v21994_v16 = vcombine.high %v21898_v35, %v21898_v35  ;;  %v13782_v56 = vcombine.high %v21631_v11, %v21631_v11 }
 0x430   : > { %v21990_v6 = vpop.eup %18297  ;;  %18323 = vpow2.f32 %v9748_v63  ;;  %v13784_v55 = vcombine.high %v21622_v39, %v21622_v39  ;;  %v22004_v9 = vcombine.high %v21903_v42, %v21903_v42  ;;  %v13792_v3 = vrot.slane %v21979_v22, %v19159_v57 }
 0x431   : > { %27215 = vst [vmem:[#allocation49_spill] sm:$0xff] %v21990_v6  ;;  %v22000_v37 = vpop.eup %18299  ;;  %18325 = vpow2.f32 %v9750_v23  ;;  %v7624_v28 = vcombine.low %v27217_v49, %v7622_v60  ;;  %v22011_v7 = vadd.f32 %v17080_v17, %v17079_v59  ;;  %v22016_v11 = vrot.slane %v18021_v20, %v19159_v57 }
 0x432   : > { %27216 = vst [vmem:[#allocation45_spill] sm:$0xff] %v22000_v37  ;;  %v22009_v15 = vpop.eup %18301  ;;  %18327 = vpow2.f32 %v9752_v45  ;;  %v22021_v19 = vrot.slane %v7641_v4, %v19159_v57  ;;  %v13800_v62 = vcombine.high %v13792_v3, %v13792_v3  ;;  %v13808_v33 = vrot.slane %v13792_v3, %v19159_v57  ;;  %v27222_v4 = vld [vmem:[#allocation84_spill] sm:$0xff] }
 0x433   : > { %27218 = vst [vmem:[#allocation46_spill] sm:$0xff] %v22009_v15  ;;  %27219 = vst [vmem:[#allocation47_spill] sm:$0xff] %v22011_v7  ;;  %v22018_v18 = vpop.eup %18303  ;;  %18329 = vpow2.f32 %v9754_v29  ;;  %v14856_v8 = vmul.f32 %v13782_v56, %v21874_v5  ;;  %v14857_v41 = vmul.f32 %v13784_v55, %v21898_v35  ;;  %v4464_v63 = vcombine.high %v27221_v24, %v27221_v24  ;;  %v27223_v56 = vld [vmem:[#allocation43_spill] sm:$0xff] }
 0x434   : > { %27220 = vst [vmem:[#allocation51_spill] sm:$0xff] %v22018_v18  ;;  %v18306_v50 = vpop.eup %18305  ;;  %v4471_v23 = vrot.slane %v27221_v24, %v19159_v57  ;;  %v22033_v29 = vrot.slane %v7624_v28, %v19159_v57  ;;  %v13822_v44 = vrot.slane %v13800_v62, %v19159_v57  ;;  %v13830_v51 = vcombine.high %v13808_v33, %v13808_v33  ;;  %v27238_v18 = vld [vmem:[#allocation57_spill] sm:$0xff] }
 0x435   : > { %v18308_v45 = vpop.eup %18307  ;;  %v14858_v20 = vmul.f32 %v13808_v33, %v21974_v14  ;;  %v16347_v60 = vcombine.low %v14856_v8, %v14857_v41  ;;  %v27224_v55 = vcombine.low %v27222_v4, %v27223_v56  ;;  %v4478_v3 = vrot.slane %v4464_v63, %v19159_v57 }
 0x436   : > { %v18310_v17 = vpop.eup %18309  ;;  %v10618_v25 = vcombine.low %v18306_v50, %v18308_v45  ;;  %v13832_v59 = vcombine.high %v13822_v44, %v13822_v44  ;;  %v14859_v28 = vmul.f32 %v13822_v44, %v21994_v16  ;;  %v4479_v39 = vcombine.high %v4471_v23, %v4471_v23 }
 0x437   : > { %v16368_v49 = vrot.slane %v27224_v55, %v19159_v57  ;;  %v18312_v24 = vpop.eup %18311  ;;  %v14860_v12 = vmul.f32 %v13830_v51, %v21884_v43  ;;  %v16375_v33 = vrot.slane %v16347_v60, %v19159_v57  ;;  %v4480_v8 = vcombine.high %v4478_v3, %v4478_v3 }
 0x438   : > { %v18314_v36 = vpop.eup %18313  ;;  %v10619_v62 = vcombine.low %v18310_v17, %v18312_v24  ;;  %v14861_v54 = vmul.f32 %v13832_v59, %v21903_v42  ;;  %v16393_v4 = vcombine.low %v14858_v20, %v14859_v28  ;;  %v22047_v56 = vrot.slane %v4471_v23, %v19159_v57  ;;  %v27227_v28 = vld [vmem:[#allocation60_spill] sm:$0xff] }
 0x439   : > { %v18316_v41 = vpop.eup %18315  ;;  %v22050_v50 = vrot.slane %v4478_v3, %v19159_v57  ;;  %v16377_v51 = vcombine.low %v16368_v49, %v16375_v33  ;;  %v10640_v60 = vrot.slane %v10618_v25, %v19159_v57  ;;  %v22058_v23 = vrot.slane %v4479_v39, %v19159_v57 }
 0x43a   : > { %27225 = vst [vmem:[#allocation73_spill] sm:$0xff] %v22047_v56  ;;  %v18318_v63 = vpop.eup %18317  ;;  %v10647_v45 = vrot.slane %v10619_v62, %v19159_v57  ;;  %v10665_v44 = vcombine.low %v18314_v36, %v18316_v41  ;;  %v16394_v20 = vcombine.low %v14860_v12, %v14861_v54  ;;  %v22063_v36 = vrot.slane %v16393_v4, %v19159_v57  ;;  %v27230_v54 = vld [vmem:[#allocation7_spill] sm:$0xff] }
 0x43b   : > { %v18320_v55 = vpop.eup %18319  ;;  %27226 = vst [vmem:[#allocation52_spill] sm:$0xff] %v22058_v23  ;;  %v22066_v49 = vrot.slane %v4480_v8, %v19159_v57  ;;  %v22070_v33 = vcombine.high %v22047_v56, %v22047_v56  ;;  %v22074_v12 = vcombine.high %v22050_v50, %v22050_v50  ;;  %vm6334_vm5 = vcmp.eq.s32.totalorder %v27213_v46, %v27230_v54 }
 0x43c   : > { %v18322_v24 = vpop.eup %18321  ;;  %v10666_v3 = vcombine.low %v18318_v63, %v18320_v55  ;;  %v10649_v25 = vcombine.low %v10640_v60, %v10647_v45  ;;  %v10675_v4 = vrot.slane %v10665_v44, %v19159_v57  ;;  %v22081_v63 = vrot.slane %v16377_v51, %v19159_v57  ;;  %v22095_v44 = vpop.f32.mrf.mxu1 }
 0x43d   : > { %27228 = vst [vmem:[#allocation76_spill] sm:$0xff] %v22066_v49  ;;  %v18324_v62 = vpop.eup %18323  ;;  %27229 = vst [vmem:[#allocation53_spill] sm:$0xff] %v22070_v33  ;;  %v22084_v55 = vrot.slane %v16394_v20, %v19159_v57  ;;  %v22088_v60 = vcombine.high %v22058_v23, %v22058_v23  ;;  %v22091_v17 = vsel %vm6334_vm5, 1.0, %v26932_v30  ;;  %v18005_v13 = vcombine.high %v22047_v56, %v22058_v23 }
 0x43e   : > { %v18326_v39 = vpop.eup %18325  ;;  %v10667_v41 = vcombine.low %v18322_v24, %v18324_v62  ;;  %v10682_v8 = vrot.slane %v10666_v3, %v19159_v57  ;;  %27232 = vst [vmem:[#allocation43_spill] sm:$0xff] %v22091_v17  ;;  %v6698_v24 = vcombine.low %v22047_v56, %v22058_v23  ;;  %27233 = vst [vmem:[#allocation60_spill] sm:$0xff] %v22095_v44  ;;  %v18106_v37 = vpop.f32.mrf.mxu1 }
 0x43f   : > { %v18328_v45 = vpop.eup %18327  ;;  %27231 = vst [vmem:[#allocation84_spill] sm:$0xff] %v22088_v60  ;;  %v6745_v20 = vcombine.low %v22050_v50, %v22066_v49  ;;  %v22102_v59 = vrot.slane %v10649_v25, %v19159_v57  ;;  %v22107_v31 = vcombine.high %v22066_v49, %v22066_v49  ;;  %v12886_v25 = vcombine.high %v21812_v0, %v21812_v0 }
 0x440   : > { %v18330_v3 = vpop.eup %18329  ;;  %v10668_v62 = vcombine.low %v18326_v39, %v18328_v45  ;;  %v10697_v51 = vcombine.low %v10675_v4, %v10682_v8  ;;  %v6726_v32 = vrot.slane %v6698_v24, %v19159_v57  ;;  %v10689_v39 = vrot.slane %v10667_v41, %v19159_v57  ;;  %v27235_v8 = vld [vmem:[#allocation90_spill] sm:$0xff] }
 0x441   : > { %27234 = vst [vmem:[#allocation7_spill] sm:$0xff] %v22102_v59  ;;  %v10720_v7 = vrot.slane %v18330_v3, %v19159_v57  ;;  %v27236_v59 = vld [vmem:[#allocation92_spill] sm:$0xff]  ;;  %v22118_v3 = vrot.slane %v6745_v20, %v19159_v57  ;;  %v12888_v15 = vcombine.high %v21806_v10, %v21806_v10  ;;  %v12896_v37 = vrot.slane %v22091_v17, %v19159_v57 }
 0x442   : > { %v10696_v4 = vrot.slane %v10668_v62, %v19159_v57  ;;  %v6728_v6 = vcombine.low %v27236_v59, %v6726_v32  ;;  %v22125_v41 = vrot.slane %v10697_v51, %v19159_v57  ;;  %v22132_v32 = vrot.slane %v18005_v13, %v19159_v57 }
 0x443   : > { %v10727_v62 = vrot.slane %v10720_v7, %v19159_v57  ;;  %v12904_v20 = vcombine.high %v12896_v37, %v12896_v37  ;;  %v12912_v10 = vrot.slane %v12896_v37, %v19159_v57  ;;  %v14720_v45 = vmul.f32 %v12886_v25, %v22047_v56 }
 0x444   : > { %27237 = vst [vmem:[#allocation90_spill] sm:$0xff] %v22125_v41  ;;  %v10698_v59 = vcombine.low %v10689_v39, %v10696_v4  ;;  %v14721_v51 = vmul.f32 %v12888_v15, %v22058_v23  ;;  %v5346_v44 = vcombine.high %v27238_v18, %v27238_v18  ;;  %v5353_v24 = vrot.slane %v27238_v18, %v19159_v57 }
 0x445   : > { %v22143_v0 = vrot.slane %v6728_v6, %v19159_v57  ;;  %v12926_v7 = vrot.slane %v12904_v20, %v19159_v57  ;;  %v27239_v39 = vcombine.low %v21831_v2, %v21816_v27  ;;  %v12934_v15 = vcombine.high %v12912_v10, %v12912_v10 }
 0x446   : > { %v15451_v25 = vcombine.low %v14720_v45, %v14721_v51  ;;  %v5360_v37 = vrot.slane %v5346_v44, %v19159_v57  ;;  %v5361_v58 = vcombine.high %v5353_v24, %v5353_v24  ;;  %v14722_v18 = vmul.f32 %v12912_v10, %v22070_v33  ;;  %v27242_v10 = vld [vmem:[#allocation8_spill] sm:$0xff] }
 0x447   : > { %v15472_v4 = vrot.slane %v27239_v39, %v19159_v57  ;;  %v12936_v46 = vcombine.high %v12926_v7, %v12926_v7  ;;  %v14723_v6 = vmul.f32 %v12926_v7, %v22088_v60  ;;  %v22156_v23 = vrot.slane %v5353_v24, %v19159_v57 }
 0x448   : > { %v15479_v20 = vrot.slane %v15451_v25, %v19159_v57  ;;  %v5362_v13 = vcombine.high %v5360_v37, %v5360_v37  ;;  %v22160_v56 = vrot.slane %v5360_v37, %v19159_v57  ;;  %v22163_v27 = vrot.slane %v5361_v58, %v19159_v57 }
 0x449   : > { %v22166_v2 = vrot.slane %v10698_v59, %v19159_v57  ;;  %v14725_v44 = vmul.f32 %v12936_v46, %v22066_v49  ;;  %v15497_v45 = vcombine.low %v14722_v18, %v14723_v6  ;;  %v6261_v51 = vcombine.high %v27242_v10, %v27242_v10  ;;  %v27246_v59 = vld [vmem:[#allocation21_spill] sm:$0xff] }
 0x44a   : > { %27240 = vst [vmem:[#allocation92_spill] sm:$0xff] %v22160_v56  ;;  %v14724_v24 = vmul.f32 %v12934_v15, %v22050_v50  ;;  %v15481_v7 = vcombine.low %v15472_v4, %v15479_v20  ;;  %v22173_v39 = vrot.slane %v5362_v13, %v19159_v57  ;;  %v22177_v25 = vcombine.high %v22156_v23, %v22156_v23  ;;  %v27248_v4 = vld [vmem:[#allocation22_spill] sm:$0xff] }
 0x44b   : > { %27241 = vst [vmem:[#allocation57_spill] sm:$0xff] %v22166_v2  ;;  %v22181_v58 = vcombine.high %v22160_v56, %v22160_v56  ;;  %v22185_v46 = vcombine.high %v22163_v27, %v22163_v27  ;;  %v22188_v37 = vrot.slane %v6261_v51, %v27246_v59  ;;  %vm6359_vm6 = vcmp.eq.s32.totalorder %v27248_v4, %v27212_v48  ;;  %v27250_v51 = vld [vmem:[#allocation5_spill] sm:$0xff] }
 0x44c   : > { %27243 = vst [vmem:[#allocation8_spill] sm:$0xff] %v22173_v39  ;;  %v22193_v13 = vsel %vm8314_vm10, %v10727_v62, 0.0  ;;  %v15498_v18 = vcombine.low %v14724_v24, %v14725_v44  ;;  %v7643_v6 = vcombine.low %v22156_v23, %v22163_v27  ;;  %v22202_v10 = vrot.slane %v15497_v45, %v19159_v57 }
 0x44d   : > { %27244 = vst [vmem:[#allocation93_spill] sm:$0xff] %v22181_v58  ;;  %27245 = vst [vmem:[#allocation94_spill] sm:$0xff] %v22185_v46  ;;  %vm6360_vm7 = vcmp.eq.s32.totalorder %v27250_v51, %v22188_v37  ;;  %v22207_v48 = vsel %vm6359_vm6, 1.0, %v26932_v30  ;;  %v27253_v44 = vcombine.high %v21884_v43, %v21903_v42  ;;  %v7695_v45 = vrot.slane %v22177_v25, %v19159_v57 }
 0x44e   : > { %27247 = vst [vmem:[#allocation95_spill] sm:$0xff] %v22188_v37  ;;  %27249 = vst [vmem:[#allocation96_spill] sm:$0xff] %v22193_v13  ;;  %v22210_v62 = vsel %vm6360_vm7, 1.0, %v26932_v30  ;;  %v7671_v15 = vrot.slane %v7643_v6, %v19159_v57  ;;  %v22220_v20 = vrot.slane %v15481_v7, %v19159_v57  ;;  %v22224_v13 = vcombine.high %v22173_v39, %v22173_v39 }
 0x44f   : > { %27251 = vst [vmem:[#allocation97_spill] sm:$0xff] %v22207_v48  ;;  %27252 = vst [vmem:[#allocation98_spill] sm:$0xff] %v22210_v62  ;;  %v7664_v24 = vrot.slane %v27253_v44, %v19159_v57  ;;  %v7703_v2 = vcombine.low %v22185_v46, %v22160_v56  ;;  %v7704_v41 = vcombine.low %v22173_v39, %v22181_v58 }
 0x450   : > { %27254 = vst [vmem:[#allocation99_spill] sm:$0xff] %v22224_v13  ;;  %v22231_v44 = vrot.slane %v15498_v18, %v19159_v57  ;;  %v13785_v37 = vcombine.high %v21979_v22, %v21979_v22  ;;  %v13840_v7 = vrot.slane %v22207_v48, %v19159_v57  ;;  %v27255_v13 = vcombine.low %v22016_v11, %v22021_v19 }
 0x451   : > { %v7673_v6 = vcombine.low %v7664_v24, %v7671_v15  ;;  %v7702_v33 = vrot.slane %v7695_v45, %v19159_v57  ;;  %v22243_v38 = vrot.slane %v7703_v2, %v19159_v57  ;;  %v13855_v18 = vrot.slane %v22210_v62, %v19159_v57 }
 0x452   : > { %v7680_v60 = vrot.slane %v27255_v13, %v19159_v57  ;;  %v22249_v24 = vrot.slane %v7704_v41, %v19159_v57  ;;  %v13799_v48 = vrot.slane %v13785_v37, %v19159_v57  ;;  %v13847_v22 = vrot.slane %v13840_v7, %v19159_v57 }
 0x453   : > { %v7687_v15 = vrot.slane %v7673_v6, %v19159_v57  ;;  %v27256_v19 = vcombine.low %v27227_v28, %v22033_v29  ;;  %v13863_v13 = vcombine.high %v13855_v18, %v13855_v18  ;;  %v13871_v45 = vrot.slane %v13855_v18, %v19159_v57 }
 0x454   : > { %v13801_v6 = vcombine.high %v13799_v48, %v13799_v48  ;;  %v13815_v41 = vrot.slane %v13799_v48, %v19159_v57  ;;  %v14866_v40 = vmul.f32 %v13847_v22, %v22177_v25  ;;  %v8425_v37 = vsel %vm8314_vm10, %v7702_v33, -inf }
 0x455   : > { %v8422_v2 = vsel %vm732_vm2, %v27256_v19, -inf  ;;  %v7688_v62 = vcombine.low %v7680_v60, %v7687_v15  ;;  %v13885_v7 = vrot.slane %v13863_v13, %v19159_v57  ;;  %v13893_v26 = vcombine.high %v13871_v45, %v13871_v45 }
 0x456   : > { %v14867_v11 = vmul.f32 %v13871_v45, %v22185_v46  ;;  %v7735_v29 = vcombine.low %v22243_v38, %v22249_v24  ;;  %v13829_v18 = vrot.slane %v13801_v6, %v19159_v57  ;;  %v13831_v60 = vcombine.high %v13815_v41, %v13815_v41  ;;  %v27257_v24 = vld [vmem:[#allocation72_spill] sm:$0xff] }
 0x457   : > { %v8423_v28 = vsel %vm732_vm2, %v7688_v62, -inf  ;;  %v13895_v19 = vcombine.high %v13885_v7, %v13885_v7  ;;  %v14868_v48 = vmul.f32 %v13885_v7, %v22160_v56  ;;  %v14869_v22 = vmul.f32 %v13893_v26, %v22173_v39  ;;  %v27273_v56 = vld [vmem:[#allocation50_spill] sm:$0xff] }
 0x458   : > { %v8424_v15 = vmax.f32 %v8422_v2, %v8423_v28  ;;  %v13833_v33 = vcombine.high %v13829_v18, %v13829_v18  ;;  %v14862_v13 = vmul.f32 %v13815_v41, %v21985_v21  ;;  %v14863_v61 = vmul.f32 %v13829_v18, %v22004_v9 }
 0x459   : > { %v16448_v45 = vrot.slane %v14866_v40, %v19159_v57  ;;  %v14870_v38 = vmul.f32 %v13895_v19, %v22181_v58  ;;  %v16456_v62 = vcombine.low %v14867_v11, %v14868_v48  ;;  %v4513_v6 = vcombine.high %v27257_v24, %v27257_v24  ;;  %v27272_v58 = vld [vmem:[#allocation64_spill] sm:$0xff] }
 0x45a   : > { %v8426_v46 = vmax.f32 %v8424_v15, %v8425_v37  ;;  %v14864_v2 = vmul.f32 %v13831_v60, %v22156_v23  ;;  %v14865_v7 = vmul.f32 %v13833_v33, %v22163_v27  ;;  %v16395_v28 = vcombine.low %v14862_v13, %v14863_v61  ;;  %v22283_v37 = vpop.f32.mrf.mxu0 }
 0x45b   : > { %v4520_v26 = vrot.slane %v27257_v24, %v19159_v57  ;;  %v16455_v18 = vrot.slane %v16448_v45, %v19159_v57  ;;  %v16457_v39 = vcombine.low %v14869_v22, %v14870_v38  ;;  %v4527_v40 = vrot.slane %v4513_v6, %v19159_v57  ;;  %27258 = vst [vmem:[#allocation72_spill] sm:$0xff] %v22283_v37  ;;  %v27259_v6 = vld [vmem:[#allocation79_spill] sm:$0xff] }
 0x45c   : > { %v8427_v41 = vrot.slane %v8426_v46, 4  ;;  %v16396_v11 = vcombine.low %v14864_v2, %v14865_v7  ;;  %v16417_v15 = vrot.slane %v16395_v28, %v19159_v57  ;;  %v16466_v19 = vrot.slane %v16456_v62, %v19159_v57  ;;  %v18073_v24 = vpop.f32.mrf.mxu0 }
 0x45d   : > { %v4528_v60 = vcombine.high %v4520_v26, %v4520_v26  ;;  %v16473_v61 = vrot.slane %v16457_v39, %v19159_v57  ;;  %v4529_v33 = vcombine.high %v4527_v40, %v4527_v40  ;;  %v22289_v13 = vrot.slane %v4520_v26, %v19159_v57 }
 0x45e   : > { %v8428_v48 = vmax.f32 %v8426_v46, %v8427_v41  ;;  %v16424_v22 = vrot.slane %v16396_v11, %v19159_v57  ;;  %v22293_v45 = vrot.slane %v4527_v40, %v19159_v57  ;;  %v6212_v62 = vcombine.high %v27259_v6, %v27259_v6 }
 0x45f   : > { %v22296_v38 = vrot.slane %v4528_v60, %v19159_v57  ;;  %v27260_v2 = vcombine.low %v22063_v36, %v22084_v55  ;;  %v27261_v28 = vcombine.low %v27235_v8, %v22081_v63  ;;  %v22312_v40 = vcombine.high %v22289_v13, %v22289_v13 }
 0x460   : > { %v8429_v39 = vrot.slane %v8428_v48, 2  ;;  %v16426_v41 = vcombine.low %v16417_v15, %v16424_v22  ;;  %v22319_v60 = vrot.slane %v6212_v62, %v27246_v59  ;;  %v16488_v36 = vcombine.low %v16466_v19, %v16473_v61 }
 0x461   : > { %v16433_v7 = vrot.slane %v27260_v2, %v19159_v57  ;;  %v17174_v26 = vsel %vm732_vm2, %v27261_v28, 0.0  ;;  %v22316_v11 = vcombine.high %v22296_v38, %v22296_v38  ;;  %v22322_v55 = vrot.slane %v4529_v33, %v19159_v57 }
 0x462   : > { %27262 = vst [vmem:[#allocation79_spill] sm:$0xff] %v22319_v60  ;;  %v8430_v24 = vmax.f32 %v8428_v48, %v8429_v39  ;;  %v22326_v63 = vcombine.high %v22293_v45, %v22293_v45  ;;  %v22329_v8 = vrot.slane %v7735_v29, %v19159_v57  ;;  %v16440_v15 = vrot.slane %v16426_v41, %v19159_v57 }
 0x463   : > { %v17177_v22 = vsel %vm8314_vm10, %v16455_v18, 0.0  ;;  %v6747_v6 = vcombine.low %v22289_v13, %v22296_v38  ;;  %vm6335_vm8 = vcmp.eq.s32.totalorder %v27248_v4, %v27230_v54  ;;  %vm6336_vm9 = vcmp.eq.s32.totalorder %v27250_v51, %v22319_v60  ;;  %v27275_v4 = vld [vmem:[#allocation62_spill] sm:$0xff] }
 0x464   : > { %27263 = vst [vmem:[#allocation100_spill] sm:$0xff] %v22329_v8  ;;  %v8431_v62 = vrot.slane %v8430_v24, 1  ;;  %v27264_v19 = vcombine.high %v22050_v50, %v22066_v49  ;;  %v16441_v48 = vcombine.low %v16433_v7, %v16440_v15  ;;  %v6799_v18 = vrot.slane %v22312_v40, %v19159_v57 }
 0x465   : > { %v6775_v61 = vrot.slane %v6747_v6, %v19159_v57  ;;  %v6807_v33 = vcombine.low %v22316_v11, %v22293_v45  ;;  %v22351_v54 = vrot.slane %v16488_v36, %v19159_v57  ;;  %v6808_v2 = vcombine.low %v22322_v55, %v22326_v63 }
 0x466   : > { %v6768_v29 = vrot.slane %v27264_v19, %v19159_v57  ;;  %v22348_v39 = vmax.f32 %v8430_v24, %v8431_v62  ;;  %v12889_v28 = vcombine.high %v22091_v17, %v22091_v17  ;;  %v17175_v7 = vsel %vm732_vm2, %v16441_v48, 0.0 }
 0x467   : > { %27266 = vst [vmem:[#allocation102_spill] sm:$0xff] %v22351_v54  ;;  %v22359_v41 = vsel %vm6335_vm8, 1.0, %v26932_v30  ;;  %v6806_v6 = vrot.slane %v6799_v18, %v19159_v57  ;;  %v17176_v62 = vadd.f32 %v17175_v7, %v17174_v26  ;;  %v22370_v19 = vsel %vm6336_vm9, 1.0, %v26932_v30  ;;  %v27276_v54 = vld [vmem:[#allocation71_spill] sm:$0xff] }
 0x468   : > { %27265 = vst [vmem:[#allocation101_spill] sm:$0xff] %v22348_v39  ;;  %27267 = vst [vmem:[#allocation103_spill] sm:$0xff] %v22359_v41  ;;  %v6777_v15 = vcombine.low %v6768_v29, %v6775_v61  ;;  %v8994_v24 = vcombine.high %v22348_v39, %v22348_v39  ;;  %v9001_v36 = vrot.slane %v22348_v39, %v19159_v57 }
 0x469   : > { %27268 = vst [vmem:[#allocation104_spill] sm:$0xff] %v22370_v19  ;;  %v22376_v29 = vrot.slane %v6807_v33, %v19159_v57  ;;  %v22379_v61 = vrot.slane %v6808_v2, %v19159_v57  ;;  %v22382_v18 = vrot.slane %v12889_v28, %v19159_v57  ;;  %v22388_v17 = vadd.f32 %v17177_v22, %v17176_v62 }
 0x46a   : > { %v22373_v48 = vrot.slane %v6777_v15, %v19159_v57  ;;  %v9008_v26 = vrot.slane %v8994_v24, %v19159_v57  ;;  %v9009_v7 = vcombine.high %v9001_v36, %v9001_v36  ;;  %v22386_v46 = vrot.slane %v9001_v36, %v19159_v57 }
 0x46b   : > { %v27269_v15 = vcombine.low %v22132_v32, %v22118_v3  ;;  %v27270_v2 = vcombine.low %v21845_v52, %v22143_v0  ;;  %v22401_v28 = vsel %vm8314_vm10, %v6806_v6, -inf  ;;  %v12944_v24 = vrot.slane %v22359_v41, %v19159_v57  ;;  %v27271_v32 = vld [vmem:[#allocation65_spill] sm:$0xff]  ;;  %v27274_v6 = vld [vmem:[#allocation63_spill] sm:$0xff] }
 0x46c   : > { %v9010_v36 = vcombine.high %v9008_v26, %v9008_v26  ;;  %v9024_v22 = vrot.slane %v9008_v26, %v19159_v57  ;;  %v9031_v62 = vrot.slane %v9009_v7, %v19159_v57  ;;  %v9039_v3 = vcombine.high %v22386_v46, %v22386_v46 }
 0x46d   : > { %v6784_v33 = vrot.slane %v27269_v15, %v19159_v57  ;;  %v22398_v39 = vsel %vm732_vm2, %v27270_v2, -inf  ;;  %v9586_v52 = vsub.f32 %v27271_v32, %v22386_v46  ;;  %v12905_v15 = vcombine.high %v22382_v18, %v22382_v18 }
 0x46e   : > { %v9038_v2 = vrot.slane %v9010_v36, %v19159_v57  ;;  %v9040_v41 = vcombine.high %v9024_v22, %v9024_v22  ;;  %v9041_v26 = vcombine.high %v9031_v62, %v9031_v62  ;;  %v9587_v7 = vsub.f32 %v27272_v58, %v9031_v62 }
 0x46f   : > { %v6792_v0 = vcombine.low %v6784_v33, %v22373_v48  ;;  %v9588_v37 = vsub.f32 %v27273_v56, %v9039_v3  ;;  %v9594_v51 = vsub.f32 %v21974_v14, %v22386_v46  ;;  %v9602_v48 = vsub.f32 %v22177_v25, %v22386_v46 }
 0x470   : > { %v12919_v33 = vrot.slane %v22382_v18, %v19159_v57  ;;  %v9042_v32 = vcombine.high %v9038_v2, %v9038_v2  ;;  %v9589_v59 = vsub.f32 %v27274_v6, %v9041_v26  ;;  %v9590_v36 = vsub.f32 %v27275_v4, %v9024_v22 }
 0x471   : > { %v9591_v58 = vsub.f32 %v27276_v54, %v9038_v2  ;;  %v9592_v56 = vsub.f32 %v21874_v5, %v9040_v41  ;;  %v9595_v8 = vsub.f32 %v21994_v16, %v9031_v62  ;;  %v9596_v14 = vsub.f32 %v21884_v43, %v9039_v3 }
 0x472   : > { %v9593_v25 = vsub.f32 %v21898_v35, %v9042_v32  ;;  %v9597_v46 = vsub.f32 %v21903_v42, %v9041_v26  ;;  %v10028_v18 = vmul.f32 1.442695, %v9586_v52  ;;  %v10030_v30 = vmul.f32 1.442695, %v9587_v7 }
 0x473   : > { %v9598_v6 = vsub.f32 %v21985_v21, %v9024_v22  ;;  %v9599_v4 = vsub.f32 %v22004_v9, %v9038_v2  ;;  %v10032_v49 = vmul.f32 1.442695, %v9588_v37  ;;  %v10034_v60 = vmul.f32 1.442695, %v9589_v59 }
 0x474   : > { %v9600_v54 = vsub.f32 %v22156_v23, %v9040_v41  ;;  %v9601_v5 = vsub.f32 %v22163_v27, %v9042_v32  ;;  %18331 = vpow2.f32 %v10028_v18  ;;  %v10036_v16 = vmul.f32 1.442695, %v9590_v36 }
 0x475   : > { %18333 = vpow2.f32 %v10030_v30  ;;  %v10038_v43 = vmul.f32 1.442695, %v9591_v58  ;;  %v10040_v62 = vmul.f32 1.442695, %v9592_v56  ;;  %v10042_v35 = vmul.f32 1.442695, %v9593_v25 }
 0x476   : > { %18335 = vpow2.f32 %v10032_v49  ;;  %v10044_v42 = vmul.f32 1.442695, %v9594_v51  ;;  %v10046_v3 = vmul.f32 1.442695, %v9595_v8  ;;  %v10048_v52 = vmul.f32 1.442695, %v9596_v14 }
 0x477   : > { %18337 = vpow2.f32 %v10034_v60  ;;  %v10050_v21 = vmul.f32 1.442695, %v9597_v46  ;;  %v10052_v22 = vmul.f32 1.442695, %v9598_v6  ;;  %v10054_v9 = vmul.f32 1.442695, %v9599_v4 }
 0x478   : > { %18339 = vpow2.f32 %v10036_v16  ;;  %v10056_v59 = vmul.f32 1.442695, %v9600_v54  ;;  %v10058_v37 = vmul.f32 1.442695, %v9601_v5  ;;  %v8335_v23 = vsel %vm732_vm2, %v6792_v0, -inf }
 0x479   : > { %18341 = vpow2.f32 %v10038_v43  ;;  %v8336_v27 = vmax.f32 %v22398_v39, %v8335_v23  ;;  %v12933_v30 = vrot.slane %v12905_v15, %v19159_v57  ;;  %v12935_v41 = vcombine.high %v12919_v33, %v12919_v33 }
 0x47a   : > { %18343 = vpow2.f32 %v10040_v62  ;;  %v10060_v49 = vmul.f32 1.442695, %v9602_v48  ;;  %v12951_v51 = vrot.slane %v12944_v24, %v19159_v57  ;;  %v12959_v60 = vrot.slane %v22370_v19, %v19159_v57 }
 0x47b   : > { %18345 = vpow2.f32 %v10042_v35  ;;  %v8338_v8 = vmax.f32 %v8336_v27, %v22401_v28  ;;  %v12937_v2 = vcombine.high %v12933_v30, %v12933_v30  ;;  %v14727_v26 = vmul.f32 %v12933_v30, %v22107_v31  ;;  %v22464_v27 = vpop.f32.mrf.mxu1 }
 0x47c   : > { %18347 = vpow2.f32 %v10044_v42  ;;  %v12967_v0 = vcombine.high %v12959_v60, %v12959_v60  ;;  %v12975_v39 = vrot.slane %v12959_v60, %v19159_v57  ;;  %v14726_v15 = vmul.f32 %v12919_v33, %v22074_v12 }
 0x47d   : > { %18349 = vpow2.f32 %v10046_v3  ;;  %v8339_v7 = vrot.slane %v8338_v8, 4  ;;  %v14728_v48 = vmul.f32 %v12935_v41, %v22289_v13  ;;  %v14729_v24 = vmul.f32 %v12937_v2, %v22296_v38 }
 0x47e   : > { %18351 = vpow2.f32 %v10048_v52  ;;  %v12989_v32 = vrot.slane %v12967_v0, %v19159_v57  ;;  %v12997_v36 = vcombine.high %v12975_v39, %v12975_v39  ;;  %v14730_v28 = vmul.f32 %v12951_v51, %v22312_v40 }
 0x47f   : > { %18353 = vpow2.f32 %v10050_v21  ;;  %v8340_v58 = vmax.f32 %v8338_v8, %v8339_v7  ;;  %v15499_v56 = vcombine.low %v14726_v15, %v14727_v26  ;;  %v15500_v14 = vcombine.low %v14728_v48, %v14729_v24 }
 0x480   : > { %18355 = vpow2.f32 %v10052_v22  ;;  %v12999_v25 = vcombine.high %v12989_v32, %v12989_v32  ;;  %v14731_v33 = vmul.f32 %v12975_v39, %v22316_v11  ;;  %v14733_v46 = vmul.f32 %v12997_v36, %v22322_v55  ;;  %v18109_v39 = vpop.f32.mrf.mxu1 }
 0x481   : > { %v18332_v18 = vpop.eup %18331  ;;  %18357 = vpow2.f32 %v10054_v9  ;;  %v8341_v6 = vrot.slane %v8340_v58, 2  ;;  %v15521_v4 = vrot.slane %v15499_v56, %v19159_v57  ;;  %v15528_v54 = vrot.slane %v15500_v14, %v19159_v57 }
 0x482   : > { %v18334_v5 = vpop.eup %18333  ;;  %18359 = vpow2.f32 %v10056_v59  ;;  %v14732_v16 = vmul.f32 %v12989_v32, %v22293_v45  ;;  %v14734_v43 = vmul.f32 %v12999_v25, %v22326_v63  ;;  %v15552_v62 = vrot.slane %v14730_v28, %v19159_v57 }
 0x483   : > { %v18336_v35 = vpop.eup %18335  ;;  %18361 = vpow2.f32 %v10058_v37  ;;  %v27277_v42 = vrot.slane %v22388_v17, 4  ;;  %v8342_v52 = vmax.f32 %v8340_v58, %v8341_v6  ;;  %v15530_v21 = vcombine.low %v15521_v4, %v15528_v54 }
 0x484   : > { %v18338_v22 = vpop.eup %18337  ;;  %18363 = vpow2.f32 %v10060_v49  ;;  %v11624_v9 = vcombine.low %v18332_v18, %v18334_v5  ;;  %v15560_v23 = vcombine.low %v14731_v33, %v14732_v16  ;;  %v15561_v59 = vcombine.low %v14733_v46, %v14734_v43 }
 0x485   : > { %v22462_v3 = vadd.f32 %v27277_v42, %v22388_v17  ;;  %v18340_v30 = vpop.eup %18339  ;;  %v11625_v41 = vcombine.low %v18336_v35, %v18338_v22  ;;  %v22468_v51 = vcombine.high %v22322_v55, %v22322_v55  ;;  %v8343_v37 = vrot.slane %v8342_v52, 1 }
 0x486   : > { %v15544_v60 = vrot.slane %v15530_v21, %v19159_v57  ;;  %v18342_v17 = vpop.eup %18341  ;;  %v27279_v8 = vcombine.low %v22202_v10, %v22231_v44  ;;  %v15559_v2 = vrot.slane %v15552_v62, %v19159_v57  ;;  %v15570_v26 = vrot.slane %v15560_v23, %v19159_v57 }
 0x487   : > { %27278 = vst [vmem:[#allocation65_spill] sm:$0xff] %v22462_v3  ;;  %v15577_v0 = vrot.slane %v15561_v59, %v19159_v57  ;;  %v18344_v15 = vpop.eup %18343  ;;  %v11626_v7 = vcombine.low %v18340_v30, %v18342_v17  ;;  %v11641_v48 = vrot.slane %v11625_v41, %v19159_v57  ;;  %v22480_v32 = vmax.f32 %v8342_v52, %v8343_v37  ;;  %v27319_v3 = vld [vmem:[#allocation60_spill] sm:$0xff] }
 0x488   : > { %v15537_v49 = vrot.slane %v27279_v8, %v19159_v57  ;;  %v18346_v36 = vpop.eup %18345  ;;  %v11634_v28 = vrot.slane %v11624_v9, %v19159_v57  ;;  %v27281_v10 = vcombine.low %v22376_v29, %v22379_v61  ;;  %v27282_v46 = vcombine.low %v21865_v53, %v22220_v20 }
 0x489   : > { %27280 = vst [vmem:[#allocation64_spill] sm:$0xff] %v22480_v32  ;;  %v15592_v56 = vcombine.low %v15570_v26, %v15577_v0  ;;  %v18348_v14 = vpop.eup %18347  ;;  %v11627_v25 = vcombine.low %v18344_v15, %v18346_v36  ;;  %v8602_v33 = vcombine.high %v22480_v32, %v22480_v32  ;;  %v5395_v6 = vcombine.high %v21789_v1, %v21789_v1 }
 0x48a   : > { %v22487_v44 = vrot.slane %v27281_v10, %v19159_v57  ;;  %v15545_v58 = vcombine.low %v15537_v49, %v15544_v60  ;;  %v17086_v18 = vsel %vm732_vm2, %v27282_v46, 0.0  ;;  %v18350_v4 = vpop.eup %18349  ;;  %v11648_v29 = vrot.slane %v11626_v7, %v19159_v57 }
 0x48b   : > { %v8609_v61 = vrot.slane %v22480_v32, %v19159_v57  ;;  %v22501_v54 = vsel %vm8314_vm10, %v15559_v2, 0.0  ;;  %v22505_v5 = vrot.slane %v21789_v1, %v19159_v57  ;;  %v18352_v16 = vpop.eup %18351  ;;  %v11655_v53 = vrot.slane %v11627_v25, %v19159_v57 }
 0x48c   : > { %v11656_v20 = vcombine.low %v11634_v28, %v11641_v48  ;;  %v11673_v43 = vcombine.low %v18348_v14, %v18350_v4  ;;  %v8616_v62 = vrot.slane %v8602_v33, %v19159_v57  ;;  %v18354_v35 = vpop.eup %18353  ;;  %v22513_v21 = vrot.slane %v15592_v56, %v19159_v57  ;;  %v27285_v4 = vld [vmem:[#allocation12_spill] sm:$0xff] }
 0x48d   : > { %v8617_v42 = vcombine.high %v8609_v61, %v8609_v61  ;;  %v22510_v52 = vrot.slane %v8609_v61, %v19159_v57  ;;  %v17087_v22 = vsel %vm732_vm2, %v15545_v58, 0.0  ;;  %v18356_v9 = vpop.eup %18355  ;;  %v11657_v1 = vcombine.low %v11648_v29, %v11655_v53  ;;  %v27286_v53 = vld [vmem:[#allocation75_spill] sm:$0xff] }
 0x48e   : > { %v11674_v23 = vcombine.low %v18352_v16, %v18354_v35  ;;  %v8618_v59 = vcombine.high %v8616_v62, %v8616_v62  ;;  %v22517_v30 = vrot.slane %v5395_v6, %v19159_v57  ;;  %v18358_v41 = vpop.eup %18357  ;;  %v11683_v37 = vrot.slane %v11673_v43, %v19159_v57 }
 0x48f   : > { %v22521_v60 = vrot.slane %v8616_v62, %v19159_v57  ;;  %v8639_v17 = vrot.slane %v8617_v42, %v19159_v57  ;;  %v8647_v8 = vcombine.high %v22510_v52, %v22510_v52  ;;  %v18360_v49 = vpop.eup %18359  ;;  %v22527_v2 = vrot.slane %v11657_v1, %v19159_v57  ;;  %v27287_v62 = vld [vmem:[#allocation85_spill] sm:$0xff]  ;;  %v27288_v42 = vld [vmem:[#allocation88_spill] sm:$0xff] }
 0x490   : > { %v11675_v26 = vcombine.low %v18356_v9, %v18358_v41  ;;  %v11690_v0 = vrot.slane %v11674_v23, %v19159_v57  ;;  %v8646_v39 = vrot.slane %v8618_v59, %v19159_v57  ;;  %v18362_v15 = vpop.eup %18361  ;;  %v22532_v7 = vrot.slane %v11656_v20, %v19159_v57  ;;  %v27289_v9 = vld [vmem:[#allocation73_spill] sm:$0xff]  ;;  %v27290_v23 = vld [vmem:[#allocation52_spill] sm:$0xff] }
 0x491   : > { %27283 = vst [vmem:[#allocation50_spill] sm:$0xff] %v22527_v2  ;;  %v8649_v48 = vcombine.high %v8639_v17, %v8639_v17  ;;  %v17088_v36 = vadd.f32 %v17087_v22, %v17086_v18  ;;  %v5410_v28 = vcombine.high %v22505_v5, %v22505_v5  ;;  %v18364_v10 = vpop.eup %18363  ;;  %v11676_v58 = vcombine.low %v18360_v49, %v18362_v15  ;;  %v27291_v41 = vld [vmem:[#allocation53_spill] sm:$0xff]  ;;  %v27292_v49 = vld [vmem:[#allocation84_spill] sm:$0xff] }
 0x492   : > { %27284 = vst [vmem:[#allocation63_spill] sm:$0xff] %v22532_v7  ;;  %v11705_v56 = vcombine.low %v11683_v37, %v11690_v0  ;;  %v8648_v14 = vcombine.high %v22521_v60, %v22521_v60  ;;  %v9450_v25 = vsub.f32 %v21676_v34, %v22510_v52  ;;  %v11728_v33 = vrot.slane %v18364_v10, %v19159_v57  ;;  %v27293_v15 = vld [vmem:[#allocation76_spill] sm:$0xff] }
 0x493   : > { %v22541_v46 = vcombine.high %v8646_v39, %v8646_v39  ;;  %v9451_v6 = vsub.f32 %v21699_v47, %v8639_v17  ;;  %v9452_v18 = vsub.f32 %v27285_v4, %v8647_v8  ;;  %v11697_v61 = vrot.slane %v11675_v26, %v19159_v57 }
 0x494   : > { %v11704_v16 = vrot.slane %v11676_v58, %v19159_v57  ;;  %v9453_v20 = vsub.f32 %v27286_v53, %v8649_v48  ;;  %v11713_v43 = vrot.slane %v11705_v56, %v19159_v57  ;;  %v11735_v34 = vrot.slane %v11728_v33, %v19159_v57  ;;  %v27294_v56 = vld [vmem:[#allocation95_spill] sm:$0xff]  ;;  %v27295_v33 = vld [vmem:[#allocation14_spill] sm:$0xff] }
 0x495   : > { %v9454_v35 = vsub.f32 %v27287_v62, %v22521_v60  ;;  %v9455_v47 = vsub.f32 %v27288_v42, %v8646_v39  ;;  %v9456_v1 = vsub.f32 %v27289_v9, %v8648_v14  ;;  %v9457_v59 = vsub.f32 %v27290_v23, %v22541_v46 }
 0x496   : > { %v11706_v22 = vcombine.low %v11697_v61, %v11704_v16  ;;  %v9458_v37 = vsub.f32 %v27291_v41, %v22510_v52  ;;  %v9459_v26 = vsub.f32 %v27292_v49, %v8639_v17  ;;  %v9460_v0 = vsub.f32 %v22050_v50, %v8647_v8 }
 0x497   : > { %v9461_v10 = vsub.f32 %v27293_v15, %v8649_v48  ;;  %v9462_v58 = vsub.f32 %v22074_v12, %v22521_v60  ;;  %vm6361_vm11 = vcmp.eq.s32.totalorder %v27295_v33, %v27294_v56  ;;  %v22569_v61 = vsel %vm8314_vm10, %v11735_v34, 0.0 }
 0x498   : > { %v11720_v4 = vrot.slane %v11706_v22, %v19159_v57  ;;  %27296 = vst [vmem:[#allocation62_spill] sm:$0xff] %v22569_v61  ;;  %v9756_v16 = vmul.f32 1.442695, %v9450_v25  ;;  %v9758_v53 = vmul.f32 1.442695, %v9451_v6  ;;  %v9463_v62 = vsub.f32 %v22107_v31, %v8646_v39 }
 0x499   : > { %v9760_v17 = vmul.f32 1.442695, %v9452_v18  ;;  %v9762_v42 = vmul.f32 1.442695, %v9453_v20  ;;  %v17090_v50 = vadd.f32 %v22501_v54, %v17088_v36  ;;  %v9464_v48 = vsub.f32 %v22289_v13, %v8648_v14 }
 0x49a   : > { %v11721_v8 = vcombine.low %v11713_v43, %v11720_v4  ;;  %18365 = vpow2.f32 %v9756_v16  ;;  %v9764_v12 = vmul.f32 1.442695, %v9454_v35  ;;  %v9465_v60 = vsub.f32 %v22296_v38, %v22541_v46 }
 0x49b   : > { %v9466_v34 = vsub.f32 %v22312_v40, %v22510_v52  ;;  %18367 = vpow2.f32 %v9758_v53  ;;  %v9766_v25 = vmul.f32 1.442695, %v9455_v47  ;;  %v9768_v6 = vmul.f32 1.442695, %v9456_v1  ;;  %v27300_v1 = vld [vmem:[#allocation99_spill] sm:$0xff] }
 0x49c   : > { %18369 = vpow2.f32 %v9760_v17  ;;  %v9770_v31 = vmul.f32 1.442695, %v9457_v59  ;;  %v9772_v39 = vmul.f32 1.442695, %v9458_v37  ;;  %v22579_v18 = vsel %vm732_vm2, %v11721_v8, 0.0 }
 0x49d   : > { %27297 = vst [vmem:[#allocation71_spill] sm:$0xff] %v22579_v18  ;;  %18371 = vpow2.f32 %v9762_v42  ;;  %v9774_v54 = vmul.f32 1.442695, %v9459_v26  ;;  %v9776_v13 = vmul.f32 1.442695, %v9460_v0  ;;  %v5411_v38 = vcombine.high %v22517_v30, %v22517_v30  ;;  %v27301_v0 = vld [vmem:[#allocation98_spill] sm:$0xff] }
 0x49e   : > { %18373 = vpow2.f32 %v9764_v12  ;;  %v9778_v36 = vmul.f32 1.442695, %v9461_v10  ;;  %v9780_v14 = vmul.f32 1.442695, %v9462_v58  ;;  %v9782_v20 = vmul.f32 1.442695, %v9463_v62  ;;  %v22626_v10 = vpop.f32.mrf.mxu0 }
 0x49f   : > { %18375 = vpow2.f32 %v9766_v25  ;;  %v22585_v40 = vrot.slane %v22505_v5, %v19159_v57  ;;  %v22589_v52 = vrot.slane %v22517_v30, %v19159_v57  ;;  %v9784_v46 = vmul.f32 1.442695, %v9464_v48  ;;  %27302 = vst [vmem:[#allocation75_spill] sm:$0xff] %v22626_v10 }
 0x4a0   : > { %18377 = vpow2.f32 %v9768_v6  ;;  %v17091_v43 = vrot.slane %v17090_v50, 4  ;;  %v22592_v35 = vrot.slane %v5410_v28, %v19159_v57  ;;  %v22595_v47 = vrot.slane %v5411_v38, %v19159_v57  ;;  %v18074_v42 = vpop.f32.mrf.mxu0  ;;  %v27304_v38 = vld [vmem:[#allocation82_spill] sm:$0xff] }
 0x4a1   : > { %18379 = vpow2.f32 %v9770_v31  ;;  %v22599_v22 = vcombine.high %v22585_v40, %v22585_v40  ;;  %v22603_v5 = vcombine.high %v22589_v52, %v22589_v52  ;;  %v27298_v9 = vmov 0.0  }
 0x4a2   : > { %18381 = vpow2.f32 %v9772_v39  ;;  %v22607_v30 = vcombine.high %v22592_v35, %v22592_v35  ;;  %v22613_v28 = vsel %vm6361_vm11, 1.0, %v27298_v9  ;;  %v7705_v23 = vcombine.low %v27300_v1, %v22585_v40 }
 0x4a3   : > { %27299 = vst [vmem:[#allocation12_spill] sm:$0xff] %v22613_v28  ;;  %18383 = vpow2.f32 %v9774_v54  ;;  %v9786_v59 = vmul.f32 1.442695, %v9465_v60  ;;  %v7706_v41 = vcombine.low %v22592_v35, %v22599_v22  ;;  %v7753_v37 = vcombine.low %v22595_v47, %v22603_v5 }
 0x4a4   : > { %18385 = vpow2.f32 %v9776_v13  ;;  %v7727_v49 = vrot.slane %v7705_v23, %v19159_v57  ;;  %v7752_v26 = vcombine.low %v22607_v30, %v22589_v52  ;;  %v13848_v15 = vcombine.high %v27301_v0, %v27301_v0 }
 0x4a5   : > { %18387 = vpow2.f32 %v9778_v36  ;;  %v22628_v58 = vadd.f32 %v17091_v43, %v17090_v50  ;;  %v7734_v4 = vrot.slane %v7706_v41, %v19159_v57  ;;  %v13904_v16 = vrot.slane %v22613_v28, %v19159_v57 }
 0x4a6   : > { %18389 = vpow2.f32 %v9780_v14  ;;  %v9788_v53 = vmul.f32 1.442695, %v9466_v34  ;;  %v22634_v62 = vrot.slane %v7753_v37, %v19159_v57  ;;  %v13862_v17 = vrot.slane %v13848_v15, %v19159_v57 }
 0x4a7   : > { %27303 = vst [vmem:[#allocation85_spill] sm:$0xff] %v22628_v58  ;;  %v18366_v8 = vpop.eup %18365  ;;  %18391 = vpow2.f32 %v9782_v20  ;;  %v7736_v48 = vcombine.low %v7727_v49, %v7734_v4  ;;  %v13912_v12 = vcombine.high %v13904_v16, %v13904_v16  ;;  %v13920_v50 = vrot.slane %v13904_v16, %v19159_v57 }
 0x4a8   : > { %v18368_v60 = vpop.eup %18367  ;;  %18393 = vpow2.f32 %v9784_v46  ;;  %v22639_v25 = vrot.slane %v7752_v26, %v19159_v57  ;;  %v13864_v6 = vcombine.high %v13862_v17, %v13862_v17  ;;  %v13878_v34 = vrot.slane %v13862_v17, %v19159_v57 }
 0x4a9   : > { %v18370_v31 = vpop.eup %18369  ;;  %18395 = vpow2.f32 %v9786_v59  ;;  %v22645_v54 = vcombine.high %v22595_v47, %v22595_v47  ;;  %v13934_v13 = vrot.slane %v13912_v12, %v19159_v57  ;;  %v4562_v46 = vcombine.high %v27304_v38, %v27304_v38 }
 0x4aa   : > { %v18372_v36 = vpop.eup %18371  ;;  %18397 = vpow2.f32 %v9788_v53  ;;  %v13892_v14 = vrot.slane %v13864_v6, %v19159_v57  ;;  %v13894_v20 = vcombine.high %v13878_v34, %v13878_v34  ;;  %v10728_v23 = vcombine.low %v18366_v8, %v18368_v60 }
 0x4ab   : > { %v18374_v43 = vpop.eup %18373  ;;  %v10729_v41 = vcombine.low %v18370_v31, %v18372_v36  ;;  %v22652_v59 = vrot.slane %v7736_v48, %v19159_v57  ;;  %v13942_v37 = vcombine.high %v13920_v50, %v13920_v50  ;;  %v7784_v26 = vcombine.low %v22639_v25, %v22634_v62 }
 0x4ac   : > { %v18376_v49 = vpop.eup %18375  ;;  %v13896_v15 = vcombine.high %v13892_v14, %v13892_v14  ;;  %v13944_v4 = vcombine.high %v13934_v13, %v13934_v13  ;;  %v14871_v16 = vmul.f32 %v13878_v34, %v27300_v1  ;;  %v14872_v12 = vmul.f32 %v13892_v14, %v22585_v40 }
 0x4ad   : > { %v18378_v53 = vpop.eup %18377  ;;  %v10730_v17 = vcombine.low %v18374_v43, %v18376_v49  ;;  %v10745_v42 = vrot.slane %v10729_v41, %v19159_v57  ;;  %v14873_v8 = vmul.f32 %v13894_v20, %v22592_v35  ;;  %v14875_v6 = vmul.f32 %v13920_v50, %v22607_v30  ;;  %v27305_v43 = vld [vmem:[#allocation100_spill] sm:$0xff] }
 0x4ae   : > { %v18380_v60 = vpop.eup %18379  ;;  %v14874_v48 = vmul.f32 %v13896_v15, %v22599_v22  ;;  %v14876_v31 = vmul.f32 %v13934_v13, %v22589_v52  ;;  %v14877_v62 = vmul.f32 %v13942_v37, %v22595_v47  ;;  %v10738_v34 = vrot.slane %v10728_v23, %v19159_v57 }
 0x4af   : > { %v18382_v25 = vpop.eup %18381  ;;  %v10731_v36 = vcombine.low %v18378_v53, %v18380_v60  ;;  %v7751_v41 = vcombine.low %v27305_v43, %v22652_v59  ;;  %v14878_v14 = vmul.f32 %v13944_v4, %v22603_v5  ;;  %v16458_v20 = vcombine.low %v14871_v16, %v14872_v12 }
 0x4b0   : > { %v18384_v49 = vpop.eup %18383  ;;  %v16459_v24 = vcombine.low %v14873_v8, %v14874_v48  ;;  %v16505_v39 = vcombine.low %v14875_v6, %v14876_v31  ;;  %v4569_v50 = vrot.slane %v27304_v38, %v19159_v57  ;;  %v10752_v13 = vrot.slane %v10730_v17, %v19159_v57  ;;  %v22677_v17 = vpop.f32.mrf.mxu1 }
 0x4b1   : > { %v18386_v15 = vpop.eup %18385  ;;  %v10759_v37 = vrot.slane %v10731_v36, %v19159_v57  ;;  %v10760_v53 = vcombine.low %v10738_v34, %v10745_v42  ;;  %v16506_v60 = vcombine.low %v14877_v62, %v14878_v14  ;;  %v16480_v29 = vrot.slane %v16458_v20, %v19159_v57  ;;  %27306 = vst [vmem:[#allocation88_spill] sm:$0xff] %v22677_v17 }
 0x4b2   : > { %v18388_v23 = vpop.eup %18387  ;;  %v16487_v59 = vrot.slane %v16459_v24, %v19159_v57  ;;  %v16515_v4 = vrot.slane %v16505_v39, %v19159_v57  ;;  %v4576_v16 = vrot.slane %v4562_v46, %v19159_v57  ;;  %v10777_v48 = vcombine.low %v18382_v25, %v18384_v49  ;;  %v18110_v14 = vpop.f32.mrf.mxu1 }
 0x4b3   : > { %v18390_v12 = vpop.eup %18389  ;;  %v10761_v8 = vcombine.low %v10752_v13, %v10759_v37  ;;  %v10778_v38 = vcombine.low %v18386_v15, %v18388_v23  ;;  %v16522_v6 = vrot.slane %v16506_v60, %v19159_v57  ;;  %v4577_v62 = vcombine.high %v4569_v50, %v4569_v50 }
 0x4b4   : > { %v18392_v31 = vpop.eup %18391  ;;  %v16489_v42 = vcombine.low %v16480_v29, %v16487_v59  ;;  %v4578_v36 = vcombine.high %v4576_v16, %v4576_v16  ;;  %v22680_v34 = vrot.slane %v4569_v50, %v19159_v57  ;;  %v22683_v39 = vrot.slane %v10760_v53, %v19159_v57 }
 0x4b5   : > { %v18394_v24 = vpop.eup %18393  ;;  %v22686_v46 = vrot.slane %v10761_v8, %v19159_v57  ;;  %v10779_v25 = vcombine.low %v18390_v12, %v18392_v31  ;;  %v10794_v43 = vrot.slane %v10778_v38, %v19159_v57  ;;  %v16537_v29 = vcombine.low %v16515_v4, %v16522_v6  ;;  %v27315_v6 = vld [vmem:[#allocation102_spill] sm:$0xff] }
 0x4b6   : > { %27307 = vst [vmem:[#allocation73_spill] sm:$0xff] %v22680_v34  ;;  %27308 = vst [vmem:[#allocation52_spill] sm:$0xff] %v22683_v39  ;;  %v18396_v49 = vpop.eup %18395  ;;  %v16503_v20 = vrot.slane %v16489_v42, %v19159_v57  ;;  %v22691_v15 = vrot.slane %v4576_v16, %v19159_v57  ;;  %v22694_v50 = vrot.slane %v4577_v62, %v19159_v57  ;;  %v22701_v23 = vsel %vm732_vm2, %v7751_v41, -inf  ;;  %v27316_v62 = vld [vmem:[#allocation79_spill] sm:$0xff] }
 0x4b7   : > { %27309 = vst [vmem:[#allocation53_spill] sm:$0xff] %v22686_v46  ;;  %v18398_v13 = vpop.eup %18397  ;;  %v10780_v37 = vcombine.low %v18394_v24, %v18396_v49  ;;  %v10787_v53 = vrot.slane %v10777_v48, %v19159_v57  ;;  %v22698_v60 = vrot.slane %v7784_v26, %v19159_v57  ;;  %v22707_v16 = vrot.slane %v4578_v36, %v19159_v57 }
 0x4b8   : > { %27310 = vst [vmem:[#allocation84_spill] sm:$0xff] %v22691_v15  ;;  %27311 = vst [vmem:[#allocation76_spill] sm:$0xff] %v22694_v50  ;;  %v10832_v4 = vrot.slane %v18398_v13, %v19159_v57  ;;  %v22711_v12 = vcombine.high %v22680_v34, %v22680_v34  ;;  %v10801_v8 = vrot.slane %v10779_v25, %v19159_v57 }
 0x4b9   : > { %27312 = vst [vmem:[#allocation95_spill] sm:$0xff] %v22707_v16  ;;  %v10808_v26 = vrot.slane %v10780_v37, %v19159_v57  ;;  %v22717_v41 = vcombine.high %v22691_v15, %v22691_v15  ;;  %v22721_v48 = vcombine.high %v22694_v50, %v22694_v50  ;;  %v10809_v38 = vcombine.low %v10787_v53, %v10794_v43 }
 0x4ba   : > { %27313 = vst [vmem:[#allocation99_spill] sm:$0xff] %v22711_v12  ;;  %v16504_v31 = vcombine.low %v27315_v6, %v16503_v20  ;;  %v22725_v42 = vrot.slane %v16537_v29, %v19159_v57  ;;  %vm6337_vm12 = vcmp.eq.s32.totalorder %v27295_v33, %v27316_v62  ;;  %v6809_v25 = vcombine.low %v22468_v51, %v22680_v34  ;;  %v27335_v33 = vld [vmem:[#allocation72_spill] sm:$0xff] }
 0x4bb   : > { %27314 = vst [vmem:[#allocation82_spill] sm:$0xff] %v22717_v41  ;;  %v10810_v36 = vcombine.low %v10801_v8, %v10808_v26  ;;  %v22730_v24 = vsel %vm6337_vm12, 1.0, %v27298_v9  ;;  %v6810_v14 = vcombine.low %v22694_v50, %v22711_v12  ;;  %v10839_v43 = vrot.slane %v10832_v4, %v19159_v57 }
 0x4bc   : > { %27317 = vst [vmem:[#allocation100_spill] sm:$0xff] %v22730_v24  ;;  %v6856_v49 = vcombine.low %v22721_v48, %v22691_v15  ;;  %v6857_v20 = vcombine.low %v22707_v16, %v22717_v41  ;;  %v12952_v29 = vcombine.high %v22370_v19, %v22370_v19  ;;  %v6831_v37 = vrot.slane %v6809_v25, %v19159_v57 }
 0x4bd   : > { %v10824_v13 = vrot.slane %v10810_v36, %v19159_v57  ;;  %v6838_v53 = vrot.slane %v6810_v14, %v19159_v57  ;;  %v13008_v8 = vrot.slane %v22730_v24, %v19159_v57  ;;  %v10817_v4 = vrot.slane %v10809_v38, %v19159_v57 }
 0x4be   : > { %v22750_v26 = vsel %vm732_vm2, %v16504_v31, 0.0  ;;  %v22754_v6 = vcombine.high %v22707_v16, %v22707_v16  ;;  %v12966_v59 = vrot.slane %v12952_v29, %v19159_v57  ;;  %v6866_v36 = vrot.slane %v6856_v49, %v19159_v57 }
 0x4bf   : > { %v6873_v25 = vrot.slane %v6857_v20, %v19159_v57  ;;  %v13016_v0 = vcombine.high %v13008_v8, %v13008_v8  ;;  %v13024_v14 = vrot.slane %v13008_v8, %v19159_v57  ;;  %v22761_v19 = vsel %vm8314_vm10, %v10839_v43, 0.0 }
 0x4c0   : > { %27318 = vst [vmem:[#allocation102_spill] sm:$0xff] %v22761_v19  ;;  %v12968_v38 = vcombine.high %v12966_v59, %v12966_v59  ;;  %v12982_v31 = vrot.slane %v12966_v59, %v19159_v57  ;;  %v5444_v32 = vcombine.high %v27319_v3, %v27319_v3  ;;  %v10825_v58 = vcombine.low %v10817_v4, %v10824_v13 }
 0x4c1   : > { %v6840_v61 = vcombine.low %v6831_v37, %v6838_v53  ;;  %v13038_v29 = vrot.slane %v13016_v0, %v19159_v57  ;;  %v13046_v18 = vcombine.high %v13024_v14, %v13024_v14  ;;  %v5451_v43 = vrot.slane %v27319_v3, %v19159_v57 }
 0x4c2   : > { %v12996_v49 = vrot.slane %v12968_v38, %v19159_v57  ;;  %v12998_v20 = vcombine.high %v12982_v31, %v12982_v31  ;;  %v14735_v2 = vmul.f32 %v12982_v31, %v22468_v51  ;;  %v6888_v8 = vcombine.low %v6866_v36, %v6873_v25 }
 0x4c3   : > { %v13048_v7 = vcombine.high %v13038_v29, %v13038_v29  ;;  %v14739_v59 = vmul.f32 %v13024_v14, %v22721_v48  ;;  %v14740_v19 = vmul.f32 %v13038_v29, %v22691_v15  ;;  %v14741_v37 = vmul.f32 %v13046_v18, %v22707_v16 }
 0x4c4   : > { %v13000_v46 = vcombine.high %v12996_v49, %v12996_v49  ;;  %v14736_v13 = vmul.f32 %v12996_v49, %v22680_v34  ;;  %v14737_v0 = vmul.f32 %v12998_v20, %v22694_v50  ;;  %v6854_v53 = vrot.slane %v6840_v61, %v19159_v57 }
 0x4c5   : > { %v14742_v4 = vmul.f32 %v13048_v7, %v22717_v41  ;;  %v15609_v38 = vcombine.low %v14739_v59, %v14740_v19  ;;  %v5458_v3 = vrot.slane %v5444_v32, %v19159_v57  ;;  %v5459_v14 = vcombine.high %v5451_v43, %v5451_v43 }
 0x4c6   : > { %v14738_v36 = vmul.f32 %v13000_v46, %v22711_v12  ;;  %v15562_v25 = vcombine.low %v14735_v2, %v14736_v13  ;;  %v22781_v31 = vrot.slane %v5451_v43, %v19159_v57  ;;  %v22784_v29 = vsel %vm732_vm2, %v10825_v58, 0.0  ;;  %v27322_v43 = vld [vmem:[#allocation20_spill] sm:$0xff] }
 0x4c7   : > { %27320 = vst [vmem:[#allocation79_spill] sm:$0xff] %v22784_v29  ;;  %v22787_v49 = vrot.slane %v6888_v8, %v19159_v57  ;;  %v15610_v18 = vcombine.low %v14741_v37, %v14742_v4  ;;  %v5460_v61 = vcombine.high %v5458_v3, %v5458_v3  ;;  %v22791_v32 = vrot.slane %v5459_v14, %v19159_v57  ;;  %v27331_v29 = vld [vmem:[#allocation5_spill] sm:$0xff] }
 0x4c8   : > { %v15563_v20 = vcombine.low %v14737_v0, %v14738_v36  ;;  %v15584_v19 = vrot.slane %v15562_v25, %v19159_v57  ;;  %v22795_v2 = vcombine.high %v22781_v31, %v22781_v31  ;;  %v6855_v7 = vcombine.low %v22487_v44, %v6854_v53  ;;  %v27325_v44 = vld [vmem:[#allocation22_spill] sm:$0xff] }
 0x4c9   : > { %v22799_v58 = vrot.slane %v15609_v38, %v19159_v57  ;;  %v22802_v46 = vrot.slane %v5460_v61, %v19159_v57  ;;  %v27323_v8 = vcombine.high %v27322_v43, %v27322_v43  ;;  %v22813_v0 = vcombine.high %v22791_v32, %v22791_v32 }
 0x4ca   : > { %v15591_v13 = vrot.slane %v15563_v20, %v19159_v57  ;;  %vm6362_vm13 = vcmp.eq.s32.totalorder %v27325_v44, %v27294_v56  ;;  %v7754_v37 = vcombine.low %v22645_v54, %v22781_v31  ;;  %v22820_v53 = vrot.slane %v15610_v18, %v19159_v57 }
 0x4cb   : > { %27321 = vst [vmem:[#allocation60_spill] sm:$0xff] %v22802_v46  ;;  %v22808_v59 = vrot.slane %v27323_v8, %v19159_v57  ;;  %v22823_v4 = vrot.slane %v5458_v3, %v19159_v57  ;;  %v22830_v36 = vsel %vm6362_vm13, 1.0, %v27298_v9  ;;  %v7755_v56 = vcombine.low %v22791_v32, %v22795_v2  ;;  %v27329_v3 = vld [vmem:[#allocation21_spill] sm:$0xff] }
 0x4cc   : > { %27328 = vst [vmem:[#allocation107_spill] sm:$0xff] %v22830_v36  ;;  %v15593_v25 = vcombine.low %v15584_v19, %v15591_v13  ;;  %v7776_v14 = vrot.slane %v7754_v37, %v19159_v57  ;;  %v7807_v18 = vrot.slane %v22813_v0, %v19159_v57  ;;  %v22838_v61 = vsel %vm732_vm2, %v6855_v7, -inf }
 0x4cd   : > { %27324 = vst [vmem:[#allocation20_spill] sm:$0xff] %v22808_v59  ;;  %27326 = vst [vmem:[#allocation105_spill] sm:$0xff] %v22823_v4  ;;  %v22827_v38 = vrot.slane %v22808_v59, %v19159_v57  ;;  %v7815_v43 = vcombine.low %v22823_v4, %v22802_v46  ;;  %v18023_v19 = vcombine.high %v22823_v4, %v22802_v46 }
 0x4ce   : > { %v15607_v8 = vrot.slane %v15593_v25, %v19159_v57  ;;  %v7783_v13 = vrot.slane %v7755_v56, %v19159_v57  ;;  %v7814_v37 = vrot.slane %v7807_v18, %v19159_v57  ;;  %v13897_v7 = vcombine.high %v22613_v28, %v22613_v28 }
 0x4cf   : > { %27327 = vst [vmem:[#allocation106_spill] sm:$0xff] %v22827_v38  ;;  %v22842_v20 = vrot.slane %v22827_v38, %v27329_v3  ;;  %v7825_v39 = vrot.slane %v7815_v43, %v19159_v57  ;;  %v7832_v38 = vrot.slane %v18023_v19, %v19159_v57  ;;  %v13952_v59 = vrot.slane %v22830_v36, %v19159_v57 }
 0x4d0   : > { %v15641_v25 = vcombine.low %v22799_v58, %v22820_v53  ;;  %v22863_v56 = vcombine.high %v22823_v4, %v22823_v4  ;;  %v7785_v28 = vcombine.low %v7776_v14, %v7783_v13  ;;  %v22870_v17 = vcombine.high %v22802_v46, %v22802_v46  ;;  %v22881_v13 = vpop.f32.mrf.mxu0 }
 0x4d1   : > { %27330 = vst [vmem:[#allocation108_spill] sm:$0xff] %v22842_v20  ;;  %vm6363_vm14 = vcmp.eq.s32.totalorder %v27331_v29, %v22842_v20  ;;  %v13911_v43 = vrot.slane %v13897_v7, %v19159_v57  ;;  %v13959_v19 = vrot.slane %v13952_v59, %v19159_v57  ;;  %v15608_v58 = vcombine.low %v22513_v21, %v15607_v8 }
 0x4d2   : > { %27332 = vst [vmem:[#allocation109_spill] sm:$0xff] %v22863_v56  ;;  %v22866_v18 = vsel %vm6363_vm14, 1.0, %v27298_v9  ;;  %27334 = vst [vmem:[#allocation111_spill] sm:$0xff] %v22870_v17  ;;  %v7799_v53 = vrot.slane %v7785_v28, %v19159_v57  ;;  %v8436_v10 = vsel %vm8314_vm10, %v7814_v37, -inf  ;;  %v4611_v14 = vcombine.high %v27335_v33, %v27335_v33  ;;  %v18077_v8 = vpop.f32.mrf.mxu0 }
 0x4d3   : > { %27333 = vst [vmem:[#allocation110_spill] sm:$0xff] %v22866_v18  ;;  %v13967_v36 = vrot.slane %v22866_v18, %v19159_v57  ;;  %27336 = vst [vmem:[#allocation72_spill] sm:$0xff] %v22881_v13  ;;  %v7847_v20 = vcombine.low %v7825_v39, %v7832_v38  ;;  %v13913_v41 = vcombine.high %v13911_v43, %v13911_v43 }
 0x4d4   : > { %v13927_v7 = vrot.slane %v13911_v43, %v19159_v57  ;;  %v7800_v59 = vcombine.low %v22698_v60, %v7799_v53  ;;  %v14883_v21 = vmul.f32 %v13959_v19, %v22813_v0  ;;  %v4618_v28 = vrot.slane %v27335_v33, %v19159_v57 }
 0x4d5   : > { %v13975_v16 = vcombine.high %v13967_v36, %v13967_v36  ;;  %v13983_v18 = vrot.slane %v13967_v36, %v19159_v57  ;;  %v13941_v37 = vrot.slane %v13913_v41, %v19159_v57  ;;  %v4625_v36 = vrot.slane %v4611_v14, %v19159_v57 }
 0x4d6   : > { %v13943_v15 = vcombine.high %v13927_v7, %v13927_v7  ;;  %v14879_v39 = vmul.f32 %v13927_v7, %v22645_v54  ;;  %v8434_v38 = vsel %vm732_vm2, %v7800_v59, -inf  ;;  %v16560_v7 = vrot.slane %v14883_v21, %v19159_v57 }
 0x4d7   : > { %v13997_v13 = vrot.slane %v13975_v16, %v19159_v57  ;;  %v14005_v43 = vcombine.high %v13983_v18, %v13983_v18  ;;  %v14884_v60 = vmul.f32 %v13983_v18, %v22823_v4  ;;  %v8435_v19 = vmax.f32 %v22701_v23, %v8434_v38 }
 0x4d8   : > { %v13945_v53 = vcombine.high %v13941_v37, %v13941_v37  ;;  %v14880_v33 = vmul.f32 %v13941_v37, %v22781_v31  ;;  %v14881_v41 = vmul.f32 %v13943_v15, %v22791_v32  ;;  %v22904_v23 = vrot.slane %v15641_v25, %v19159_v57 }
 0x4d9   : > { %v14007_v12 = vcombine.high %v13997_v13, %v13997_v13  ;;  %v14885_v8 = vmul.f32 %v13997_v13, %v22802_v46  ;;  %v14886_v16 = vmul.f32 %v14005_v43, %v22863_v56  ;;  %v8437_v59 = vmax.f32 %v8435_v19, %v8436_v10 }
 0x4da   : > { %v14882_v50 = vmul.f32 %v13945_v53, %v22795_v2  ;;  %v16507_v14 = vcombine.low %v14879_v39, %v14880_v33  ;;  %v4626_v4 = vcombine.high %v4618_v28, %v4618_v28  ;;  %v4627_v37 = vcombine.high %v4625_v36, %v4625_v36 }
 0x4db   : > { %v14887_v18 = vmul.f32 %v14007_v12, %v22870_v17  ;;  %v16568_v38 = vcombine.low %v14884_v60, %v14885_v8  ;;  %v8438_v34 = vrot.slane %v8437_v59, 4  ;;  %v22908_v43 = vsel %vm732_vm2, %v15608_v58, 0.0 }
 0x4dc   : > { %v16508_v15 = vcombine.low %v14881_v41, %v14882_v50  ;;  %v16529_v13 = vrot.slane %v16507_v14, %v19159_v57  ;;  %v22911_v10 = vrot.slane %v7847_v20, %v19159_v57  ;;  %v22914_v12 = vrot.slane %v4618_v28, %v19159_v57 }
 0x4dd   : > { %v16569_v46 = vcombine.low %v14886_v16, %v14887_v18  ;;  %v22917_v25 = vrot.slane %v4626_v4, %v19159_v57  ;;  %v8439_v21 = vmax.f32 %v8437_v59, %v8438_v34  ;;  %v16567_v50 = vrot.slane %v16560_v7, %v19159_v57  ;;  %v27338_v4 = vld [vmem:[#allocation6_spill] sm:$0xff] }
 0x4de   : > { %27337 = vst [vmem:[#allocation112_spill] sm:$0xff] %v22911_v10  ;;  %v16536_v39 = vrot.slane %v16508_v15, %v19159_v57  ;;  %v22922_v60 = vrot.slane %v4625_v36, %v19159_v57  ;;  %v22927_v20 = vcombine.high %v22914_v12, %v22914_v12  ;;  %v22935_v34 = vrot.slane %v27338_v4, %v19159_v57 }
 0x4df   : > { %v16585_v58 = vrot.slane %v16569_v46, %v19159_v57  ;;  %v22931_v28 = vcombine.high %v22917_v25, %v22917_v25  ;;  %v8440_v19 = vrot.slane %v8439_v21, 2  ;;  %v16578_v33 = vrot.slane %v16568_v38, %v19159_v57 }
 0x4e0   : > { %27339 = vst [vmem:[#allocation6_spill] sm:$0xff] %v22935_v34  ;;  %v16538_v53 = vcombine.low %v16529_v13, %v16536_v39  ;;  %v22939_v36 = vrot.slane %v4627_v37, %v19159_v57  ;;  %v22943_v46 = vrot.slane %v22935_v34, %v27329_v3  ;;  %vm6338_vm15 = vcmp.eq.s32.totalorder %v27325_v44, %v27316_v62  ;;  %v27348_v3 = vld [vmem:[#allocation8_spill] sm:$0xff] }
 0x4e1   : > { %v6858_v41 = vcombine.low %v22754_v6, %v22914_v12  ;;  %v6859_v8 = vcombine.low %v22917_v25, %v22927_v20  ;;  %v8441_v16 = vmax.f32 %v8439_v21, %v8440_v19  ;;  %v17188_v59 = vsel %vm8314_vm10, %v16567_v50, 0.0 }
 0x4e2   : > { %v16552_v7 = vrot.slane %v16538_v53, %v19159_v57  ;;  %v22955_v18 = vcombine.high %v22922_v60, %v22922_v60  ;;  %v16600_v14 = vcombine.low %v16578_v33, %v16585_v58  ;;  %v6911_v37 = vrot.slane %v22931_v28, %v19159_v57 }
 0x4e3   : > { %v6880_v38 = vrot.slane %v6858_v41, %v19159_v57  ;;  %v6887_v62 = vrot.slane %v6859_v8, %v19159_v57  ;;  %v8442_v15 = vrot.slane %v8441_v16, 1  ;;  %v22963_v21 = vsel %vm6338_vm15, 1.0, %v27298_v9 }
 0x4e4   : > { %v16553_v13 = vcombine.low %v22725_v42, %v16552_v7  ;;  %27340 = vst [vmem:[#allocation113_spill] sm:$0xff] %v22963_v21  ;;  %v6919_v39 = vcombine.low %v22922_v60, %v22939_v36  ;;  %vm6339_vm0 = vcmp.eq.s32.totalorder %v27331_v29, %v22943_v46  ;;  %v18007_v58 = vcombine.high %v22922_v60, %v22939_v36  ;;  %v27347_v29 = vld [vmem:[#allocation92_spill] sm:$0xff] }
 0x4e5   : > { %v6889_v50 = vcombine.low %v6880_v38, %v6887_v62  ;;  %v13001_v4 = vcombine.high %v22730_v24, %v22730_v24  ;;  %v22973_v19 = vmax.f32 %v8441_v16, %v8442_v15  ;;  %v6918_v53 = vrot.slane %v6911_v37, %v19159_v57 }
 0x4e6   : > { %v17186_v42 = vsel %vm732_vm2, %v16553_v13, 0.0  ;;  %v22978_v33 = vrot.slane %v6919_v39, %v19159_v57  ;;  %v6936_v7 = vrot.slane %v18007_v58, %v19159_v57  ;;  %v13056_v38 = vrot.slane %v22963_v21, %v19159_v57 }
 0x4e7   : > { %27341 = vst [vmem:[#allocation114_spill] sm:$0xff] %v22973_v19  ;;  %v17187_v41 = vadd.f32 %v17186_v42, %v22750_v26  ;;  %v6903_v8 = vrot.slane %v6889_v50, %v19159_v57  ;;  %v9043_v16 = vcombine.high %v22973_v19, %v22973_v19  ;;  %v9050_v62 = vrot.slane %v22973_v19, %v19159_v57  ;;  %v27346_v19 = vld [vmem:[#allocation94_spill] sm:$0xff] }
 0x4e8   : > { %v22990_v37 = vsel %vm6339_vm0, 1.0, %v27298_v9  ;;  %v22993_v15 = vrot.slane %v13001_v4, %v19159_v57  ;;  %v22996_v26 = vrot.slane %v16600_v14, %v19159_v57  ;;  %v23002_v39 = vcombine.high %v22939_v36, %v22939_v36 }
 0x4e9   : > { %27342 = vst [vmem:[#allocation115_spill] sm:$0xff] %v22990_v37  ;;  %v22998_v13 = vadd.f32 %v17188_v59, %v17187_v41  ;;  %v6904_v50 = vcombine.low %v22787_v49, %v6903_v8  ;;  %v9057_v58 = vrot.slane %v9043_v16, %v19159_v57  ;;  %v9058_v42 = vcombine.high %v9050_v62, %v9050_v62  ;;  %v23018_v49 = vpop.f32.mrf.mxu1 }
 0x4ea   : > { %27343 = vst [vmem:[#allocation116_spill] sm:$0xff] %v22996_v26  ;;  %v9066_v21 = vrot.slane %v9050_v62, %v19159_v57  ;;  %v8348_v24 = vsel %vm8314_vm10, %v6918_v53, -inf  ;;  %v6951_v4 = vcombine.low %v22978_v33, %v6936_v7  ;;  %v13017_v14 = vcombine.high %v22993_v15, %v22993_v15  ;;  %27345 = vst [vmem:[#allocation118_spill] sm:$0xff] %v23018_v49 }
 0x4eb   : > { %27344 = vst [vmem:[#allocation117_spill] sm:$0xff] %v22998_v13  ;;  %v23012_v59 = vrot.slane %v13056_v38, %v19159_v57  ;;  %v23016_v41 = vrot.slane %v22990_v37, %v19159_v57  ;;  %v9059_v8 = vcombine.high %v9057_v58, %v9057_v58  ;;  %v9073_v16 = vrot.slane %v9057_v58, %v19159_v57  ;;  %v18113_v17 = vpop.f32.mrf.mxu1 }
 0x4ec   : > { %v9080_v62 = vrot.slane %v9058_v42, %v19159_v57  ;;  %v9088_v53 = vcombine.high %v9066_v21, %v9066_v21  ;;  %v9603_v33 = vsub.f32 %v27346_v19, %v9066_v21  ;;  %v8346_v34 = vsel %vm732_vm2, %v6904_v50, -inf }
 0x4ed   : > { %v13031_v38 = vrot.slane %v22993_v15, %v19159_v57  ;;  %v9087_v56 = vrot.slane %v9059_v8, %v19159_v57  ;;  %v9089_v26 = vcombine.high %v9073_v16, %v9073_v16  ;;  %v9611_v58 = vsub.f32 %v22607_v30, %v9066_v21 }
 0x4ee   : > { %v23028_v49 = vcombine.high %v9080_v62, %v9080_v62  ;;  %v9604_v42 = vsub.f32 %v27347_v29, %v9080_v62  ;;  %v9605_v10 = vsub.f32 %v27348_v3, %v9088_v53  ;;  %v9607_v19 = vsub.f32 %v27300_v1, %v9073_v16 }
 0x4ef   : > { %v9619_v7 = vsub.f32 %v22813_v0, %v9066_v21  ;;  %v9091_v50 = vcombine.high %v9087_v56, %v9087_v56  ;;  %v9608_v13 = vsub.f32 %v22585_v40, %v9087_v56  ;;  %v9609_v17 = vsub.f32 %v22592_v35, %v9089_v26 }
 0x4f0   : > { %v8347_v15 = vmax.f32 %v22838_v61, %v8346_v34  ;;  %v9612_v8 = vsub.f32 %v22589_v52, %v9080_v62  ;;  %v9613_v44 = vsub.f32 %v22595_v47, %v9088_v53  ;;  %v9614_v30 = vsub.f32 %v22603_v5, %v23028_v49 }
 0x4f1   : > { %v9615_v29 = vsub.f32 %v22645_v54, %v9073_v16  ;;  %v9610_v1 = vsub.f32 %v22599_v22, %v9091_v50  ;;  %v9616_v0 = vsub.f32 %v22781_v31, %v9087_v56  ;;  %v9617_v3 = vsub.f32 %v22791_v32, %v9089_v26  ;;  %v27349_v31 = vld [vmem:[#allocation93_spill] sm:$0xff] }
 0x4f2   : > { %v10062_v40 = vmul.f32 1.442695, %v9603_v33  ;;  %v9618_v35 = vsub.f32 %v22795_v2, %v9091_v50  ;;  %v23047_v21 = vmul.f32 1.442695, %v9604_v42  ;;  %v23049_v61 = vmul.f32 1.442695, %v9605_v10 }
 0x4f3   : > { %v10070_v52 = vmul.f32 1.442695, %v9607_v19  ;;  %v10072_v47 = vmul.f32 1.442695, %v9608_v13  ;;  %v10074_v34 = vmul.f32 1.442695, %v9609_v17  ;;  %v8349_v5 = vmax.f32 %v8347_v15, %v8348_v24 }
 0x4f4   : > { %v10076_v62 = vmul.f32 1.442695, %v9610_v1  ;;  %v10078_v53 = vmul.f32 1.442695, %v9611_v58  ;;  %v10080_v54 = vmul.f32 1.442695, %v9612_v8  ;;  %v23052_v22 = vrot.slane %v6951_v4, %v19159_v57 }
 0x4f5   : > { %v10082_v16 = vmul.f32 1.442695, %v9613_v44  ;;  %v9606_v32 = vsub.f32 %v27349_v31, %v23028_v49  ;;  %v10084_v56 = vmul.f32 1.442695, %v9614_v30  ;;  %v10086_v2 = vmul.f32 1.442695, %v9615_v29 }
 0x4f6   : > { %v10088_v26 = vmul.f32 1.442695, %v9616_v0  ;;  %18399 = vpow2.f32 %v10062_v40  ;;  %v10090_v10 = vmul.f32 1.442695, %v9617_v3  ;;  %v10092_v33 = vmul.f32 1.442695, %v9618_v35 }
 0x4f7   : > { %v10094_v42 = vmul.f32 1.442695, %v9619_v7  ;;  %18401 = vpow2.f32 %v10070_v52  ;;  %v8350_v13 = vrot.slane %v8349_v5, 4  ;;  %v13045_v24 = vrot.slane %v13017_v14, %v19159_v57 }
 0x4f8   : > { %v13047_v58 = vcombine.high %v13031_v38, %v13031_v38  ;;  %18403 = vpow2.f32 %v10072_v47  ;;  %v13079_v44 = vcombine.high %v23016_v41, %v23016_v41  ;;  %v13087_v4 = vrot.slane %v23016_v41, %v19159_v57 }
 0x4f9   : > { %v14743_v49 = vmul.f32 %v13031_v38, %v22754_v6  ;;  %18405 = vpow2.f32 %v10074_v34  ;;  %v8351_v19 = vmax.f32 %v8349_v5, %v8350_v13  ;;  %v13049_v50 = vcombine.high %v13045_v24, %v13045_v24 }
 0x4fa   : > { %v14744_v17 = vmul.f32 %v13045_v24, %v22914_v12  ;;  %18407 = vpow2.f32 %v10076_v62  ;;  %v13101_v7 = vrot.slane %v13079_v44, %v19159_v57  ;;  %v13109_v15 = vcombine.high %v13087_v4, %v13087_v4 }
 0x4fb   : > { %v14745_v14 = vmul.f32 %v13047_v58, %v22917_v25  ;;  %18409 = vpow2.f32 %v10078_v53  ;;  %v8352_v8 = vrot.slane %v8351_v19, 2  ;;  %v14746_v30 = vmul.f32 %v13049_v50, %v22927_v20 }
 0x4fc   : > { %v14747_v41 = vmul.f32 %v23012_v59, %v22931_v28  ;;  %18411 = vpow2.f32 %v10080_v54  ;;  %v13111_v38 = vcombine.high %v13101_v7, %v13101_v7  ;;  %v14748_v29 = vmul.f32 %v13087_v4, %v22922_v60 }
 0x4fd   : > { %v14749_v1 = vmul.f32 %v13101_v7, %v22939_v36  ;;  %18413 = vpow2.f32 %v10082_v16  ;;  %v8353_v0 = vmax.f32 %v8351_v19, %v8352_v8  ;;  %v14750_v3 = vmul.f32 %v13109_v15, %v22955_v18 }
 0x4fe   : > { %v15611_v40 = vcombine.low %v14743_v49, %v14744_v17  ;;  %18415 = vpow2.f32 %v10084_v56  ;;  %v14751_v35 = vmul.f32 %v13111_v38, %v23002_v39  ;;  %v15612_v52 = vcombine.low %v14745_v14, %v14746_v30 }
 0x4ff   : > { %v15664_v47 = vrot.slane %v14747_v41, %v19159_v57  ;;  %18417 = vpow2.f32 %v10086_v2  ;;  %v8354_v34 = vrot.slane %v8353_v0, 1  ;;  %v15672_v62 = vcombine.low %v14748_v29, %v14749_v1 }
 0x500   : > { %v15633_v59 = vrot.slane %v15611_v40, %v19159_v57  ;;  %v10068_v5 = vmul.f32 1.442695, %v9606_v32  ;;  %18419 = vpow2.f32 %v10088_v26  ;;  %v15640_v53 = vrot.slane %v15612_v52, %v19159_v57 }
 0x501   : > { %v15673_v54 = vcombine.low %v14750_v3, %v14751_v35  ;;  %18421 = vpow2.f32 %v10090_v10  ;;  %v23075_v16 = vmax.f32 %v8353_v0, %v8354_v34  ;;  %v15671_v31 = vrot.slane %v15664_v47, %v19159_v57 }
 0x502   : > { %v5493_v56 = vcombine.high %v22464_v27, %v22464_v27  ;;  %18423 = vpow2.f32 %v10092_v33  ;;  %v15642_v13 = vcombine.low %v15633_v59, %v15640_v53  ;;  %v15682_v2 = vrot.slane %v15672_v62, %v19159_v57 }
 0x503   : > { %27350 = vst [vmem:[#allocation94_spill] sm:$0xff] %v23075_v16  ;;  %v15689_v24 = vrot.slane %v15673_v54, %v19159_v57  ;;  %v23082_v58 = vpop.eup %18399  ;;  %18425 = vpow2.f32 %v10094_v42  ;;  %v8651_v32 = vcombine.high %v23075_v16, %v23075_v16  ;;  %v8658_v26 = vrot.slane %v23075_v16, %v19159_v57 }
 0x504   : > { %27351 = vst [vmem:[#allocation92_spill] sm:$0xff] %v23082_v58  ;;  %v23090_v10 = vrot.slane %v22464_v27, %v19159_v57  ;;  %v18402_v44 = vpop.eup %18401  ;;  %18427 = vpow2.f32 %v23047_v21  ;;  %v23094_v33 = vrot.slane %v15642_v13, %v19159_v57  ;;  %v23097_v49 = vrot.slane %v5493_v56, %v19159_v57 }
 0x505   : > { %v15704_v4 = vcombine.low %v15682_v2, %v15689_v24  ;;  %v18404_v42 = vpop.eup %18403  ;;  %18429 = vpow2.f32 %v23049_v61  ;;  %v8665_v19 = vrot.slane %v8651_v32, %v19159_v57  ;;  %v8666_v50 = vcombine.high %v8658_v26, %v8658_v26 }
 0x506   : > { %v23102_v17 = vrot.slane %v8658_v26, %v19159_v57  ;;  %v18406_v27 = vpop.eup %18405  ;;  %18431 = vpow2.f32 %v10068_v5  ;;  %v11738_v7 = vcombine.low %v18402_v44, %v18404_v42  ;;  %v23105_v21 = vsel %vm8314_vm10, %v15671_v31, 0.0  ;;  %v27352_v44 = vld [vmem:[#allocation73_spill] sm:$0xff] }
 0x507   : > { %v5508_v15 = vcombine.high %v23090_v10, %v23090_v10  ;;  %v18408_v14 = vpop.eup %18407  ;;  %v8667_v8 = vcombine.high %v8665_v19, %v8665_v19  ;;  %v23110_v30 = vrot.slane %v8665_v19, %v19159_v57  ;;  %v23113_v61 = vrot.slane %v8666_v50, %v19159_v57 }
 0x508   : > { %v23117_v41 = vcombine.high %v23102_v17, %v23102_v17  ;;  %v18410_v38 = vpop.eup %18409  ;;  %v11739_v29 = vcombine.low %v18406_v27, %v18408_v14  ;;  %v15657_v1 = vcombine.low %v22904_v23, %v23094_v33  ;;  %v23122_v0 = vrot.slane %v15704_v4, %v19159_v57 }
 0x509   : > { %v5509_v3 = vcombine.high %v23097_v49, %v23097_v49  ;;  %v18412_v40 = vpop.eup %18411  ;;  %v11760_v35 = vrot.slane %v11738_v7, %v19159_v57  ;;  %v23128_v52 = vrot.slane %v8667_v8, %v19159_v57  ;;  %v23132_v47 = vcombine.high %v23110_v30, %v23110_v30 }
 0x50a   : > { %v23136_v34 = vcombine.high %v23113_v61, %v23113_v61  ;;  %v18414_v59 = vpop.eup %18413  ;;  %v11767_v62 = vrot.slane %v11739_v29, %v19159_v57  ;;  %v11785_v5 = vcombine.low %v18410_v38, %v18412_v40  ;;  %v9467_v53 = vsub.f32 %v22316_v11, %v23102_v17  ;;  %v27357_v40 = vld [vmem:[#allocation82_spill] sm:$0xff] }
 0x50b   : > { %v9475_v54 = vsub.f32 %v22721_v48, %v23102_v17  ;;  %v18416_v31 = vpop.eup %18415  ;;  %v23145_v56 = vcombine.high %v23128_v52, %v23128_v52  ;;  %v9468_v13 = vsub.f32 %v22293_v45, %v23113_v61  ;;  %v9469_v2 = vsub.f32 %v22322_v55, %v23117_v41  ;;  %v27353_v45 = vld [vmem:[#allocation76_spill] sm:$0xff]  ;;  %v27354_v55 = vld [vmem:[#allocation99_spill] sm:$0xff] }
 0x50c   : > { %v9471_v24 = vsub.f32 %v22468_v51, %v23110_v30  ;;  %v18418_v32 = vpop.eup %18417  ;;  %v11769_v26 = vcombine.low %v11760_v35, %v11767_v62  ;;  %v11786_v11 = vcombine.low %v18414_v59, %v18416_v31  ;;  %v9470_v48 = vsub.f32 %v22326_v63, %v23136_v34  ;;  %v27355_v51 = vld [vmem:[#allocation84_spill] sm:$0xff]  ;;  %v27356_v63 = vld [vmem:[#allocation95_spill] sm:$0xff] }
 0x50d   : > { %v9472_v4 = vsub.f32 %v27352_v44, %v23128_v52  ;;  %v18420_v42 = vpop.eup %18419  ;;  %v11795_v19 = vrot.slane %v11785_v5, %v19159_v57  ;;  %v9473_v50 = vsub.f32 %v27353_v45, %v23132_v47  ;;  %v9474_v27 = vsub.f32 %v27354_v55, %v23145_v56  ;;  %v23178_v45 = vpop.f32.mrf.mxu0 }
 0x50e   : > { %v9476_v7 = vsub.f32 %v27355_v51, %v23113_v61  ;;  %v18422_v14 = vpop.eup %18421  ;;  %v11787_v8 = vcombine.low %v18418_v32, %v18420_v42  ;;  %v11802_v38 = vrot.slane %v11786_v11, %v19159_v57  ;;  %v9477_v29 = vsub.f32 %v27356_v63, %v23117_v41  ;;  %27359 = vst [vmem:[#allocation93_spill] sm:$0xff] %v23178_v45  ;;  %v27362_v51 = vld [vmem:[#allocation14_spill] sm:$0xff] }
 0x50f   : > { %v9478_v35 = vsub.f32 %v27357_v40, %v23136_v34  ;;  %v18424_v59 = vpop.eup %18423  ;;  %v23170_v62 = vrot.slane %v11769_v26, %v19159_v57  ;;  %v9479_v5 = vsub.f32 %v22754_v6, %v23110_v30  ;;  %v9480_v61 = vsub.f32 %v22914_v12, %v23128_v52  ;;  %v27361_v30 = vld [vmem:[#allocation108_spill] sm:$0xff] }
 0x510   : > { %v9790_v31 = vmul.f32 1.442695, %v9467_v53  ;;  %v18426_v32 = vpop.eup %18425  ;;  %v11788_v44 = vcombine.low %v18422_v14, %v18424_v59  ;;  %v11817_v11 = vcombine.low %v11795_v19, %v11802_v38  ;;  %v9481_v41 = vsub.f32 %v22917_v25, %v23132_v47  ;;  %v18078_v47 = vpop.f32.mrf.mxu0 }
 0x511   : > { %27358 = vst [vmem:[#allocation8_spill] sm:$0xff] %v23170_v62  ;;  %v9792_v42 = vmul.f32 1.442695, %v9468_v13  ;;  %v23180_v34 = vpop.eup %18427  ;;  %v11840_v26 = vrot.slane %v18426_v32, %v19159_v57  ;;  %v9794_v55 = vmul.f32 1.442695, %v9469_v2  ;;  %vm6364_vm1 = vcmp.eq.s32.totalorder %v27362_v51, %v27361_v30 }
 0x512   : > { %27360 = vst [vmem:[#allocation73_spill] sm:$0xff] %v23180_v34  ;;  %18433 = vpow2.f32 %v9790_v31  ;;  %v9796_v6 = vmul.f32 1.442695, %v9470_v48  ;;  %v23185_v12 = vpop.eup %18429  ;;  %v11809_v52 = vrot.slane %v11787_v8, %v19159_v57  ;;  %v11816_v53 = vrot.slane %v11788_v44, %v19159_v57 }
 0x513   : > { %27363 = vst [vmem:[#allocation76_spill] sm:$0xff] %v23185_v12  ;;  %18435 = vpow2.f32 %v9792_v42  ;;  %v9798_v25 = vmul.f32 1.442695, %v9471_v24  ;;  %v23189_v13 = vpop.eup %18431  ;;  %v9482_v19 = vsub.f32 %v22927_v20, %v23145_v56  ;;  %v9800_v2 = vmul.f32 1.442695, %v9472_v4 }
 0x514   : > { %27364 = vst [vmem:[#allocation99_spill] sm:$0xff] %v23189_v13  ;;  %18437 = vpow2.f32 %v9794_v55  ;;  %v9802_v48 = vmul.f32 1.442695, %v9473_v50  ;;  %v11818_v14 = vcombine.low %v11809_v52, %v11816_v53  ;;  %v9483_v38 = vsub.f32 %v22931_v28, %v23102_v17 }
 0x515   : > { %18439 = vpow2.f32 %v9796_v6  ;;  %v9804_v63 = vmul.f32 1.442695, %v9474_v27  ;;  %v23196_v8 = vrot.slane %v11817_v11, %v19159_v57  ;;  %v23199_v24 = vrot.slane %v11840_v26, %v19159_v57  ;;  %v23262_v26 = vpop.f32.mrf.mxu1 }
 0x516   : > { %18441 = vpow2.f32 %v9798_v25  ;;  %v9806_v40 = vmul.f32 1.442695, %v9475_v54  ;;  %v9808_v59 = vmul.f32 1.442695, %v9476_v7  ;;  %v9810_v20 = vmul.f32 1.442695, %v9477_v29 }
 0x517   : > { %27365 = vst [vmem:[#allocation84_spill] sm:$0xff] %v23196_v8  ;;  %27366 = vst [vmem:[#allocation95_spill] sm:$0xff] %v23199_v24  ;;  %18443 = vpow2.f32 %v9800_v2  ;;  %v9812_v56 = vmul.f32 1.442695, %v9478_v35  ;;  %v23202_v4 = vrot.slane %v11818_v14, %v19159_v57  ;;  %v9814_v50 = vmul.f32 1.442695, %v9479_v5 }
 0x518   : > { %18445 = vpow2.f32 %v9802_v48  ;;  %v9816_v28 = vmul.f32 1.442695, %v9480_v61  ;;  %v9818_v17 = vmul.f32 1.442695, %v9481_v41  ;;  %v17098_v27 = vsel %vm732_vm2, %v15657_v1, 0.0  ;;  %v27371_v41 = vld [vmem:[#allocation110_spill] sm:$0xff]  ;;  %v18114_v48 = vpop.f32.mrf.mxu1 }
 0x519   : > { %27367 = vst [vmem:[#allocation82_spill] sm:$0xff] %v23202_v4  ;;  %18447 = vpow2.f32 %v9804_v63  ;;  %v23210_v54 = vrot.slane %v23090_v10, %v19159_v57  ;;  %v17099_v7 = vadd.f32 %v17098_v27, %v22908_v43  ;;  %v23215_v29 = vrot.slane %v23097_v49, %v19159_v57  ;;  %27372 = vst [vmem:[#allocation121_spill] sm:$0xff] %v23262_v26 }
 0x51a   : > { %18449 = vpow2.f32 %v9806_v40  ;;  %v23221_v35 = vrot.slane %v5508_v15, %v19159_v57  ;;  %v9820_v23 = vmul.f32 1.442695, %v9482_v19  ;;  %v9822_v33 = vmul.f32 1.442695, %v9483_v38  ;;  %v27376_v40 = vld [vmem:[#allocation75_spill] sm:$0xff] }
 0x51b   : > { %18451 = vpow2.f32 %v9808_v59  ;;  %v23227_v1 = vrot.slane %v5509_v3, %v19159_v57  ;;  %v23232_v5 = vadd.f32 %v23105_v21, %v17099_v7  ;;  %v23236_v10 = vcombine.high %v23210_v54, %v23210_v54 }
 0x51c   : > { %18453 = vpow2.f32 %v9810_v20  ;;  %v23242_v15 = vsel %vm6364_vm1, 1.0, %v27298_v9  ;;  %v7817_v49 = vcombine.low %v23210_v54, %v23221_v35  ;;  %v18024_v3 = vcombine.high %v23210_v54, %v23221_v35 }
 0x51d   : > { %27368 = vst [vmem:[#allocation108_spill] sm:$0xff] %v23232_v5  ;;  %18455 = vpow2.f32 %v9812_v56  ;;  %27369 = vst [vmem:[#allocation119_spill] sm:$0xff] %v23242_v15  ;;  %v23250_v21 = vcombine.high %v23215_v29, %v23215_v29  ;;  %v7864_v61 = vcombine.low %v23215_v29, %v23227_v1  ;;  %v18025_v31 = vcombine.high %v23215_v29, %v23227_v1 }
 0x51e   : > { %18457 = vpow2.f32 %v9814_v50  ;;  %v7839_v44 = vrot.slane %v7817_v49, %v19159_v57  ;;  %v7846_v11 = vrot.slane %v18024_v3, %v19159_v57  ;;  %v13960_v42 = vcombine.high %v27371_v41, %v27371_v41 }
 0x51f   : > { %v23256_v32 = vpop.eup %18433  ;;  %18459 = vpow2.f32 %v9816_v28  ;;  %v7874_v6 = vrot.slane %v7864_v61, %v19159_v57  ;;  %v7881_v52 = vrot.slane %v18025_v31, %v19159_v57  ;;  %v14016_v53 = vrot.slane %v23242_v15, %v19159_v57 }
 0x520   : > { %27370 = vst [vmem:[#allocation120_spill] sm:$0xff] %v23256_v32  ;;  %v23264_v55 = vpop.eup %18435  ;;  %18461 = vpow2.f32 %v9818_v17  ;;  %v23274_v47 = vcombine.high %v23221_v35, %v23221_v35  ;;  %v7848_v19 = vcombine.low %v7839_v44, %v7846_v11  ;;  %v13974_v2 = vrot.slane %v13960_v42, %v19159_v57 }
 0x521   : > { %27373 = vst [vmem:[#allocation122_spill] sm:$0xff] %v23264_v55  ;;  %v23270_v25 = vpop.eup %18437  ;;  %18463 = vpow2.f32 %v9820_v23  ;;  %v14024_v38 = vcombine.high %v14016_v53, %v14016_v53  ;;  %v14032_v63 = vrot.slane %v14016_v53, %v19159_v57  ;;  %v4660_v59 = vcombine.high %v27376_v40, %v27376_v40  ;;  %v27396_v55 = vld [vmem:[#allocation72_spill] sm:$0xff] }
 0x522   : > { %27374 = vst [vmem:[#allocation123_spill] sm:$0xff] %v23270_v25  ;;  %v23277_v14 = vpop.eup %18439  ;;  %18465 = vpow2.f32 %v9822_v33  ;;  %v23285_v50 = vcombine.high %v23227_v1, %v23227_v1  ;;  %v13976_v28 = vcombine.high %v13974_v2, %v13974_v2  ;;  %v13990_v17 = vrot.slane %v13974_v2, %v19159_v57 }
 0x523   : > { %27375 = vst [vmem:[#allocation124_spill] sm:$0xff] %v23277_v14  ;;  %v18442_v20 = vpop.eup %18441  ;;  %v23289_v7 = vrot.slane %v7848_v19, %v19159_v57  ;;  %v7896_v23 = vcombine.low %v7874_v6, %v7881_v52  ;;  %v14046_v33 = vrot.slane %v14024_v38, %v19159_v57  ;;  %v14054_v49 = vcombine.high %v14032_v63, %v14032_v63 }
 0x524   : > { %v18444_v27 = vpop.eup %18443  ;;  %v14004_v31 = vrot.slane %v13976_v28, %v19159_v57  ;;  %v14006_v44 = vcombine.high %v13990_v17, %v13990_v17  ;;  %v4667_v11 = vrot.slane %v27376_v40, %v19159_v57  ;;  %v14892_v2 = vmul.f32 %v14032_v63, %v23215_v29 }
 0x525   : > { %v18446_v3 = vpop.eup %18445  ;;  %v10842_v61 = vcombine.low %v18442_v20, %v18444_v27  ;;  %v14056_v53 = vcombine.high %v14046_v33, %v14046_v33  ;;  %v14893_v48 = vmul.f32 %v14046_v33, %v23227_v1  ;;  %v4674_v19 = vrot.slane %v4660_v59, %v19159_v57 }
 0x526   : > { %v18448_v42 = vpop.eup %18447  ;;  %v14008_v38 = vcombine.high %v14004_v31, %v14004_v31  ;;  %v14888_v56 = vmul.f32 %v13990_v17, %v23210_v54  ;;  %v14889_v20 = vmul.f32 %v14004_v31, %v23221_v35  ;;  %v14894_v40 = vmul.f32 %v14054_v49, %v23250_v21 }
 0x527   : > { %v18450_v6 = vpop.eup %18449  ;;  %v10843_v52 = vcombine.low %v18446_v3, %v18448_v42  ;;  %v10864_v27 = vrot.slane %v10842_v61, %v19159_v57  ;;  %v14895_v43 = vmul.f32 %v14056_v53, %v23285_v50  ;;  %v16617_v41 = vcombine.low %v14892_v2, %v14893_v48 }
 0x528   : > { %v18452_v28 = vpop.eup %18451  ;;  %v14890_v59 = vmul.f32 %v14006_v44, %v23236_v10  ;;  %v14891_v3 = vmul.f32 %v14008_v38, %v23274_v47  ;;  %v4675_v42 = vcombine.high %v4667_v11, %v4667_v11  ;;  %v16570_v5 = vcombine.low %v14888_v56, %v14889_v20 }
 0x529   : > { %v18454_v63 = vpop.eup %18453  ;;  %v10871_v33 = vrot.slane %v10843_v52, %v19159_v57  ;;  %v10889_v17 = vcombine.low %v18450_v6, %v18452_v28  ;;  %v16618_v31 = vcombine.low %v14894_v40, %v14895_v43  ;;  %v4676_v24 = vcombine.high %v4674_v19, %v4674_v19 }
 0x52a   : > { %v18456_v16 = vpop.eup %18455  ;;  %v16571_v49 = vcombine.low %v14890_v59, %v14891_v3  ;;  %v23307_v53 = vrot.slane %v4667_v11, %v19159_v57  ;;  %v23310_v48 = vrot.slane %v7896_v23, %v19159_v57  ;;  %v16627_v44 = vrot.slane %v16617_v41, %v19159_v57 }
 0x52b   : > { %v18458_v4 = vpop.eup %18457  ;;  %v10873_v61 = vcombine.low %v10864_v27, %v10871_v33  ;;  %v10890_v8 = vcombine.low %v18454_v63, %v18456_v16  ;;  %v16634_v52 = vrot.slane %v16618_v31, %v19159_v57  ;;  %v23315_v6 = vrot.slane %v4674_v19, %v19159_v57 }
 0x52c   : > { %v18460_v2 = vpop.eup %18459  ;;  %v16599_v16 = vrot.slane %v16571_v49, %v19159_v57  ;;  %v23320_v11 = vrot.slane %v4675_v42, %v19159_v57  ;;  %v10899_v23 = vrot.slane %v10889_v17, %v19159_v57  ;;  %v16592_v28 = vrot.slane %v16570_v5, %v19159_v57 }
 0x52d   : > { %v18462_v43 = vpop.eup %18461  ;;  %v10891_v56 = vcombine.low %v18458_v4, %v18460_v2  ;;  %v10906_v38 = vrot.slane %v10890_v8, %v19159_v57  ;;  %v16649_v41 = vcombine.low %v16627_v44, %v16634_v52  ;;  %v23325_v27 = vrot.slane %v4676_v24, %v19159_v57 }
 0x52e   : > { %v18464_v20 = vpop.eup %18463  ;;  %v23328_v40 = vrot.slane %v10873_v61, %v19159_v57  ;;  %v23332_v8 = vcombine.high %v23307_v53, %v23307_v53  ;;  %v23336_v63 = vcombine.high %v23315_v6, %v23315_v6  ;;  %v16601_v24 = vcombine.low %v16592_v28, %v16599_v16 }
 0x52f   : > { %27377 = vst [vmem:[#allocation75_spill] sm:$0xff] %v23325_v27  ;;  %v18466_v19 = vpop.eup %18465  ;;  %v10892_v4 = vcombine.low %v18462_v43, %v18464_v20  ;;  %v10913_v33 = vrot.slane %v10891_v56, %v19159_v57  ;;  %v10921_v5 = vcombine.low %v10899_v23, %v10906_v38  ;;  %v23342_v42 = vrot.slane %v16649_v41, %v19159_v57 }
 0x530   : > { %27378 = vst [vmem:[#allocation125_spill] sm:$0xff] %v23328_v40  ;;  %27379 = vst [vmem:[#allocation126_spill] sm:$0xff] %v23332_v8  ;;  %v10944_v59 = vrot.slane %v18466_v19, %v19159_v57  ;;  %v23346_v17 = vcombine.high %v23320_v11, %v23320_v11  ;;  %vm6340_vm3 = vcmp.eq.s32.totalorder %v27362_v51, %v22943_v46 }
 0x531   : > { %27380 = vst [vmem:[#allocation127_spill] sm:$0xff] %v23336_v63  ;;  %v10920_v3 = vrot.slane %v10892_v4, %v19159_v57  ;;  %v23352_v31 = vcombine.high %v23325_v27, %v23325_v27  ;;  %v23355_v61 = vsel %vm6340_vm3, 1.0, %v27298_v9  ;;  %v6921_v49 = vcombine.low %v23307_v53, %v23320_v11 }
 0x532   : > { %27381 = vst [vmem:[#allocation128_spill] sm:$0xff] %v23346_v17  ;;  %27383 = vst [vmem:[#allocation130_spill] sm:$0xff] %v23355_v61  ;;  %v18008_v2 = vcombine.high %v23307_v53, %v23320_v11  ;;  %v6968_v52 = vcombine.low %v23315_v6, %v23325_v27  ;;  %v18009_v43 = vcombine.high %v23315_v6, %v23325_v27 }
 0x533   : > { %27382 = vst [vmem:[#allocation129_spill] sm:$0xff] %v23352_v31  ;;  %v10922_v44 = vcombine.low %v10913_v33, %v10920_v3  ;;  %v13064_v56 = vcombine.high %v22990_v37, %v22990_v37  ;;  %v23368_v38 = vrot.slane %v10921_v5, %v19159_v57  ;;  %v6943_v16 = vrot.slane %v6921_v49, %v19159_v57  ;;  %v27386_v49 = vld [vmem:[#allocation88_spill] sm:$0xff] }
 0x534   : > { %v6950_v20 = vrot.slane %v18008_v2, %v19159_v57  ;;  %v13120_v23 = vrot.slane %v23355_v61, %v19159_v57  ;;  %v6978_v41 = vrot.slane %v6968_v52, %v19159_v57  ;;  %v6985_v19 = vrot.slane %v18009_v43, %v19159_v57 }
 0x535   : > { %27384 = vst [vmem:[#allocation131_spill] sm:$0xff] %v23368_v38  ;;  %v23375_v28 = vrot.slane %v10922_v44, %v19159_v57  ;;  %v13078_v4 = vrot.slane %v13064_v56, %v19159_v57  ;;  %v23381_v33 = vrot.slane %v16601_v24, %v19159_v57  ;;  %v5542_v2 = vcombine.high %v27386_v49, %v27386_v49 }
 0x536   : > { %v13128_v5 = vcombine.high %v13120_v23, %v13120_v23  ;;  %v13136_v3 = vrot.slane %v13120_v23, %v19159_v57  ;;  %v23387_v37 = vrot.slane %v10944_v59, %v19159_v57  ;;  %v5549_v52 = vrot.slane %v27386_v49, %v19159_v57 }
 0x537   : > { %27385 = vst [vmem:[#allocation132_spill] sm:$0xff] %v23375_v28  ;;  %v13080_v44 = vcombine.high %v13078_v4, %v13078_v4  ;;  %v13094_v62 = vrot.slane %v13078_v4, %v19159_v57  ;;  %v6952_v24 = vcombine.low %v6943_v16, %v6950_v20  ;;  %v7000_v23 = vcombine.low %v6978_v41, %v6985_v19 }
 0x538   : > { %27387 = vst [vmem:[#allocation88_spill] sm:$0xff] %v23387_v37  ;;  %v13150_v56 = vrot.slane %v13128_v5, %v19159_v57  ;;  %v13158_v12 = vcombine.high %v13136_v3, %v13136_v3  ;;  %v14756_v59 = vmul.f32 %v13136_v3, %v23315_v6  ;;  %v5556_v49 = vrot.slane %v5542_v2, %v19159_v57  ;;  %v23404_v3 = vpop.f32.mrf.mxu0 }
 0x539   : > { %v13108_v13 = vrot.slane %v13080_v44, %v19159_v57  ;;  %v13110_v58 = vcombine.high %v13094_v62, %v13094_v62  ;;  %v14752_v34 = vmul.f32 %v13094_v62, %v23307_v53  ;;  %v5557_v20 = vcombine.high %v5549_v52, %v5549_v52  ;;  %27388 = vst [vmem:[#allocation133_spill] sm:$0xff] %v23404_v3 }
 0x53a   : > { %v13160_v37 = vcombine.high %v13150_v56, %v13150_v56  ;;  %v14757_v4 = vmul.f32 %v13150_v56, %v23325_v27  ;;  %v14758_v16 = vmul.f32 %v13158_v12, %v23336_v63  ;;  %v5558_v44 = vcombine.high %v5556_v49, %v5556_v49 }
 0x53b   : > { %v13112_v40 = vcombine.high %v13108_v13, %v13108_v13  ;;  %v14753_v43 = vmul.f32 %v13108_v13, %v23320_v11  ;;  %v14754_v41 = vmul.f32 %v13110_v58, %v23332_v8  ;;  %v23408_v56 = vrot.slane %v5556_v49, %v19159_v57 }
 0x53c   : > { %v14759_v19 = vmul.f32 %v13160_v37, %v23352_v31  ;;  %v15721_v5 = vcombine.low %v14756_v59, %v14757_v4  ;;  %v23411_v2 = vrot.slane %v5557_v20, %v19159_v57  ;;  %v23414_v12 = vrot.slane %v6952_v24, %v19159_v57  ;;  %v18081_v59 = vpop.f32.mrf.mxu0 }
 0x53d   : > { %v14755_v62 = vmul.f32 %v13112_v40, %v23346_v17  ;;  %v15674_v28 = vcombine.low %v14752_v34, %v14753_v43  ;;  %v23417_v58 = vrot.slane %v7000_v23, %v19159_v57  ;;  %v23420_v13 = vrot.slane %v5549_v52, %v19159_v57  ;;  %v27389_v23 = vld [vmem:[#allocation20_spill] sm:$0xff]  ;;  %v27390_v52 = vld [vmem:[#allocation22_spill] sm:$0xff] }
 0x53e   : > { %v15722_v37 = vcombine.low %v14758_v16, %v14759_v19  ;;  %v15731_v40 = vrot.slane %v15721_v5, %v19159_v57  ;;  %v23425_v43 = vrot.slane %v5558_v44, %v19159_v57  ;;  %v23430_v24 = vcombine.high %v23408_v56, %v23408_v56 }
 0x53f   : > { %v15675_v4 = vcombine.low %v14754_v41, %v14755_v62  ;;  %v15696_v34 = vrot.slane %v15674_v28, %v19159_v57  ;;  %v6230_v16 = vcombine.high %v27389_v23, %v27389_v23  ;;  %vm6365_vm4 = vcmp.eq.s32.totalorder %v27390_v52, %v27361_v30  ;;  %v27392_v41 = vld [vmem:[#allocation112_spill] sm:$0xff]  ;;  %v27394_v23 = vld [vmem:[#allocation21_spill] sm:$0xff] }
 0x540   : > { %v15738_v49 = vrot.slane %v15722_v37, %v19159_v57  ;;  %v23438_v28 = vsel %vm6365_vm4, 1.0, %v27298_v9  ;;  %v7863_v19 = vcombine.low %v27392_v41, %v23289_v7  ;;  %v7866_v5 = vcombine.low %v23420_v13, %v23411_v2 }
 0x541   : > { %v15703_v20 = vrot.slane %v15675_v4, %v19159_v57  ;;  %27391 = vst [vmem:[#allocation20_spill] sm:$0xff] %v23438_v28  ;;  %v23445_v62 = vrot.slane %v6230_v16, %v19159_v57  ;;  %v18026_v37 = vcombine.high %v23420_v13, %v23411_v2  ;;  %v7919_v30 = vrot.slane %v23408_v56, %v19159_v57 }
 0x542   : > { %v15753_v44 = vcombine.low %v15731_v40, %v15738_v49  ;;  %v23453_v59 = vcombine.high %v23420_v13, %v23420_v13  ;;  %v23457_v7 = vcombine.high %v23411_v2, %v23411_v2  ;;  %v23461_v4 = vcombine.high %v23425_v43, %v23425_v43 }
 0x543   : > { %27393 = vst [vmem:[#allocation112_spill] sm:$0xff] %v23445_v62  ;;  %v7888_v40 = vrot.slane %v7866_v5, %v19159_v57  ;;  %v15705_v49 = vcombine.low %v15696_v34, %v15703_v20  ;;  %v23466_v16 = vrot.slane %v23445_v62, %v27394_v23  ;;  %v7895_v41 = vrot.slane %v18026_v37, %v19159_v57  ;;  %v27395_v20 = vld [vmem:[#allocation5_spill] sm:$0xff] }
 0x544   : > { %v23472_v25 = vrot.slane %v15753_v44, %v19159_v57  ;;  %v8444_v14 = vsel %vm732_vm2, %v7863_v19, -inf  ;;  %v14009_v32 = vcombine.high %v23242_v15, %v23242_v15  ;;  %v14064_v34 = vrot.slane %v23438_v28, %v19159_v57  ;;  %v27398_v15 = vld [vmem:[#allocation116_spill] sm:$0xff] }
 0x545   : > { %vm6366_vm5 = vcmp.eq.s32.totalorder %v27395_v20, %v23466_v16  ;;  %v7897_v5 = vcombine.low %v7888_v40, %v7895_v41  ;;  %v7926_v37 = vrot.slane %v7919_v30, %v19159_v57  ;;  %v4709_v38 = vcombine.high %v27396_v55, %v27396_v55 }
 0x546   : > { %v23485_v44 = vsel %vm6366_vm5, 1.0, %v27298_v9  ;;  %v14023_v19 = vrot.slane %v14009_v32, %v19159_v57  ;;  %v14071_v62 = vrot.slane %v14064_v34, %v19159_v57  ;;  %v16616_v3 = vcombine.low %v27398_v15, %v23381_v33 }
 0x547   : > { %27397 = vst [vmem:[#allocation72_spill] sm:$0xff] %v23485_v44  ;;  %v7911_v28 = vrot.slane %v7897_v5, %v19159_v57  ;;  %v23494_v40 = vrot.slane %v23485_v44, %v19159_v57  ;;  %v4716_v30 = vrot.slane %v27396_v55, %v19159_v57  ;;  %v4723_v41 = vrot.slane %v4709_v38, %v19159_v57 }
 0x548   : > { %v23500_v26 = vrot.slane %v15705_v49, %v19159_v57  ;;  %v14025_v32 = vcombine.high %v14023_v19, %v14023_v19  ;;  %v14039_v34 = vrot.slane %v14023_v19, %v19159_v57  ;;  %v14900_v45 = vmul.f32 %v14071_v62, %v23408_v56 }
 0x549   : > { %v7912_v15 = vcombine.low %v23310_v48, %v7911_v28  ;;  %v8447_v33 = vsel %vm8314_vm10, %v7926_v37, -inf  ;;  %v23508_v5 = vrot.slane %v23494_v40, %v19159_v57  ;;  %v4724_v31 = vcombine.high %v4716_v30, %v4716_v30 }
 0x54a   : > { %v14053_v55 = vrot.slane %v14025_v32, %v19159_v57  ;;  %v14055_v38 = vcombine.high %v14039_v34, %v14039_v34  ;;  %v16672_v49 = vrot.slane %v14900_v45, %v19159_v57  ;;  %v23513_v17 = vsel %vm732_vm2, %v16616_v3, 0.0 }
 0x54b   : > { %27399 = vst [vmem:[#allocation116_spill] sm:$0xff] %v23508_v5  ;;  %v8445_v19 = vsel %vm732_vm2, %v7912_v15, -inf  ;;  %v4725_v62 = vcombine.high %v4723_v41, %v4723_v41  ;;  %v23517_v48 = vrot.slane %v4716_v30, %v19159_v57  ;;  %v23520_v28 = vrot.slane %v4723_v41, %v19159_v57  ;;  %v27401_v30 = vld [vmem:[#allocation23_spill] sm:$0xff] }
 0x54c   : > { %v8446_v37 = vmax.f32 %v8444_v14, %v8445_v19  ;;  %v14057_v63 = vcombine.high %v14053_v55, %v14053_v55  ;;  %v14896_v27 = vmul.f32 %v14039_v34, %v23420_v13  ;;  %v14897_v32 = vmul.f32 %v14053_v55, %v23411_v2 }
 0x54d   : > { %v23526_v45 = vmul.f32 %v23508_v5, %v23425_v43  ;;  %v16679_v3 = vrot.slane %v16672_v49, %v19159_v57  ;;  %v23530_v15 = vrot.slane %v4724_v31, %v19159_v57  ;;  %v23534_v8 = vrot.slane %v27401_v30, %v27394_v23 }
 0x54e   : > { %v8448_v41 = vmax.f32 %v8446_v37, %v8447_v33  ;;  %v14898_v14 = vmul.f32 %v14055_v38, %v23453_v59  ;;  %v14899_v34 = vmul.f32 %v14057_v63, %v23457_v7  ;;  %v16619_v19 = vcombine.low %v14896_v27, %v14897_v32 }
 0x54f   : > { %27400 = vst [vmem:[#allocation134_spill] sm:$0xff] %v23526_v45  ;;  %27402 = vst [vmem:[#allocation23_spill] sm:$0xff] %v23534_v8  ;;  %v23539_v55 = vrot.slane %v4725_v62, %v19159_v57  ;;  %v23543_v45 = vcombine.high %v23517_v48, %v23517_v48  ;;  %v23547_v31 = vcombine.high %v23520_v28, %v23520_v28  ;;  %v17199_v27 = vsel %vm8314_vm10, %v16679_v3, 0.0 }
 0x550   : > { %vm6341_vm6 = vcmp.eq.s32.totalorder %v27390_v52, %v22943_v46  ;;  %v8449_v33 = vrot.slane %v8448_v41, 4  ;;  %v16620_v49 = vcombine.low %v14898_v14, %v14899_v34  ;;  %v16641_v38 = vrot.slane %v16619_v19, %v19159_v57 }
 0x551   : > { %27403 = vst [vmem:[#allocation135_spill] sm:$0xff] %v23539_v55  ;;  %27404 = vst [vmem:[#allocation136_spill] sm:$0xff] %v23547_v31  ;;  %vm6342_vm7 = vcmp.eq.s32.totalorder %v27395_v20, %v23534_v8  ;;  %v23556_v63 = vsel %vm6341_vm6, 1.0, %v27298_v9  ;;  %v6967_v62 = vcombine.low %v23052_v22, %v23414_v12  ;;  %v6970_v37 = vcombine.low %v23517_v48, %v23530_v15 }
 0x552   : > { %27405 = vst [vmem:[#allocation137_spill] sm:$0xff] %v23556_v63  ;;  %v8450_v32 = vmax.f32 %v8448_v41, %v8449_v33  ;;  %v16648_v46 = vrot.slane %v16620_v49, %v19159_v57  ;;  %v18010_v30 = vcombine.high %v23517_v48, %v23530_v15  ;;  %v7023_v3 = vrot.slane %v23520_v28, %v19159_v57 }
 0x553   : > { %v23569_v14 = vcombine.high %v23530_v15, %v23530_v15  ;;  %v23573_v34 = vcombine.high %v23539_v55, %v23539_v55  ;;  %v6992_v22 = vrot.slane %v6970_v37, %v19159_v57  ;;  %v13113_v12 = vcombine.high %v23355_v61, %v23355_v61 }
 0x554   : > { %v8451_v41 = vrot.slane %v8450_v32, 2  ;;  %v16650_v19 = vcombine.low %v16641_v38, %v16648_v46  ;;  %v23579_v33 = vsel %vm6342_vm7, 1.0, %v27298_v9  ;;  %v6999_v49 = vrot.slane %v18010_v30, %v19159_v57 }
 0x555   : > { %27406 = vst [vmem:[#allocation138_spill] sm:$0xff] %v23573_v34  ;;  %27407 = vst [vmem:[#allocation139_spill] sm:$0xff] %v23579_v33  ;;  %v7030_v20 = vrot.slane %v7023_v3, %v19159_v57  ;;  %v13127_v52 = vrot.slane %v13113_v12, %v19159_v57  ;;  %v13168_v37 = vrot.slane %v23556_v63, %v19159_v57  ;;  %v8356_v38 = vsel %vm732_vm2, %v6967_v62, -inf }
 0x556   : > { %v8452_v34 = vmax.f32 %v8450_v32, %v8451_v41  ;;  %v16664_v61 = vrot.slane %v16650_v19, %v19159_v57  ;;  %v7001_v8 = vcombine.low %v6992_v22, %v6999_v49  ;;  %v23594_v3 = vrot.slane %v23579_v33, %v19159_v57  ;;  %v27415_v33 = vld [vmem:[#allocation109_spill] sm:$0xff] }
 0x557   : > { %v13129_v46 = vcombine.high %v13127_v52, %v13127_v52  ;;  %v13143_v5 = vrot.slane %v13127_v52, %v19159_v57  ;;  %v13175_v30 = vrot.slane %v13168_v37, %v19159_v57  ;;  %v15720_v32 = vcombine.low %v23122_v0, %v23500_v26 }
 0x558   : > { %27408 = vst [vmem:[#allocation140_spill] sm:$0xff] %v23594_v3  ;;  %v8453_v23 = vrot.slane %v8452_v34, 1  ;;  %v16665_v12 = vcombine.low %v23342_v42, %v16664_v61  ;;  %v7015_v63 = vrot.slane %v7001_v8, %v19159_v57  ;;  %v8359_v22 = vsel %vm8314_vm10, %v7030_v20, -inf  ;;  %v23611_v61 = vpop.f32.mrf.mxu1 }
 0x559   : > { %v13157_v62 = vrot.slane %v13129_v46, %v19159_v57  ;;  %v23604_v52 = vrot.slane %v23594_v3, %v19159_v57  ;;  %v14764_v41 = vmul.f32 %v13175_v30, %v23520_v28  ;;  %v13159_v8 = vcombine.high %v13143_v5, %v13143_v5  ;;  %27411 = vst [vmem:[#allocation143_spill] sm:$0xff] %v23611_v61 }
 0x55a   : > { %v23607_v19 = vmax.f32 %v8452_v34, %v8453_v23  ;;  %v17197_v49 = vsel %vm732_vm2, %v16665_v12, 0.0  ;;  %v7016_v42 = vcombine.low %v23417_v58, %v7015_v63  ;;  %v14760_v20 = vmul.f32 %v13143_v5, %v23517_v48  ;;  %v18117_v63 = vpop.f32.mrf.mxu1 }
 0x55b   : > { %27409 = vst [vmem:[#allocation141_spill] sm:$0xff] %v23604_v52  ;;  %v17198_v0 = vadd.f32 %v17197_v49, %v23513_v17  ;;  %v13161_v26 = vcombine.high %v13157_v62, %v13157_v62  ;;  %v14761_v37 = vmul.f32 %v13157_v62, %v23530_v15  ;;  %v15776_v58 = vrot.slane %v14764_v41, %v19159_v57 }
 0x55c   : > { %27410 = vst [vmem:[#allocation142_spill] sm:$0xff] %v23607_v19  ;;  %v9092_v46 = vcombine.high %v23607_v19, %v23607_v19  ;;  %v9099_v23 = vrot.slane %v23607_v19, %v19159_v57  ;;  %v8357_v34 = vsel %vm732_vm2, %v7016_v42, -inf  ;;  %v23628_v3 = vsel %vm732_vm2, %v15720_v32, 0.0  ;;  %v27413_v32 = vld [vmem:[#allocation105_spill] sm:$0xff] }
 0x55d   : > { %v17200_v30 = vadd.f32 %v17199_v27, %v17198_v0  ;;  %v8358_v12 = vmax.f32 %v8356_v38, %v8357_v34  ;;  %v14763_v17 = vmul.f32 %v13161_v26, %v23569_v14  ;;  %v15723_v49 = vcombine.low %v14760_v20, %v14761_v37 }
 0x55e   : > { %v9106_v5 = vrot.slane %v9092_v46, %v19159_v57  ;;  %v9107_v61 = vcombine.high %v9099_v23, %v9099_v23  ;;  %v23625_v62 = vrot.slane %v9099_v23, %v19159_v57  ;;  %v14762_v42 = vmul.f32 %v13159_v8, %v23543_v45 }
 0x55f   : > { %v17201_v19 = vrot.slane %v17200_v30, 4  ;;  %v23633_v41 = vmul.f32 %v23604_v52, %v23539_v55  ;;  %v23636_v27 = vrot.slane %v15776_v58, %v19159_v57  ;;  %v8360_v46 = vmax.f32 %v8358_v12, %v8359_v22  ;;  %v27417_v12 = vld [vmem:[#allocation111_spill] sm:$0xff] }
 0x560   : > { %v9108_v38 = vcombine.high %v9106_v5, %v9106_v5  ;;  %v9122_v0 = vrot.slane %v9106_v5, %v19159_v57  ;;  %v9129_v26 = vrot.slane %v9107_v61, %v19159_v57  ;;  %v9137_v20 = vcombine.high %v23625_v62, %v23625_v62 }
 0x561   : > { %27412 = vst [vmem:[#allocation144_spill] sm:$0xff] %v23633_v41  ;;  %v9620_v37 = vsub.f32 %v27413_v32, %v23625_v62  ;;  %v15724_v8 = vcombine.low %v14762_v42, %v14763_v17  ;;  %v15745_v23 = vrot.slane %v15723_v49, %v19159_v57  ;;  %v27414_v41 = vld [vmem:[#allocation60_spill] sm:$0xff]  ;;  %v9628_v61 = vsub.f32 %v23215_v29, %v23625_v62 }
 0x562   : > { %v9136_v34 = vrot.slane %v9108_v38, %v19159_v57  ;;  %v9138_v63 = vcombine.high %v9122_v0, %v9122_v0  ;;  %v9139_v58 = vcombine.high %v9129_v26, %v9129_v26  ;;  %v9621_v52 = vsub.f32 %v27414_v41, %v9129_v26 }
 0x563   : > { %v9622_v5 = vsub.f32 %v27415_v33, %v9137_v20  ;;  %v9636_v31 = vsub.f32 %v23408_v56, %v23625_v62  ;;  %v23652_v55 = vadd.f32 %v17201_v19, %v17200_v30  ;;  %v9624_v49 = vsub.f32 %v23210_v54, %v9122_v0 }
 0x564   : > { %v9140_v22 = vcombine.high %v9136_v34, %v9136_v34  ;;  %v9623_v17 = vsub.f32 %v27417_v12, %v9139_v58  ;;  %v9629_v42 = vsub.f32 %v23227_v1, %v9129_v26  ;;  %v9625_v38 = vsub.f32 %v23221_v35, %v9136_v34 }
 0x565   : > { %27416 = vst [vmem:[#allocation105_spill] sm:$0xff] %v23652_v55  ;;  %v9626_v41 = vsub.f32 %v23236_v10, %v9138_v63  ;;  %v9630_v33 = vsub.f32 %v23250_v21, %v9137_v20  ;;  %v9631_v29 = vsub.f32 %v23285_v50, %v9139_v58  ;;  %v9632_v56 = vsub.f32 %v23420_v13, %v9122_v0  ;;  %v27418_v58 = vld [vmem:[#allocation118_spill] sm:$0xff] }
 0x566   : > { %v9627_v32 = vsub.f32 %v23274_v47, %v9140_v22  ;;  %v10096_v19 = vmul.f32 1.442695, %v9620_v37  ;;  %v10098_v30 = vmul.f32 1.442695, %v9621_v52  ;;  %v9633_v62 = vsub.f32 %v23411_v2, %v9136_v34 }
 0x567   : > { %v9634_v54 = vsub.f32 %v23453_v59, %v9138_v63  ;;  %v10100_v12 = vmul.f32 1.442695, %v9622_v5  ;;  %v10102_v1 = vmul.f32 1.442695, %v9623_v17  ;;  %v9635_v35 = vsub.f32 %v23457_v7, %v9140_v22 }
 0x568   : > { %18467 = vpow2.f32 %v10096_v19  ;;  %v10104_v10 = vmul.f32 1.442695, %v9624_v49  ;;  %v15752_v21 = vrot.slane %v15724_v8, %v19159_v57  ;;  %v10106_v50 = vmul.f32 1.442695, %v9625_v38 }
 0x569   : > { %18469 = vpow2.f32 %v10098_v30  ;;  %v10108_v26 = vmul.f32 1.442695, %v9626_v41  ;;  %v10110_v47 = vmul.f32 1.442695, %v9627_v32  ;;  %v10112_v13 = vmul.f32 1.442695, %v9628_v61 }
 0x56a   : > { %18471 = vpow2.f32 %v10100_v12  ;;  %v10114_v0 = vmul.f32 1.442695, %v9629_v42  ;;  %v10116_v52 = vmul.f32 1.442695, %v9630_v33  ;;  %v10118_v2 = vmul.f32 1.442695, %v9631_v29 }
 0x56b   : > { %18473 = vpow2.f32 %v10102_v1  ;;  %v10120_v20 = vmul.f32 1.442695, %v9632_v56  ;;  %v10122_v59 = vmul.f32 1.442695, %v9633_v62  ;;  %v10124_v37 = vmul.f32 1.442695, %v9634_v54 }
 0x56c   : > { %18475 = vpow2.f32 %v10104_v10  ;;  %v8361_v34 = vrot.slane %v8360_v46, 4  ;;  %v15754_v7 = vcombine.low %v15745_v23, %v15752_v21  ;;  %v10126_v63 = vmul.f32 1.442695, %v9635_v35 }
 0x56d   : > { %18477 = vpow2.f32 %v10106_v50  ;;  %v5591_v8 = vcombine.high %v27418_v58, %v27418_v58  ;;  %v5598_v5 = vrot.slane %v27418_v58, %v19159_v57  ;;  %v10128_v61 = vmul.f32 1.442695, %v9636_v31 }
 0x56e   : > { %18479 = vpow2.f32 %v10108_v26  ;;  %v8362_v22 = vmax.f32 %v8360_v46, %v8361_v34  ;;  %v15768_v17 = vrot.slane %v15754_v7, %v19159_v57  ;;  %vm6367_vm8 = vcmp.eq.s32.totalorder %v27362_v51, %v23466_v16 }
 0x56f   : > { %18481 = vpow2.f32 %v10110_v47  ;;  %v5605_v49 = vrot.slane %v5591_v8, %v19159_v57  ;;  %v5606_v42 = vcombine.high %v5598_v5, %v5598_v5  ;;  %v23674_v38 = vrot.slane %v5598_v5, %v19159_v57 }
 0x570   : > { %18483 = vpow2.f32 %v10112_v13  ;;  %v8363_v23 = vrot.slane %v8362_v22, 2  ;;  %v15769_v41 = vcombine.low %v23472_v25, %v15768_v17  ;;  %v17111_v31 = vsel %vm8314_vm10, %v23636_v27, 0.0 }
 0x571   : > { %18485 = vpow2.f32 %v10114_v0  ;;  %v5607_v46 = vcombine.high %v5605_v49, %v5605_v49  ;;  %v23682_v33 = vrot.slane %v5606_v42, %v19159_v57  ;;  %v23687_v56 = vcombine.high %v23674_v38, %v23674_v38 }
 0x572   : > { %18487 = vpow2.f32 %v10116_v52  ;;  %v8364_v29 = vmax.f32 %v8362_v22, %v8363_v23  ;;  %v17109_v32 = vsel %vm732_vm2, %v15769_v41, 0.0  ;;  %v23691_v19 = vrot.slane %v5605_v49, %v19159_v57 }
 0x573   : > { %18489 = vpow2.f32 %v10118_v2  ;;  %v17110_v25 = vadd.f32 %v17109_v32, %v23628_v3  ;;  %v23694_v27 = vsel %vm6367_vm8, 1.0, %v27298_v9  ;;  %v23698_v62 = vcombine.high %v23682_v33, %v23682_v33 }
 0x574   : > { %27419 = vst [vmem:[#allocation60_spill] sm:$0xff] %v23694_v27  ;;  %18491 = vpow2.f32 %v10120_v20  ;;  %v8365_v30 = vrot.slane %v8364_v29, 1  ;;  %v7928_v54 = vcombine.low %v23461_v4, %v23674_v38  ;;  %v23705_v3 = vrot.slane %v5607_v46, %v19159_v57 }
 0x575   : > { %v23702_v12 = vpop.eup %18467  ;;  %18493 = vpow2.f32 %v10122_v59  ;;  %v17112_v1 = vadd.f32 %v17111_v31, %v17110_v25  ;;  %v7929_v35 = vcombine.low %v23682_v33, %v23687_v56  ;;  %v7930_v50 = vcombine.low %v23698_v62, %v23691_v19 }
 0x576   : > { %27420 = vst [vmem:[#allocation109_spill] sm:$0xff] %v23702_v12  ;;  %v23709_v10 = vpop.eup %18469  ;;  %18495 = vpow2.f32 %v10124_v37  ;;  %v23711_v21 = vmax.f32 %v8364_v29, %v8365_v30  ;;  %v7944_v26 = vrot.slane %v7928_v54, %v19159_v57  ;;  %v23720_v0 = vcombine.high %v23691_v19, %v23691_v19 }
 0x577   : > { %27421 = vst [vmem:[#allocation111_spill] sm:$0xff] %v23709_v10  ;;  %v23716_v47 = vpop.eup %18471  ;;  %18497 = vpow2.f32 %v10126_v63  ;;  %v17113_v13 = vrot.slane %v17112_v1, 4  ;;  %v27424_v52 = vcombine.low %v23425_v43, %v23430_v24  ;;  %v23733_v34 = vrot.slane %v7930_v50, %v19159_v57 }
 0x578   : > { %27422 = vst [vmem:[#allocation118_spill] sm:$0xff] %v23711_v21  ;;  %27423 = vst [vmem:[#allocation145_spill] sm:$0xff] %v23716_v47  ;;  %v23726_v20 = vpop.eup %18473  ;;  %18499 = vpow2.f32 %v10128_v61  ;;  %v8700_v59 = vcombine.high %v23711_v21, %v23711_v21  ;;  %v8707_v37 = vrot.slane %v23711_v21, %v19159_v57  ;;  %v23738_v63 = vrot.slane %v7929_v35, %v19159_v57  ;;  %v27436_v21 = vld [vmem:[#allocation127_spill] sm:$0xff] }
 0x579   : > { %v7937_v2 = vrot.slane %v27424_v52, %v19159_v57  ;;  %27425 = vst [vmem:[#allocation146_spill] sm:$0xff] %v23726_v20  ;;  %v23735_v7 = vpop.eup %18475  ;;  %v14072_v8 = vcombine.high %v23485_v44, %v23485_v44  ;;  %v14087_v5 = vcombine.high %v23494_v40, %v23494_v40  ;;  %v23752_v42 = vcombine.high %v23705_v3, %v23705_v3  ;;  %v27434_v40 = vld [vmem:[#allocation126_spill] sm:$0xff] }
 0x57a   : > { %27426 = vst [vmem:[#allocation147_spill] sm:$0xff] %v23735_v7  ;;  %v23744_v61 = vpop.eup %18477  ;;  %v8714_v22 = vrot.slane %v8700_v59, %v19159_v57  ;;  %v8715_v17 = vcombine.high %v8707_v37, %v8707_v37  ;;  %v23748_v49 = vrot.slane %v8707_v37, %v19159_v57  ;;  %v23756_v31 = vadd.f32 %v17113_v13, %v17112_v1  ;;  %v23810_v7 = vpop.f32.mrf.mxu0 }
 0x57b   : > { %v7959_v58 = vcombine.low %v7937_v2, %v7944_v26  ;;  %27427 = vst [vmem:[#allocation148_spill] sm:$0xff] %v23744_v61  ;;  %v18480_v23 = vpop.eup %18479  ;;  %v23774_v26 = vrot.slane %v14072_v8, %v19159_v57  ;;  %v23777_v13 = vrot.slane %v14087_v5, %v19159_v57  ;;  %27439 = vst [vmem:[#allocation126_spill] sm:$0xff] %v23810_v7  ;;  %vm17611_vm8 = vcmask 1042434  }
 0x57c   : > { %27428 = vst [vmem:[#allocation149_spill] sm:$0xff] %v23756_v31  ;;  %v18482_v29 = vpop.eup %18481  ;;  %v8716_v32 = vcombine.high %v8714_v22, %v8714_v22  ;;  %v23763_v25 = vrot.slane %v8714_v22, %v19159_v57  ;;  %v8737_v30 = vrot.slane %v8715_v17, %v19159_v57  ;;  %v8745_v54 = vcombine.high %v23748_v49, %v23748_v49  ;;  %v27437_v31 = vld [vmem:[#allocation128_spill] sm:$0xff] }
 0x57d   : > { %v23768_v35 = vpop.eup %18483  ;;  %v11851_v1 = vcombine.low %v18480_v23, %v18482_v29  ;;  %v23771_v50 = vrot.slane %v7959_v58, %v19159_v57  ;;  %v9484_v22 = vsub.f32 %v22922_v60, %v23748_v49  ;;  %v9492_v5 = vsub.f32 %v23315_v6, %v23748_v49  ;;  %v27435_v6 = vld [vmem:[#allocation75_spill] sm:$0xff] }
 0x57e   : > { %27429 = vst [vmem:[#allocation150_spill] sm:$0xff] %v23768_v35  ;;  %v23779_v52 = vpop.eup %18485  ;;  %v8744_v2 = vrot.slane %v8716_v32, %v19159_v57  ;;  %v8746_v59 = vcombine.high %v23763_v25, %v23763_v25  ;;  %v8747_v37 = vcombine.high %v8737_v30, %v8737_v30  ;;  %v9485_v58 = vsub.f32 %v22939_v36, %v8737_v30 }
 0x57f   : > { %27430 = vst [vmem:[#allocation151_spill] sm:$0xff] %v23779_v52  ;;  %v23786_v17 = vpop.eup %18487  ;;  %v9486_v8 = vsub.f32 %v22955_v18, %v8745_v54  ;;  %v9500_v23 = vsub.f32 %v23520_v28, %v23748_v49  ;;  %v23797_v32 = vrot.slane %v11851_v1, %v19159_v57  ;;  %v9488_v46 = vsub.f32 %v23307_v53, %v23763_v25  ;;  %v27438_v1 = vld [vmem:[#allocation129_spill] sm:$0xff] }
 0x580   : > { %27431 = vst [vmem:[#allocation152_spill] sm:$0xff] %v23786_v17  ;;  %v23794_v29 = vpop.eup %18489  ;;  %v8748_v41 = vcombine.high %v8744_v2, %v8744_v2  ;;  %v9487_v60 = vsub.f32 %v23002_v39, %v8747_v37  ;;  %v9489_v18 = vsub.f32 %v23320_v11, %v8744_v2  ;;  %v9490_v44 = vsub.f32 %v27434_v40, %v8746_v59 }
 0x581   : > { %27432 = vst [vmem:[#allocation153_spill] sm:$0xff] %v23794_v29  ;;  %27433 = vst [vmem:[#allocation154_spill] sm:$0xff] %v23797_v32  ;;  %v18492_v36 = vpop.eup %18491  ;;  %v9493_v55 = vsub.f32 %v27435_v6, %v8737_v30  ;;  %v9494_v28 = vsub.f32 %v27436_v21, %v8745_v54  ;;  %v9495_v29 = vsub.f32 %v27438_v1, %v8747_v37  ;;  %v9824_v32 = vmul.f32 1.442695, %v9484_v22 }
 0x582   : > { %v18494_v49 = vpop.eup %18493  ;;  %v9491_v17 = vsub.f32 %v27437_v31, %v8748_v41  ;;  %v9496_v39 = vsub.f32 %v23517_v48, %v23763_v25  ;;  %v9826_v52 = vmul.f32 1.442695, %v9485_v58  ;;  %v9828_v61 = vmul.f32 1.442695, %v9486_v8  ;;  %v18082_v25 = vpop.f32.mrf.mxu0 }
 0x583   : > { %v18496_v35 = vpop.eup %18495  ;;  %v11899_v53 = vcombine.low %v18492_v36, %v18494_v49  ;;  %v9830_v11 = vmul.f32 1.442695, %v9487_v60  ;;  %v9497_v30 = vsub.f32 %v23530_v15, %v8744_v2  ;;  %v9498_v21 = vsub.f32 %v23543_v45, %v8746_v59 }
 0x584   : > { %v18498_v40 = vpop.eup %18497  ;;  %18501 = vpow2.f32 %v9824_v32  ;;  %v9832_v31 = vmul.f32 1.442695, %v9488_v46  ;;  %v9499_v6 = vsub.f32 %v23569_v14, %v8748_v41  ;;  %v9834_v48 = vmul.f32 1.442695, %v9489_v18 }
 0x585   : > { %v18500_v54 = vpop.eup %18499  ;;  %v11900_v37 = vcombine.low %v18496_v35, %v18498_v40  ;;  %18503 = vpow2.f32 %v9826_v52  ;;  %v11921_v22 = vrot.slane %v11899_v53, %v19159_v57  ;;  %v9836_v8 = vmul.f32 1.442695, %v9490_v44 }
 0x586   : > { %v11952_v58 = vrot.slane %v18500_v54, %v19159_v57  ;;  %18505 = vpow2.f32 %v9828_v61  ;;  %v9838_v15 = vmul.f32 1.442695, %v9491_v17  ;;  %v9840_v45 = vmul.f32 1.442695, %v9492_v5  ;;  %v27445_v54 = vld [vmem:[#allocation134_spill] sm:$0xff] }
 0x587   : > { %v11928_v60 = vrot.slane %v11900_v37, %v19159_v57  ;;  %18507 = vpow2.f32 %v9830_v11  ;;  %v9842_v46 = vmul.f32 1.442695, %v9493_v55  ;;  %v9844_v2 = vmul.f32 1.442695, %v9494_v28 }
 0x588   : > { %18509 = vpow2.f32 %v9832_v31  ;;  %v9846_v35 = vmul.f32 1.442695, %v9495_v29  ;;  %v23819_v14 = vrot.slane %v11952_v58, %v19159_v57  ;;  %v9848_v41 = vmul.f32 1.442695, %v9496_v39  ;;  %v27442_v29 = vld [vmem:[#allocation116_spill] sm:$0xff]  ;;  %v27447_v58 = vld [vmem:[#allocation93_spill] sm:$0xff] }
 0x589   : > { %v11930_v59 = vcombine.low %v11921_v22, %v11928_v60  ;;  %18511 = vpow2.f32 %v9834_v48  ;;  %v9850_v52 = vmul.f32 1.442695, %v9497_v30  ;;  %v27441_v44 = vcombine.low %v23738_v63, %v23733_v34 }
 0x58a   : > { %27440 = vst [vmem:[#allocation75_spill] sm:$0xff] %v23819_v14  ;;  %18513 = vpow2.f32 %v9836_v8  ;;  %v14088_v17 = vcombine.high %v23774_v26, %v23774_v26  ;;  %v9852_v55 = vmul.f32 1.442695, %v9498_v21  ;;  %v14102_v5 = vrot.slane %v23774_v26, %v19159_v57 }
 0x58b   : > { %v7974_v61 = vrot.slane %v27441_v44, %v19159_v57  ;;  %18515 = vpow2.f32 %v9838_v15  ;;  %v14117_v32 = vcombine.high %v27442_v29, %v27442_v29  ;;  %v9854_v36 = vmul.f32 1.442695, %v9499_v6 }
 0x58c   : > { %v9856_v18 = vmul.f32 1.442695, %v9500_v23  ;;  %v14116_v28 = vrot.slane %v14088_v17, %v19159_v57  ;;  %v14119_v49 = vcombine.high %v23777_v13, %v23777_v13  ;;  %v23835_v34 = vrot.slane %v11930_v59, %v19159_v57 }
 0x58d   : > { %18517 = vpow2.f32 %v9840_v45  ;;  %v14118_v63 = vcombine.high %v14102_v5, %v14102_v5  ;;  %v14902_v1 = vmul.f32 %v23777_v13, %v23430_v24  ;;  %v7975_v26 = vcombine.low %v23771_v50, %v7974_v61 }
 0x58e   : > { %27443 = vst [vmem:[#allocation127_spill] sm:$0xff] %v23835_v34  ;;  %18519 = vpow2.f32 %v9842_v46  ;;  %v14120_v39 = vcombine.high %v14116_v28, %v14116_v28  ;;  %v14903_v53 = vmul.f32 %v14117_v32, %v23461_v4  ;;  %v23843_v23 = vrot.slane %v23694_v27, %v19159_v57 }
 0x58f   : > { %18521 = vpow2.f32 %v9844_v2  ;;  %v14904_v11 = vmul.f32 %v14119_v49, %v23674_v38  ;;  %v14905_v40 = vmul.f32 %v14102_v5, %v23682_v33  ;;  %v14906_v30 = vmul.f32 %v14116_v28, %v23687_v56  ;;  %v23867_v2 = vpop.f32.mrf.mxu1 }
 0x590   : > { %18523 = vpow2.f32 %v9848_v41  ;;  %v14907_v13 = vmul.f32 %v14118_v63, %v23698_v62  ;;  %v14908_v21 = vmul.f32 %v14120_v39, %v23691_v19  ;;  %v23854_v31 = vrot.slane %v23843_v23, %v19159_v57  ;;  %27449 = vst [vmem:[#allocation134_spill] sm:$0xff] %v23867_v2 }
 0x591   : > { %v23850_v50 = vpop.eup %18501  ;;  %18525 = vpow2.f32 %v9850_v52  ;;  %v16680_v37 = vcombine.low %v27445_v54, %v14902_v1  ;;  %v16681_v6 = vcombine.low %v14903_v53, %v14904_v11  ;;  %v16682_v25 = vcombine.low %v14905_v40, %v14906_v30  ;;  %v18118_v32 = vpop.f32.mrf.mxu1  ;;  %v27457_v53 = vld [vmem:[#allocation23_spill] sm:$0xff] }
 0x592   : > { %27444 = vst [vmem:[#allocation128_spill] sm:$0xff] %v23850_v50  ;;  %v23857_v48 = vpop.eup %18503  ;;  %18527 = vpow2.f32 %v9852_v55  ;;  %v16683_v22 = vcombine.low %v14907_v13, %v14908_v21  ;;  %v4758_v8 = vcombine.high %v27447_v58, %v27447_v58  ;;  %v4765_v46 = vrot.slane %v27447_v58, %v19159_v57  ;;  %v27458_v13 = vld [vmem:[#allocation138_spill] sm:$0xff] }
 0x593   : > { %27446 = vst [vmem:[#allocation129_spill] sm:$0xff] %v23857_v48  ;;  %v23861_v60 = vpop.eup %18505  ;;  %18529 = vpow2.f32 %v9854_v36  ;;  %v16690_v15 = vrot.slane %v16680_v37, %v19159_v57  ;;  %v16697_v45 = vrot.slane %v16681_v6, %v19159_v57  ;;  %v16704_v41 = vrot.slane %v16682_v25, %v19159_v57 }
 0x594   : > { %27448 = vst [vmem:[#allocation116_spill] sm:$0xff] %v23861_v60  ;;  %v23869_v59 = vpop.eup %18507  ;;  %18531 = vpow2.f32 %v9856_v18  ;;  %v16711_v52 = vrot.slane %v16683_v22, %v19159_v57  ;;  %v4772_v44 = vrot.slane %v4758_v8, %v19159_v57  ;;  %v23877_v17 = vsel %vm732_vm2, %v7975_v26, -inf }
 0x595   : > { %27450 = vst [vmem:[#allocation93_spill] sm:$0xff] %v23869_v59  ;;  %v23874_v61 = vpop.eup %18509  ;;  %v16712_v55 = vcombine.low %v16690_v15, %v16697_v45  ;;  %v4773_v5 = vcombine.high %v4765_v46, %v4765_v46  ;;  %v23880_v29 = vrot.slane %v4765_v46, %v19159_v57  ;;  %18533 = vpow2.f32 %v9846_v35  ;;  %v27462_v15 = vld [vmem:[#allocation135_spill] sm:$0xff]  ;;  %v27463_v45 = vld [vmem:[#allocation136_spill] sm:$0xff] }
 0x596   : > { %27451 = vst [vmem:[#allocation155_spill] sm:$0xff] %v23874_v61  ;;  %v23882_v36 = vpop.eup %18511  ;;  %v16713_v18 = vcombine.low %v16704_v41, %v16711_v52  ;;  %v4774_v28 = vcombine.high %v4772_v44, %v4772_v44  ;;  %v23885_v49 = vrot.slane %v4772_v44, %v19159_v57  ;;  %v23889_v1 = vmul.f32 %v23854_v31, %v23705_v3  ;;  %v27473_v59 = vld [vmem:[#allocation144_spill] sm:$0xff] }
 0x597   : > { %27452 = vst [vmem:[#allocation156_spill] sm:$0xff] %v23880_v29  ;;  %27453 = vst [vmem:[#allocation157_spill] sm:$0xff] %v23882_v36  ;;  %v18514_v63 = vpop.eup %18513  ;;  %v23892_v26 = vrot.slane %v4773_v5, %v19159_v57  ;;  %v23896_v39 = vcombine.high %v23880_v29, %v23880_v29  ;;  %vm6343_vm9 = vcmp.eq.s32.totalorder %v27362_v51, %v27457_v53 }
 0x598   : > { %27454 = vst [vmem:[#allocation158_spill] sm:$0xff] %v23885_v49  ;;  %v18516_v35 = vpop.eup %18515  ;;  %v16727_v11 = vrot.slane %v16713_v18, %v19159_v57  ;;  %v23902_v40 = vrot.slane %v4774_v28, %v19159_v57  ;;  %v23906_v30 = vcombine.high %v23885_v49, %v23885_v49  ;;  %v7032_v21 = vcombine.low %v27458_v13, %v23880_v29  ;;  %v27466_v18 = vld [vmem:[#allocation139_spill] sm:$0xff] }
 0x599   : > { %27455 = vst [vmem:[#allocation159_spill] sm:$0xff] %v23892_v26  ;;  %27456 = vst [vmem:[#allocation160_spill] sm:$0xff] %v23896_v39  ;;  %v10955_v54 = vcombine.low %v18514_v63, %v18516_v35  ;;  %v16720_v37 = vrot.slane %v16712_v55, %v19159_v57  ;;  %v23913_v6 = vcombine.high %v23892_v26, %v23892_v26  ;;  %v23922_v8 = vsel %vm6343_vm9, 1.0, %v27298_v9 }
 0x59a   : > { %v7033_v25 = vcombine.low %v23892_v26, %v23896_v39  ;;  %v23917_v22 = vpop.eup %18517  ;;  %27461 = vst [vmem:[#allocation162_spill] sm:$0xff] %v23922_v8  ;;  %v27464_v46 = vcombine.low %v27462_v15, %v27463_v45  ;;  %v7048_v52 = vrot.slane %v7032_v21, %v19159_v57  ;;  %v23933_v5 = vcombine.high %v23902_v40, %v23902_v40  ;;  %v27468_v21 = vld [vmem:[#allocation140_spill] sm:$0xff] }
 0x59b   : > { %27459 = vst [vmem:[#allocation23_spill] sm:$0xff] %v23913_v6  ;;  %27460 = vst [vmem:[#allocation161_spill] sm:$0xff] %v23917_v22  ;;  %v23929_v44 = vpop.eup %18519  ;;  %v16728_v55 = vcombine.low %v16720_v37, %v16727_v11  ;;  %v7034_v32 = vcombine.low %v23913_v6, %v23885_v49  ;;  %v13176_v28 = vcombine.high %v27466_v18, %v27466_v18  ;;  %v27469_v11 = vld [vmem:[#allocation141_spill] sm:$0xff]  ;;  %vm17614_vm9 = vcmask 1043459  }
 0x59c   : > { %v7041_v41 = vrot.slane %v27464_v46, %v19159_v57  ;;  %27465 = vst [vmem:[#allocation135_spill] sm:$0xff] %v23929_v44  ;;  %v23939_v63 = vpop.eup %18521  ;;  %v13191_v58 = vcombine.high %v27468_v21, %v27468_v21  ;;  %v13221_v37 = vcombine.high %v27469_v11, %v27469_v11  ;;  %v23948_v34 = vrot.slane %v10955_v54, %v19159_v57  ;;  %v27471_v11 = vld [vmem:[#allocation121_spill] sm:$0xff] }
 0x59d   : > { %27467 = vst [vmem:[#allocation136_spill] sm:$0xff] %v23939_v63  ;;  %v18524_v14 = vpop.eup %18523  ;;  %v7055_v47 = vrot.slane %v7033_v25, %v19159_v57  ;;  %v7062_v18 = vrot.slane %v7034_v32, %v19159_v57  ;;  %v13190_v20 = vrot.slane %v13176_v28, %v19159_v57  ;;  %v23957_v21 = vrot.slane %v23922_v8, %v19159_v57 }
 0x59e   : > { %v7063_v35 = vcombine.low %v7041_v41, %v7048_v52  ;;  %27470 = vst [vmem:[#allocation140_spill] sm:$0xff] %v23948_v34  ;;  %v18526_v41 = vpop.eup %18525  ;;  %v13213_v46 = vrot.slane %v13191_v58, %v19159_v57  ;;  %v5640_v12 = vcombine.high %v27471_v11, %v27471_v11  ;;  %v14767_v32 = vmul.f32 %v13221_v37, %v27458_v13 }
 0x59f   : > { %v18528_v54 = vpop.eup %18527  ;;  %v7064_v10 = vcombine.low %v7055_v47, %v7062_v18  ;;  %v13192_v34 = vcombine.high %v13190_v20, %v13190_v20  ;;  %v13206_v25 = vrot.slane %v13190_v20, %v19159_v57  ;;  %v11003_v63 = vcombine.low %v18524_v14, %v18526_v41 }
 0x5a0   : > { %v7071_v52 = vrot.slane %v7063_v35, %v19159_v57  ;;  %v18530_v28 = vpop.eup %18529  ;;  %v13223_v22 = vcombine.high %v13213_v46, %v13213_v46  ;;  %v14766_v35 = vmul.f32 %v13213_v46, %v27463_v45  ;;  %v5647_v58 = vrot.slane %v27471_v11, %v19159_v57 }
 0x5a1   : > { %v18532_v44 = vpop.eup %18531  ;;  %v11004_v36 = vcombine.low %v18528_v54, %v18530_v28  ;;  %v7078_v61 = vrot.slane %v7064_v10, %v19159_v57  ;;  %v13220_v60 = vrot.slane %v13192_v34, %v19159_v57  ;;  %v23970_v47 = vrot.slane %v23957_v21, %v19159_v57 }
 0x5a2   : > { %v11056_v20 = vrot.slane %v18532_v44, %v19159_v57  ;;  %v13222_v18 = vcombine.high %v13206_v25, %v13206_v25  ;;  %v14769_v14 = vmul.f32 %v13206_v25, %v23892_v26  ;;  %v5654_v46 = vrot.slane %v5640_v12, %v19159_v57  ;;  %v23975_v37 = vpop.eup %18533 }
 0x5a3   : > { %27472 = vst [vmem:[#allocation141_spill] sm:$0xff] %v23975_v37  ;;  %v11032_v41 = vrot.slane %v11004_v36, %v19159_v57  ;;  %v13224_v11 = vcombine.high %v13220_v60, %v13220_v60  ;;  %v14768_v10 = vmul.f32 %v13223_v22, %v23880_v29  ;;  %v14770_v34 = vmul.f32 %v13220_v60, %v23896_v39 }
 0x5a4   : > { %v11025_v54 = vrot.slane %v11003_v63, %v19159_v57  ;;  %v23982_v28 = vsel %vm732_vm2, %v16728_v55, 0.0  ;;  %v14771_v44 = vmul.f32 %v13222_v18, %v23913_v6  ;;  %v15784_v25 = vcombine.low %v27473_v59, %v14766_v35 }
 0x5a5   : > { %v23987_v12 = vrot.slane %v11056_v20, %v19159_v57  ;;  %v7079_v37 = vcombine.low %v7071_v52, %v7078_v61  ;;  %v14772_v36 = vmul.f32 %v13224_v11, %v23885_v49  ;;  %v15785_v50 = vcombine.low %v14767_v32, %v14768_v10  ;;  %v27477_v10 = vld [vmem:[#allocation22_spill] sm:$0xff] }
 0x5a6   : > { %v11034_v48 = vcombine.low %v11025_v54, %v11032_v41  ;;  %v15786_v22 = vcombine.low %v14769_v14, %v14770_v34  ;;  %v5655_v2 = vcombine.high %v5647_v58, %v5647_v58  ;;  %v5656_v60 = vcombine.high %v5654_v46, %v5654_v46 }
 0x5a7   : > { %27474 = vst [vmem:[#allocation121_spill] sm:$0xff] %v23987_v12  ;;  %v23992_v63 = vmul.f32 %v23970_v47, %v23902_v40  ;;  %v15787_v55 = vcombine.low %v14771_v44, %v14772_v36  ;;  %v15801_v18 = vrot.slane %v15785_v50, %v19159_v57  ;;  %v23996_v59 = vrot.slane %v5647_v58, %v19159_v57  ;;  %v27475_v58 = vld [vmem:[#allocation106_spill] sm:$0xff] }
 0x5a8   : > { %v15794_v35 = vrot.slane %v15784_v25, %v19159_v57  ;;  %v24000_v61 = vrot.slane %v5654_v46, %v19159_v57  ;;  %v24003_v52 = vrot.slane %v5655_v2, %v19159_v57  ;;  %v24006_v32 = vrot.slane %v5656_v60, %v19159_v57  ;;  %v27479_v25 = vld [vmem:[#allocation21_spill] sm:$0xff] }
 0x5a9   : > { %v15808_v20 = vrot.slane %v15786_v22, %v19159_v57  ;;  %v15815_v14 = vrot.slane %v15787_v55, %v19159_v57  ;;  %v24012_v50 = vcombine.high %v23996_v59, %v23996_v59  ;;  %v6260_v41 = vcombine.high %v27475_v58, %v27475_v58  ;;  %v27481_v55 = vld [vmem:[#allocation5_spill] sm:$0xff] }
 0x5aa   : > { %v24017_v46 = vrot.slane %v11034_v48, %v19159_v57  ;;  %v24020_v2 = vsel %vm732_vm2, %v7079_v37, -inf  ;;  %v24024_v11 = vcombine.high %v24003_v52, %v24003_v52  ;;  %vm6368_vm11 = vcmp.eq.s32.totalorder %v27477_v10, %v23466_v16 }
 0x5ab   : > { %v15816_v34 = vcombine.low %v15794_v35, %v15801_v18  ;;  %v15817_v54 = vcombine.low %v15808_v20, %v15815_v14  ;;  %v24030_v44 = vcombine.high %v24000_v61, %v24000_v61  ;;  %v24033_v36 = vrot.slane %v6260_v41, %v27479_v25 }
 0x5ac   : > { %27476 = vst [vmem:[#allocation144_spill] sm:$0xff] %v24017_v46  ;;  %v24037_v48 = vcombine.high %v24006_v32, %v24006_v32  ;;  %v7977_v37 = vcombine.low %v23752_v42, %v23996_v59  ;;  %v7978_v22 = vcombine.low %v24003_v52, %v24012_v50  ;;  %v7979_v16 = vcombine.low %v24024_v11, %v24000_v61 }
 0x5ad   : > { %27478 = vst [vmem:[#allocation106_spill] sm:$0xff] %v24030_v44  ;;  %v15831_v60 = vrot.slane %v15817_v54, %v19159_v57  ;;  %vm6369_vm12 = vcmp.eq.s32.totalorder %v27481_v55, %v24033_v36  ;;  %v24049_v18 = vsel %vm6368_vm11, 1.0, %v27298_v9  ;;  %v8031_v35 = vrot.slane %v24006_v32, %v19159_v57 }
 0x5ae   : > { %27480 = vst [vmem:[#allocation163_spill] sm:$0xff] %v24037_v48  ;;  %27482 = vst [vmem:[#allocation164_spill] sm:$0xff] %v24049_v18  ;;  %v27483_v20 = vcombine.low %v23705_v3, %v23720_v0  ;;  %v7993_v58 = vrot.slane %v7977_v37, %v19159_v57  ;;  %v8000_v41 = vrot.slane %v7978_v22, %v19159_v57  ;;  %v24062_v46 = vsel %vm6369_vm12, 1.0, %v27298_v9 }
 0x5af   : > { %v8007_v54 = vrot.slane %v7979_v16, %v19159_v57  ;;  %v15824_v12 = vrot.slane %v15816_v34, %v19159_v57  ;;  %27484 = vst [vmem:[#allocation165_spill] sm:$0xff] %v24062_v46  ;;  %v8038_v7 = vrot.slane %v8031_v35, %v19159_v57  ;;  %v14121_v49 = vcombine.high %v23694_v27, %v23694_v27 }
 0x5b0   : > { %v7986_v14 = vrot.slane %v27483_v20, %v19159_v57  ;;  %v14136_v20 = vcombine.high %v23843_v23, %v23843_v23  ;;  %v14166_v37 = vcombine.high %v23854_v31, %v23854_v31  ;;  %v18027_v34 = vcombine.high %v24000_v61, %v24006_v32 }
 0x5b1   : > { %v8009_v39 = vcombine.low %v8000_v41, %v8007_v54  ;;  %v15832_v22 = vcombine.low %v15824_v12, %v15831_v60  ;;  %v14135_v16 = vrot.slane %v14121_v49, %v19159_v57  ;;  %v14176_v35 = vrot.slane %v24049_v18, %v19159_v57  ;;  %v24081_v41 = vpop.f32.mrf.mxu0 }
 0x5b2   : > { %v8008_v6 = vcombine.low %v7986_v14, %v7993_v58  ;;  %v14158_v58 = vrot.slane %v14136_v20, %v19159_v57  ;;  %v14191_v23 = vrot.slane %v24062_v46, %v19159_v57  ;;  %27485 = vst [vmem:[#allocation166_spill] sm:$0xff] %v24081_v41  ;;  %v8458_v31 = vsel %vm8314_vm10, %v8038_v7, -inf }
 0x5b3   : > { %v8023_v14 = vrot.slane %v8009_v39, %v19159_v57  ;;  %v14137_v12 = vcombine.high %v14135_v16, %v14135_v16  ;;  %v14151_v60 = vrot.slane %v14135_v16, %v19159_v57  ;;  %v14183_v49 = vrot.slane %v14176_v35, %v19159_v57  ;;  %v18085_v39 = vpop.f32.mrf.mxu0 }
 0x5b4   : > { %v8016_v26 = vrot.slane %v8008_v6, %v19159_v57  ;;  %v14168_v18 = vcombine.high %v14158_v58, %v14158_v58  ;;  %v14199_v27 = vcombine.high %v14191_v23, %v14191_v23  ;;  %v14911_v6 = vmul.f32 %v14166_v37, %v23752_v42 }
 0x5b5   : > { %v14165_v20 = vrot.slane %v14137_v12, %v19159_v57  ;;  %v14167_v29 = vcombine.high %v14151_v60, %v14151_v60  ;;  %v14910_v46 = vmul.f32 %v14158_v58, %v23720_v0  ;;  %v14913_v41 = vmul.f32 %v14151_v60, %v24003_v52 }
 0x5b6   : > { %v8024_v54 = vcombine.low %v8016_v26, %v8023_v14  ;;  %v24092_v13 = vrot.slane %v14199_v27, %v19159_v57  ;;  %v14912_v16 = vmul.f32 %v14168_v18, %v23996_v59  ;;  %v14917_v26 = vmul.f32 %v14183_v49, %v24006_v32 }
 0x5b7   : > { %v14169_v37 = vcombine.high %v14165_v20, %v14165_v20  ;;  %v14914_v14 = vmul.f32 %v14165_v20, %v24012_v50  ;;  %v14915_v12 = vmul.f32 %v14167_v29, %v24024_v11  ;;  %v24100_v58 = vrot.slane %v14191_v23, %v19159_v57 }
 0x5b8   : > { %v8456_v7 = vsel %vm732_vm2, %v8024_v54, -inf  ;;  %27486 = vst [vmem:[#allocation167_spill] sm:$0xff] %v24092_v13  ;;  %v24104_v60 = vmul.f32 %v24092_v13, %v24037_v48  ;;  %v16729_v27 = vcombine.low %v23889_v1, %v14910_v46  ;;  %v16730_v54 = vcombine.low %v14911_v6, %v14912_v16 }
 0x5b9   : > { %v8457_v35 = vmax.f32 %v23877_v17, %v8456_v7  ;;  %27487 = vst [vmem:[#allocation168_spill] sm:$0xff] %v24100_v58  ;;  %v24108_v18 = vrot.slane %v18027_v34, %v19159_v57  ;;  %v14916_v17 = vmul.f32 %v14169_v37, %v24000_v61  ;;  %v16731_v39 = vcombine.low %v14913_v41, %v14914_v14  ;;  %v27491_v7 = vld [vmem:[#allocation133_spill] sm:$0xff] }
 0x5ba   : > { %27488 = vst [vmem:[#allocation169_spill] sm:$0xff] %v24104_v60  ;;  %v24113_v29 = vmul.f32 %v24100_v58, %v24030_v44  ;;  %v16746_v23 = vrot.slane %v16730_v54, %v19159_v57  ;;  %v16784_v20 = vrot.slane %v14917_v26, %v19159_v57  ;;  %v4807_v48 = vcombine.high %v27491_v7, %v27491_v7 }
 0x5bb   : > { %27489 = vst [vmem:[#allocation170_spill] sm:$0xff] %v24108_v18  ;;  %v8459_v49 = vmax.f32 %v8457_v35, %v8458_v31  ;;  %v24120_v1 = vsel %vm732_vm2, %v15832_v22, 0.0  ;;  %v16732_v34 = vcombine.low %v14915_v12, %v14916_v17  ;;  %v16739_v31 = vrot.slane %v16729_v27, %v19159_v57  ;;  %v27492_v35 = vld [vmem:[#allocation6_spill] sm:$0xff] }
 0x5bc   : > { %27490 = vst [vmem:[#allocation171_spill] sm:$0xff] %v24113_v29  ;;  %v4814_v6 = vrot.slane %v27491_v7, %v19159_v57  ;;  %v4821_v16 = vrot.slane %v4807_v48, %v19159_v57  ;;  %v6211_v26 = vcombine.high %v27492_v35, %v27492_v35  ;;  %v16753_v14 = vrot.slane %v16731_v39, %v19159_v57 }
 0x5bd   : > { %v8460_v46 = vrot.slane %v8459_v49, 4  ;;  %v16760_v22 = vrot.slane %v16732_v34, %v19159_v57  ;;  %v16761_v54 = vcombine.low %v16739_v31, %v16746_v23  ;;  %v24133_v12 = vrot.slane %v16784_v20, %v19159_v57 }
 0x5be   : > { %v4822_v27 = vcombine.high %v4814_v6, %v4814_v6  ;;  %v4823_v17 = vcombine.high %v4821_v16, %v4821_v16  ;;  %v24136_v41 = vrot.slane %v4814_v6, %v19159_v57  ;;  %v24139_v48 = vrot.slane %v6211_v26, %v27479_v25 }
 0x5bf   : > { %v8461_v37 = vmax.f32 %v8459_v49, %v8460_v46  ;;  %27493 = vst [vmem:[#allocation133_spill] sm:$0xff] %v24133_v12  ;;  %v16762_v44 = vcombine.low %v16753_v14, %v16760_v22  ;;  %vm6344_vm13 = vcmp.eq.s32.totalorder %v27477_v10, %v27457_v53  ;;  %v27495_v20 = vcombine.low %v23902_v40, %v23906_v30 }
 0x5c0   : > { %27494 = vst [vmem:[#allocation6_spill] sm:$0xff] %v24139_v48  ;;  %v24144_v49 = vrot.slane %v4822_v27, %v19159_v57  ;;  %v24147_v39 = vrot.slane %v4823_v17, %v19159_v57  ;;  %v24151_v23 = vcombine.high %v24136_v41, %v24136_v41  ;;  %v16769_v31 = vrot.slane %v16761_v54, %v19159_v57 }
 0x5c1   : > { %v8462_v7 = vrot.slane %v8461_v37, 2  ;;  %v7090_v46 = vrot.slane %v27495_v20, %v19159_v57  ;;  %v16776_v53 = vrot.slane %v16762_v44, %v19159_v57  ;;  %v24160_v6 = vrot.slane %v4821_v16, %v19159_v57 }
 0x5c2   : > { %v24164_v35 = vcombine.high %v24144_v49, %v24144_v49  ;;  %vm6345_vm14 = vcmp.eq.s32.totalorder %v27481_v55, %v24139_v48  ;;  %v24169_v26 = vsel %vm6344_vm13, 1.0, %v27298_v9  ;;  %v7082_v44 = vcombine.low %v24144_v49, %v24151_v23 }
 0x5c3   : > { %v8463_v34 = vmax.f32 %v8461_v37, %v8462_v7  ;;  %27496 = vst [vmem:[#allocation172_spill] sm:$0xff] %v24169_v26  ;;  %v7081_v37 = vcombine.low %v23933_v5, %v24136_v41  ;;  %v16777_v22 = vcombine.low %v16769_v31, %v16776_v53  ;;  %v7135_v16 = vrot.slane %v24147_v39, %v19159_v57 }
 0x5c4   : > { %v7083_v54 = vcombine.low %v24164_v35, %v24160_v6  ;;  %v18011_v17 = vcombine.high %v24160_v6, %v24147_v39  ;;  %v13225_v7 = vcombine.high %v23922_v8, %v23922_v8  ;;  %v24189_v53 = vcombine.high %v24160_v6, %v24160_v6  ;;  %v24209_v8 = vpop.f32.mrf.mxu1 }
 0x5c5   : > { %v8464_v14 = vrot.slane %v8463_v34, 1  ;;  %v7097_v27 = vrot.slane %v7081_v37, %v19159_v57  ;;  %v17208_v31 = vsel %vm732_vm2, %v16777_v22, 0.0  ;;  %v7142_v12 = vrot.slane %v7135_v16, %v19159_v57  ;;  %27499 = vst [vmem:[#allocation175_spill] sm:$0xff] %v24209_v8 }
 0x5c6   : > { %v24194_v25 = vcombine.high %v24147_v39, %v24147_v39  ;;  %v7104_v37 = vrot.slane %v7082_v44, %v19159_v57  ;;  %v7111_v10 = vrot.slane %v7083_v54, %v19159_v57  ;;  %v24206_v22 = vsel %vm6345_vm14, 1.0, %v27298_v9  ;;  %v18121_v8 = vpop.f32.mrf.mxu1 }
 0x5c7   : > { %v24184_v20 = vmax.f32 %v8463_v34, %v8464_v14  ;;  %v7112_v60 = vcombine.low %v7090_v46, %v7097_v27  ;;  %27498 = vst [vmem:[#allocation174_spill] sm:$0xff] %v24206_v22  ;;  %v13239_v16 = vrot.slane %v13225_v7, %v19159_v57  ;;  %v24212_v44 = vadd.f32 %v17208_v31, %v23982_v28 }
 0x5c8   : > { %v7113_v46 = vcombine.low %v7104_v37, %v7111_v10  ;;  %v24215_v54 = vrot.slane %v18011_v17, %v19159_v57  ;;  %v13240_v27 = vcombine.high %v23957_v21, %v23957_v21  ;;  %v24224_v7 = vsel %vm8314_vm10, %v7142_v12, -inf }
 0x5c9   : > { %27497 = vst [vmem:[#allocation173_spill] sm:$0xff] %v24184_v20  ;;  %v9141_v34 = vcombine.high %v24184_v20, %v24184_v20  ;;  %v9148_v14 = vrot.slane %v24184_v20, %v19159_v57  ;;  %27500 = vst [vmem:[#allocation176_spill] sm:$0xff] %v24212_v44  ;;  %v7120_v28 = vrot.slane %v7112_v60, %v19159_v57  ;;  %vm17617_vm11 = vcmask 1044484  }
 0x5ca   : > { %27501 = vst [vmem:[#allocation177_spill] sm:$0xff] %v24215_v54  ;;  %v7127_v10 = vrot.slane %v7113_v46, %v19159_v57  ;;  %v13241_v31 = vcombine.high %v13239_v16, %v13239_v16  ;;  %v24237_v8 = vrot.slane %v13239_v16, %v19159_v57  ;;  %v24240_v60 = vrot.slane %v13240_v27, %v19159_v57 }
 0x5cb   : > { %v9155_v20 = vrot.slane %v9141_v34, %v19159_v57  ;;  %v9156_v29 = vcombine.high %v9148_v14, %v9148_v14  ;;  %v24221_v55 = vrot.slane %v9148_v14, %v19159_v57  ;;  %v13280_v46 = vrot.slane %v24169_v26, %v19159_v57 }
 0x5cc   : > { %v7128_v48 = vcombine.low %v7120_v28, %v7127_v10  ;;  %vm6370_vm15 = vcmp.eq.s32.totalorder %v27362_v51, %v24033_v36  ;;  %vm17620_vm12 = vcmask 1045509   ;;  %vm17623_vm13 = vcmask 1046534  }
 0x5cd   : > { %v9157_v37 = vcombine.high %v9155_v20, %v9155_v20  ;;  %v9171_v21 = vrot.slane %v9155_v20, %v19159_v57  ;;  %v9178_v34 = vrot.slane %v9156_v29, %v19159_v57  ;;  %v9186_v14 = vcombine.high %v24221_v55, %v24221_v55 }
 0x5ce   : > { %v9637_v12 = vsub.f32 %v23425_v43, %v24221_v55  ;;  %v9645_v43 = vsub.f32 %v23705_v3, %v24221_v55  ;;  %v9653_v16 = vsub.f32 %v24006_v32, %v24221_v55  ;;  %vm17626_vm14 = vcmask 1047559  }
 0x5cf   : > { %v9185_v17 = vrot.slane %v9157_v37, %v19159_v57  ;;  %v9187_v20 = vcombine.high %v9171_v21, %v9171_v21  ;;  %v9188_v44 = vcombine.high %v9178_v34, %v9178_v34  ;;  %v9638_v29 = vsub.f32 %v23430_v24, %v9178_v34 }
 0x5d0   : > { %v9639_v54 = vsub.f32 %v23461_v4, %v9186_v14  ;;  %v9641_v26 = vsub.f32 %v23682_v33, %v9171_v21  ;;  %v9646_v37 = vsub.f32 %v23720_v0, %v9178_v34  ;;  %v9647_v4 = vsub.f32 %v23752_v42, %v9186_v14 }
 0x5d1   : > { %v9189_v27 = vcombine.high %v9185_v17, %v9185_v17  ;;  %v9640_v18 = vsub.f32 %v23674_v38, %v9188_v44  ;;  %v9642_v13 = vsub.f32 %v23687_v56, %v9185_v17  ;;  %v9643_v24 = vsub.f32 %v23698_v62, %v9187_v20 }
 0x5d2   : > { %v9648_v58 = vsub.f32 %v23996_v59, %v9188_v44  ;;  %v9649_v32 = vsub.f32 %v24003_v52, %v9171_v21  ;;  %v10130_v55 = vmul.f32 1.442695, %v9637_v12  ;;  %v10132_v28 = vmul.f32 1.442695, %v9638_v29 }
 0x5d3   : > { %v9644_v3 = vsub.f32 %v23691_v19, %v9189_v27  ;;  %v9650_v38 = vsub.f32 %v24012_v50, %v9185_v17  ;;  %v9651_v33 = vsub.f32 %v24024_v11, %v9187_v20  ;;  %v10134_v10 = vmul.f32 1.442695, %v9639_v54 }
 0x5d4   : > { %v10136_v0 = vmul.f32 1.442695, %v9640_v18  ;;  %v9652_v56 = vsub.f32 %v24000_v61, %v9189_v27  ;;  %18535 = vpow2.f32 %v10130_v55  ;;  %v10138_v62 = vmul.f32 1.442695, %v9641_v26 }
 0x5d5   : > { %v13269_v42 = vrot.slane %v13241_v31, %v19159_v57  ;;  %18537 = vpow2.f32 %v10132_v28  ;;  %v10140_v59 = vmul.f32 1.442695, %v9642_v13  ;;  %v10142_v44 = vmul.f32 1.442695, %v9643_v24 }
 0x5d6   : > { %v10144_v19 = vmul.f32 1.442695, %v9644_v3  ;;  %18539 = vpow2.f32 %v10134_v10  ;;  %v10146_v52 = vmul.f32 1.442695, %v9645_v43  ;;  %v10148_v21 = vmul.f32 1.442695, %v9646_v37 }
 0x5d7   : > { %v10150_v34 = vmul.f32 1.442695, %v9647_v4  ;;  %18541 = vpow2.f32 %v10136_v0  ;;  %v10152_v50 = vmul.f32 1.442695, %v9648_v58  ;;  %v10154_v17 = vmul.f32 1.442695, %v9649_v32 }
 0x5d8   : > { %v10156_v11 = vmul.f32 1.442695, %v9650_v38  ;;  %18543 = vpow2.f32 %v10138_v62  ;;  %v10158_v18 = vmul.f32 1.442695, %v9651_v33  ;;  %v10160_v54 = vmul.f32 1.442695, %v9652_v56 }
 0x5d9   : > { %v8368_v61 = vsel %vm732_vm2, %v7128_v48, -inf  ;;  %18545 = vpow2.f32 %v10140_v59  ;;  %v13271_v13 = vcombine.high %v24237_v8, %v24237_v8  ;;  %v13272_v31 = vcombine.high %v24240_v60, %v24240_v60 }
 0x5da   : > { %v8369_v26 = vmax.f32 %v24020_v2, %v8368_v61  ;;  %18547 = vpow2.f32 %v10142_v44  ;;  %v13273_v14 = vcombine.high %v13269_v42, %v13269_v42  ;;  %v13287_v58 = vrot.slane %v13280_v46, %v19159_v57 }
 0x5db   : > { %v13295_v12 = vrot.slane %v24206_v22, %v19159_v57  ;;  %18549 = vpow2.f32 %v10144_v19  ;;  %v14774_v48 = vmul.f32 %v24240_v60, %v23906_v30  ;;  %v27502_v2 = vcombine.high %v23970_v47, %v23970_v47 }
 0x5dc   : > { %v8371_v20 = vmax.f32 %v8369_v26, %v24224_v7  ;;  %18551 = vpow2.f32 %v10146_v52  ;;  %v10162_v43 = vmul.f32 1.442695, %v9653_v16  ;;  %v14777_v27 = vmul.f32 %v24237_v8, %v24144_v49 }
 0x5dd   : > { %v14775_v29 = vmul.f32 %v27502_v2, %v23933_v5  ;;  %v14778_v46 = vmul.f32 %v13269_v42, %v24151_v23  ;;  %18553 = vpow2.f32 %v10148_v21  ;;  %v14776_v24 = vmul.f32 %v13272_v31, %v24136_v41 }
 0x5de   : > { %v8372_v37 = vrot.slane %v8371_v20, 4  ;;  %v14779_v7 = vmul.f32 %v13271_v13, %v24164_v35  ;;  %18555 = vpow2.f32 %v10150_v34  ;;  %v13303_v60 = vcombine.high %v13295_v12, %v13295_v12 }
 0x5df   : > { %v14780_v4 = vmul.f32 %v13273_v14, %v24160_v6  ;;  %v14781_v47 = vmul.f32 %v13287_v58, %v24147_v39  ;;  %18557 = vpow2.f32 %v10152_v50  ;;  %v15833_v16 = vcombine.low %v23992_v63, %v14774_v48  ;;  %v27503_v14 = vld [vmem:[#allocation143_spill] sm:$0xff] }
 0x5e0   : > { %v8373_v3 = vmax.f32 %v8371_v20, %v8372_v37  ;;  %v15834_v32 = vcombine.low %v14775_v29, %v14776_v24  ;;  %18559 = vpow2.f32 %v10154_v17  ;;  %v24289_v8 = vrot.slane %v13295_v12, %v19159_v57 }
 0x5e1   : > { %v15835_v55 = vcombine.low %v14777_v27, %v14778_v46  ;;  %v15836_v28 = vcombine.low %v14779_v7, %v14780_v4  ;;  %v18536_v38 = vpop.eup %18535  ;;  %18561 = vpow2.f32 %v10156_v11  ;;  %v15843_v10 = vrot.slane %v15833_v16, %v19159_v57 }
 0x5e2   : > { %v8374_v33 = vrot.slane %v8373_v3, 2  ;;  %v15850_v0 = vrot.slane %v15834_v32, %v19159_v57  ;;  %v18538_v56 = vpop.eup %18537  ;;  %18563 = vpow2.f32 %v10158_v18  ;;  %v24294_v62 = vrot.slane %v13303_v60, %v19159_v57 }
 0x5e3   : > { %v15857_v63 = vrot.slane %v15835_v55, %v19159_v57  ;;  %v15864_v42 = vrot.slane %v15836_v28, %v19159_v57  ;;  %v18540_v59 = vpop.eup %18539  ;;  %18565 = vpow2.f32 %v10160_v54  ;;  %v15888_v52 = vrot.slane %v14781_v47, %v19159_v57 }
 0x5e4   : > { %v8375_v44 = vmax.f32 %v8373_v3, %v8374_v33  ;;  %v15865_v19 = vcombine.low %v15843_v10, %v15850_v0  ;;  %v18542_v21 = vpop.eup %18541  ;;  %v11960_v34 = vcombine.low %v18536_v38, %v18538_v56  ;;  %v24301_v50 = vmul.f32 %v24289_v8, %v24189_v53  ;;  %v27520_v0 = vld [vmem:[#allocation158_spill] sm:$0xff] }
 0x5e5   : > { %v24305_v17 = vmul.f32 %v24294_v62, %v24194_v25  ;;  %v15866_v11 = vcombine.low %v15857_v63, %v15864_v42  ;;  %v18544_v18 = vpop.eup %18543  ;;  %18567 = vpow2.f32 %v10162_v43  ;;  %v11961_v61 = vcombine.low %v18540_v59, %v18542_v21 }
 0x5e6   : > { %v8376_v26 = vrot.slane %v8375_v44, 1  ;;  %v15873_v54 = vrot.slane %v15865_v19, %v19159_v57  ;;  %v18546_v13 = vpop.eup %18545  ;;  %v5689_v58 = vcombine.high %v27503_v14, %v27503_v14  ;;  %v5696_v12 = vrot.slane %v27503_v14, %v19159_v57 }
 0x5e7   : > { %v15880_v31 = vrot.slane %v15866_v11, %v19159_v57  ;;  %v18548_v20 = vpop.eup %18547  ;;  %v11962_v48 = vcombine.low %v18544_v18, %v18546_v13  ;;  %v24316_v2 = vrot.slane %v11961_v61, %v19159_v57  ;;  %v24321_v43 = vrot.slane %v15888_v52, %v19159_v57 }
 0x5e8   : > { %v24318_v29 = vmax.f32 %v8375_v44, %v8376_v26  ;;  %v18550_v27 = vpop.eup %18549  ;;  %v24324_v46 = vrot.slane %v11960_v34, %v19159_v57  ;;  %v5703_v7 = vrot.slane %v5689_v58, %v19159_v57  ;;  %v5704_v3 = vcombine.high %v5696_v12, %v5696_v12 }
 0x5e9   : > { %27504 = vst [vmem:[#allocation143_spill] sm:$0xff] %v24316_v2  ;;  %27506 = vst [vmem:[#allocation179_spill] sm:$0xff] %v24321_v43  ;;  %v15881_v37 = vcombine.low %v15873_v54, %v15880_v31  ;;  %v18552_v60 = vpop.eup %18551  ;;  %v11963_v4 = vcombine.low %v18548_v20, %v18550_v27  ;;  %v24332_v16 = vsel %vm6370_vm15, 1.0, %v27298_v9  ;;  %v24335_v55 = vrot.slane %v11962_v48, %v19159_v57 }
 0x5ea   : > { %27505 = vst [vmem:[#allocation178_spill] sm:$0xff] %v24318_v29  ;;  %27507 = vst [vmem:[#allocation180_spill] sm:$0xff] %v24324_v46  ;;  %v8749_v47 = vcombine.high %v24318_v29, %v24318_v29  ;;  %v18554_v32 = vpop.eup %18553  ;;  %v8756_v28 = vrot.slane %v24318_v29, %v19159_v57  ;;  %v24341_v33 = vrot.slane %v5696_v12, %v19159_v57  ;;  %vm402_vm15 = vcmask 0  }
 0x5eb   : > { %27508 = vst [vmem:[#allocation181_spill] sm:$0xff] %v24332_v16  ;;  %27509 = vst [vmem:[#allocation182_spill] sm:$0xff] %v24335_v55  ;;  %v17120_v38 = vsel %vm732_vm2, %v15881_v37, 0.0  ;;  %v18556_v10 = vpop.eup %18555  ;;  %v12009_v56 = vcombine.low %v18552_v60, %v18554_v32  ;;  %v5705_v42 = vcombine.high %v5703_v7, %v5703_v7  ;;  %v24347_v44 = vrot.slane %v11963_v4, %v19159_v57 }
 0x5ec   : > { %v8763_v63 = vrot.slane %v8749_v47, %v19159_v57  ;;  %v18558_v59 = vpop.eup %18557  ;;  %v8764_v19 = vcombine.high %v8756_v28, %v8756_v28  ;;  %v24350_v52 = vrot.slane %v8756_v28, %v19159_v57  ;;  %v24353_v21 = vrot.slane %v5703_v7, %v19159_v57 }
 0x5ed   : > { %27510 = vst [vmem:[#allocation183_spill] sm:$0xff] %v24347_v44  ;;  %v18560_v34 = vpop.eup %18559  ;;  %v12010_v11 = vcombine.low %v18556_v10, %v18558_v59  ;;  %v24357_v26 = vadd.f32 %v17120_v38, %v24120_v1  ;;  %v12019_v13 = vrot.slane %v12009_v56, %v19159_v57  ;;  %v24364_v58 = vrot.slane %v5704_v3, %v19159_v57  ;;  %v24376_v10 = vpop.f32.mrf.mxu0  ;;  %v27514_v59 = vld [vmem:[#allocation138_spill] sm:$0xff] }
 0x5ee   : > { %v8765_v18 = vcombine.high %v8763_v63, %v8763_v63  ;;  %v8779_v61 = vrot.slane %v8763_v63, %v19159_v57  ;;  %v18562_v54 = vpop.eup %18561  ;;  %v8786_v31 = vrot.slane %v8764_v19, %v19159_v57  ;;  %v8794_v14 = vcombine.high %v24350_v52, %v24350_v52  ;;  %27512 = vst [vmem:[#allocation185_spill] sm:$0xff] %v24376_v10 }
 0x5ef   : > { %27511 = vst [vmem:[#allocation184_spill] sm:$0xff] %v24357_v26  ;;  %v18564_v12 = vpop.eup %18563  ;;  %v12011_v20 = vcombine.low %v18560_v34, %v18562_v54  ;;  %v12026_v48 = vrot.slane %v12010_v11, %v19159_v57  ;;  %v9501_v60 = vsub.f32 %v27462_v15, %v24350_v52  ;;  %v9509_v4 = vsub.f32 %v23902_v40, %v24350_v52  ;;  %v27515_v15 = vld [vmem:[#allocation156_spill] sm:$0xff]  ;;  %v27516_v11 = vld [vmem:[#allocation159_spill] sm:$0xff] }
 0x5f0   : > { %v8793_v27 = vrot.slane %v8765_v18, %v19159_v57  ;;  %v8795_v37 = vcombine.high %v8779_v61, %v8779_v61  ;;  %v18566_v1 = vpop.eup %18565  ;;  %v8796_v7 = vcombine.high %v8786_v31, %v8786_v31  ;;  %v24373_v47 = vrot.slane %v5705_v42, %v19159_v57  ;;  %v27517_v18 = vld [vmem:[#allocation160_spill] sm:$0xff] }
 0x5f1   : > { %v12012_v3 = vcombine.low %v18564_v12, %v18566_v1  ;;  %v12041_v32 = vcombine.low %v12019_v13, %v12026_v48  ;;  %v9502_v38 = vsub.f32 %v27463_v45, %v8786_v31  ;;  %v12033_v63 = vrot.slane %v12011_v20, %v19159_v57  ;;  %v27518_v13 = vld [vmem:[#allocation23_spill] sm:$0xff]  ;;  %v18086_v48 = vpop.f32.mrf.mxu0 }
 0x5f2   : > { %v8797_v28 = vcombine.high %v8793_v27, %v8793_v27  ;;  %v24378_v56 = vpop.eup %18567  ;;  %v9503_v19 = vsub.f32 %v27514_v59, %v8794_v14  ;;  %v9504_v34 = vsub.f32 %v27515_v15, %v8796_v7  ;;  %v9505_v40 = vsub.f32 %v27516_v11, %v8779_v61  ;;  %v27523_v48 = vld [vmem:[#allocation168_spill] sm:$0xff] }
 0x5f3   : > { %27513 = vst [vmem:[#allocation186_spill] sm:$0xff] %v24378_v56  ;;  %v12040_v42 = vrot.slane %v12012_v3, %v19159_v57  ;;  %v9506_v54 = vsub.f32 %v27517_v18, %v8793_v27  ;;  %v9507_v12 = vsub.f32 %v27518_v13, %v8795_v37  ;;  %v9510_v45 = vsub.f32 %v23906_v30, %v8786_v31 }
 0x5f4   : > { %v24389_v1 = vrot.slane %v12041_v32, %v19159_v57  ;;  %v9508_v20 = vsub.f32 %v27520_v0, %v8797_v28  ;;  %v9511_v59 = vsub.f32 %v23933_v5, %v8794_v14  ;;  %v9512_v15 = vsub.f32 %v24136_v41, %v8796_v7 }
 0x5f5   : > { %v12042_v24 = vcombine.low %v12033_v63, %v12040_v42  ;;  %v9513_v11 = vsub.f32 %v24144_v49, %v8779_v61  ;;  %v9514_v3 = vsub.f32 %v24151_v23, %v8793_v27  ;;  %v9858_v18 = vmul.f32 1.442695, %v9501_v60 }
 0x5f6   : > { %27519 = vst [vmem:[#allocation138_spill] sm:$0xff] %v24389_v1  ;;  %v9515_v13 = vsub.f32 %v24164_v35, %v8795_v37  ;;  %v9860_v29 = vmul.f32 1.442695, %v9502_v38  ;;  %v9862_v30 = vmul.f32 1.442695, %v9503_v19  ;;  %v9516_v32 = vsub.f32 %v24160_v6, %v8797_v28  ;;  %v27539_v1 = vld [vmem:[#allocation177_spill] sm:$0xff] }
 0x5f7   : > { %v9864_v31 = vmul.f32 1.442695, %v9504_v34  ;;  %v9517_v0 = vsub.f32 %v24147_v39, %v24350_v52  ;;  %18569 = vpow2.f32 %v9858_v18  ;;  %v9866_v5 = vmul.f32 1.442695, %v9505_v40  ;;  %v27522_v34 = vld [vmem:[#allocation165_spill] sm:$0xff] }
 0x5f8   : > { %v24401_v41 = vrot.slane %v12042_v24, %v19159_v57  ;;  %18571 = vpow2.f32 %v9860_v29  ;;  %v9868_v49 = vmul.f32 1.442695, %v9506_v54  ;;  %v24405_v23 = vcombine.high %v24341_v33, %v24341_v33 }
 0x5f9   : > { %18573 = vpow2.f32 %v9862_v30  ;;  %v9870_v35 = vmul.f32 1.442695, %v9507_v12  ;;  %v9872_v61 = vmul.f32 1.442695, %v9508_v20  ;;  %v9874_v14 = vmul.f32 1.442695, %v9509_v4 }
 0x5fa   : > { %27521 = vst [vmem:[#allocation156_spill] sm:$0xff] %v24401_v41  ;;  %18575 = vpow2.f32 %v9864_v31  ;;  %v9876_v6 = vmul.f32 1.442695, %v9510_v45  ;;  %v9878_v27 = vmul.f32 1.442695, %v9511_v59  ;;  %v8040_v60 = vcombine.low %v24341_v33, %v24364_v58  ;;  %v27524_v59 = vld [vmem:[#allocation167_spill] sm:$0xff] }
 0x5fb   : > { %v9880_v37 = vmul.f32 1.442695, %v9512_v15  ;;  %18577 = vpow2.f32 %v9866_v5  ;;  %v9882_v39 = vmul.f32 1.442695, %v9513_v11  ;;  %v9884_v52 = vmul.f32 1.442695, %v9514_v3 }
 0x5fc   : > { %v9886_v7 = vmul.f32 1.442695, %v9515_v13  ;;  %18579 = vpow2.f32 %v9868_v49  ;;  %v9888_v24 = vmul.f32 1.442695, %v9516_v32  ;;  %v9890_v29 = vmul.f32 1.442695, %v9517_v0 }
 0x5fd   : > { %18581 = vpow2.f32 %v9870_v35  ;;  %v24411_v28 = vcombine.high %v24353_v21, %v24353_v21  ;;  %v18028_v4 = vcombine.high %v24341_v33, %v24364_v58  ;;  %v8042_v38 = vcombine.low %v24353_v21, %v24373_v47  ;;  %v27525_v11 = vld [vmem:[#allocation170_spill] sm:$0xff] }
 0x5fe   : > { %18583 = vpow2.f32 %v9872_v61  ;;  %v24419_v63 = vcombine.high %v24364_v58, %v24364_v58  ;;  %v8056_v19 = vrot.slane %v8040_v60, %v19159_v57  ;;  %v14184_v40 = vcombine.high %v27522_v34, %v27522_v34 }
 0x5ff   : > { %18585 = vpow2.f32 %v9874_v14  ;;  %v8063_v42 = vrot.slane %v18028_v4, %v19159_v57  ;;  %v8070_v54 = vrot.slane %v8042_v38, %v19159_v57  ;;  %v18029_v12 = vcombine.high %v24353_v21, %v24373_v47 }
 0x600   : > { %18587 = vpow2.f32 %v9876_v6  ;;  %v14198_v45 = vrot.slane %v14184_v40, %v19159_v57  ;;  %v14229_v20 = vcombine.high %v27523_v48, %v27523_v48  ;;  %v14231_v15 = vcombine.high %v27524_v59, %v27524_v59  ;;  %v24460_v40 = vpop.f32.mrf.mxu1 }
 0x601   : > { %18589 = vpow2.f32 %v9878_v27  ;;  %v8071_v3 = vcombine.low %v27525_v11, %v8056_v19  ;;  %v8072_v18 = vcombine.low %v8063_v42, %v8070_v54  ;;  %v14240_v13 = vrot.slane %v24332_v16, %v19159_v57  ;;  %27526 = vst [vmem:[#allocation159_spill] sm:$0xff] %v24460_v40 }
 0x602   : > { %18591 = vpow2.f32 %v9880_v37  ;;  %v24438_v30 = vcombine.high %v24373_v47, %v24373_v47  ;;  %v14200_v31 = vcombine.high %v14198_v45, %v14198_v45  ;;  %v14214_v32 = vrot.slane %v14198_v45, %v19159_v57  ;;  %v18122_v11 = vpop.f32.mrf.mxu1 }
 0x603   : > { %18593 = vpow2.f32 %v9882_v39  ;;  %v24442_v0 = vrot.slane %v8072_v18, %v19159_v57  ;;  %v24445_v5 = vrot.slane %v18029_v12, %v19159_v57  ;;  %v14248_v49 = vcombine.high %v14240_v13, %v14240_v13 }
 0x604   : > { %v18570_v35 = vpop.eup %18569  ;;  %18595 = vpow2.f32 %v9884_v52  ;;  %v14228_v61 = vrot.slane %v14200_v31, %v19159_v57  ;;  %v14230_v14 = vcombine.high %v14214_v32, %v14214_v32  ;;  %v14921_v6 = vmul.f32 %v14231_v15, %v24364_v58  ;;  %v27528_v31 = vld [vmem:[#allocation169_spill] sm:$0xff] }
 0x605   : > { %v18572_v27 = vpop.eup %18571  ;;  %18597 = vpow2.f32 %v9886_v7  ;;  %v24450_v37 = vrot.slane %v8071_v3, %v19159_v57  ;;  %v24453_v39 = vrot.slane %v14240_v13, %v19159_v57  ;;  %v14920_v60 = vmul.f32 %v14229_v20, %v24341_v33  ;;  %v27527_v13 = vld [vmem:[#allocation171_spill] sm:$0xff] }
 0x606   : > { %v18574_v4 = vpop.eup %18573  ;;  %18599 = vpow2.f32 %v9888_v24  ;;  %v14232_v38 = vcombine.high %v14228_v61, %v14228_v61  ;;  %v24457_v52 = vrot.slane %v14248_v49, %v19159_v57  ;;  %v14923_v19 = vmul.f32 %v14228_v61, %v24419_v63 }
 0x607   : > { %v18576_v42 = vpop.eup %18575  ;;  %v11064_v7 = vcombine.low %v18570_v35, %v18572_v27  ;;  %v14922_v12 = vmul.f32 %v14214_v32, %v24405_v23  ;;  %v14924_v45 = vmul.f32 %v14230_v14, %v24353_v21  ;;  %v16793_v15 = vcombine.low %v14920_v60, %v14921_v6  ;;  %v27530_v35 = vld [vmem:[#allocation126_spill] sm:$0xff] }
 0x608   : > { %v18578_v48 = vpop.eup %18577  ;;  %v11065_v20 = vcombine.low %v18574_v4, %v18576_v42  ;;  %v14925_v24 = vmul.f32 %v14232_v38, %v24373_v47  ;;  %v24469_v59 = vmul.f32 %v24457_v52, %v24438_v30  ;;  %18601 = vpow2.f32 %v9890_v29 }
 0x609   : > { %v18580_v3 = vpop.eup %18579  ;;  %v16794_v18 = vcombine.low %v14922_v12, %v14923_v19  ;;  %v27529_v49 = vcombine.low %v27527_v13, %v27528_v31  ;;  %v4856_v61 = vcombine.high %v27530_v35, %v27530_v35  ;;  %v24479_v4 = vmul.f32 %v24453_v39, %v24411_v28 }
 0x60a   : > { %v18582_v14 = vpop.eup %18581  ;;  %v11066_v27 = vcombine.low %v18578_v48, %v18580_v3  ;;  %v16795_v38 = vcombine.low %v14924_v45, %v14925_v24  ;;  %v16809_v6 = vrot.slane %v16793_v15, %v19159_v57  ;;  %v24483_v29 = vrot.slane %v11065_v20, %v19159_v57 }
 0x60b   : > { %v16802_v32 = vrot.slane %v27529_v49, %v19159_v57  ;;  %v18584_v60 = vpop.eup %18583  ;;  %v16816_v19 = vrot.slane %v16794_v18, %v19159_v57  ;;  %v4863_v42 = vrot.slane %v27530_v35, %v19159_v57  ;;  %v4870_v12 = vrot.slane %v4856_v61, %v19159_v57 }
 0x60c   : > { %27531 = vst [vmem:[#allocation160_spill] sm:$0xff] %v24483_v29  ;;  %v18586_v11 = vpop.eup %18585  ;;  %v11067_v48 = vcombine.low %v18582_v14, %v18584_v60  ;;  %v24490_v3 = vrot.slane %v11064_v7, %v19159_v57  ;;  %v16823_v45 = vrot.slane %v16795_v38, %v19159_v57  ;;  %v27533_v7 = vld [vmem:[#allocation6_spill] sm:$0xff]  ;;  %v24504_v60 = vrot.slane %v11066_v27, %v19159_v57 }
 0x60d   : > { %v18588_v15 = vpop.eup %18587  ;;  %v16824_v20 = vcombine.low %v16802_v32, %v16809_v6  ;;  %v4871_v13 = vcombine.high %v4863_v42, %v4863_v42  ;;  %v4872_v31 = vcombine.high %v4870_v12, %v4870_v12  ;;  %v24496_v18 = vrot.slane %v4863_v42, %v19159_v57 }
 0x60e   : > { %27532 = vst [vmem:[#allocation23_spill] sm:$0xff] %v24490_v3  ;;  %v18590_v49 = vpop.eup %18589  ;;  %v11113_v35 = vcombine.low %v18586_v11, %v18588_v15  ;;  %v16825_v61 = vcombine.low %v16816_v19, %v16823_v45  ;;  %v24499_v14 = vrot.slane %v4870_v12, %v19159_v57  ;;  %vm6346_vm0 = vcmp.eq.s32.totalorder %v27362_v51, %v27533_v7 }
 0x60f   : > { %v18592_v38 = vpop.eup %18591  ;;  %27534 = vst [vmem:[#allocation158_spill] sm:$0xff] %v24504_v60  ;;  %v24509_v6 = vrot.slane %v4871_v13, %v19159_v57  ;;  %v24512_v42 = vrot.slane %v4872_v31, %v19159_v57  ;;  %v24515_v12 = vrot.slane %v11067_v48, %v19159_v57  ;;  %v24518_v45 = vrot.slane %v16824_v20, %v19159_v57 }
 0x610   : > { %v18594_v19 = vpop.eup %18593  ;;  %v11114_v11 = vcombine.low %v18590_v49, %v18592_v38  ;;  %v24522_v27 = vcombine.high %v24496_v18, %v24496_v18  ;;  %v11123_v32 = vrot.slane %v11113_v35, %v19159_v57  ;;  %v24526_v13 = vrot.slane %v16825_v61, %v19159_v57 }
 0x611   : > { %27535 = vst [vmem:[#allocation168_spill] sm:$0xff] %v24515_v12  ;;  %27536 = vst [vmem:[#allocation167_spill] sm:$0xff] %v24518_v45  ;;  %v18596_v15 = vpop.eup %18595  ;;  %v24530_v31 = vcombine.high %v24499_v14, %v24499_v14  ;;  %v7144_v48 = vcombine.low %v24496_v18, %v24509_v6  ;;  %v18012_v24 = vcombine.high %v24496_v18, %v24509_v6  ;;  %v24547_v34 = vsel %vm6346_vm0, 1.0, %v27298_v9 }
 0x612   : > { %27537 = vst [vmem:[#allocation170_spill] sm:$0xff] %v24526_v13  ;;  %v18598_v49 = vpop.eup %18597  ;;  %v11115_v20 = vcombine.low %v18594_v19, %v18596_v15  ;;  %v11130_v38 = vrot.slane %v11114_v11, %v19159_v57  ;;  %v7146_v35 = vcombine.low %v24499_v14, %v24512_v42  ;;  %v24541_v61 = vcombine.high %v24509_v6, %v24509_v6 }
 0x613   : > { %v18600_v54 = vpop.eup %18599  ;;  %27538 = vst [vmem:[#allocation171_spill] sm:$0xff] %v24547_v34  ;;  %v7160_v19 = vrot.slane %v7144_v48, %v19159_v57  ;;  %v13288_v11 = vcombine.high %v24206_v22, %v24206_v22  ;;  %v18013_v43 = vcombine.high %v24499_v14, %v24512_v42  ;;  %v13333_v45 = vcombine.high %v24289_v8, %v24289_v8 }
 0x614   : > { %v11116_v15 = vcombine.low %v18598_v49, %v18600_v54  ;;  %v11145_v26 = vcombine.low %v11123_v32, %v11130_v38  ;;  %v7167_v13 = vrot.slane %v18012_v24, %v19159_v57  ;;  %v7174_v56 = vrot.slane %v7146_v35, %v19159_v57 }
 0x615   : > { %v7175_v41 = vcombine.low %v27539_v1, %v7160_v19  ;;  %v13302_v2 = vrot.slane %v13288_v11, %v19159_v57  ;;  %v24560_v48 = vpop.eup %18601  ;;  %v11137_v22 = vrot.slane %v11115_v20, %v19159_v57  ;;  %v13335_v32 = vcombine.high %v24294_v62, %v24294_v62 }
 0x616   : > { %27540 = vst [vmem:[#allocation169_spill] sm:$0xff] %v24560_v48  ;;  %v11144_v54 = vrot.slane %v11116_v15, %v19159_v57  ;;  %v13344_v8 = vrot.slane %v24547_v34, %v19159_v57  ;;  %v24570_v24 = vcombine.high %v24512_v42, %v24512_v42  ;;  %v7176_v49 = vcombine.low %v7167_v13, %v7174_v56 }
 0x617   : > { %v13304_v1 = vcombine.high %v13302_v2, %v13302_v2  ;;  %v13318_v38 = vrot.slane %v13302_v2, %v19159_v57  ;;  %v24574_v19 = vrot.slane %v11145_v26, %v19159_v57  ;;  %v24577_v20 = vrot.slane %v18013_v43, %v19159_v57 }
 0x618   : > { %v11146_v35 = vcombine.low %v11137_v22, %v11144_v54  ;;  %v13352_v11 = vcombine.high %v13344_v8, %v13344_v8  ;;  %v24580_v62 = vrot.slane %v7175_v41, %v19159_v57  ;;  %v14785_v55 = vmul.f32 %v13335_v32, %v24509_v6 }
 0x619   : > { %27541 = vst [vmem:[#allocation126_spill] sm:$0xff] %v24574_v19  ;;  %v13332_v15 = vrot.slane %v13304_v1, %v19159_v57  ;;  %v13334_v46 = vcombine.high %v13318_v38, %v13318_v38  ;;  %v24585_v56 = vrot.slane %v7176_v49, %v19159_v57  ;;  %v24588_v22 = vrot.slane %v13344_v8, %v19159_v57 }
 0x61a   : > { %v24591_v2 = vrot.slane %v13352_v11, %v19159_v57  ;;  %v14784_v43 = vmul.f32 %v13333_v45, %v24496_v18  ;;  %v24595_v26 = vrot.slane %v11146_v35, %v19159_v57  ;;  %v14786_v13 = vmul.f32 %v13318_v38, %v24522_v27  ;;  %v27544_v11 = vld [vmem:[#allocation134_spill] sm:$0xff] }
 0x61b   : > { %v13336_v41 = vcombine.high %v13332_v15, %v13332_v15  ;;  %v14787_v54 = vmul.f32 %v13332_v15, %v24541_v61  ;;  %v27543_v8 = vcombine.low %v24301_v50, %v24305_v17  ;;  %v5738_v45 = vcombine.high %v27544_v11, %v27544_v11 }
 0x61c   : > { %27542 = vst [vmem:[#allocation6_spill] sm:$0xff] %v24595_v26  ;;  %v24601_v32 = vmul.f32 %v24591_v2, %v24570_v24  ;;  %v15897_v49 = vcombine.low %v14784_v43, %v14785_v55  ;;  %v14788_v35 = vmul.f32 %v13334_v46, %v24499_v14  ;;  %v5745_v15 = vrot.slane %v27544_v11, %v19159_v57 }
 0x61d   : > { %v15906_v1 = vrot.slane %v27543_v8, %v19159_v57  ;;  %v14789_v44 = vmul.f32 %v13336_v41, %v24512_v42  ;;  %v15898_v38 = vcombine.low %v14786_v13, %v14787_v54  ;;  %v24617_v55 = vmul.f32 %v24588_v22, %v24530_v31  ;;  %v27545_v41 = vld [vmem:[#allocation22_spill] sm:$0xff] }
 0x61e   : > { %v15913_v50 = vrot.slane %v15897_v49, %v19159_v57  ;;  %v5752_v17 = vrot.slane %v5738_v45, %v19159_v57  ;;  %v5753_v8 = vcombine.high %v5745_v15, %v5745_v15  ;;  %v24622_v46 = vrot.slane %v5745_v15, %v19159_v57 }
 0x61f   : > { %v15899_v43 = vcombine.low %v14788_v35, %v14789_v44  ;;  %vm6371_vm1 = vcmp.eq.s32.totalorder %v27545_v41, %v24033_v36  ;;  %v24632_v49 = vrot.slane %v15898_v38, %v19159_v57  ;;  %v14233_v36 = vcombine.high %v24332_v16, %v24332_v16 }
 0x620   : > { %v15928_v13 = vcombine.low %v15906_v1, %v15913_v50  ;;  %v5754_v11 = vcombine.high %v5752_v17, %v5752_v17  ;;  %v24629_v48 = vrot.slane %v5752_v17, %v19159_v57  ;;  %v24638_v45 = vrot.slane %v5753_v8, %v19159_v57 }
 0x621   : > { %v24635_v44 = vrot.slane %v15899_v43, %v19159_v57  ;;  %v24650_v15 = vsel %vm6371_vm1, 1.0, %v27298_v9  ;;  %v27547_v38 = vcombine.low %v24450_v37, %v24442_v0  ;;  %v24658_v17 = vcombine.high %v24622_v46, %v24622_v46 }
 0x622   : > { %v24643_v1 = vrot.slane %v5754_v11, %v19159_v57  ;;  %v24647_v35 = vcombine.high %v24629_v48, %v24629_v48  ;;  %27546 = vst [vmem:[#allocation177_spill] sm:$0xff] %v24650_v15  ;;  %v8089_v43 = vcombine.low %v24622_v46, %v24638_v45  ;;  %v18030_v8 = vcombine.high %v24622_v46, %v24638_v45 }
 0x623   : > { %v8466_v50 = vsel %vm732_vm2, %v27547_v38, -inf  ;;  %v14278_v11 = vcombine.high %v24453_v39, %v24453_v39  ;;  %v24667_v54 = vrot.slane %v15928_v13, %v19159_v57  ;;  %v14247_v38 = vrot.slane %v14233_v36, %v19159_v57 }
 0x624   : > { %v8091_v0 = vcombine.low %v24629_v48, %v24643_v1  ;;  %v8143_v37 = vrot.slane %v24647_v35, %v19159_v57  ;;  %v15929_v16 = vcombine.low %v24632_v49, %v24635_v44  ;;  %v24678_v19 = vcombine.high %v24638_v45, %v24638_v45 }
 0x625   : > { %27548 = vst [vmem:[#allocation134_spill] sm:$0xff] %v24667_v54  ;;  %v8105_v39 = vrot.slane %v8089_v43, %v19159_v57  ;;  %v14280_v13 = vcombine.high %v24457_v52, %v24457_v52  ;;  %v8112_v54 = vrot.slane %v18030_v8, %v19159_v57  ;;  %v14249_v29 = vcombine.high %v14247_v38, %v14247_v38 }
 0x626   : > { %v8119_v26 = vrot.slane %v8091_v0, %v19159_v57  ;;  %v14263_v3 = vrot.slane %v14247_v38, %v19159_v57  ;;  %v14288_v49 = vrot.slane %v24650_v15, %v19159_v57  ;;  %v14928_v44 = vmul.f32 %v14278_v11, %v24622_v46 }
 0x627   : > { %v8120_v36 = vcombine.low %v24445_v5, %v8105_v39  ;;  %v14929_v60 = vmul.f32 %v14280_v13, %v24638_v45  ;;  %v8150_v12 = vrot.slane %v8143_v37, %v19159_v57  ;;  %v14277_v52 = vrot.slane %v14249_v29, %v19159_v57 }
 0x628   : > { %v8121_v43 = vcombine.low %v8112_v54, %v8119_v26  ;;  %v14279_v8 = vcombine.high %v14263_v3, %v14263_v3  ;;  %v14295_v51 = vrot.slane %v14288_v49, %v19159_v57  ;;  %v14930_v38 = vmul.f32 %v14263_v3, %v24658_v17 }
 0x629   : > { %v8128_v0 = vrot.slane %v8120_v36, %v19159_v57  ;;  %v16842_v5 = vcombine.low %v14928_v44, %v14929_v60  ;;  %v14281_v15 = vcombine.high %v14277_v52, %v14277_v52  ;;  %v14931_v11 = vmul.f32 %v14277_v52, %v24678_v19  ;;  %v27550_v36 = vld [vmem:[#allocation166_spill] sm:$0xff] }
 0x62a   : > { %v8135_v39 = vrot.slane %v8121_v43, %v19159_v57  ;;  %v14932_v13 = vmul.f32 %v14279_v8, %v24629_v48  ;;  %v14934_v26 = vmul.f32 %v14295_v51, %v24647_v35  ;;  %v27549_v29 = vcombine.low %v24479_v4, %v24469_v59 }
 0x62b   : > { %v16858_v37 = vrot.slane %v16842_v5, %v19159_v57  ;;  %v4905_v3 = vcombine.high %v27550_v36, %v27550_v36  ;;  %v14933_v49 = vmul.f32 %v14281_v15, %v24643_v1  ;;  %v16843_v44 = vcombine.low %v14930_v38, %v14931_v11 }
 0x62c   : > { %v16851_v54 = vrot.slane %v27549_v29, %v19159_v57  ;;  %v8136_v60 = vcombine.low %v8128_v0, %v8135_v39  ;;  %v4912_v43 = vrot.slane %v27550_v36, %v19159_v57  ;;  %v24712_v51 = vcombine.high %v24643_v1, %v24643_v1 }
 0x62d   : > { %v16896_v59 = vrot.slane %v14934_v26, %v19159_v57  ;;  %v4919_v4 = vrot.slane %v4905_v3, %v19159_v57  ;;  %v16844_v5 = vcombine.low %v14932_v13, %v14933_v49  ;;  %v16865_v0 = vrot.slane %v16843_v44, %v19159_v57 }
 0x62e   : > { %v16873_v52 = vcombine.low %v16851_v54, %v16858_v37  ;;  %v8467_v8 = vsel %vm732_vm2, %v8136_v60, -inf  ;;  %v4920_v39 = vcombine.high %v4912_v43, %v4912_v43  ;;  %v8469_v38 = vsel %vm8314_vm10, %v8150_v12, -inf }
 0x62f   : > { %v8468_v15 = vmax.f32 %v8466_v50, %v8467_v8  ;;  %v4921_v11 = vcombine.high %v4919_v4, %v4919_v4  ;;  %vm6347_vm3 = vcmp.eq.s32.totalorder %v27545_v41, %v27533_v7  ;;  %v16872_v29 = vrot.slane %v16844_v5, %v19159_v57 }
 0x630   : > { %v24723_v54 = vrot.slane %v4912_v43, %v19159_v57  ;;  %v24726_v26 = vrot.slane %v4919_v4, %v19159_v57  ;;  %v24729_v13 = vrot.slane %v4920_v39, %v19159_v57  ;;  %v24732_v37 = vrot.slane %v15929_v16, %v19159_v57 }
 0x631   : > { %v8470_v50 = vmax.f32 %v8468_v15, %v8469_v38  ;;  %v24735_v12 = vrot.slane %v16873_v52, %v19159_v57  ;;  %v24738_v7 = vrot.slane %v4921_v11, %v19159_v57  ;;  %v16874_v36 = vcombine.low %v16865_v0, %v16872_v29 }
 0x632   : > { %27551 = vst [vmem:[#allocation166_spill] sm:$0xff] %v24726_v26  ;;  %27552 = vst [vmem:[#allocation187_spill] sm:$0xff] %v24732_v37  ;;  %v24741_v3 = vrot.slane %v16896_v59, %v19159_v57  ;;  %v24745_v60 = vcombine.high %v24726_v26, %v24726_v26  ;;  %v24748_v49 = vsel %vm6347_vm3, 1.0, %v27298_v9  ;;  %v7193_v44 = vcombine.low %v24723_v54, %v24729_v13 }
 0x633   : > { %27553 = vst [vmem:[#allocation188_spill] sm:$0xff] %v24735_v12  ;;  %27556 = vst [vmem:[#allocation191_spill] sm:$0xff] %v24748_v49  ;;  %v8471_v16 = vrot.slane %v8470_v50, 4  ;;  %v18014_v43 = vcombine.high %v24723_v54, %v24729_v13  ;;  %v27557_v52 = vcombine.low %v24580_v62, %v24585_v56  ;;  %v24759_v4 = vrot.slane %v16874_v36, %v19159_v57 }
 0x634   : > { %27554 = vst [vmem:[#allocation189_spill] sm:$0xff] %v24741_v3  ;;  %27555 = vst [vmem:[#allocation190_spill] sm:$0xff] %v24745_v60  ;;  %v24763_v8 = vcombine.high %v24723_v54, %v24723_v54  ;;  %v7195_v5 = vcombine.low %v24726_v26, %v24738_v7  ;;  %v13337_v0 = vcombine.high %v24547_v34, %v24547_v34 }
 0x635   : > { %v8378_v59 = vsel %vm732_vm2, %v27557_v52, -inf  ;;  %27558 = vst [vmem:[#allocation192_spill] sm:$0xff] %v24759_v4  ;;  %v8472_v39 = vmax.f32 %v8470_v50, %v8471_v16  ;;  %v7209_v15 = vrot.slane %v7193_v44, %v19159_v57  ;;  %v7216_v62 = vrot.slane %v18014_v43, %v19159_v57 }
 0x636   : > { %v7247_v56 = vrot.slane %v24745_v60, %v19159_v57  ;;  %v7223_v11 = vrot.slane %v7195_v5, %v19159_v57  ;;  %v13351_v29 = vrot.slane %v13337_v0, %v19159_v57  ;;  %v13382_v36 = vcombine.high %v24588_v22, %v24588_v22 }
 0x637   : > { %v8473_v52 = vrot.slane %v8472_v39, 2  ;;  %v7224_v50 = vcombine.low %v24577_v20, %v7209_v15  ;;  %v13384_v16 = vcombine.high %v24591_v2, %v24591_v2  ;;  %v13392_v44 = vrot.slane %v24748_v49, %v19159_v57 }
 0x638   : > { %v24786_v43 = vcombine.high %v24729_v13, %v24729_v13  ;;  %v7225_v38 = vcombine.low %v7216_v62, %v7223_v11  ;;  %v13353_v5 = vcombine.high %v13351_v29, %v13351_v29  ;;  %v13367_v0 = vrot.slane %v13351_v29, %v19159_v57 }
 0x639   : > { %v8474_v34 = vmax.f32 %v8472_v39, %v8473_v52  ;;  %v7232_v22 = vrot.slane %v7224_v50, %v19159_v57  ;;  %v7254_v3 = vrot.slane %v7247_v56, %v19159_v57  ;;  %v13399_v20 = vrot.slane %v13392_v44, %v19159_v57 }
 0x63a   : > { %v7239_v2 = vrot.slane %v7225_v38, %v19159_v57  ;;  %v13381_v15 = vrot.slane %v13353_v5, %v19159_v57  ;;  %v13383_v49 = vcombine.high %v13367_v0, %v13367_v0  ;;  %v14793_v4 = vmul.f32 %v13384_v16, %v24729_v13  ;;  %v27561_v5 = vld [vmem:[#allocation175_spill] sm:$0xff] }
 0x63b   : > { %v8475_v12 = vrot.slane %v8474_v34, 1  ;;  %v14792_v62 = vmul.f32 %v13382_v36, %v24723_v54  ;;  %v14794_v11 = vmul.f32 %v13367_v0, %v24763_v8  ;;  %v24798_v39 = vmul.f32 %v13399_v20, %v24745_v60 }
 0x63c   : > { %v7240_v29 = vcombine.low %v7232_v22, %v7239_v2  ;;  %v13385_v52 = vcombine.high %v13381_v15, %v13381_v15  ;;  %v14795_v56 = vmul.f32 %v13381_v15, %v24786_v43  ;;  %v27559_v38 = vcombine.low %v24617_v55, %v24601_v32 }
 0x63d   : > { %v24807_v44 = vmax.f32 %v8474_v34, %v8475_v12  ;;  %v14796_v16 = vmul.f32 %v13383_v49, %v24726_v26  ;;  %v15946_v36 = vcombine.low %v14792_v62, %v14793_v4  ;;  %v5787_v0 = vcombine.high %v27561_v5, %v27561_v5 }
 0x63e   : > { %v24805_v50 = vrot.slane %v27559_v38, %v19159_v57  ;;  %v8379_v20 = vsel %vm732_vm2, %v7240_v29, -inf  ;;  %v14797_v22 = vmul.f32 %v13385_v52, %v24738_v7  ;;  %v15947_v2 = vcombine.low %v14794_v11, %v14795_v56 }
 0x63f   : > { %27560 = vst [vmem:[#allocation193_spill] sm:$0xff] %v24807_v44  ;;  %v24816_v15 = vrot.slane %v27561_v5, %v19159_v57  ;;  %v9190_v32 = vcombine.high %v24807_v44, %v24807_v44  ;;  %v9197_v34 = vrot.slane %v24807_v44, %v19159_v57  ;;  %v8380_v55 = vmax.f32 %v8378_v59, %v8379_v20 }
 0x640   : > { %v24823_v12 = vrot.slane %v15946_v36, %v19159_v57  ;;  %v8381_v49 = vsel %vm8314_vm10, %v7254_v3, -inf  ;;  %v15948_v4 = vcombine.low %v14796_v16, %v14797_v22  ;;  %v24829_v11 = vrot.slane %v5787_v0, %v19159_v57 }
 0x641   : > { %v9204_v29 = vrot.slane %v9190_v32, %v19159_v57  ;;  %v9205_v52 = vcombine.high %v9197_v34, %v9197_v34  ;;  %v24833_v56 = vrot.slane %v9197_v34, %v19159_v57  ;;  %v24836_v59 = vrot.slane %v15947_v2, %v19159_v57  ;;  %v27562_v2 = vld [vmem:[#allocation106_spill] sm:$0xff] }
 0x642   : > { %v8382_v38 = vmax.f32 %v8380_v55, %v8381_v49  ;;  %v15976_v36 = vrot.slane %v15948_v4, %v19159_v57  ;;  %v15977_v3 = vcombine.low %v24805_v50, %v24823_v12  ;;  %v5802_v16 = vcombine.high %v24816_v15, %v24816_v15 }
 0x643   : > { %v9206_v5 = vcombine.high %v9204_v29, %v9204_v29  ;;  %v9220_v0 = vrot.slane %v9204_v29, %v19159_v57  ;;  %v9227_v20 = vrot.slane %v9205_v52, %v19159_v57  ;;  %v9235_v22 = vcombine.high %v24833_v56, %v24833_v56  ;;  %v27563_v29 = vld [vmem:[#allocation163_spill] sm:$0xff] }
 0x644   : > { %v9654_v32 = vsub.f32 %v27562_v2, %v24833_v56  ;;  %v9662_v34 = vsub.f32 %v24411_v28, %v24833_v56  ;;  %v9670_v50 = vsub.f32 %v24647_v35, %v24833_v56  ;;  %v5803_v55 = vcombine.high %v24829_v11, %v24829_v11 }
 0x645   : > { %v9234_v12 = vrot.slane %v9206_v5, %v19159_v57  ;;  %v9236_v49 = vcombine.high %v9220_v0, %v9220_v0  ;;  %v9237_v4 = vcombine.high %v9227_v20, %v9227_v20  ;;  %v9655_v52 = vsub.f32 %v27563_v29, %v9227_v20 }
 0x646   : > { %v9656_v62 = vsub.f32 %v24341_v33, %v9235_v22  ;;  %v9658_v44 = vsub.f32 %v24405_v23, %v9220_v0  ;;  %v9663_v2 = vsub.f32 %v24438_v30, %v9227_v20  ;;  %v8383_v37 = vrot.slane %v8382_v38, 4 }
 0x647   : > { %v9238_v28 = vcombine.high %v9234_v12, %v9234_v12  ;;  %v9657_v41 = vsub.f32 %v24364_v58, %v9237_v4  ;;  %v9659_v35 = vsub.f32 %v24419_v63, %v9234_v12  ;;  %v9660_v56 = vsub.f32 %v24353_v21, %v9236_v49 }
 0x648   : > { %v9664_v5 = vsub.f32 %v24622_v46, %v9235_v22  ;;  %v9665_v40 = vsub.f32 %v24638_v45, %v9237_v4  ;;  %v9666_v29 = vsub.f32 %v24658_v17, %v9220_v0  ;;  %v9667_v33 = vsub.f32 %v24678_v19, %v9234_v12 }
 0x649   : > { %v9661_v23 = vsub.f32 %v24373_v47, %v9238_v28  ;;  %v9668_v30 = vsub.f32 %v24629_v48, %v9236_v49  ;;  %v10164_v20 = vmul.f32 1.442695, %v9654_v32  ;;  %v10166_v10 = vmul.f32 1.442695, %v9655_v52 }
 0x64a   : > { %v9669_v58 = vsub.f32 %v24643_v1, %v9238_v28  ;;  %v10168_v60 = vmul.f32 1.442695, %v9656_v62  ;;  %v10170_v63 = vmul.f32 1.442695, %v9657_v41  ;;  %v10172_v26 = vmul.f32 1.442695, %v9658_v44 }
 0x64b   : > { %18603 = vpow2.f32 %v10164_v20  ;;  %v10174_v21 = vmul.f32 1.442695, %v9659_v35  ;;  %v10176_v46 = vmul.f32 1.442695, %v9660_v56  ;;  %v8384_v22 = vmax.f32 %v8382_v38, %v8383_v37  ;;  %v27570_v28 = vld [vmem:[#allocation21_spill] sm:$0xff] }
 0x64c   : > { %18605 = vpow2.f32 %v10166_v10  ;;  %v10178_v45 = vmul.f32 1.442695, %v9661_v23  ;;  %v10180_v17 = vmul.f32 1.442695, %v9662_v34  ;;  %v10182_v0 = vmul.f32 1.442695, %v9663_v2 }
 0x64d   : > { %18607 = vpow2.f32 %v10168_v60  ;;  %v10184_v19 = vmul.f32 1.442695, %v9664_v5  ;;  %v10186_v47 = vmul.f32 1.442695, %v9665_v40  ;;  %v10188_v12 = vmul.f32 1.442695, %v9666_v29 }
 0x64e   : > { %18609 = vpow2.f32 %v10170_v63  ;;  %v10190_v48 = vmul.f32 1.442695, %v9667_v33  ;;  %v10192_v32 = vmul.f32 1.442695, %v9668_v30  ;;  %v10194_v49 = vmul.f32 1.442695, %v9669_v58 }
 0x64f   : > { %18611 = vpow2.f32 %v10172_v26  ;;  %v8385_v1 = vrot.slane %v8384_v22, 2  ;;  %v15978_v41 = vcombine.low %v24836_v59, %v15976_v36  ;;  %v24872_v44 = vrot.slane %v15977_v3, %v19159_v57  ;;  %v27572_v20 = vld [vmem:[#allocation5_spill] sm:$0xff] }
 0x650   : > { %18613 = vpow2.f32 %v10174_v21  ;;  %v24876_v10 = vrot.slane %v24816_v15, %v19159_v57  ;;  %v24880_v40 = vrot.slane %v24829_v11, %v19159_v57  ;;  %v24883_v37 = vrot.slane %v5802_v16, %v19159_v57  ;;  %v27568_v16 = vld [vmem:[#allocation112_spill] sm:$0xff] }
 0x651   : > { %27564 = vst [vmem:[#allocation175_spill] sm:$0xff] %v24872_v44  ;;  %18615 = vpow2.f32 %v10176_v46  ;;  %v8386_v26 = vmax.f32 %v8384_v22, %v8385_v1  ;;  %v24886_v60 = vrot.slane %v15978_v41, %v19159_v57  ;;  %v24889_v62 = vrot.slane %v5803_v55, %v19159_v57 }
 0x652   : > { %18617 = vpow2.f32 %v10178_v45  ;;  %v24893_v15 = vcombine.high %v24876_v10, %v24876_v10  ;;  %v24897_v11 = vcombine.high %v24880_v40, %v24880_v40  ;;  %v24901_v59 = vcombine.high %v24883_v37, %v24883_v37 }
 0x653   : > { %27565 = vst [vmem:[#allocation106_spill] sm:$0xff] %v24886_v60  ;;  %27566 = vst [vmem:[#allocation163_spill] sm:$0xff] %v24889_v62  ;;  %18619 = vpow2.f32 %v10180_v17  ;;  %v10196_v38 = vmul.f32 1.442695, %v9670_v50  ;;  %v8387_v36 = vrot.slane %v8386_v26, 1  ;;  %v6262_v34 = vcombine.high %v27568_v16, %v27568_v16 }
 0x654   : > { %27567 = vst [vmem:[#allocation194_spill] sm:$0xff] %v24897_v11  ;;  %18621 = vpow2.f32 %v10182_v0  ;;  %v8151_v55 = vcombine.low %v24712_v51, %v24876_v10  ;;  %v8152_v4 = vcombine.low %v24883_v37, %v24893_v15  ;;  %v8153_v50 = vcombine.low %v24901_v59, %v24880_v40 }
 0x655   : > { %18623 = vpow2.f32 %v10184_v19  ;;  %v24911_v52 = vmax.f32 %v8386_v26, %v8387_v36  ;;  %v8154_v2 = vcombine.low %v24889_v62, %v24897_v11  ;;  %v24918_v35 = vrot.slane %v6262_v34, %v27570_v28 }
 0x656   : > { %18625 = vpow2.f32 %v10186_v47  ;;  %v8161_v56 = vrot.slane %v8151_v55, %v19159_v57  ;;  %v8168_v5 = vrot.slane %v8152_v4, %v19159_v57  ;;  %v24927_v23 = vrot.slane %v8153_v50, %v19159_v57 }
 0x657   : > { %27569 = vst [vmem:[#allocation112_spill] sm:$0xff] %v24911_v52  ;;  %18627 = vpow2.f32 %v10188_v12  ;;  %v8798_v29 = vcombine.high %v24911_v52, %v24911_v52  ;;  %v8805_v33 = vrot.slane %v24911_v52, %v19159_v57  ;;  %vm6372_vm4 = vcmp.eq.s32.totalorder %v27572_v20, %v24918_v35 }
 0x658   : > { %v24929_v30 = vpop.eup %18603  ;;  %18629 = vpow2.f32 %v10190_v48  ;;  %v24934_v58 = vrot.slane %v8154_v2, %v19159_v57  ;;  %v8183_v63 = vcombine.low %v8161_v56, %v8168_v5  ;;  %v24944_v0 = vcombine.high %v24738_v7, %v24738_v7 }
 0x659   : > { %27571 = vst [vmem:[#allocation21_spill] sm:$0xff] %v24929_v30  ;;  %v24936_v21 = vpop.eup %18605  ;;  %18631 = vpow2.f32 %v10192_v32  ;;  %v8812_v46 = vrot.slane %v8798_v29, %v19159_v57  ;;  %v8813_v22 = vcombine.high %v8805_v33, %v8805_v33  ;;  %v24940_v45 = vrot.slane %v8805_v33, %v19159_v57 }
 0x65a   : > { %27573 = vst [vmem:[#allocation5_spill] sm:$0xff] %v24936_v21  ;;  %v18608_v17 = vpop.eup %18607  ;;  %18633 = vpow2.f32 %v10194_v49  ;;  %v27574_v19 = vrot.slane %v24798_v39, %v19159_v57  ;;  %v24954_v12 = vcombine.high %v24889_v62, %v24889_v62  ;;  %v24966_v41 = vsel %vm6372_vm4, 1.0, %v27298_v9 }
 0x65b   : > { %v18610_v48 = vpop.eup %18609  ;;  %v8814_v32 = vcombine.high %v8812_v46, %v8812_v46  ;;  %v24957_v1 = vrot.slane %v8812_v46, %v19159_v57  ;;  %v24960_v49 = vrot.slane %v8813_v22, %v19159_v57  ;;  %27576 = vst [vmem:[#allocation196_spill] sm:$0xff] %v24966_v41  ;;  %v8843_v36 = vcombine.high %v24940_v45, %v24940_v45 }
 0x65c   : > { %v24950_v47 = vrot.slane %v27574_v19, %v19159_v57  ;;  %v24968_v39 = vpop.eup %18611  ;;  %v12073_v26 = vcombine.low %v18608_v17, %v18610_v48  ;;  %v8184_v16 = vcombine.low %v24927_v23, %v24934_v58  ;;  %v24975_v34 = vrot.slane %v8183_v63, %v19159_v57 }
 0x65d   : > { %27577 = vst [vmem:[#allocation197_spill] sm:$0xff] %v24968_v39  ;;  %v24977_v55 = vpop.eup %18613  ;;  %18635 = vpow2.f32 %v10196_v38  ;;  %v24980_v4 = vrot.slane %v8814_v32, %v19159_v57  ;;  %v24984_v50 = vcombine.high %v24957_v1, %v24957_v1  ;;  %v8845_v2 = vcombine.high %v24960_v49, %v24960_v49 }
 0x65e   : > { %27575 = vst [vmem:[#allocation195_spill] sm:$0xff] %v24950_v47  ;;  %27578 = vst [vmem:[#allocation198_spill] sm:$0xff] %v24977_v55  ;;  %v18616_v28 = vpop.eup %18615  ;;  %v24989_v56 = vrot.slane %v12073_v26, %v19159_v57  ;;  %v9518_v5 = vsub.f32 %v24189_v53, %v24940_v45  ;;  %v9519_v38 = vsub.f32 %v24194_v25, %v24960_v49  ;;  %v27580_v26 = vld [vmem:[#allocation166_spill] sm:$0xff] }
 0x65f   : > { %v9526_v29 = vsub.f32 %v24530_v31, %v24940_v45  ;;  %v18618_v33 = vpop.eup %18617  ;;  %v8846_v23 = vcombine.high %v24980_v4, %v24980_v4  ;;  %v9520_v58 = vsub.f32 %v24496_v18, %v8843_v36  ;;  %v9521_v63 = vsub.f32 %v24509_v6, %v8845_v2 }
 0x660   : > { %27579 = vst [vmem:[#allocation199_spill] sm:$0xff] %v24989_v56  ;;  %v9522_v46 = vsub.f32 %v24522_v27, %v24957_v1  ;;  %v18620_v22 = vpop.eup %18619  ;;  %v12075_v17 = vcombine.low %v18616_v28, %v18618_v33  ;;  %v9523_v53 = vsub.f32 %v24541_v61, %v24980_v4  ;;  %v9524_v25 = vsub.f32 %v24499_v14, %v24984_v50 }
 0x661   : > { %v9527_v31 = vsub.f32 %v24570_v24, %v24960_v49  ;;  %v18622_v19 = vpop.eup %18621  ;;  %v9525_v48 = vsub.f32 %v24512_v42, %v8846_v23  ;;  %v9528_v18 = vsub.f32 %v24723_v54, %v8843_v36  ;;  %v9529_v6 = vsub.f32 %v24729_v13, %v8845_v2 }
 0x662   : > { %v9530_v27 = vsub.f32 %v24763_v8, %v24957_v1  ;;  %v18624_v32 = vpop.eup %18623  ;;  %v9531_v61 = vsub.f32 %v24786_v43, %v24980_v4  ;;  %v9532_v14 = vsub.f32 %v27580_v26, %v24984_v50  ;;  %v9533_v28 = vsub.f32 %v24738_v7, %v8846_v23  ;;  %v27582_v43 = vld [vmem:[#allocation190_spill] sm:$0xff] }
 0x663   : > { %v9892_v24 = vmul.f32 1.442695, %v9518_v5  ;;  %v18626_v49 = vpop.eup %18625  ;;  %v12121_v33 = vcombine.low %v18620_v22, %v18622_v19  ;;  %v9894_v42 = vmul.f32 1.442695, %v9519_v38  ;;  %v9896_v3 = vmul.f32 1.442695, %v9520_v58 }
 0x664   : > { %v9898_v54 = vmul.f32 1.442695, %v9521_v63  ;;  %v18628_v36 = vpop.eup %18627  ;;  %v25020_v13 = vrot.slane %v12075_v17, %v19159_v57  ;;  %v12122_v8 = vcombine.low %v18624_v32, %v18626_v49  ;;  %v9900_v1 = vmul.f32 1.442695, %v9522_v46 }
 0x665   : > { %18637 = vpow2.f32 %v9892_v24  ;;  %v18630_v2 = vpop.eup %18629  ;;  %v9534_v4 = vsub.f32 %v27582_v43, %v24940_v45  ;;  %v9902_v50 = vmul.f32 1.442695, %v9523_v53  ;;  %v25025_v7 = vrot.slane %v8184_v16, %v19159_v57 }
 0x666   : > { %27581 = vst [vmem:[#allocation166_spill] sm:$0xff] %v25020_v13  ;;  %18639 = vpow2.f32 %v9894_v42  ;;  %v18632_v5 = vpop.eup %18631  ;;  %v12123_v38 = vcombine.low %v18628_v36, %v18630_v2  ;;  %v25028_v23 = vrot.slane %v12122_v8, %v19159_v57  ;;  %v9904_v58 = vmul.f32 1.442695, %v9524_v25 }
 0x667   : > { %18641 = vpow2.f32 %v9896_v3  ;;  %v18634_v63 = vpop.eup %18633  ;;  %v25031_v22 = vrot.slane %v12121_v33, %v19159_v57  ;;  %v9906_v46 = vmul.f32 1.442695, %v9525_v48  ;;  %v9908_v17 = vmul.f32 1.442695, %v9526_v29  ;;  %v27588_v33 = vld [vmem:[#allocation185_spill] sm:$0xff] }
 0x668   : > { %27583 = vst [vmem:[#allocation190_spill] sm:$0xff] %v25028_v23  ;;  %18643 = vpow2.f32 %v9898_v54  ;;  %v12124_v45 = vcombine.low %v18632_v5, %v18634_v63  ;;  %v9910_v53 = vmul.f32 1.442695, %v9527_v31  ;;  %v9912_v19 = vmul.f32 1.442695, %v9528_v18 }
 0x669   : > { %27584 = vst [vmem:[#allocation200_spill] sm:$0xff] %v25031_v22  ;;  %18645 = vpow2.f32 %v9900_v1  ;;  %v25034_v16 = vrot.slane %v12123_v38, %v19159_v57  ;;  %v9914_v3 = vmul.f32 1.442695, %v9529_v6  ;;  %v9916_v26 = vmul.f32 1.442695, %v9530_v27 }
 0x66a   : > { %18647 = vpow2.f32 %v9902_v50  ;;  %v25038_v25 = vpop.eup %18635  ;;  %v9918_v24 = vmul.f32 1.442695, %v9531_v61  ;;  %v9920_v49 = vmul.f32 1.442695, %v9532_v14  ;;  %v25041_v29 = vrot.slane %v12124_v45, %v19159_v57 }
 0x66b   : > { %27585 = vst [vmem:[#allocation201_spill] sm:$0xff] %v25034_v16  ;;  %27586 = vst [vmem:[#allocation202_spill] sm:$0xff] %v25038_v25  ;;  %18649 = vpow2.f32 %v9904_v58  ;;  %v14296_v31 = vcombine.high %v24966_v41, %v24966_v41  ;;  %v14303_v48 = vrot.slane %v24966_v41, %v19159_v57  ;;  %v9922_v18 = vmul.f32 1.442695, %v9533_v28  ;;  %v27608_v16 = vld [vmem:[#allocation41_spill] sm:$0xff] }
 0x66c   : > { %27587 = vst [vmem:[#allocation203_spill] sm:$0xff] %v25041_v29  ;;  %18651 = vpow2.f32 %v9906_v46  ;;  %v4954_v6 = vcombine.high %v27588_v33, %v27588_v33  ;;  %v4961_v27 = vrot.slane %v27588_v33, %v19159_v57  ;;  %v9924_v61 = vmul.f32 1.442695, %v9534_v4 }
 0x66d   : > { %18653 = vpow2.f32 %v9908_v17  ;;  %v14310_v14 = vrot.slane %v14296_v31, %v19159_v57  ;;  %v14311_v42 = vcombine.high %v14303_v48, %v14303_v48  ;;  %v8199_v54 = vcombine.low %v24975_v34, %v25025_v7 }
 0x66e   : > { %18655 = vpow2.f32 %v9910_v53  ;;  %v14319_v36 = vrot.slane %v14303_v48, %v19159_v57  ;;  %v4968_v8 = vrot.slane %v4954_v6, %v19159_v57  ;;  %v4969_v50 = vcombine.high %v4961_v27, %v4961_v27 }
 0x66f   : > { %18657 = vpow2.f32 %v9912_v19  ;;  %v14312_v28 = vcombine.high %v14310_v14, %v14310_v14  ;;  %v14326_v1 = vrot.slane %v14310_v14, %v19159_v57  ;;  %v14333_v2 = vrot.slane %v14311_v42, %v19159_v57 }
 0x670   : > { %18659 = vpow2.f32 %v9914_v3  ;;  %v14341_v43 = vcombine.high %v14319_v36, %v14319_v36  ;;  %v14935_v4 = vmul.f32 %v14319_v36, %v24712_v51  ;;  %v4970_v45 = vcombine.high %v4968_v8, %v4968_v8 }
 0x671   : > { %18661 = vpow2.f32 %v9916_v26  ;;  %v14340_v34 = vrot.slane %v14312_v28, %v19159_v57  ;;  %v14342_v7 = vcombine.high %v14326_v1, %v14326_v1  ;;  %v14343_v38 = vcombine.high %v14333_v2, %v14333_v2 }
 0x672   : > { %v25059_v5 = vpop.eup %18637  ;;  %18663 = vpow2.f32 %v9918_v24  ;;  %v14936_v63 = vmul.f32 %v14333_v2, %v24876_v10  ;;  %v14937_v46 = vmul.f32 %v14341_v43, %v24883_v37  ;;  %v14939_v17 = vmul.f32 %v14326_v1, %v24901_v59 }
 0x673   : > { %27589 = vst [vmem:[#allocation185_spill] sm:$0xff] %v25059_v5  ;;  %v25062_v58 = vpop.eup %18639  ;;  %18665 = vpow2.f32 %v9922_v18  ;;  %v14344_v19 = vcombine.high %v14340_v34, %v14340_v34  ;;  %v14938_v3 = vmul.f32 %v14343_v38, %v24893_v15  ;;  %v14940_v26 = vmul.f32 %v14340_v34, %v24880_v40 }
 0x674   : > { %27590 = vst [vmem:[#allocation204_spill] sm:$0xff] %v25062_v58  ;;  %v18642_v53 = vpop.eup %18641  ;;  %v14941_v48 = vmul.f32 %v14342_v7, %v24889_v62  ;;  %v16904_v33 = vcombine.low %v14935_v4, %v14936_v63  ;;  %v25073_v6 = vrot.slane %v4961_v27, %v19159_v57  ;;  %18667 = vpow2.f32 %v9920_v49  ;;  %v27624_v58 = vld [vmem:[#allocation36_spill] sm:$0xff] }
 0x675   : > { %v18644_v24 = vpop.eup %18643  ;;  %v14942_v18 = vmul.f32 %v14344_v19, %v24897_v11  ;;  %v16905_v42 = vcombine.low %v14937_v46, %v14938_v3  ;;  %v16906_v36 = vcombine.low %v14939_v17, %v14940_v26  ;;  %v25081_v1 = vsel %vm732_vm2, %v8199_v54, -inf  ;;  %v27625_v11 = vld [vmem:[#allocation10_spill] sm:$0xff] }
 0x676   : > { %v25075_v14 = vpop.eup %18645  ;;  %v25084_v2 = vrot.slane %v4968_v8, %v19159_v57  ;;  %v25087_v43 = vrot.slane %v4969_v50, %v19159_v57  ;;  %v25090_v27 = vrot.slane %v4970_v45, %v19159_v57  ;;  %v16914_v34 = vrot.slane %v16904_v33, %v19159_v57 }
 0x677   : > { %27591 = vst [vmem:[#allocation205_spill] sm:$0xff] %v25075_v14  ;;  %v25078_v28 = vpop.eup %18647  ;;  %v16907_v49 = vcombine.low %v14941_v48, %v14942_v18  ;;  %v16921_v7 = vrot.slane %v16905_v42, %v19159_v57  ;;  %v16928_v38 = vrot.slane %v16906_v36, %v19159_v57  ;;  %18669 = vpow2.f32 %v9924_v61  ;;  %v27593_v61 = vld [vmem:[#allocation28_spill] sm:$0xff] }
 0x678   : > { %27592 = vst [vmem:[#allocation206_spill] sm:$0xff] %v25078_v28  ;;  %v18650_v4 = vpop.eup %18649  ;;  %v25097_v54 = vcombine.high %v25073_v6, %v25073_v6  ;;  %v25101_v8 = vcombine.high %v25084_v2, %v25084_v2  ;;  %v25105_v50 = vcombine.high %v25087_v43, %v25087_v43  ;;  %v11177_v17 = vcombine.low %v18642_v53, %v18644_v24 }
 0x679   : > { %v18652_v63 = vpop.eup %18651  ;;  %v16935_v45 = vrot.slane %v16907_v49, %v19159_v57  ;;  %v25110_v19 = vcombine.high %v25090_v27, %v25090_v27  ;;  %vm6348_vm5 = vcmp.eq.s32.totalorder %v27572_v20, %v27593_v61  ;;  %v7255_v48 = vcombine.low %v24944_v0, %v25073_v6 }
 0x67a   : > { %v18654_v46 = vpop.eup %18653  ;;  %v11179_v26 = vcombine.low %v18650_v4, %v18652_v63  ;;  %v7256_v33 = vcombine.low %v25087_v43, %v25097_v54  ;;  %v7257_v53 = vcombine.low %v25105_v50, %v25084_v2  ;;  %v16936_v42 = vcombine.low %v16914_v34, %v16921_v7  ;;  %v27597_v7 = vld [vmem:[#allocation32_spill] sm:$0xff] }
 0x67b   : > { %v18656_v3 = vpop.eup %18655  ;;  %v16937_v36 = vcombine.low %v16928_v38, %v16935_v45  ;;  %v25121_v49 = vsel %vm6348_vm5, 1.0, %v27298_v9  ;;  %v7258_v20 = vcombine.low %v25090_v27, %v25101_v8  ;;  %v7265_v4 = vrot.slane %v7255_v48, %v19159_v57 }
 0x67c   : > { %v18658_v24 = vpop.eup %18657  ;;  %v11225_v18 = vcombine.low %v18654_v46, %v18656_v3  ;;  %27594 = vst [vmem:[#allocation28_spill] sm:$0xff] %v25121_v49  ;;  %v7272_v63 = vrot.slane %v7256_v33, %v19159_v57  ;;  %v7279_v61 = vrot.slane %v7257_v53, %v19159_v57  ;;  %v25129_v41 = vrot.slane %v11177_v17, %v19159_v57 }
 0x67d   : > { %v18660_v31 = vpop.eup %18659  ;;  %v25132_v34 = vrot.slane %v16937_v36, %v19159_v57  ;;  %v7304_v38 = vcombine.low %v25110_v19, %v27597_v7  ;;  %v7286_v3 = vrot.slane %v7258_v20, %v19159_v57  ;;  %v13400_v48 = vcombine.high %v25121_v49, %v25121_v49 }
 0x67e   : > { %v18662_v32 = vpop.eup %18661  ;;  %27595 = vst [vmem:[#allocation207_spill] sm:$0xff] %v25129_v41  ;;  %v11226_v46 = vcombine.low %v18658_v24, %v18660_v31  ;;  %v7287_v52 = vcombine.low %v7265_v4, %v7272_v63  ;;  %v13407_v33 = vrot.slane %v25121_v49, %v19159_v57  ;;  %v25142_v17 = vrot.slane %v11179_v26, %v19159_v57 }
 0x67f   : > { %27596 = vst [vmem:[#allocation208_spill] sm:$0xff] %v25132_v34  ;;  %v18664_v45 = vpop.eup %18663  ;;  %v25145_v53 = vrot.slane %v16936_v42, %v19159_v57  ;;  %v7314_v24 = vrot.slane %v7304_v38, %v19159_v57  ;;  %v25149_v47 = vrot.slane %v11225_v18, %v19159_v57  ;;  %v7288_v20 = vcombine.low %v7279_v61, %v7286_v3  ;;  %v27602_v42 = vld [vmem:[#allocation26_spill] sm:$0xff] }
 0x680   : > { %27598 = vst [vmem:[#allocation32_spill] sm:$0xff] %v25142_v17  ;;  %v11227_v31 = vcombine.low %v18662_v32, %v18664_v45  ;;  %v18666_v36 = vpop.eup %18665  ;;  %v13414_v4 = vrot.slane %v13400_v48, %v19159_v57  ;;  %v13415_v63 = vcombine.high %v13407_v33, %v13407_v33  ;;  %v25153_v60 = vrot.slane %v11226_v46, %v19159_v57  ;;  %v27623_v17 = vld [vmem:[#allocation34_spill] sm:$0xff] }
 0x681   : > { %27599 = vst [vmem:[#allocation209_spill] sm:$0xff] %v25145_v53  ;;  %27600 = vst [vmem:[#allocation210_spill] sm:$0xff] %v25149_v47  ;;  %v7295_v32 = vrot.slane %v7287_v52, %v19159_v57  ;;  %v7336_v45 = vcombine.low %v7314_v24, %v27602_v42  ;;  %v18668_v49 = vpop.eup %18667  ;;  %v7302_v38 = vrot.slane %v7288_v20, %v19159_v57  ;;  %v27605_v20 = vld [vmem:[#allocation40_spill] sm:$0xff]  ;;  %v27622_v47 = vld [vmem:[#allocation35_spill] sm:$0xff] }
 0x682   : > { %27601 = vst [vmem:[#allocation211_spill] sm:$0xff] %v25153_v60  ;;  %v13416_v44 = vcombine.high %v13414_v4, %v13414_v4  ;;  %v13423_v18 = vrot.slane %v13407_v33, %v19159_v57  ;;  %v13430_v61 = vrot.slane %v13414_v4, %v19159_v57  ;;  %v11228_v3 = vcombine.low %v18668_v49, %v18666_v36  ;;  %v27606_v49 = vld [vmem:[#allocation24_spill] sm:$0xff] }
 0x683   : > { %v25163_v48 = vrot.slane %v11227_v31, %v19159_v57  ;;  %v7344_v46 = vrot.slane %v7336_v45, %v19159_v57  ;;  %v13437_v26 = vrot.slane %v13415_v63, %v19159_v57  ;;  %v7303_v34 = vcombine.low %v7295_v32, %v7302_v38 }
 0x684   : > { %v13444_v52 = vrot.slane %v13416_v44, %v19159_v57  ;;  %v13445_v24 = vcombine.high %v13423_v18, %v13423_v18  ;;  %v13446_v42 = vcombine.high %v13430_v61, %v13430_v61  ;;  %v25168_v53 = vpop.eup %18669  ;;  %v14799_v4 = vmul.f32 %v13423_v18, %v24944_v0 }
 0x685   : > { %27603 = vst [vmem:[#allocation26_spill] sm:$0xff] %v25163_v48  ;;  %27604 = vst [vmem:[#allocation212_spill] sm:$0xff] %v25168_v53  ;;  %v7352_v13 = vcombine.low %v7344_v46, %v27605_v20  ;;  %v13447_v33 = vcombine.high %v13437_v26, %v13437_v26  ;;  %v14807_v31 = vmul.f32 %v27606_v49, %v25110_v19  ;;  %v8389_v36 = vsel %vm732_vm2, %v7303_v34, -inf  ;;  %v27620_v53 = vld [vmem:[#allocation16_spill] sm:$0xff] }
 0x686   : > { %v13448_v45 = vcombine.high %v13444_v52, %v13444_v52  ;;  %v14800_v63 = vmul.f32 %v13437_v26, %v25073_v6  ;;  %v14801_v32 = vmul.f32 %v13445_v24, %v25087_v43  ;;  %v14803_v56 = vmul.f32 %v13430_v61, %v25105_v50  ;;  %v27607_v24 = vld [vmem:[#allocation159_spill] sm:$0xff] }
 0x687   : > { %v8390_v44 = vsel %vm732_vm2, %v7352_v13, -inf  ;;  %v14802_v38 = vmul.f32 %v13447_v33, %v25097_v54  ;;  %v14804_v46 = vmul.f32 %v13444_v52, %v25084_v2  ;;  %v14805_v18 = vmul.f32 %v13446_v42, %v25090_v27 }
 0x688   : > { %v8391_v20 = vmax.f32 %v8389_v36, %v8390_v44  ;;  %v14806_v49 = vmul.f32 %v13448_v45, %v25101_v8  ;;  %v16008_v25 = vcombine.low %v14799_v4, %v14800_v63  ;;  %v5836_v13 = vcombine.high %v27607_v24, %v27607_v24  ;;  %v27609_v36 = vld [vmem:[#allocation19_spill] sm:$0xff] }
 0x689   : > { %v16009_v26 = vcombine.low %v14801_v32, %v14802_v38  ;;  %v16010_v29 = vcombine.low %v14803_v56, %v14804_v46  ;;  %v5843_v52 = vrot.slane %v27607_v24, %v19159_v57  ;;  %v16057_v45 = vcombine.low %v14807_v31, %v27609_v36  ;;  %v27612_v24 = vld [vmem:[#allocation14_spill] sm:$0xff] }
 0x68a   : > { %v8393_v33 = vmax.f32 %v8391_v20, %v27608_v16  ;;  %v16011_v23 = vcombine.low %v14805_v18, %v14806_v49  ;;  %v16018_v61 = vrot.slane %v16008_v25, %v19159_v57  ;;  %v5850_v63 = vrot.slane %v5836_v13, %v19159_v57 }
 0x68b   : > { %v16025_v42 = vrot.slane %v16009_v26, %v19159_v57  ;;  %v16032_v4 = vrot.slane %v16010_v29, %v19159_v57  ;;  %v5851_v44 = vcombine.high %v5843_v52, %v5843_v52  ;;  %v25197_v16 = vrot.slane %v5843_v52, %v19159_v57 }
 0x68c   : > { %v8394_v56 = vrot.slane %v8393_v33, 4  ;;  %v16039_v32 = vrot.slane %v16011_v23, %v19159_v57  ;;  %v25200_v25 = vrot.slane %v11228_v3, %v19159_v57  ;;  %v5852_v46 = vcombine.high %v5850_v63, %v5850_v63 }
 0x68d   : > { %v16040_v38 = vcombine.low %v16018_v61, %v16025_v42  ;;  %v25203_v20 = vrot.slane %v5850_v63, %v19159_v57  ;;  %v25206_v31 = vrot.slane %v5851_v44, %v19159_v57  ;;  %v25210_v23 = vcombine.high %v25197_v16, %v25197_v16 }
 0x68e   : > { %27610 = vst [vmem:[#allocation40_spill] sm:$0xff] %v25200_v25  ;;  %v8395_v29 = vmax.f32 %v8393_v33, %v8394_v56  ;;  %v16041_v18 = vcombine.low %v16032_v4, %v16039_v32  ;;  %v25213_v49 = vrot.slane %v16057_v45, %v19159_v57  ;;  %v25216_v3 = vrot.slane %v5852_v46, %v19159_v57  ;;  %v27615_v4 = vld [vmem:[#allocation22_spill] sm:$0xff] }
 0x68f   : > { %v25220_v26 = vcombine.high %v25203_v20, %v25203_v20  ;;  %vm6373_vm6 = vcmp.eq.s32.totalorder %v27612_v24, %v24918_v35  ;;  %v25225_v33 = vrot.slane %v16040_v38, %v19159_v57  ;;  %v25232_v52 = vcombine.high %v25206_v31, %v25206_v31 }
 0x690   : > { %27611 = vst [vmem:[#allocation24_spill] sm:$0xff] %v25213_v49  ;;  %v8396_v13 = vrot.slane %v8395_v29, 2  ;;  %v25228_v61 = vrot.slane %v16041_v18, %v19159_v57  ;;  %v25236_v42 = vcombine.high %v25216_v3, %v25216_v3  ;;  %vm6374_vm7 = vcmp.eq.s32.totalorder %v27615_v4, %v24918_v35 }
 0x691   : > { %27613 = vst [vmem:[#allocation159_spill] sm:$0xff] %v25225_v33  ;;  %v25241_v36 = vsel %vm6373_vm6, 1.0, %v27298_v9  ;;  %v8200_v45 = vcombine.low %v24954_v12, %v25197_v16  ;;  %v8201_v32 = vcombine.low %v25206_v31, %v25210_v23  ;;  %v8202_v44 = vcombine.low %v25232_v52, %v25203_v20 }
 0x692   : > { %27614 = vst [vmem:[#allocation41_spill] sm:$0xff] %v25228_v61  ;;  %27616 = vst [vmem:[#allocation19_spill] sm:$0xff] %v25241_v36  ;;  %v8397_v63 = vmax.f32 %v8395_v29, %v8396_v13  ;;  %v8203_v38 = vcombine.low %v25216_v3, %v25220_v26  ;;  %v8255_v18 = vrot.slane %v25236_v42, %v19159_v57 }
 0x693   : > { %v8210_v46 = vrot.slane %v8200_v45, %v19159_v57  ;;  %v14345_v29 = vcombine.high %v25241_v36, %v25241_v36  ;;  %v8217_v13 = vrot.slane %v8201_v32, %v19159_v57  ;;  %v8224_v56 = vrot.slane %v8202_v44, %v19159_v57 }
 0x694   : > { %v8398_v24 = vrot.slane %v8397_v63, 1  ;;  %v14352_v34 = vrot.slane %v25241_v36, %v19159_v57  ;;  %v25268_v45 = vsel %vm6374_vm7, 1.0, %v27298_v9  ;;  %v8231_v33 = vrot.slane %v8203_v38, %v19159_v57 }
 0x695   : > { %27617 = vst [vmem:[#allocation14_spill] sm:$0xff] %v25268_v45  ;;  %v14359_v22 = vrot.slane %v14345_v29, %v19159_v57  ;;  %v8232_v32 = vcombine.low %v8210_v46, %v8217_v13  ;;  %v8262_v44 = vrot.slane %v8255_v18, %v19159_v57 }
 0x696   : > { %v25272_v39 = vmax.f32 %v8397_v63, %v8398_v24  ;;  %v14360_v55 = vcombine.high %v14352_v34, %v14352_v34  ;;  %v8233_v36 = vcombine.low %v8224_v56, %v8231_v33  ;;  %v25276_v61 = vrot.slane %v14352_v34, %v19159_v57 }
 0x697   : > { %v14361_v30 = vcombine.high %v14359_v22, %v14359_v22  ;;  %v25279_v21 = vrot.slane %v14359_v22, %v19159_v57  ;;  %v8240_v33 = vrot.slane %v8232_v32, %v19159_v57  ;;  %v14400_v22 = vrot.slane %v25268_v45, %v19159_v57 }
 0x698   : > { %27618 = vst [vmem:[#allocation22_spill] sm:$0xff] %v25272_v39  ;;  %v8847_v35 = vcombine.high %v25272_v39, %v25272_v39  ;;  %v8854_v4 = vrot.slane %v25272_v39, %v19159_v57  ;;  %v25288_v46 = vrot.slane %v14360_v55, %v19159_v57  ;;  %v8247_v34 = vrot.slane %v8233_v36, %v19159_v57 }
 0x699   : > { %v25293_v56 = vrot.slane %v14361_v30, %v19159_v57  ;;  %v8480_v13 = vsel %vm8314_vm10, %v8262_v44, -inf  ;;  %v14390_v32 = vcombine.high %v25276_v61, %v25276_v61  ;;  %v14391_v36 = vcombine.high %v25279_v21, %v25279_v21 }
 0x69a   : > { %v8861_v18 = vrot.slane %v8847_v35, %v19159_v57  ;;  %v8862_v29 = vcombine.high %v8854_v4, %v8854_v4  ;;  %v25299_v24 = vrot.slane %v8854_v4, %v19159_v57  ;;  %v8248_v55 = vcombine.low %v8240_v33, %v8247_v34 }
 0x69b   : > { %v14392_v30 = vcombine.high %v25288_v46, %v25288_v46  ;;  %v14393_v33 = vcombine.high %v25293_v56, %v25293_v56  ;;  %v25317_v34 = vrot.slane %v14400_v22, %v19159_v57  ;;  %v25321_v45 = vmul.f32 %v25276_v61, %v24954_v12 }
 0x69c   : > { %v8863_v38 = vcombine.high %v8861_v18, %v8861_v18  ;;  %v8877_v9 = vrot.slane %v8861_v18, %v19159_v57  ;;  %v8884_v35 = vrot.slane %v8862_v29, %v19159_v57  ;;  %v8892_v4 = vcombine.high %v25299_v24, %v25299_v24 }
 0x69d   : > { %v9535_v44 = vsub.f32 %v24944_v0, %v25299_v24  ;;  %v9543_v0 = vsub.f32 %v25110_v19, %v25299_v24  ;;  %v8478_v22 = vsel %vm732_vm2, %v8248_v55, -inf }
 0x69e   : > { %v8891_v18 = vrot.slane %v8863_v38, %v19159_v57  ;;  %v8893_v39 = vcombine.high %v8877_v9, %v8877_v9  ;;  %v8894_v29 = vcombine.high %v8884_v35, %v8884_v35  ;;  %v9536_v63 = vsub.f32 %v25073_v6, %v8884_v35 }
 0x69f   : > { %v9537_v49 = vsub.f32 %v25087_v43, %v8892_v4  ;;  %v9539_v25 = vsub.f32 %v25105_v50, %v8877_v9  ;;  %v9544_v38 = vsub.f32 %v27597_v7, %v8884_v35  ;;  %v27621_v43 = vld [vmem:[#allocation15_spill] sm:$0xff]  ;;  %v9547_v28 = vsub.f32 %v27623_v17, %v8877_v9  ;;  %v27626_v35 = vld [vmem:[#allocation25_spill] sm:$0xff] }
 0x6a0   : > { %v8895_v41 = vcombine.high %v8891_v18, %v8891_v18  ;;  %v9538_v61 = vsub.f32 %v25097_v54, %v8894_v29  ;;  %v9540_v48 = vsub.f32 %v25084_v2, %v8891_v18  ;;  %v9541_v6 = vsub.f32 %v25090_v27, %v8893_v39 }
 0x6a1   : > { %v9545_v60 = vsub.f32 %v27621_v43, %v8892_v4  ;;  %v9546_v19 = vsub.f32 %v27622_v47, %v8894_v29  ;;  %v9926_v55 = vmul.f32 1.442695, %v9535_v44  ;;  %v9928_v5 = vmul.f32 1.442695, %v9536_v63 }
 0x6a2   : > { %v9542_v14 = vsub.f32 %v25101_v8, %v8895_v41  ;;  %v9548_v54 = vsub.f32 %v27624_v58, %v8891_v18  ;;  %v9549_v50 = vsub.f32 %v27625_v11, %v8893_v39  ;;  %v9930_v62 = vmul.f32 1.442695, %v9537_v49 }
 0x6a3   : > { %v9932_v7 = vmul.f32 1.442695, %v9538_v61  ;;  %v9550_v2 = vsub.f32 %v27626_v35, %v8895_v41  ;;  %18671 = vpow2.f32 %v9926_v55  ;;  %v9934_v27 = vmul.f32 1.442695, %v9539_v25 }
 0x6a4   : > { %v8479_v4 = vmax.f32 %v25081_v1, %v8478_v22  ;;  %18673 = vpow2.f32 %v9928_v5  ;;  %v9936_v47 = vmul.f32 1.442695, %v9540_v48  ;;  %v9938_v29 = vmul.f32 1.442695, %v9541_v6  ;;  %v6160_v22 = vld [vmem:[%s25360_s17 + $0x8] sm:$0xff] }
 0x6a5   : > { %v9940_v8 = vmul.f32 1.442695, %v9542_v14  ;;  %18675 = vpow2.f32 %v9930_v62  ;;  %v9942_v9 = vmul.f32 1.442695, %v9543_v0  ;;  %v9944_v17 = vmul.f32 1.442695, %v9544_v38 }
 0x6a6   : > { %v9946_v63 = vmul.f32 1.442695, %v9545_v60  ;;  %18677 = vpow2.f32 %v9932_v7  ;;  %v9948_v58 = vmul.f32 1.442695, %v9546_v19  ;;  %v9950_v44 = vmul.f32 1.442695, %v9547_v28 }
 0x6a7   : > { %v9952_v11 = vmul.f32 1.442695, %v9548_v54  ;;  %18679 = vpow2.f32 %v9934_v27  ;;  %v8481_v39 = vmax.f32 %v8479_v4, %v8480_v13  ;;  %v14944_v41 = vmul.f32 %v25288_v46, %v25197_v16  ;;  %v6159_v0 = vld [vmem:[%s25360_s17] sm:$0xff]  ;;  %v27629_v27 = vld [vmem:[#allocation51_spill] sm:$0xff]  ;;  %v27630_v4 = vld [vmem:[#allocation46_spill] sm:$0xff] }
 0x6a8   : > { %v14945_v1 = vmul.f32 %v14390_v32, %v25206_v31  ;;  %18681 = vpow2.f32 %v9936_v47  ;;  %v14946_v5 = vmul.f32 %v14392_v30, %v25210_v23  ;;  %v14947_v62 = vmul.f32 %v25279_v21, %v25232_v52 }
 0x6a9   : > { %v14948_v60 = vmul.f32 %v25293_v56, %v25203_v20  ;;  %18683 = vpow2.f32 %v9938_v29  ;;  %v8482_v14 = vrot.slane %v8481_v39, 4  ;;  %v14949_v28 = vmul.f32 %v14391_v36, %v25216_v3 }
 0x6aa   : > { %v14950_v48 = vmul.f32 %v14393_v33, %v25220_v26  ;;  %18685 = vpow2.f32 %v9940_v8  ;;  %v9954_v25 = vmul.f32 1.442695, %v9549_v50  ;;  %v16953_v49 = vcombine.low %v25321_v45, %v14944_v41 }
 0x6ab   : > { %v16954_v46 = vcombine.low %v14945_v1, %v14946_v5  ;;  %18687 = vpow2.f32 %v9942_v9  ;;  %v8483_v21 = vmax.f32 %v8481_v39, %v8482_v14  ;;  %v16955_v56 = vcombine.low %v14947_v62, %v14948_v60  ;;  %v27637_v5 = vld [vmem:[#allocation124_spill] sm:$0xff]  ;;  %v27638_v62 = vld [vmem:[#allocation123_spill] sm:$0xff] }
 0x6ac   : > { %v16956_v13 = vcombine.low %v14949_v28, %v14950_v48  ;;  %18689 = vpow2.f32 %v9944_v17  ;;  %v9956_v32 = vmul.f32 1.442695, %v9550_v2  ;;  %v16963_v36 = vrot.slane %v16953_v49, %v19159_v57  ;;  %v27633_v17 = vld [vmem:[#allocation45_spill] sm:$0xff]  ;;  %v27687_v49 = vld [vmem:[#allocation111_spill] sm:$0xff] }
 0x6ad   : > { %v16970_v30 = vrot.slane %v16954_v46, %v19159_v57  ;;  %18691 = vpow2.f32 %v9946_v63  ;;  %v8484_v45 = vrot.slane %v8483_v21, 2  ;;  %v16977_v33 = vrot.slane %v16955_v56, %v19159_v57 }
 0x6ae   : > { %v16984_v18 = vrot.slane %v16956_v13, %v19159_v57  ;;  %18693 = vpow2.f32 %v9948_v58  ;;  %v17661_v38 = vsel %vm732_vm2, %v6159_v0, 0.0  ;;  %v17662_v6 = vsel %vm732_vm2, %v6160_v22, 0.0 }
 0x6af   : > { %v16985_v61 = vcombine.low %v16963_v36, %v16970_v30  ;;  %v8485_v43 = vmax.f32 %v8483_v21, %v8484_v45  ;;  %v25372_v19 = vmul.f32 %v25317_v34, %v25236_v42  ;;  %v17663_v54 = vadd.f32 %v17662_v6, %v17661_v38  ;;  %v27632_v34 = vld [vmem:[#allocation49_spill] sm:$0xff]  ;;  %v27641_v45 = vld [vmem:[#allocation128_spill] sm:$0xff] }
 0x6b0   : > { %v16986_v55 = vcombine.low %v16977_v33, %v16984_v18  ;;  %v18672_v50 = vpop.eup %18671  ;;  %18695 = vpow2.f32 %v9950_v44  ;;  %v27627_v7 = vsub.f32 %v27620_v53, %v25299_v24  ;;  %v10617_v47 = vcombine.low %v27630_v4, %v27629_v27  ;;  %v27635_v44 = vld [vmem:[#allocation122_spill] sm:$0xff]  ;;  %v27636_v53 = vld [vmem:[#allocation120_spill] sm:$0xff]  ;;  %v27640_v30 = vld [vmem:[#allocation129_spill] sm:$0xff] }
 0x6b1   : > { %v25378_v2 = vrot.slane %v16985_v61, %v19159_v57  ;;  %v18674_v29 = vpop.eup %18673  ;;  %v8486_v8 = vrot.slane %v8485_v43, 1  ;;  %17664 = vadd.xlane.f32.xlu0 %v17663_v54  ;;  %v27634_v63 = vcombine.low %v27632_v34, %v27633_v17  ;;  %v10840_v24 = vcombine.low %v27636_v53, %v27635_v44  ;;  %v27642_v54 = vld [vmem:[#allocation93_spill] sm:$0xff] }
 0x6b2   : > { %v9958_v35 = vmul.f32 1.442695, %v27627_v7  ;;  %v25383_v9 = vrot.slane %v16986_v55, %v19159_v57  ;;  %v18676_v39 = vpop.eup %18675  ;;  %18697 = vpow2.f32 %v9956_v32  ;;  %v11288_v41 = vcombine.low %v18672_v50, %v18674_v29  ;;  %v27643_v50 = vld [vmem:[#allocation116_spill] sm:$0xff] }
 0x6b3   : > { %27628 = vst [vmem:[#allocation16_spill] sm:$0xff] %v25378_v2  ;;  %v10626_v58 = vrot.slane %v27634_v63, %v19159_v57  ;;  %v10633_v1 = vrot.slane %v10617_v47, %v19159_v57  ;;  %v10841_v60 = vcombine.low %v27638_v62, %v27637_v5  ;;  %v18678_v14 = vpop.eup %18677  ;;  %18699 = vpow2.f32 %v9954_v25  ;;  %v27738_v2 = vld [vmem:[#allocation102_spill] sm:$0xff] }
 0x6b4   : > { %27631 = vst [vmem:[#allocation15_spill] sm:$0xff] %v25383_v9  ;;  %v25394_v28 = vmax.f32 %v8485_v43, %v8486_v8  ;;  %v18680_v46 = vpop.eup %18679  ;;  %18701 = vpow2.f32 %v9952_v11  ;;  %v11289_v21 = vcombine.low %v18676_v39, %v18678_v14  ;;  %v10952_v33 = vcombine.low %v27641_v45, %v27640_v30 }
 0x6b5   : > { %v10648_v56 = vcombine.low %v10626_v58, %v10633_v1  ;;  %v25401_v13 = vrot.slane %v10841_v60, %v19159_v57  ;;  %v18682_v32 = vpop.eup %18681  ;;  %18703 = vpow2.f32 %v9958_v35  ;;  %v25410_v11 = vrot.slane %v11288_v41, %v19159_v57  ;;  %v27644_v41 = vld [vmem:[#allocation7_spill] sm:$0xff]  ;;  %v27716_v1 = vld [vmem:[#allocation201_spill] sm:$0xff] }
 0x6b6   : > { %27639 = vst [vmem:[#allocation35_spill] sm:$0xff] %v25394_v28  ;;  %v9239_v25 = vcombine.high %v25394_v28, %v25394_v28  ;;  %v9246_v36 = vrot.slane %v25394_v28, %v19159_v57  ;;  %v18684_v18 = vpop.eup %18683  ;;  %v11290_v0 = vcombine.low %v18680_v46, %v18682_v32  ;;  %v25413_v22 = vrot.slane %v11289_v21, %v19159_v57 }
 0x6b7   : > { %v25416_v61 = vrot.slane %v10840_v24, %v19159_v57  ;;  %v18686_v38 = vpop.eup %18685  ;;  %v10953_v7 = vcombine.low %v27643_v50, %v27642_v54  ;;  %v25427_v4 = vrot.slane %v10648_v56, %v19159_v57  ;;  %v25432_v29 = vrot.slane %v10952_v33, %v19159_v57  ;;  %v27656_v50 = vld [vmem:[#allocation140_spill] sm:$0xff] }
 0x6b8   : > { %v9253_v6 = vrot.slane %v9239_v25, %v19159_v57  ;;  %v9254_v43 = vcombine.high %v9246_v36, %v9246_v36  ;;  %v25420_v55 = vrot.slane %v9246_v36, %v19159_v57  ;;  %v25424_v35 = vpop.eup %18687  ;;  %v11291_v27 = vcombine.low %v18684_v18, %v18686_v38  ;;  %v27646_v38 = vld [vmem:[#allocation194_spill] sm:$0xff] }
 0x6b9   : > { %v10872_v47 = vcombine.low %v25416_v61, %v25401_v13  ;;  %v25434_v8 = vpop.eup %18689  ;;  %v25441_v53 = vrot.slane %v11290_v0, %v19159_v57  ;;  %v11320_v39 = vcombine.low %v25410_v11, %v25413_v22  ;;  %v27645_v0 = vld [vmem:[#allocation163_spill] sm:$0xff] }
 0x6ba   : > { %v9255_v34 = vcombine.high %v9253_v6, %v9253_v6  ;;  %v9269_v17 = vrot.slane %v9253_v6, %v19159_v57  ;;  %v9276_v63 = vrot.slane %v9254_v43, %v19159_v57  ;;  %v9284_v58 = vcombine.high %v25420_v55, %v25420_v55  ;;  %v18692_v44 = vpop.eup %18691 }
 0x6bb   : > { %v25444_v24 = vrot.slane %v11291_v27, %v19159_v57  ;;  %v18694_v5 = vpop.eup %18693  ;;  %v11337_v62 = vcombine.low %v25424_v35, %v25434_v8  ;;  %v9671_v56 = vsub.f32 %v24712_v51, %v25420_v55  ;;  %v9679_v32 = vsub.f32 %v24954_v12, %v25420_v55  ;;  %v27680_v35 = vld [vmem:[#allocation67_spill] sm:$0xff]  ;;  %v27681_v8 = vld [vmem:[#allocation70_spill] sm:$0xff] }
 0x6bc   : > { %v9283_v60 = vrot.slane %v9255_v34, %v19159_v57  ;;  %v9285_v14 = vcombine.high %v9269_v17, %v9269_v17  ;;  %v9286_v46 = vcombine.high %v9276_v63, %v9276_v63  ;;  %v11338_v21 = vcombine.low %v18692_v44, %v18694_v5 }
 0x6bd   : > { %v9672_v13 = vsub.f32 %v24876_v10, %v9276_v63  ;;  %v25458_v25 = vpop.eup %18695  ;;  %v11321_v36 = vcombine.low %v25441_v53, %v25444_v24  ;;  %v9673_v45 = vsub.f32 %v24883_v37, %v9284_v58  ;;  %v9675_v51 = vsub.f32 %v24901_v59, %v9269_v17 }
 0x6be   : > { %v9287_v30 = vcombine.high %v9283_v60, %v9283_v60  ;;  %v9674_v33 = vsub.f32 %v24893_v15, %v9286_v46  ;;  %v25465_v18 = vrot.slane %v11338_v21, %v19159_v57  ;;  %v9676_v10 = vsub.f32 %v24880_v40, %v9283_v60 }
 0x6bf   : > { %v9677_v61 = vsub.f32 %v27645_v0, %v9285_v14  ;;  %v25470_v12 = vpop.eup %18697  ;;  %v9680_v43 = vsub.f32 %v25197_v16, %v9276_v63  ;;  %v9681_v27 = vsub.f32 %v25206_v31, %v9284_v58  ;;  %v9682_v37 = vsub.f32 %v25210_v23, %v9286_v46 }
 0x6c0   : > { %v9678_v6 = vsub.f32 %v27646_v38, %v9287_v30  ;;  %v25476_v15 = vpop.eup %18699  ;;  %v9683_v34 = vsub.f32 %v25232_v52, %v9269_v17  ;;  %v9684_v59 = vsub.f32 %v25203_v20, %v9283_v60  ;;  %v9685_v40 = vsub.f32 %v25216_v3, %v9285_v14  ;;  %v27652_v38 = vld [vmem:[#allocation141_spill] sm:$0xff] }
 0x6c1   : > { %v10198_v44 = vmul.f32 1.442695, %v9671_v56  ;;  %v25481_v5 = vpop.eup %18701  ;;  %v11340_v21 = vcombine.low %v25476_v15, %v25470_v12  ;;  %v10200_v0 = vmul.f32 1.442695, %v9672_v13  ;;  %v10202_v16 = vmul.f32 1.442695, %v9673_v45 }
 0x6c2   : > { %v10204_v63 = vmul.f32 1.442695, %v9674_v33  ;;  %v25485_v31 = vpop.eup %18703  ;;  %v9686_v23 = vsub.f32 %v25220_v26, %v9287_v30  ;;  %v9687_v52 = vsub.f32 %v25236_v42, %v25420_v55  ;;  %v10206_v20 = vmul.f32 1.442695, %v9675_v51  ;;  %v27647_v55 = vld [vmem:[#allocation155_spill] sm:$0xff]  ;;  %v27688_v15 = vld [vmem:[#allocation109_spill] sm:$0xff] }
 0x6c3   : > { %18705 = vpow2.f32 %v10198_v44  ;;  %v10208_v3 = vmul.f32 1.442695, %v9676_v10  ;;  %v10210_v17 = vmul.f32 1.442695, %v9677_v61  ;;  %v25491_v58 = vrot.slane %v10872_v47, %v19159_v57  ;;  %v27648_v47 = vld [vmem:[#allocation157_spill] sm:$0xff] }
 0x6c4   : > { %18707 = vpow2.f32 %v10200_v0  ;;  %v10212_v60 = vmul.f32 1.442695, %v9678_v6  ;;  %v10214_v14 = vmul.f32 1.442695, %v9679_v32  ;;  %v10216_v46 = vmul.f32 1.442695, %v9680_v43 }
 0x6c5   : > { %18709 = vpow2.f32 %v10202_v16  ;;  %v10218_v56 = vmul.f32 1.442695, %v9681_v27  ;;  %v10220_v13 = vmul.f32 1.442695, %v9682_v37  ;;  %v10222_v45 = vmul.f32 1.442695, %v9683_v34 }
 0x6c6   : > { %18711 = vpow2.f32 %v10204_v63  ;;  %v10224_v26 = vmul.f32 1.442695, %v9684_v59  ;;  %v10226_v30 = vmul.f32 1.442695, %v9685_v40  ;;  %v10969_v42 = vrot.slane %v10953_v7, %v19159_v57  ;;  %v27650_v32 = vld [vmem:[#allocation135_spill] sm:$0xff]  ;;  %v27651_v10 = vld [vmem:[#allocation161_spill] sm:$0xff] }
 0x6c7   : > { %18713 = vpow2.f32 %v10206_v20  ;;  %v27649_v33 = vcombine.low %v27647_v55, %v27648_v47  ;;  %v11001_v61 = vcombine.low %v27651_v10, %v27650_v32  ;;  %v27653_v6 = vld [vmem:[#allocation136_spill] sm:$0xff]  ;;  %v10228_v27 = vmul.f32 1.442695, %v9686_v23  ;;  %v27655_v59 = vld [vmem:[#allocation158_spill] sm:$0xff]  ;;  %v27657_v16 = vld [vmem:[#allocation125_spill] sm:$0xff] }
 0x6c8   : > { %18715 = vpow2.f32 %v10208_v3  ;;  %v11002_v43 = vcombine.low %v27653_v6, %v27652_v38  ;;  %v10984_v37 = vcombine.low %v25432_v29, %v10969_v42  ;;  %v27654_v34 = vld [vmem:[#allocation168_spill] sm:$0xff]  ;;  %v10230_v0 = vmul.f32 1.442695, %v9687_v52  ;;  %v27658_v3 = vld [vmem:[#allocation23_spill] sm:$0xff]  ;;  %v27662_v55 = vld [vmem:[#allocation185_spill] sm:$0xff] }
 0x6c9   : > { %v10976_v51 = vrot.slane %v27649_v33, %v19159_v57  ;;  %18717 = vpow2.f32 %v10210_v17  ;;  %v11097_v54 = vcombine.low %v27655_v59, %v27654_v34  ;;  %v11011_v40 = vrot.slane %v11001_v61, %v19159_v57  ;;  %v27659_v17 = vld [vmem:[#allocation160_spill] sm:$0xff]  ;;  %v27663_v33 = vld [vmem:[#allocation206_spill] sm:$0xff]  ;;  %v27667_v6 = vld [vmem:[#allocation169_spill] sm:$0xff] }
 0x6ca   : > { %18719 = vpow2.f32 %v10212_v60  ;;  %v11018_v44 = vrot.slane %v11002_v43, %v19159_v57  ;;  %v27660_v60 = vcombine.low %v27658_v3, %v27659_v17  ;;  %v25526_v52 = vrot.slane %v10984_v37, %v19159_v57  ;;  %v27665_v10 = vld [vmem:[#allocation6_spill] sm:$0xff]  ;;  %v27709_v63 = vld [vmem:[#allocation197_spill] sm:$0xff] }
 0x6cb   : > { %v10985_v7 = vcombine.low %v10976_v51, %v27656_v50  ;;  %18721 = vpow2.f32 %v10214_v14  ;;  %v25514_v20 = vrot.slane %v11097_v54, %v19159_v57  ;;  %v27661_v14 = vld [vmem:[#allocation204_spill] sm:$0xff]  ;;  %v27664_v51 = vld [vmem:[#allocation205_spill] sm:$0xff]  ;;  %v27666_v61 = vld [vmem:[#allocation126_spill] sm:$0xff]  ;;  %v11168_v43 = vrot.slane %v27667_v6, %v19159_v57 }
 0x6cc   : > { %18723 = vpow2.f32 %v10216_v46  ;;  %v11033_v23 = vcombine.low %v11011_v40, %v11018_v44  ;;  %v25523_v42 = vrot.slane %v27660_v60, %v19159_v57  ;;  %v11176_v47 = vcombine.low %v27662_v55, %v27661_v14  ;;  %v27668_v54 = vld [vmem:[#allocation210_spill] sm:$0xff]  ;;  %v27669_v50 = vld [vmem:[#allocation211_spill] sm:$0xff]  ;;  %v27672_v44 = vld [vmem:[#allocation40_spill] sm:$0xff] }
 0x6cd   : > { %v25517_v29 = vrot.slane %v10985_v7, %v19159_v57  ;;  %18725 = vpow2.f32 %v10218_v56  ;;  %v11178_v46 = vcombine.low %v27664_v51, %v27663_v33  ;;  %v27670_v7 = vcombine.low %v27668_v54, %v27669_v50  ;;  %v27674_v14 = vld [vmem:[#allocation207_spill] sm:$0xff]  ;;  %v27675_v55 = vld [vmem:[#allocation32_spill] sm:$0xff]  ;;  %v27696_v38 = vld [vmem:[#allocation154_spill] sm:$0xff] }
 0x6ce   : > { %18727 = vpow2.f32 %v10220_v13  ;;  %v11186_v37 = vrot.slane %v11176_v47, %v19159_v57  ;;  %v25545_v13 = vrot.slane %v11033_v23, %v19159_v57  ;;  %v27676_v47 = vld [vmem:[#allocation212_spill] sm:$0xff]  ;;  %v25568_v54 = vrot.slane %v11168_v43, %v19159_v57  ;;  %v27707_v6 = vld [vmem:[#allocation21_spill] sm:$0xff]  ;;  %v27708_v56 = vld [vmem:[#allocation198_spill] sm:$0xff] }
 0x6cf   : > { %18729 = vpow2.f32 %v10222_v45  ;;  %v11200_v34 = vrot.slane %v11178_v46, %v19159_v57  ;;  %v25551_v40 = vrot.slane %v27670_v7, %v19159_v57  ;;  %v27671_v45 = vld [vmem:[#allocation26_spill] sm:$0xff]  ;;  %v11280_v33 = vrot.slane %v27676_v47, %v19159_v57  ;;  %v27677_v46 = vld [vmem:[#allocation144_spill] sm:$0xff] }
 0x6d0   : > { %v25542_v59 = vpop.eup %18705  ;;  %18731 = vpow2.f32 %v10224_v26  ;;  %v27673_v3 = vcombine.low %v27671_v45, %v27672_v44  ;;  %v11208_v26 = vcombine.low %v11186_v37, %v27674_v14  ;;  %v25587_v43 = vrot.slane %v11321_v36, %v19159_v57  ;;  %v27678_v36 = vld [vmem:[#allocation81_spill] sm:$0xff]  ;;  %v27684_v47 = vld [vmem:[#allocation92_spill] sm:$0xff] }
 0x6d1   : > { %v25559_v60 = vpop.eup %18707  ;;  %18733 = vpow2.f32 %v10226_v30  ;;  %v11209_v23 = vcombine.low %v11200_v34, %v27675_v55  ;;  %v25574_v30 = vrot.slane %v11320_v39, %v19159_v57  ;;  %v11339_v39 = vcombine.low %v25458_v25, %v25481_v5 }
 0x6d2   : > { %v25557_v17 = vrot.slane %v27673_v3, %v19159_v57  ;;  %v18710_v51 = vpop.eup %18709  ;;  %18735 = vpow2.f32 %v10228_v27  ;;  %v25592_v22 = vrot.slane %v11208_v26, %v19159_v57  ;;  %v11368_v45 = vrot.slane %v11340_v21, %v19159_v57  ;;  %v27679_v3 = vld [vmem:[#allocation68_spill] sm:$0xff] }
 0x6d3   : > { %v18712_v37 = vpop.eup %18711  ;;  %v25579_v50 = vrot.slane %v11209_v23, %v19159_v57  ;;  %18737 = vpow2.f32 %v10230_v0  ;;  %v25603_v53 = vrot.slane %v11280_v33, %v19159_v57  ;;  %v11347_v24 = vrot.slane %v11337_v62, %v19159_v57  ;;  %v27683_v23 = vld [vmem:[#allocation73_spill] sm:$0xff] }
 0x6d4   : > { %v25589_v7 = vpop.eup %18713  ;;  %v12185_v11 = vcombine.low %v18710_v51, %v18712_v37  ;;  %v11513_v14 = vcombine.low %v27679_v3, %v27678_v36  ;;  %v11361_v5 = vrot.slane %v11339_v39, %v19159_v57  ;;  %v11392_v21 = vrot.slane %v25485_v31, %v19159_v57  ;;  %v27685_v51 = vld [vmem:[#allocation99_spill] sm:$0xff]  ;;  %v27686_v37 = vld [vmem:[#allocation76_spill] sm:$0xff] }
 0x6d5   : > { %v25600_v44 = vpop.eup %18715  ;;  %v27682_v62 = vcombine.low %v27680_v35, %v27681_v8  ;;  %v11736_v33 = vcombine.low %v27684_v47, %v27683_v23  ;;  %v11737_v36 = vcombine.low %v27686_v37, %v27685_v51  ;;  %v11369_v31 = vcombine.low %v11347_v24, %v25465_v18  ;;  %v27689_v23 = vld [vmem:[#allocation146_spill] sm:$0xff]  ;;  %v27690_v47 = vld [vmem:[#allocation145_spill] sm:$0xff] }
 0x6d6   : > { %v25611_v25 = vpop.eup %18717  ;;  %v11529_v55 = vrot.slane %v11513_v14, %v19159_v57  ;;  %v25632_v39 = vrot.slane %v12185_v11, %v19159_v57  ;;  %v11370_v48 = vcombine.low %v11361_v5, %v11368_v45  ;;  %v11848_v27 = vcombine.low %v27688_v15, %v27687_v49  ;;  %v27691_v45 = vld [vmem:[#allocation147_spill] sm:$0xff]  ;;  %v27692_v49 = vld [vmem:[#allocation148_spill] sm:$0xff] }
 0x6d7   : > { %v25620_v0 = vpop.eup %18719  ;;  %v11522_v26 = vrot.slane %v27682_v62, %v19159_v57  ;;  %v11746_v14 = vrot.slane %v11736_v33, %v19159_v57  ;;  %v11753_v62 = vrot.slane %v11737_v36, %v19159_v57  ;;  %v11849_v12 = vcombine.low %v27690_v47, %v27689_v23  ;;  %v27694_v36 = vld [vmem:[#allocation151_spill] sm:$0xff]  ;;  %v27695_v23 = vld [vmem:[#allocation150_spill] sm:$0xff] }
 0x6d8   : > { %v18722_v3 = vpop.eup %18721  ;;  %v25642_v11 = vrot.slane %v11370_v48, %v19159_v57  ;;  %v25645_v18 = vrot.slane %v11392_v21, %v19159_v57  ;;  %v27693_v24 = vcombine.low %v27691_v45, %v27692_v49  ;;  %v12187_v48 = vcombine.low %v25611_v25, %v25620_v0 }
 0x6d9   : > { %v18724_v35 = vpop.eup %18723  ;;  %v11544_v8 = vcombine.low %v11522_v26, %v11529_v55  ;;  %v11768_v26 = vcombine.low %v11746_v14, %v11753_v62  ;;  %v11858_v55 = vrot.slane %v11848_v27, %v19159_v57  ;;  %v11865_v33 = vrot.slane %v11849_v12, %v19159_v57  ;;  %v27697_v62 = vld [vmem:[#allocation153_spill] sm:$0xff] }
 0x6da   : > { %v18726_v51 = vpop.eup %18725  ;;  %v12233_v37 = vcombine.low %v18722_v3, %v18724_v35  ;;  %v11872_v15 = vrot.slane %v27693_v24, %v19159_v57  ;;  %v11897_v3 = vcombine.low %v27695_v23, %v27694_v36  ;;  %v25658_v47 = vrot.slane %v11369_v31, %v19159_v57  ;;  %v27698_v24 = vld [vmem:[#allocation152_spill] sm:$0xff] }
 0x6db   : > { %v18728_v5 = vpop.eup %18727  ;;  %v25663_v27 = vrot.slane %v11544_v8, %v19159_v57  ;;  %v11880_v12 = vcombine.low %v11858_v55, %v11865_v33  ;;  %v11898_v36 = vcombine.low %v27698_v24, %v27697_v62  ;;  %v25671_v31 = vrot.slane %v11768_v26, %v19159_v57  ;;  %v27706_v62 = vld [vmem:[#allocation5_spill] sm:$0xff] }
 0x6dc   : > { %v18730_v35 = vpop.eup %18729  ;;  %v12234_v21 = vcombine.low %v18726_v51, %v18728_v5  ;;  %v11881_v45 = vcombine.low %v11872_v15, %v27696_v38  ;;  %v12243_v14 = vrot.slane %v12233_v37, %v19159_v57  ;;  %v11907_v8 = vrot.slane %v11897_v3, %v19159_v57  ;;  %v27699_v15 = vld [vmem:[#allocation183_spill] sm:$0xff]  ;;  %v27700_v5 = vld [vmem:[#allocation182_spill] sm:$0xff] }
 0x6dd   : > { %v18732_v49 = vpop.eup %18731  ;;  %v11914_v37 = vrot.slane %v11898_v36, %v19159_v57  ;;  %v11993_v55 = vcombine.low %v27700_v5, %v27699_v15  ;;  %v25685_v26 = vrot.slane %v11880_v12, %v19159_v57  ;;  %v12072_v12 = vcombine.low %v27707_v6, %v27706_v62  ;;  %v27714_v62 = vld [vmem:[#allocation190_spill] sm:$0xff] }
 0x6de   : > { %v18734_v23 = vpop.eup %18733  ;;  %v12235_v32 = vcombine.low %v18730_v35, %v18732_v49  ;;  %v12250_v25 = vrot.slane %v12234_v21, %v19159_v57  ;;  %v25674_v51 = vrot.slane %v11881_v45, %v19159_v57  ;;  %v27701_v35 = vld [vmem:[#allocation44_spill] sm:$0xff] }
 0x6df   : > { %v18736_v38 = vpop.eup %18735  ;;  %v27702_v49 = vld [vmem:[#allocation8_spill] sm:$0xff]  ;;  %v11929_v0 = vcombine.low %v11907_v8, %v11914_v37  ;;  %v25689_v3 = vrot.slane %v11993_v55, %v19159_v57  ;;  %v27711_v37 = vld [vmem:[#allocation138_spill] sm:$0xff]  ;;  %v12082_v6 = vrot.slane %v12072_v12, %v19159_v57  ;;  %v27717_v55 = vld [vmem:[#allocation203_spill] sm:$0xff]  ;;  %v12186_v12 = vcombine.low %v25589_v7, %v25600_v44 }
 0x6e0   : > { %v12236_v33 = vcombine.low %v18734_v23, %v18736_v38  ;;  %v12257_v45 = vrot.slane %v12235_v32, %v19159_v57  ;;  %v12265_v24 = vcombine.low %v12243_v14, %v12250_v25  ;;  %v18738_v36 = vpop.eup %18737  ;;  %v27703_v23 = vld [vmem:[#allocation180_spill] sm:$0xff]  ;;  %v27704_v38 = vld [vmem:[#allocation143_spill] sm:$0xff]  ;;  %v12074_v32 = vcombine.low %v27709_v63, %v27708_v56 }
 0x6e1   : > { %v27705_v5 = vcombine.low %v27703_v23, %v27704_v38  ;;  %v25705_v25 = vrot.slane %v11929_v0, %v19159_v57  ;;  %v27710_v8 = vld [vmem:[#allocation156_spill] sm:$0xff]  ;;  %v27718_v34 = vcombine.low %v27716_v1, %v27717_v55  ;;  %v27723_v1 = vld [vmem:[#allocation127_spill] sm:$0xff] }
 0x6e2   : > { %v12264_v15 = vrot.slane %v12236_v33, %v19159_v57  ;;  %v27712_v33 = vld [vmem:[#allocation186_spill] sm:$0xff]  ;;  %v12096_v63 = vrot.slane %v12074_v32, %v19159_v57  ;;  %v27713_v56 = vld [vmem:[#allocation200_spill] sm:$0xff] }
 0x6e3   : > { %v25696_v21 = vrot.slane %v27705_v5, %v19159_v57  ;;  %v12064_v23 = vrot.slane %v27712_v33, %v19159_v57  ;;  %v27715_v14 = vcombine.low %v27713_v56, %v27714_v62  ;;  %v25725_v28 = vrot.slane %v27718_v34, %v19159_v57  ;;  %v27720_v33 = vld [vmem:[#allocation199_spill] sm:$0xff]  ;;  %v27721_v5 = vld [vmem:[#allocation166_spill] sm:$0xff] }
 0x6e4   : > { %v12266_v38 = vcombine.low %v12257_v45, %v12264_v15  ;;  %v27719_v45 = vld [vmem:[#allocation202_spill] sm:$0xff]  ;;  %v12104_v32 = vcombine.low %v12082_v6, %v27720_v33  ;;  %v12105_v9 = vcombine.low %v12096_v63, %v27721_v5  ;;  %v12215_v62 = vrot.slane %v12187_v48, %v19159_v57  ;;  %v27724_v6 = vld [vmem:[#allocation61_spill] sm:$0xff] }
 0x6e5   : > { %v25719_v0 = vrot.slane %v27715_v14, %v19159_v57  ;;  %v12176_v15 = vrot.slane %v27719_v45, %v19159_v57  ;;  %v27722_v14 = vcombine.low %v25542_v59, %v25559_v60  ;;  %v25741_v55 = vrot.slane %v12064_v23, %v19159_v57  ;;  %v27727_v33 = vld [vmem:[#allocation57_spill] sm:$0xff] }
 0x6e6   : > { %v12208_v45 = vrot.slane %v12186_v12, %v19159_v57  ;;  %v25745_v7 = vrot.slane %v12266_v38, %v19159_v57  ;;  %v25748_v44 = vrot.slane %v12105_v9, %v19159_v57  ;;  %v25752_v59 = vrot.slane %v12265_v24, %v19159_v57  ;;  %v27732_v24 = vld [vmem:[#allocation79_spill] sm:$0xff] }
 0x6e7   : > { %v12194_v56 = vrot.slane %v27722_v14, %v19159_v57  ;;  %v12288_v60 = vrot.slane %v18738_v36, %v19159_v57  ;;  %v25756_v48 = vrot.slane %v12104_v32, %v19159_v57  ;;  %v12351_v63 = vrot.slane %v27724_v6, 2  ;;  %v27726_v36 = vld [vmem:[#allocation90_spill] sm:$0xff] }
 0x6e8   : > { %v12217_v23 = vcombine.low %v12208_v45, %v12215_v62  ;;  %v27725_v38 = vcombine.low %v25427_v4, %v27644_v41  ;;  %v27728_v32 = vcombine.low %v27726_v36, %v27727_v33  ;;  %v27729_v62 = vld [vmem:[#allocation52_spill] sm:$0xff]  ;;  %v27730_v45 = vld [vmem:[#allocation53_spill] sm:$0xff]  ;;  %v27733_v36 = vcombine.low %v25491_v58, %v27657_v16 }
 0x6e9   : > { %v12216_v5 = vcombine.low %v12194_v56, %v25632_v39  ;;  %v25766_v39 = vrot.slane %v12176_v15, %v19159_v57  ;;  %v25784_v9 = vrot.slane %v12288_v60, %v19159_v57  ;;  %v27735_v56 = vld [vmem:[#allocation132_spill] sm:$0xff]  ;;  %v27740_v16 = vcombine.low %v25526_v52, %v25517_v29 }
 0x6ea   : > { %v12355_v12 = vsel %vm732_vm2, %v27725_v38, 0.0  ;;  %v12356_v14 = vsel %vm732_vm2, %v27728_v32, 0.0  ;;  %v27731_v38 = vcombine.low %v27729_v62, %v27730_v45  ;;  %v12377_v33 = vsel %vm732_vm2, %v27733_v36, 0.0  ;;  %v27734_v32 = vld [vmem:[#allocation131_spill] sm:$0xff]  ;;  %v27737_v45 = vld [vmem:[#allocation96_spill] sm:$0xff] }
 0x6eb   : > { %v25777_v4 = vrot.slane %v12216_v5, %v19159_v57  ;;  %v12357_v41 = vadd.f32 %v12356_v14, %v12355_v12  ;;  %v27736_v5 = vcombine.low %v27734_v32, %v27735_v56  ;;  %v25796_v14 = vrot.slane %v12217_v23, %v19159_v57 }
 0x6ec   : > { %v12366_v15 = vsel %vm732_vm2, %v27731_v38, 0.0  ;;  %v12352_v62 = vadd.f32 %v12351_v63, %v27724_v6  ;;  %v12388_v56 = vsel %vm732_vm2, %v27740_v16, 0.0  ;;  %v27741_v36 = vcombine.low %v25545_v13, %v27677_v46 }
 0x6ed   : > { %v12368_v34 = vadd.f32 %v27732_v24, %v12366_v15  ;;  %v12378_v12 = vsel %vm732_vm2, %v27736_v5, 0.0  ;;  %v12359_v60 = vadd.f32 %v27737_v45, %v12357_v41  ;;  %v27739_v15 = vld [vmem:[#allocation88_spill] sm:$0xff]  ;;  %v27742_v41 = vld [vmem:[#allocation121_spill] sm:$0xff]  ;;  %v27744_v29 = vcombine.low %v27666_v61, %v27665_v10 }
 0x6ee   : > { %v12379_v38 = vadd.f32 %v12378_v12, %v12377_v33  ;;  %v12380_v58 = vsel %vm8314_vm10, %v27739_v15, 0.0  ;;  %v12389_v23 = vsel %vm732_vm2, %v27741_v36, 0.0  ;;  %v12391_v33 = vsel %vm8314_vm10, %v27742_v41, 0.0 }
 0x6ef   : > { %v12370_v24 = vadd.f32 %v27738_v2, %v12368_v34  ;;  %v12360_v32 = vrot.slane %v12359_v60, 4  ;;  %v12390_v63 = vadd.f32 %v12389_v23, %v12388_v56  ;;  %v27743_v34 = vcombine.low %v25523_v42, %v25514_v20 }
 0x6f0   : > { %v12381_v6 = vadd.f32 %v12380_v58, %v12379_v38  ;;  %v12400_v52 = vsel %vm732_vm2, %v27744_v29, 0.0  ;;  %v12402_v13 = vsel %vm8314_vm10, %v25568_v54, 0.0  ;;  %v27745_v58 = vcombine.low %v25592_v22, %v25579_v50 }
 0x6f1   : > { %v12371_v2 = vrot.slane %v12370_v24, 4  ;;  %v12399_v5 = vsel %vm732_vm2, %v27743_v34, 0.0  ;;  %v12361_v46 = vadd.f32 %v12360_v32, %v12359_v60  ;;  %v12392_v45 = vadd.f32 %v12391_v33, %v12390_v63 }
 0x6f2   : > { %v12382_v12 = vrot.slane %v12381_v6, 4  ;;  %v12401_v38 = vadd.f32 %v12400_v52, %v12399_v5  ;;  %v12410_v20 = vsel %vm732_vm2, %v27745_v58, 0.0  ;;  %v27746_v42 = vcombine.low %v25551_v40, %v25557_v17  ;;  %v27749_v52 = vld [vmem:[#allocation58_spill] sm:$0xff] }
 0x6f3   : > { %v12372_v15 = vadd.f32 %v12371_v2, %v12370_v24  ;;  %v12413_v61 = vsel %vm8314_vm10, %v25603_v53, 0.0  ;;  %v12362_v16 = vrot.slane %v12361_v46, 2  ;;  %v12393_v60 = vrot.slane %v12392_v45, 4 }
 0x6f4   : > { %v12411_v10 = vsel %vm732_vm2, %v27746_v42, 0.0  ;;  %v12383_v54 = vadd.f32 %v12382_v12, %v12381_v6  ;;  %v12403_v56 = vadd.f32 %v12402_v13, %v12401_v38  ;;  %v27747_v24 = vcombine.low %v25574_v30, %v25587_v43 }
 0x6f5   : > { %v12373_v36 = vrot.slane %v12372_v15, 2  ;;  %v12412_v23 = vadd.f32 %v12411_v10, %v12410_v20  ;;  %v27748_v22 = vcombine.low %v25658_v47, %v25642_v11  ;;  %v12363_v17 = vadd.f32 %v12362_v16, %v12361_v46 }
 0x6f6   : > { %v12421_v50 = vsel %vm732_vm2, %v27747_v24, 0.0  ;;  %v12384_v32 = vrot.slane %v12383_v54, 2  ;;  %v12394_v63 = vadd.f32 %v12393_v60, %v12392_v45  ;;  %v12404_v53 = vrot.slane %v12403_v56, 4  ;;  %v27752_v24 = vld [vmem:[#allocation77_spill] sm:$0xff] }
 0x6f7   : > { %v12422_v40 = vsel %vm732_vm2, %v27748_v22, 0.0  ;;  %v12353_v41 = vrot.slane %v12352_v62, 1  ;;  %v12374_v6 = vadd.f32 %v12373_v36, %v12372_v15  ;;  %v12414_v33 = vadd.f32 %v12413_v61, %v12412_v23  ;;  %v27751_v23 = vld [vmem:[#allocation74_spill] sm:$0xff] }
 0x6f8   : > { %v12423_v2 = vadd.f32 %v12422_v40, %v12421_v50  ;;  %v12385_v34 = vadd.f32 %v12384_v32, %v12383_v54  ;;  %v12395_v5 = vrot.slane %v12394_v63, 2  ;;  %v12405_v29 = vadd.f32 %v12404_v53, %v12403_v56  ;;  %v27755_v53 = vld [vmem:[#allocation50_spill] sm:$0xff] }
 0x6f9   : > { %v12424_v30 = vsel %vm8314_vm10, %v25645_v18, 0.0  ;;  %v12232_v43 = vcombine.low %v25777_v4, %v25796_v14  ;;  %v12415_v11 = vrot.slane %v12414_v33, 4  ;;  %v12439_v13 = vrot.slane %v27749_v52, 2 }
 0x6fa   : > { %v12425_v47 = vadd.f32 %v12424_v30, %v12423_v2  ;;  %v12364_v46 = vrot.slane %v12363_v17, 1  ;;  %v12375_v12 = vrot.slane %v12374_v6, 1  ;;  %v12396_v45 = vadd.f32 %v12395_v5, %v12394_v63  ;;  %v27754_v63 = vld [vmem:[#allocation63_spill] sm:$0xff] }
 0x6fb   : > { %v12406_v38 = vrot.slane %v12405_v29, 2  ;;  %v12386_v15 = vrot.slane %v12385_v34, 1  ;;  %v12416_v58 = vadd.f32 %v12415_v11, %v12414_v33  ;;  %v12440_v42 = vadd.f32 %v12439_v13, %v27749_v52  ;;  %v27757_v5 = vld [vmem:[#allocation71_spill] sm:$0xff]  ;;  %v27758_v11 = vld [vmem:[#allocation80_spill] sm:$0xff]  ;;  %v27761_v13 = vld [vmem:[#allocation82_spill] sm:$0xff] }
 0x6fc   : > { %v12426_v20 = vrot.slane %v12425_v47, 4  ;;  %v25847_v10 = vadd.f32 %v12353_v41, %v12352_v62  ;;  %v12397_v61 = vrot.slane %v12396_v45, 1  ;;  %v27750_v16 = vcombine.low %v25663_v27, %v27701_v35  ;;  %v27760_v52 = vld [vmem:[#allocation84_spill] sm:$0xff] }
 0x6fd   : > { %v12407_v18 = vadd.f32 %v12406_v38, %v12405_v29  ;;  %v12417_v60 = vrot.slane %v12416_v58, 2  ;;  %v12441_v36 = vrot.slane %v12440_v42, 1  ;;  %v27753_v50 = vcombine.low %v27751_v23, %v27752_v24 }
 0x6fe   : > { %v12443_v54 = vsel %vm732_vm2, %v27750_v16, 0.0  ;;  %v12427_v56 = vadd.f32 %v12426_v20, %v12425_v47  ;;  %v25857_v40 = vadd.f32 %v12364_v46, %v12363_v17  ;;  %v25859_v32 = vadd.f32 %v12375_v12, %v12374_v6 }
 0x6ff   : > { %v12444_v22 = vsel %vm732_vm2, %v27753_v50, 0.0  ;;  %v27756_v41 = vcombine.low %v27754_v63, %v27755_v53  ;;  %v25865_v35 = vadd.f32 %v12386_v15, %v12385_v34  ;;  %v12408_v33 = vrot.slane %v12407_v18, 1  ;;  %v27763_v15 = vld [vmem:[#allocation62_spill] sm:$0xff] }
 0x700   : > { %v12445_v62 = vadd.f32 %v12444_v22, %v12443_v54  ;;  %v12418_v2 = vadd.f32 %v12417_v60, %v12416_v58  ;;  %v12428_v30 = vrot.slane %v12427_v56, 2  ;;  %v27759_v17 = vcombine.low %v25671_v31, %v27702_v49  ;;  %v27764_v54 = vld [vmem:[#allocation95_spill] sm:$0xff] }
 0x701   : > { %v12454_v27 = vsel %vm732_vm2, %v27756_v41, 0.0  ;;  %v27762_v46 = vcombine.low %v27760_v52, %v27761_v13  ;;  %v25877_v38 = vadd.f32 %v12397_v61, %v12396_v45  ;;  %v25879_v34 = vadd.f32 %v12441_v36, %v12440_v42  ;;  %v27768_v41 = vld [vmem:[#allocation75_spill] sm:$0xff] }
 0x702   : > { %v12456_v29 = vadd.f32 %v27757_v5, %v12454_v27  ;;  %v12447_v47 = vadd.f32 %v27758_v11, %v12445_v62  ;;  %v12465_v6 = vsel %vm732_vm2, %v27759_v17, 0.0  ;;  %v12468_v60 = vsel %vm8314_vm10, %v27764_v54, 0.0 }
 0x703   : > { %v12466_v12 = vsel %vm732_vm2, %v27762_v46, 0.0  ;;  %v27765_v31 = vcombine.low %v25685_v26, %v25674_v51  ;;  %v27766_v23 = vcombine.low %v25705_v25, %v27723_v1  ;;  %v25892_v61 = vadd.f32 %v12408_v33, %v12407_v18 }
 0x704   : > { %v12458_v58 = vadd.f32 %v27763_v15, %v12456_v29  ;;  %v12467_v20 = vadd.f32 %v12466_v12, %v12465_v6  ;;  %v12448_v16 = vrot.slane %v12447_v47, 4  ;;  %v12419_v42 = vrot.slane %v12418_v2, 1 }
 0x705   : > { %v12476_v49 = vsel %vm732_vm2, %v27765_v31, 0.0  ;;  %v12477_v45 = vsel %vm732_vm2, %v27766_v23, 0.0  ;;  %v12429_v50 = vadd.f32 %v12428_v30, %v12427_v56  ;;  %v27767_v63 = vcombine.low %v25696_v21, %v25689_v3 }
 0x706   : > { %v12459_v36 = vrot.slane %v12458_v58, 4  ;;  %v12469_v24 = vadd.f32 %v12468_v60, %v12467_v20  ;;  %v12449_v22 = vadd.f32 %v12448_v16, %v12447_v47  ;;  %v12478_v62 = vadd.f32 %v12477_v45, %v12476_v49 }
 0x707   : > { %v12487_v51 = vsel %vm732_vm2, %v27767_v63, 0.0  ;;  %v12479_v25 = vsel %vm8314_vm10, %v27768_v41, 0.0  ;;  %v27769_v1 = vcombine.low %v27711_v37, %v27710_v8  ;;  %v12490_v5 = vsel %vm8314_vm10, %v25741_v55, 0.0  ;;  %v27777_v41 = vld [vmem:[#allocation134_spill] sm:$0xff] }
 0x708   : > { %v12460_v26 = vadd.f32 %v12459_v36, %v12458_v58  ;;  %v12470_v53 = vrot.slane %v12469_v24, 4  ;;  %v12450_v27 = vrot.slane %v12449_v22, 2  ;;  %v12480_v33 = vadd.f32 %v12479_v25, %v12478_v62  ;;  %v27778_v25 = vld [vmem:[#allocation11_spill] sm:$0xff] }
 0x709   : > { %v12488_v18 = vsel %vm732_vm2, %v27769_v1, 0.0  ;;  %v27770_v3 = vcombine.low %v25756_v48, %v25748_v44  ;;  %v27771_v11 = vcombine.low %v25719_v0, %v25725_v28  ;;  %v12420_v52 = vadd.f32 %v12419_v42, %v12418_v2 }
 0x70a   : > { %v12489_v56 = vadd.f32 %v12488_v18, %v12487_v51  ;;  %v12461_v29 = vrot.slane %v12460_v26, 2  ;;  %v12471_v21 = vadd.f32 %v12470_v53, %v12469_v24  ;;  %v12451_v37 = vadd.f32 %v12450_v27, %v12449_v22  ;;  %v27776_v53 = vld [vmem:[#allocation187_spill] sm:$0xff] }
 0x70b   : > { %v12498_v30 = vsel %vm732_vm2, %v27770_v3, 0.0  ;;  %v12499_v8 = vsel %vm732_vm2, %v27771_v11, 0.0  ;;  %v12481_v47 = vrot.slane %v12480_v33, 4  ;;  %v12501_v55 = vsel %vm8314_vm10, %v25766_v39, 0.0  ;;  %v27783_v3 = vld [vmem:[#allocation85_spill] sm:$0xff] }
 0x70c   : > { %v12491_v17 = vadd.f32 %v12490_v5, %v12489_v56  ;;  %v12500_v6 = vadd.f32 %v12499_v8, %v12498_v30  ;;  %v12462_v13 = vadd.f32 %v12461_v29, %v12460_v26  ;;  %v12472_v46 = vrot.slane %v12471_v21, 2 }
 0x70d   : > { %v12482_v12 = vadd.f32 %v12481_v47, %v12480_v33  ;;  %v12509_v28 = vsel %vm732_vm2, %v12232_v43, 0.0  ;;  %v12430_v0 = vrot.slane %v12429_v50, 1  ;;  %v12452_v48 = vrot.slane %v12451_v37, 1  ;;  %v27780_v33 = vld [vmem:[#allocation42_spill] sm:$0xff] }
 0x70e   : > { %v12492_v15 = vrot.slane %v12491_v17, 4  ;;  %v12502_v44 = vadd.f32 %v12501_v55, %v12500_v6  ;;  %v12473_v58 = vadd.f32 %v12472_v46, %v12471_v21  ;;  %v27772_v20 = vcombine.low %v25752_v59, %v25745_v7  ;;  %v27787_v6 = vld [vmem:[#allocation149_spill] sm:$0xff]  ;;  %v27789_v55 = vld [vmem:[#allocation167_spill] sm:$0xff] }
 0x70f   : > { %v12463_v16 = vrot.slane %v12462_v13, 1  ;;  %v12483_v54 = vrot.slane %v12482_v12, 2  ;;  %v12512_v23 = vsel %vm8314_vm10, %v25784_v9, 0.0  ;;  %18739 = vlog2.f32 %v25847_v10  ;;  %v27773_v9 = vld [vmem:[#allocation24_spill] sm:$0xff]  ;;  %v27774_v10 = vld [vmem:[#allocation17_spill] sm:$0xff] }
 0x710   : > { %v12510_v2 = vsel %vm732_vm2, %v27772_v20, 0.0  ;;  %v12493_v60 = vadd.f32 %v12492_v15, %v12491_v17  ;;  %v12503_v39 = vrot.slane %v12502_v44, 4  ;;  %v12474_v31 = vrot.slane %v12473_v58, 1 }
 0x711   : > { %v12511_v49 = vadd.f32 %v12510_v2, %v12509_v28  ;;  %v12484_v4 = vadd.f32 %v12483_v54, %v12482_v12  ;;  %18741 = vlog2.f32 %v25857_v40  ;;  %v12431_v45 = vadd.f32 %v12430_v0, %v12429_v50 }
 0x712   : > { %v12494_v14 = vrot.slane %v12493_v60, 2  ;;  %v12504_v43 = vadd.f32 %v12503_v39, %v12502_v44  ;;  %v12453_v7 = vadd.f32 %v12452_v48, %v12451_v37  ;;  %18743 = vlog2.f32 %v25859_v32  ;;  %v27785_v37 = vld [vmem:[#allocation108_spill] sm:$0xff] }
 0x713   : > { %v12513_v59 = vadd.f32 %v12512_v23, %v12511_v49  ;;  %v12485_v42 = vrot.slane %v12484_v4, 1  ;;  %18745 = vlog2.f32 %v25865_v35  ;;  %v12464_v22 = vadd.f32 %v12463_v16, %v12462_v13 }
 0x714   : > { %v12495_v36 = vadd.f32 %v12494_v14, %v12493_v60  ;;  %v12505_v24 = vrot.slane %v12504_v43, 2  ;;  %18747 = vlog2.f32 %v25877_v38  ;;  %v27775_v63 = vcombine.low %v27773_v9, %v27774_v10  ;;  %v27791_v60 = vld [vmem:[#allocation184_spill] sm:$0xff]  ;;  %v27795_v9 = vld [vmem:[#allocation106_spill] sm:$0xff] }
 0x715   : > { %v12514_v62 = vrot.slane %v12513_v59, 4  ;;  %v12475_v40 = vadd.f32 %v12474_v31, %v12473_v58  ;;  %18749 = vlog2.f32 %v25892_v61  ;;  %v15944_v35 = vcombine.low %v27777_v41, %v27776_v53  ;;  %v27781_v61 = vld [vmem:[#allocation47_spill] sm:$0xff]  ;;  %v27800_v41 = vld [vmem:[#allocation69_spill] sm:$0xff] }
 0x716   : > { %v25935_v51 = vrot.slane %v27775_v63, %v19159_v57  ;;  %v12496_v50 = vrot.slane %v12495_v36, 1  ;;  %v12506_v26 = vadd.f32 %v12505_v24, %v12504_v43  ;;  %18751 = vlog2.f32 %v12420_v52  ;;  %v27790_v58 = vld [vmem:[#allocation179_spill] sm:$0xff] }
 0x717   : > { %v12515_v32 = vadd.f32 %v12514_v62, %v12513_v59  ;;  %v27779_v38 = vrot.slane %v27778_v25, %v19159_v57  ;;  %v12486_v18 = vadd.f32 %v12485_v42, %v12484_v4  ;;  %18753 = vlog2.f32 %v12431_v45  ;;  %v27794_v62 = vld [vmem:[#allocation175_spill] sm:$0xff] }
 0x718   : > { %v12507_v27 = vrot.slane %v12506_v26, 1  ;;  %v16105_v56 = vcombine.low %v25935_v51, %v27780_v33  ;;  %18755 = vlog2.f32 %v25879_v34  ;;  %v27782_v29 = vrot.slane %v27781_v61, 2  ;;  %v27788_v34 = vld [vmem:[#allocation170_spill] sm:$0xff] }
 0x719   : > { %v25944_v1 = vrot.slane %v27779_v38, %v19159_v57  ;;  %v12516_v5 = vrot.slane %v12515_v32, 2  ;;  %v27784_v30 = vrot.slane %v27783_v3, 2  ;;  %v12497_v8 = vadd.f32 %v12496_v50, %v12495_v36 }
 0x71a   : > { %v17083_v21 = vadd.f32 %v27782_v29, %v27781_v61  ;;  %18757 = vlog2.f32 %v12453_v7  ;;  %v27786_v47 = vrot.slane %v27785_v37, 4  ;;  %v17115_v52 = vrot.slane %v27787_v6, 2  ;;  %v27802_v29 = vld [vmem:[#allocation195_spill] sm:$0xff] }
 0x71b   : > { %v17094_v11 = vadd.f32 %v27784_v30, %v27783_v3  ;;  %v12508_v13 = vadd.f32 %v12507_v27, %v12506_v26  ;;  %v12517_v46 = vadd.f32 %v12516_v5, %v12515_v32  ;;  %18759 = vlog2.f32 %v12464_v22  ;;  %v27803_v30 = vld [vmem:[#allocation64_spill] sm:$0xff] }
 0x71c   : > { %v17103_v17 = vadd.f32 %v27786_v47, %v27785_v37  ;;  %v16840_v12 = vcombine.low %v27789_v55, %v27788_v34  ;;  %18761 = vlog2.f32 %v12475_v40  ;;  %v17084_v15 = vrot.slane %v17083_v21, 1  ;;  %v18740_v2 = vpop.eup %18739  ;;  %v27805_v37 = vld [vmem:[#allocation41_spill] sm:$0xff]  ;;  %v27850_v55 = vld [vmem:[#allocation16_spill] sm:$0xff] }
 0x71d   : > { %v17116_v28 = vadd.f32 %v17115_v52, %v27787_v6  ;;  %v12518_v0 = vrot.slane %v12517_v46, 1  ;;  %18763 = vlog2.f32 %v12486_v18  ;;  %v17095_v48 = vrot.slane %v17094_v11, 1 }
 0x71e   : > { %v17104_v44 = vrot.slane %v17103_v17, 2  ;;  %v17122_v20 = vsel %vm8314_vm10, %v27790_v58, 0.0  ;;  %18765 = vlog2.f32 %v12497_v8  ;;  %v18742_v31 = vpop.eup %18741  ;;  %v12521_v23 = vmul.f32 0.6931472, %v18740_v2  ;;  %v27804_v8 = vld [vmem:[#allocation159_spill] sm:$0xff] }
 0x71f   : > { %v17117_v54 = vrot.slane %v17116_v28, 1  ;;  %v17123_v39 = vadd.f32 %v17122_v20, %v27791_v60  ;;  %v12519_v49 = vadd.f32 %v12518_v0, %v12517_v46  ;;  %18767 = vlog2.f32 %v12508_v13  ;;  %v18744_v43 = vpop.eup %18743  ;;  %v27809_v60 = vld [vmem:[#allocation118_spill] sm:$0xff] }
 0x720   : > { %v17105_v16 = vadd.f32 %v17104_v44, %v17103_v17  ;;  %v27792_v4 = vrot.slane %v25372_v19, %v19159_v57  ;;  %v12523_v45 = vmul.f32 0.6931472, %v18742_v31  ;;  %v25971_v7 = vadd.f32 %v17084_v15, %v17083_v21  ;;  %v18746_v36 = vpop.eup %18745  ;;  %v27797_v19 = vld [vmem:[#allocation39_spill] sm:$0xff] }
 0x721   : > { %v17124_v42 = vrot.slane %v17123_v39, 4  ;;  %v12525_v24 = vmul.f32 0.6931472, %v18744_v43  ;;  %18769 = vlog2.f32 %v12519_v49  ;;  %v25973_v22 = vadd.f32 %v17095_v48, %v17094_v11  ;;  %v18748_v51 = vpop.eup %18747  ;;  %v27807_v48 = vld [vmem:[#allocation94_spill] sm:$0xff] }
 0x722   : > { %v25969_v14 = vrot.slane %v27792_v4, %v19159_v57  ;;  %v17106_v59 = vrot.slane %v17105_v16, 1  ;;  %v27796_v10 = vcombine.low %v27794_v62, %v27795_v9  ;;  %v25980_v57 = vadd.f32 %v12521_v23, %v27797_v19  ;;  %v18750_v32 = vpop.eup %18749 }
 0x723   : > { %27793 = vst [vmem:[#allocation34_spill] sm:$0xff] %v25973_v22  ;;  %v25982_v40 = vadd.f32 %v17117_v54, %v17116_v28  ;;  %v17125_v50 = vadd.f32 %v17124_v42, %v17123_v39  ;;  %v17130_v26 = vsel %vm732_vm2, %v15944_v35, 0.0  ;;  %v12527_v53 = vmul.f32 0.6931472, %v18746_v36  ;;  %v18752_v27 = vpop.eup %18751 }
 0x724   : > { %v17131_v63 = vsel %vm732_vm2, %v27796_v10, 0.0  ;;  %27798 = vst [vmem:[#allocation36_spill] sm:$0xff] %v25980_v57  ;;  %v25986_v25 = vadd.f32 %v12523_v45, %v27800_v41  ;;  %v25988_v38 = vadd.f32 %v17106_v59, %v17105_v16  ;;  %v12529_v33 = vmul.f32 0.6931472, %v18748_v51  ;;  %v18754_v3 = vpop.eup %18753  ;;  %v27813_v59 = vld [vmem:[#allocation91_spill] sm:$0xff]  ;;  %v27817_v10 = vld [vmem:[#allocation22_spill] sm:$0xff] }
 0x725   : > { %27799 = vst [vmem:[#allocation10_spill] sm:$0xff] %v25982_v40  ;;  %v17132_v18 = vadd.f32 %v17131_v63, %v17130_v26  ;;  %v12531_v5 = vmul.f32 0.6931472, %v18750_v32  ;;  %v17126_v61 = vrot.slane %v17125_v50, 2  ;;  %v17133_v21 = vsel %vm8314_vm10, %v27802_v29, 0.0  ;;  %v18756_v52 = vpop.eup %18755  ;;  %v27819_v26 = vld [vmem:[#allocation78_spill] sm:$0xff] }
 0x726   : > { %27801 = vst [vmem:[#allocation25_spill] sm:$0xff] %v25988_v38  ;;  %v25993_v11 = vadd.f32 %v12525_v24, %v27803_v30  ;;  %v27806_v47 = vcombine.low %v27804_v8, %v27805_v37  ;;  %v17142_v6 = vsel %vm732_vm2, %v16105_v56, 0.0  ;;  %v12533_v13 = vmul.f32 0.6931472, %v18752_v27  ;;  %v27811_v56 = vld [vmem:[#allocation178_spill] sm:$0xff]  ;;  %v27823_v29 = vld [vmem:[#allocation65_spill] sm:$0xff] }
 0x727   : > { %v17134_v35 = vadd.f32 %v17133_v21, %v17132_v18  ;;  %v12535_v46 = vmul.f32 0.6931472, %v18754_v3  ;;  %v17127_v15 = vadd.f32 %v17126_v61, %v17125_v50  ;;  %v18758_v28 = vpop.eup %18757  ;;  %v12537_v0 = vmul.f32 0.6931472, %v18756_v52 }
 0x728   : > { %v17141_v17 = vsel %vm732_vm2, %v27806_v47, 0.0  ;;  %v26001_v58 = vadd.f32 %v12527_v53, %v27807_v48  ;;  %v17144_v2 = vsel %vm8314_vm10, %v25944_v1, 0.0  ;;  %v18760_v16 = vpop.eup %18759  ;;  %v12539_v54 = vmul.f32 0.6931472, %v18758_v28  ;;  %v27815_v1 = vld [vmem:[#allocation112_spill] sm:$0xff]  ;;  %v27832_v28 = vld [vmem:[#allocation117_spill] sm:$0xff] }
 0x729   : > { %v17143_v44 = vadd.f32 %v17142_v6, %v17141_v17  ;;  %v17135_v20 = vrot.slane %v17134_v35, 4  ;;  %v26006_v39 = vadd.f32 %v12529_v33, %v27809_v60  ;;  %v26009_v31 = vadd.f32 %v12531_v5, %v27811_v56  ;;  %v18762_v23 = vpop.eup %18761  ;;  %v27821_v33 = vld [vmem:[#allocation89_spill] sm:$0xff]  ;;  %v27828_v6 = vld [vmem:[#allocation114_spill] sm:$0xff] }
 0x72a   : > { %27808 = vst [vmem:[#allocation51_spill] sm:$0xff] %v26001_v58  ;;  %v12541_v4 = vmul.f32 0.6931472, %v18760_v16  ;;  %v17128_v43 = vrot.slane %v17127_v15, 1  ;;  %v27814_v42 = vrot.slane %v27813_v59, 2  ;;  %v18764_v24 = vpop.eup %18763  ;;  %v26015_v9 = vadd.f32 %v12533_v13, %v27815_v1  ;;  %v27830_v13 = vld [vmem:[#allocation142_spill] sm:$0xff] }
 0x72b   : > { %27810 = vst [vmem:[#allocation46_spill] sm:$0xff] %v26006_v39  ;;  %27812 = vst [vmem:[#allocation49_spill] sm:$0xff] %v26009_v31  ;;  %v17145_v49 = vadd.f32 %v17144_v2, %v17143_v44  ;;  %v17136_v45 = vadd.f32 %v17135_v20, %v17134_v35  ;;  %v12543_v62 = vmul.f32 0.6931472, %v18762_v23  ;;  %v26018_v63 = vadd.f32 %v12535_v46, %v27817_v10  ;;  %v18766_v19 = vpop.eup %18765  ;;  %v27825_v35 = vld [vmem:[#allocation101_spill] sm:$0xff] }
 0x72c   : > { %v17171_v36 = vadd.f32 %v27814_v42, %v27813_v59  ;;  %27816 = vst [vmem:[#allocation45_spill] sm:$0xff] %v26015_v9  ;;  %v12545_v50 = vmul.f32 0.6931472, %v18764_v24  ;;  %v26021_v32 = vadd.f32 %v12537_v0, %v27819_v26  ;;  %v18768_v18 = vpop.eup %18767  ;;  %v12547_v27 = vmul.f32 0.6931472, %v18766_v19  ;;  %v27834_v20 = vld [vmem:[#allocation173_spill] sm:$0xff] }
 0x72d   : > { %27818 = vst [vmem:[#allocation122_spill] sm:$0xff] %v26018_v63  ;;  %v17146_v51 = vrot.slane %v17145_v49, 4  ;;  %v17137_v53 = vrot.slane %v17136_v45, 2  ;;  %v26024_v5 = vadd.f32 %v12539_v54, %v27821_v33  ;;  %v27824_v21 = vrot.slane %v27823_v29, 2  ;;  %v27837_v54 = vld [vmem:[#allocation105_spill] sm:$0xff]  ;;  %v27842_v19 = vld [vmem:[#allocation188_spill] sm:$0xff] }
 0x72e   : > { %27820 = vst [vmem:[#allocation120_spill] sm:$0xff] %v26021_v32  ;;  %v17172_v41 = vrot.slane %v17171_v36, 1  ;;  %v12549_v30 = vmul.f32 0.6931472, %v18768_v18  ;;  %v26030_v8 = vadd.f32 %v12541_v4, %v27825_v35  ;;  %v26032_v37 = vadd.f32 %v17128_v43, %v17127_v15  ;;  %v18770_v17 = vpop.eup %18769  ;;  %v27838_v4 = vld [vmem:[#allocation133_spill] sm:$0xff]  ;;  %v27848_v35 = vld [vmem:[#allocation208_spill] sm:$0xff] }
 0x72f   : > { %27822 = vst [vmem:[#allocation124_spill] sm:$0xff] %v26024_v5  ;;  %v17147_v61 = vadd.f32 %v17146_v51, %v17145_v49  ;;  %v17182_v3 = vadd.f32 %v27824_v21, %v27823_v29  ;;  %v17138_v47 = vadd.f32 %v17137_v53, %v17136_v45  ;;  %v26035_v52 = vadd.f32 %v12543_v62, %v27828_v6  ;;  %v27839_v45 = vld [vmem:[#allocation193_spill] sm:$0xff]  ;;  %v27841_v62 = vld [vmem:[#allocation176_spill] sm:$0xff]  ;;  %v27901_v5 = vld [vmem:[#allocation119_spill] sm:$0xff] }
 0x730   : > { %27826 = vst [vmem:[#allocation123_spill] sm:$0xff] %v26030_v8  ;;  %27827 = vst [vmem:[#allocation129_spill] sm:$0xff] %v26032_v37  ;;  %v26038_v46 = vadd.f32 %v12545_v50, %v27830_v13  ;;  %v27833_v0 = vrot.slane %v27832_v28, 4  ;;  %v26044_v2 = vadd.f32 %v12547_v27, %v27834_v20  ;;  %v26046_v16 = vadd.f32 %v17172_v41, %v17171_v36  ;;  %v27843_v50 = vld [vmem:[#allocation192_spill] sm:$0xff]  ;;  %v27846_v29 = vld [vmem:[#allocation189_spill] sm:$0xff]  ;;  %v26079_v20 = vpop.permute.xlu1 %17289 }
 0x731   : > { %27829 = vst [vmem:[#allocation128_spill] sm:$0xff] %v26035_v52  ;;  %v17148_v44 = vrot.slane %v17147_v61, 2  ;;  %v17183_v15 = vrot.slane %v17182_v3, 1  ;;  %v17203_v60 = vrot.slane %v27837_v54, 2  ;;  %v12551_v56 = vmul.f32 0.6931472, %v18770_v17 }
 0x732   : > { %27831 = vst [vmem:[#allocation93_spill] sm:$0xff] %v26038_v46  ;;  %v17191_v48 = vadd.f32 %v27833_v0, %v27832_v28  ;;  %27835 = vst [vmem:[#allocation116_spill] sm:$0xff] %v26044_v2  ;;  %v17210_v43 = vsel %vm8314_vm10, %v27838_v4, 0.0  ;;  %v26052_v59 = vadd.f32 %v12549_v30, %v27839_v45  ;;  %v17139_v42 = vrot.slane %v17138_v47, 1  ;;  %v27847_v30 = vld [vmem:[#allocation209_spill] sm:$0xff]  ;;  %v27895_v46 = vld [vmem:[#allocation59_spill] sm:$0xff] }
 0x733   : > { %27836 = vst [vmem:[#allocation7_spill] sm:$0xff] %v26046_v16  ;;  %v17149_v49 = vadd.f32 %v17148_v44, %v17147_v61  ;;  %v17204_v24 = vadd.f32 %v17203_v60, %v27837_v54  ;;  %v17211_v1 = vadd.f32 %v17210_v43, %v27841_v62  ;;  %v17218_v51 = vsel %vm732_vm2, %v16840_v12, 0.0  ;;  %v27851_v12 = vld [vmem:[#allocation15_spill] sm:$0xff]  ;;  %v27897_v52 = vld [vmem:[#allocation98_spill] sm:$0xff]  ;;  %v27903_v32 = vld [vmem:[#allocation72_spill] sm:$0xff] }
 0x734   : > { %v17192_v23 = vrot.slane %v17191_v48, 2  ;;  %27840 = vst [vmem:[#allocation163_spill] sm:$0xff] %v26052_v59  ;;  %v27844_v26 = vcombine.low %v27842_v19, %v27843_v50  ;;  %v26064_v41 = vadd.f32 %v17183_v15, %v17182_v3  ;;  %v17221_v21 = vsel %vm8314_vm10, %v27846_v29, 0.0  ;;  %v27853_v44 = vld [vmem:[#allocation35_spill] sm:$0xff]  ;;  %v26111_v29 = vpop.permute.xlu0 %17294  ;;  %v27900_v16 = vld [vmem:[#allocation110_spill] sm:$0xff]  ;;  %v27905_v63 = vld [vmem:[#allocation164_spill] sm:$0xff] }
 0x735   : > { %v17150_v10 = vrot.slane %v17149_v49, 1  ;;  %v17205_v18 = vrot.slane %v17204_v24, 1  ;;  %v17212_v27 = vrot.slane %v17211_v1, 4  ;;  %v27849_v17 = vcombine.low %v27847_v30, %v27848_v35  ;;  %v27899_v8 = vld [vmem:[#allocation107_spill] sm:$0xff]  ;;  %v27907_v9 = vld [vmem:[#allocation181_spill] sm:$0xff] }
 0x736   : > { %v17193_v36 = vadd.f32 %v17192_v23, %v17191_v48  ;;  %v17219_v53 = vsel %vm732_vm2, %v27844_v26, 0.0  ;;  %27845 = vst [vmem:[#allocation194_spill] sm:$0xff] %v26064_v41  ;;  %v27852_v6 = vcombine.low %v27850_v55, %v27851_v12  ;;  %v26077_v3 = vadd.f32 %v12551_v56, %v27853_v44  ;;  %v27898_v41 = vld [vmem:[#allocation12_spill] sm:$0xff]  ;;  %v27908_v37 = vld [vmem:[#allocation177_spill] sm:$0xff] }
 0x737   : > { %v17220_v33 = vadd.f32 %v17219_v53, %v17218_v51  ;;  %v17229_v34 = vsel %vm732_vm2, %v27849_v17, 0.0  ;;  %v17213_v28 = vadd.f32 %v17212_v27, %v17211_v1  ;;  %v26081_v15 = vadd.f32 %v17139_v42, %v17138_v47  ;;  %v27902_v26 = vld [vmem:[#allocation20_spill] sm:$0xff] }
 0x738   : > { %v17194_v61 = vrot.slane %v17193_v36, 1  ;;  %v17230_v13 = vsel %vm732_vm2, %v27852_v6, 0.0  ;;  %27854 = vst [vmem:[#allocation155_spill] sm:$0xff] %v26077_v3  ;;  %v26083_v54 = vadd.f32 %v17150_v10, %v17149_v49  ;;  %v17232_v60 = vsel %vm8314_vm10, %v25969_v14, 0.0  ;;  %v27894_v3 = vld [vmem:[#allocation27_spill] sm:$0xff] }
 0x739   : > { %v17222_v0 = vadd.f32 %v17221_v21, %v17220_v33  ;;  %v17231_v48 = vadd.f32 %v17230_v13, %v17229_v34  ;;  %27855 = vst [vmem:[#allocation157_spill] sm:$0xff] %v26081_v15  ;;  %v26089_v43 = vadd.f32 %v17205_v18, %v17204_v24  ;;  %v17214_v45 = vrot.slane %v17213_v28, 2  ;;  %v26113_v21 = vpop.permute.xlu1 %17299  ;;  %v27861_v34 = vld [vmem:[#allocation9_spill] sm:$0xff] }
 0x73a   : > { %27856 = vst [vmem:[#allocation135_spill] sm:$0xff] %v26083_v54  ;;  %v26091_v1 = vadd.f32 %v17194_v61, %v17193_v36  ;;  %v17302_v55 = vmul.f32 %v27861_v34, %v26079_v20  ;;  %v27862_v13 = vld [vmem:[#allocation33_spill] sm:$0xff]  ;;  %v27872_v61 = vld [vmem:[#allocation100_spill] sm:$0xff] }
 0x73b   : > { %27858 = vst [vmem:[#allocation161_spill] sm:$0xff] %v26089_v43  ;;  %v17223_v56 = vrot.slane %v17222_v0, 4  ;;  %v17233_v62 = vadd.f32 %v17232_v60, %v17231_v48  ;;  %v17215_v14 = vadd.f32 %v17214_v45, %v17213_v28  ;;  %v17303_v44 = vmul.f32 %v27862_v13, %v26111_v29  ;;  %v27863_v28 = vld [vmem:[#allocation83_spill] sm:$0xff]  ;;  %v27865_v60 = vld [vmem:[#allocation38_spill] sm:$0xff]  ;;  %v27904_v54 = vld [vmem:[#allocation60_spill] sm:$0xff] }
 0x73c   : > { %27859 = vst [vmem:[#allocation141_spill] sm:$0xff] %v26091_v1  ;;  %v17305_v45 = vmul.f32 %v27865_v60, %v26079_v20  ;;  %v27869_v13 = vld [vmem:[#allocation43_spill] sm:$0xff]  ;;  %v27871_v60 = vld [vmem:[#allocation104_spill] sm:$0xff]  ;;  %v27896_v1 = vld [vmem:[#allocation97_spill] sm:$0xff]  ;;  %v17350_v31 = vsel %vm732_vm2, %v17302_v55, 0.0 }
 0x73d   : > { %v17224_v42 = vadd.f32 %v17223_v56, %v17222_v0  ;;  %v17234_v10 = vrot.slane %v17233_v62, 4  ;;  %v17216_v18 = vrot.slane %v17215_v14, 1  ;;  %v17304_v0 = vmul.f32 %v27863_v28, %v26113_v21  ;;  %v27866_v56 = vld [vmem:[#allocation48_spill] sm:$0xff]  ;;  %v27906_v15 = vld [vmem:[#allocation165_spill] sm:$0xff] }
 0x73e   : > { %v17309_v30 = vmul.f32 %v27869_v13, %v26111_v29  ;;  %v27875_v13 = vld [vmem:[#allocation130_spill] sm:$0xff] }
 0x73f   : > { %v17225_v27 = vrot.slane %v17224_v42, 2  ;;  %v17235_v33 = vadd.f32 %v17234_v10, %v17233_v62  ;;  %v26127_v48 = vadd.f32 %v17216_v18, %v17215_v14  ;;  %v17306_v62 = vmul.f32 %v27866_v56, %v26111_v29  ;;  %v27867_v10 = vld [vmem:[#allocation86_spill] sm:$0xff]  ;;  %v27870_v18 = vld [vmem:[#allocation103_spill] sm:$0xff] }
 0x740   : > { %v17307_v17 = vmul.f32 %v27867_v10, %v26113_v21  ;;  %v17310_v28 = vmul.f32 %v27870_v18, %v26113_v21  ;;  %v17311_v56 = vmul.f32 %v27871_v60, %v26079_v20  ;;  %v17312_v10 = vmul.f32 %v27872_v61, %v26111_v29  ;;  %v27877_v18 = vld [vmem:[#allocation137_spill] sm:$0xff]  ;;  %v27878_v60 = vld [vmem:[#allocation139_spill] sm:$0xff]  ;;  %v27879_v61 = vld [vmem:[#allocation162_spill] sm:$0xff] }
 0x741   : > { %v17226_v12 = vadd.f32 %v17225_v27, %v17224_v42  ;;  %v17236_v6 = vrot.slane %v17235_v33, 2  ;;  %27864 = vst [vmem:[#allocation136_spill] sm:$0xff] %v26127_v48  ;;  %v27868_v27 = vld [vmem:[#allocation87_spill] sm:$0xff]  ;;  %v17315_v36 = vmul.f32 %v27875_v13, %v26111_v29  ;;  %v17316_v19 = vmul.f32 %v27877_v18, %v26113_v21  ;;  %v27888_v13 = vld [vmem:[#allocation18_spill] sm:$0xff] }
 0x742   : > { %v17308_v35 = vmul.f32 %v27868_v27, %v26079_v20  ;;  %v27874_v27 = vld [vmem:[#allocation115_spill] sm:$0xff]  ;;  %v17317_v24 = vmul.f32 %v27878_v60, %v26079_v20  ;;  %v17318_v49 = vmul.f32 %v27879_v61, %v26111_v29  ;;  %v27886_v61 = vld [vmem:[#allocation29_spill] sm:$0xff]  ;;  %v17353_v40 = vsel %vm8314_vm10, %v17304_v0, 0.0 }
 0x743   : > { %v17227_v34 = vrot.slane %v17226_v12, 1  ;;  %v17237_v42 = vadd.f32 %v17236_v6, %v17235_v33  ;;  %v27873_v33 = vld [vmem:[#allocation113_spill] sm:$0xff]  ;;  %v17314_v50 = vmul.f32 %v27874_v27, %v26079_v20  ;;  %v27882_v27 = vld [vmem:[#allocation174_spill] sm:$0xff]  ;;  %v27884_v18 = vld [vmem:[#allocation191_spill] sm:$0xff]  ;;  %v17362_v39 = vsel %vm732_vm2, %v17306_v62, 0.0 }
 0x744   : > { %v17313_v6 = vmul.f32 %v27873_v33, %v26113_v21  ;;  %v27881_v33 = vld [vmem:[#allocation172_spill] sm:$0xff]  ;;  %v26167_v51 = vmul.f32 %v27882_v27, %v26079_v20  ;;  %v26177_v60 = vmul.f32 %v27884_v18, %v26113_v21  ;;  %v27889_v18 = vld [vmem:[#allocation13_spill] sm:$0xff]  ;;  %v17364_v58 = vsel %vm8314_vm10, %v17307_v17, 0.0 }
 0x745   : > { %v17238_v53 = vrot.slane %v17237_v42, 1  ;;  %v26153_v14 = vadd.f32 %v17227_v34, %v17226_v12  ;;  %v17319_v47 = vmul.f32 %v27881_v33, %v26113_v21  ;;  %v27883_v12 = vld [vmem:[#allocation171_spill] sm:$0xff]  ;;  %v26185_v33 = vmul.f32 %v27886_v61, %v26111_v29  ;;  %v27891_v61 = vld [vmem:[#allocation37_spill] sm:$0xff]  ;;  %v27892_v27 = vld [vmem:[#allocation56_spill] sm:$0xff] }
 0x746   : > { %v26171_v34 = vmul.f32 %v27883_v12, %v26111_v29  ;;  %v27887_v12 = vld [vmem:[#allocation31_spill] sm:$0xff]  ;;  %v26199_v59 = vmul.f32 %v27889_v18, %v26111_v29  ;;  %v26207_v43 = vmul.f32 %v27891_v61, %v26079_v20  ;;  %v26219_v18 = vmul.f32 %v27894_v3, %v26079_v20 }
 0x747   : > { %27876 = vst [vmem:[#allocation168_spill] sm:$0xff] %v26153_v14  ;;  %v26161_v4 = vadd.f32 %v17238_v53, %v17237_v42  ;;  %v27885_v53 = vld [vmem:[#allocation28_spill] sm:$0xff]  ;;  %v26191_v48 = vmul.f32 %v27887_v12, %v26113_v21  ;;  %v26195_v14 = vmul.f32 %v27888_v13, %v26079_v20  ;;  %v26211_v12 = vmul.f32 %v27892_v27, %v26111_v29 }
 0x748   : > { %v26181_v42 = vmul.f32 %v27885_v53, %v26079_v20  ;;  %v27890_v53 = vld [vmem:[#allocation30_spill] sm:$0xff]  ;;  %v26227_v61 = vmul.f32 %v27896_v1, %v26113_v21  ;;  %v26231_v27 = vmul.f32 %v27897_v52, %v26079_v20  ;;  %v26239_v3 = vmul.f32 %v27899_v8, %v26113_v21 }
 0x749   : > { %27880 = vst [vmem:[#allocation158_spill] sm:$0xff] %v26161_v4  ;;  %v26203_v2 = vmul.f32 %v27890_v53, %v26113_v21  ;;  %v27893_v4 = vld [vmem:[#allocation66_spill] sm:$0xff]  ;;  %v26223_v53 = vmul.f32 %v27895_v46, %v26111_v29  ;;  %v26243_v46 = vmul.f32 %v27900_v16, %v26079_v20  ;;  %v26247_v1 = vmul.f32 %v27901_v5, %v26111_v29 }
 0x74a   : > { %v26215_v13 = vmul.f32 %v27893_v4, %v26113_v21  ;;  %v26235_v4 = vmul.f32 %v27898_v41, %v26111_v29  ;;  %v26251_v52 = vmul.f32 %v27902_v26, %v26113_v21  ;;  %v26255_v41 = vmul.f32 %v27903_v32, %v26079_v20 }
 0x74b   : > { %v26259_v8 = vmul.f32 %v27904_v54, %v26111_v29  ;;  %v26263_v16 = vmul.f32 %v27905_v63, %v26113_v21  ;;  %v26267_v5 = vmul.f32 %v27906_v15, %v26079_v20  ;;  %v26271_v26 = vmul.f32 %v27907_v9, %v26111_v29 }
 0x74c   : > { %v26275_v32 = vmul.f32 %v27908_v37, %v26113_v21  ;;  %v17351_v54 = vsel %vm732_vm2, %v17303_v44, 0.0  ;;  %v17361_v63 = vsel %vm732_vm2, %v17305_v45, 0.0  ;;  %v17372_v9 = vsel %vm732_vm2, %v17308_v35, 0.0 }
 0x74d   : > { %v17352_v15 = vadd.f32 %v17351_v54, %v17350_v31  ;;  %v17363_v38 = vadd.f32 %v17362_v39, %v17361_v63  ;;  %v17373_v23 = vsel %vm732_vm2, %v17309_v30, 0.0  ;;  %v17375_v37 = vsel %vm8314_vm10, %v17310_v28, 0.0 }
 0x74e   : > { %v17383_v55 = vsel %vm732_vm2, %v17311_v56, 0.0  ;;  %v17384_v44 = vsel %vm732_vm2, %v17312_v10, 0.0  ;;  %v17374_v22 = vadd.f32 %v17373_v23, %v17372_v9  ;;  %v17386_v62 = vsel %vm8314_vm10, %v17313_v6, 0.0 }
 0x74f   : > { %v17354_v57 = vadd.f32 %v17353_v40, %v17352_v15  ;;  %v17365_v0 = vadd.f32 %v17364_v58, %v17363_v38  ;;  %v17385_v45 = vadd.f32 %v17384_v44, %v17383_v55  ;;  %v17394_v39 = vsel %vm732_vm2, %v17314_v50, 0.0 }
 0x750   : > { %v17395_v31 = vsel %vm732_vm2, %v17315_v36, 0.0  ;;  %v17397_v35 = vsel %vm8314_vm10, %v17316_v19, 0.0  ;;  %v17376_v54 = vadd.f32 %v17375_v37, %v17374_v22  ;;  %v17405_v56 = vsel %vm732_vm2, %v17317_v24, 0.0 }
 0x751   : > { %v17355_v17 = vrot.slane %v17354_v57, 4  ;;  %v17366_v30 = vrot.slane %v17365_v0, 4  ;;  %v17387_v28 = vadd.f32 %v17386_v62, %v17385_v45  ;;  %v17396_v63 = vadd.f32 %v17395_v31, %v17394_v39 }
 0x752   : > { %v17406_v40 = vsel %vm732_vm2, %v17318_v49, 0.0  ;;  %v17408_v38 = vsel %vm8314_vm10, %v17319_v47, 0.0  ;;  %v17377_v10 = vrot.slane %v17376_v54, 4  ;;  %v17416_v19 = vsel %vm732_vm2, %v26167_v51, 0.0 }
 0x753   : > { %v17356_v58 = vadd.f32 %v17355_v17, %v17354_v57  ;;  %v17367_v23 = vadd.f32 %v17366_v30, %v17365_v0  ;;  %v17388_v6 = vrot.slane %v17387_v28, 4  ;;  %v17398_v50 = vadd.f32 %v17397_v35, %v17396_v63 }
 0x754   : > { %v17407_v15 = vadd.f32 %v17406_v40, %v17405_v56  ;;  %v17417_v22 = vsel %vm732_vm2, %v26171_v34, 0.0  ;;  %v17378_v37 = vadd.f32 %v17377_v10, %v17376_v54  ;;  %v17419_v57 = vsel %vm8314_vm10, %v26177_v60, 0.0  ;;  %v27909_v40 = vld [vmem:[#allocation196_spill] sm:$0xff] }
 0x755   : > { %v17357_v36 = vrot.slane %v17356_v58, 2  ;;  %v17368_v9 = vrot.slane %v17367_v23, 2  ;;  %v17389_v24 = vadd.f32 %v17388_v6, %v17387_v28  ;;  %v17399_v55 = vrot.slane %v17398_v50, 4 }
 0x756   : > { %v17409_v49 = vadd.f32 %v17408_v38, %v17407_v15  ;;  %v17418_v44 = vadd.f32 %v17417_v22, %v17416_v19  ;;  %v17379_v45 = vrot.slane %v17378_v37, 2  ;;  %v17427_v34 = vsel %vm732_vm2, %v26181_v42, 0.0  ;;  %v27911_v22 = vld [vmem:[#allocation14_spill] sm:$0xff] }
 0x757   : > { %v17358_v47 = vadd.f32 %v17357_v36, %v17356_v58  ;;  %v17369_v0 = vadd.f32 %v17368_v9, %v17367_v23  ;;  %v17390_v62 = vrot.slane %v17389_v24, 2  ;;  %v17400_v39 = vadd.f32 %v17399_v55, %v17398_v50  ;;  %v27910_v58 = vld [vmem:[#allocation19_spill] sm:$0xff] }
 0x758   : > { %v17410_v31 = vrot.slane %v17409_v49, 4  ;;  %v17420_v51 = vadd.f32 %v17419_v57, %v17418_v44  ;;  %v17380_v30 = vadd.f32 %v17379_v45, %v17378_v37  ;;  %v17428_v60 = vsel %vm732_vm2, %v26185_v33, 0.0 }
 0x759   : > { %v17359_v35 = vrot.slane %v17358_v47, 1  ;;  %v17370_v17 = vrot.slane %v17369_v0, 1  ;;  %v17391_v54 = vadd.f32 %v17390_v62, %v17389_v24  ;;  %v17401_v28 = vrot.slane %v17400_v39, 2 }
 0x75a   : > { %v17411_v63 = vadd.f32 %v17410_v31, %v17409_v49  ;;  %v17421_v56 = vrot.slane %v17420_v51, 4  ;;  %v26307_v38 = vmul.f32 %v27909_v40, %v26079_v20  ;;  %v26311_v23 = vmul.f32 %v27910_v58, %v26111_v29 }
 0x75b   : > { %v17381_v10 = vrot.slane %v17380_v30, 1  ;;  %v17392_v42 = vrot.slane %v17391_v54, 1  ;;  %v17402_v6 = vadd.f32 %v17401_v28, %v17400_v39  ;;  %v17429_v19 = vadd.f32 %v17428_v60, %v17427_v34 }
 0x75c   : > { %v17412_v50 = vrot.slane %v17411_v63, 2  ;;  %v17422_v15 = vadd.f32 %v17421_v56, %v17420_v51  ;;  %v26315_v36 = vmul.f32 %v27911_v22, %v26113_v21  ;;  %v26317_v9 = vadd.f32 %v17359_v35, %v17358_v47 }
 0x75d   : > { %v26319_v33 = vadd.f32 %v17370_v17, %v17369_v0  ;;  %v17430_v20 = vsel %vm8314_vm10, %v26191_v48, 0.0  ;;  %v17403_v37 = vrot.slane %v17402_v6, 1  ;;  %v17438_v55 = vsel %vm732_vm2, %v26195_v14, 0.0 }
 0x75e   : > { %v17423_v29 = vrot.slane %v17422_v15, 2  ;;  %v17431_v24 = vadd.f32 %v17430_v20, %v17429_v19  ;;  %v26325_v49 = vadd.f32 %v17381_v10, %v17380_v30  ;;  %v17439_v44 = vsel %vm732_vm2, %v26199_v59, 0.0 }
 0x75f   : > { %v17449_v21 = vsel %vm732_vm2, %v26207_v43, 0.0  ;;  %v17450_v57 = vsel %vm732_vm2, %v26211_v12, 0.0  ;;  %v26333_v47 = vadd.f32 %v17392_v42, %v17391_v54  ;;  %v17413_v48 = vadd.f32 %v17412_v50, %v17411_v63 }
 0x760   : > { %v17432_v0 = vrot.slane %v17431_v24, 4  ;;  %v17441_v45 = vsel %vm8314_vm10, %v26203_v2, 0.0  ;;  %v17440_v62 = vadd.f32 %v17439_v44, %v17438_v55  ;;  %v17451_v14 = vadd.f32 %v17450_v57, %v17449_v21 }
 0x761   : > { %v17452_v39 = vsel %vm8314_vm10, %v26215_v13, 0.0  ;;  %v17460_v59 = vsel %vm732_vm2, %v26219_v18, 0.0  ;;  %v26341_v31 = vadd.f32 %v17403_v37, %v17402_v6  ;;  %v17424_v43 = vadd.f32 %v17423_v29, %v17422_v15 }
 0x762   : > { %v17433_v51 = vadd.f32 %v17432_v0, %v17431_v24  ;;  %v17461_v12 = vsel %vm732_vm2, %v26223_v53, 0.0  ;;  %v17442_v34 = vadd.f32 %v17441_v45, %v17440_v62  ;;  %v17453_v35 = vadd.f32 %v17452_v39, %v17451_v14 }
 0x763   : > { %v17462_v17 = vadd.f32 %v17461_v12, %v17460_v59  ;;  %v17463_v2 = vsel %vm8314_vm10, %v26227_v61, 0.0  ;;  %v17414_v30 = vrot.slane %v17413_v48, 1  ;;  %v17471_v13 = vsel %vm732_vm2, %v26231_v27, 0.0 }
 0x764   : > { %v17434_v54 = vrot.slane %v17433_v51, 2  ;;  %v17472_v18 = vsel %vm732_vm2, %v26235_v4, 0.0  ;;  %v17443_v28 = vrot.slane %v17442_v34, 4  ;;  %v17454_v63 = vrot.slane %v17453_v35, 4 }
 0x765   : > { %v17464_v56 = vadd.f32 %v17463_v2, %v17462_v17  ;;  %v17473_v60 = vadd.f32 %v17472_v18, %v17471_v13  ;;  %v17425_v40 = vrot.slane %v17424_v43, 1  ;;  %v17474_v53 = vsel %vm8314_vm10, %v26239_v3, 0.0 }
 0x766   : > { %v17482_v58 = vsel %vm732_vm2, %v26243_v46, 0.0  ;;  %v17483_v61 = vsel %vm732_vm2, %v26247_v1, 0.0  ;;  %v17444_v10 = vadd.f32 %v17443_v28, %v17442_v34  ;;  %v17455_v42 = vadd.f32 %v17454_v63, %v17453_v35 }
 0x767   : > { %v17465_v27 = vrot.slane %v17464_v56, 4  ;;  %v17475_v6 = vadd.f32 %v17474_v53, %v17473_v60  ;;  %v17435_v50 = vadd.f32 %v17434_v54, %v17433_v51  ;;  %v17484_v4 = vadd.f32 %v17483_v61, %v17482_v58 }
 0x768   : > { %v17485_v15 = vsel %vm8314_vm10, %v26251_v52, 0.0  ;;  %v17493_v19 = vsel %vm732_vm2, %v26255_v41, 0.0  ;;  %v17445_v22 = vrot.slane %v17444_v10, 2  ;;  %v17456_v3 = vrot.slane %v17455_v42, 2 }
 0x769   : > { %v17466_v20 = vadd.f32 %v17465_v27, %v17464_v56  ;;  %v17476_v37 = vrot.slane %v17475_v6, 4  ;;  %v26361_v46 = vadd.f32 %v17414_v30, %v17413_v48  ;;  %v17486_v29 = vadd.f32 %v17485_v15, %v17484_v4  ;;  %v18771_v27 = vld [vmem:[%s25360_s17] sm:$0xff] }
 0x76a   : > { %v17494_v1 = vsel %vm732_vm2, %v26259_v8, 0.0  ;;  %v17496_v24 = vsel %vm8314_vm10, %v26263_v16, 0.0  ;;  %v17446_v55 = vadd.f32 %v17445_v22, %v17444_v10  ;;  %v17457_v44 = vadd.f32 %v17456_v3, %v17455_v42 }
 0x76b   : > { %v17467_v21 = vrot.slane %v17466_v20, 2  ;;  %v17477_v52 = vadd.f32 %v17476_v37, %v17475_v6  ;;  %v17487_v57 = vrot.slane %v17486_v29, 4  ;;  %v17495_v0 = vadd.f32 %v17494_v1, %v17493_v19 }
 0x76c   : > { %v17504_v41 = vsel %vm732_vm2, %v26267_v5, 0.0  ;;  %v17505_v48 = vsel %vm732_vm2, %v26271_v26, 0.0  ;;  %v26371_v45 = vadd.f32 %v17425_v40, %v17424_v43  ;;  %v17436_v62 = vrot.slane %v17435_v50, 1 }
 0x76d   : > { %v17468_v14 = vadd.f32 %v17467_v21, %v17466_v20  ;;  %v17478_v8 = vrot.slane %v17477_v52, 2  ;;  %v17488_v39 = vadd.f32 %v17487_v57, %v17486_v29  ;;  %v17497_v59 = vadd.f32 %v17496_v24, %v17495_v0  ;;  %v18772_v29 = vld [vmem:[%s25360_s17 + $0x8] sm:$0xff] }
 0x76e   : > { %v17506_v16 = vadd.f32 %v17505_v48, %v17504_v41  ;;  %v17507_v51 = vsel %vm8314_vm10, %v26275_v32, 0.0  ;;  %v17447_v12 = vrot.slane %v17446_v55, 1  ;;  %v17458_v34 = vrot.slane %v17457_v44, 1 }
 0x76f   : > { %v17469_v35 = vrot.slane %v17468_v14, 1  ;;  %v17479_v17 = vadd.f32 %v17478_v8, %v17477_v52  ;;  %v17489_v2 = vrot.slane %v17488_v39, 2  ;;  %v17498_v5 = vrot.slane %v17497_v59, 4 }
 0x770   : > { %v17508_v30 = vadd.f32 %v17507_v51, %v17506_v16  ;;  %v17515_v26 = vsel %vm732_vm2, %v26307_v38, 0.0  ;;  %v17437_v43 = vadd.f32 %v17436_v62, %v17435_v50  ;;  %v17516_v13 = vsel %vm732_vm2, %v26311_v23, 0.0 }
 0x771   : > { %v17480_v54 = vrot.slane %v17479_v17, 1  ;;  %v17518_v18 = vsel %vm8314_vm10, %v26315_v36, 0.0  ;;  %v17490_v32 = vadd.f32 %v17489_v2, %v17488_v39  ;;  %v17499_v28 = vadd.f32 %v17498_v5, %v17497_v59 }
 0x772   : > { %v17509_v63 = vrot.slane %v17508_v30, 4  ;;  %v17517_v56 = vadd.f32 %v17516_v13, %v17515_v26  ;;  %v17448_v60 = vadd.f32 %v17447_v12, %v17446_v55  ;;  %v17459_v40 = vadd.f32 %v17458_v34, %v17457_v44 }
 0x773   : > { %v17470_v53 = vadd.f32 %v17469_v35, %v17468_v14  ;;  %v17481_v58 = vadd.f32 %v17480_v54, %v17479_v17  ;;  %v17491_v61 = vrot.slane %v17490_v32, 1  ;;  %v17500_v38 = vrot.slane %v17499_v28, 2 }
 0x774   : > { %v17510_v10 = vadd.f32 %v17509_v63, %v17508_v30  ;;  %v17519_v42 = vadd.f32 %v17518_v18, %v17517_v56  ;;  %v17528_v6 = vrot.slane %v18771_v27, 1  ;;  %v17529_v50 = vrot.slane %v18771_v27, 2  ;;  %v27915_v56 = vld [vmem:[#allocation36_spill] sm:$0xff] }
 0x775   : > { %v17530_v23 = vrot.slane %v18771_v27, 3  ;;  %v17531_v4 = vrot.slane %v18771_v27, 4  ;;  %v17501_v15 = vadd.f32 %v17500_v38, %v17499_v28  ;;  %v17532_v22 = vrot.slane %v18771_v27, 5  ;;  %v27913_v28 = vld [vmem:[#allocation34_spill] sm:$0xff] }
 0x776   : > { %v17511_v36 = vrot.slane %v17510_v10, 2  ;;  %v17520_v19 = vrot.slane %v17519_v42, 4  ;;  %v17492_v3 = vadd.f32 %v17491_v61, %v17490_v32  ;;  %v17533_v20 = vrot.slane %v18771_v27, 6  ;;  %v27919_v61 = vld [vmem:[#allocation25_spill] sm:$0xff]  ;;  %v27921_v38 = vld [vmem:[#allocation46_spill] sm:$0xff] }
 0x777   : > { %v17534_v37 = vrot.slane %v18771_v27, 7  ;;  %v17535_v1 = vrot.slane %v18772_v29, 1  ;;  %v17502_v24 = vrot.slane %v17501_v15, 1  ;;  %v17536_v21 = vrot.slane %v18772_v29, 2 }
 0x778   : > { %v17512_v55 = vadd.f32 %v17511_v36, %v17510_v10  ;;  %v17521_v44 = vadd.f32 %v17520_v19, %v17519_v42  ;;  %v17537_v52 = vrot.slane %v18772_v29, 3  ;;  %v17538_v57 = vrot.slane %v18772_v29, 4  ;;  %v27922_v10 = vld [vmem:[#allocation10_spill] sm:$0xff]  ;;  %v27931_v19 = vld [vmem:[#allocation135_spill] sm:$0xff] }
 0x779   : > { %v17539_v0 = vrot.slane %v18772_v29, 5  ;;  %v17540_v41 = vrot.slane %v18772_v29, 6  ;;  %v17541_v14 = vrot.slane %v18772_v29, 7  ;;  %v17558_v8 = vmul.f32 %v18771_v27, %v26317_v9  ;;  %v27930_v36 = vld [vmem:[#allocation122_spill] sm:$0xff] }
 0x77a   : > { %v17513_v48 = vrot.slane %v17512_v55, 1  ;;  %v17522_v62 = vrot.slane %v17521_v44, 2  ;;  %v17503_v39 = vadd.f32 %v17502_v24, %v17501_v15  ;;  %v17559_v59 = vmul.f32 %v17528_v6, %v26319_v33  ;;  %v27924_v6 = vld [vmem:[#allocation49_spill] sm:$0xff] }
 0x77b   : > { %v17560_v16 = vmul.f32 %v17529_v50, %v26325_v49  ;;  %v17561_v51 = vmul.f32 %v17530_v23, %v26333_v47  ;;  %v17562_v35 = vmul.f32 %v17531_v4, %v26341_v31  ;;  %v17563_v17 = vmul.f32 %v17532_v22, %v26361_v46  ;;  %v27927_v23 = vld [vmem:[#allocation45_spill] sm:$0xff] }
 0x77c   : > { %v17514_v12 = vadd.f32 %v17513_v48, %v17512_v55  ;;  %v17523_v34 = vadd.f32 %v17522_v62, %v17521_v44  ;;  %v17564_v2 = vmul.f32 %v17533_v20, %v26371_v45  ;;  %v17565_v5 = vmul.f32 %v17534_v37, %v17437_v43  ;;  %v27916_v45 = vld [vmem:[#allocation55_spill] sm:$0xff]  ;;  %v27933_v20 = vld [vmem:[#allocation120_spill] sm:$0xff]  ;;  %v27934_v37 = vld [vmem:[#allocation54_spill] sm:$0xff] }
 0x77d   : > { %v17566_v30 = vmul.f32 %v18772_v29, %v17448_v60  ;;  %v17567_v26 = vmul.f32 %v17535_v1, %v17459_v40  ;;  %v17568_v9 = vmul.f32 %v17536_v21, %v17470_v53  ;;  %v17569_v13 = vmul.f32 %v17537_v52, %v17481_v58  ;;  %v27918_v40 = vld [vmem:[#allocation51_spill] sm:$0xff]  ;;  %v27936_v55 = vld [vmem:[#allocation124_spill] sm:$0xff] }
 0x77e   : > { %v17524_v54 = vrot.slane %v17523_v34, 1  ;;  %v17570_v18 = vmul.f32 %v17538_v57, %v17492_v3  ;;  %v17571_v33 = vmul.f32 %v17539_v0, %v17503_v39  ;;  %v17572_v32 = vmul.f32 %v17540_v41, %v17514_v12  ;;  %v27937_v44 = vld [vmem:[#allocation7_spill] sm:$0xff]  ;;  %v27940_v0 = vld [vmem:[#allocation194_spill] sm:$0xff]  ;;  %v27942_v62 = vld [vmem:[#allocation128_spill] sm:$0xff] }
 0x77f   : > { %v27912_v49 = vsub.f32 %v25986_v25, %v25971_v7  ;;  %v27914_v31 = vsub.f32 %v25993_v11, %v27913_v28  ;;  %v27917_v43 = vsub.f32 %v27915_v56, %v27916_v45  ;;  %v27920_v53 = vsub.f32 %v27918_v40, %v27919_v61  ;;  %v27925_v7 = vld [vmem:[#allocation129_spill] sm:$0xff]  ;;  %v27939_v57 = vld [vmem:[#allocation123_spill] sm:$0xff]  ;;  %v27955_v56 = vld [vmem:[#allocation158_spill] sm:$0xff] }
 0x780   : > { %v17525_v46 = vadd.f32 %v17524_v54, %v17523_v34  ;;  %v27923_v42 = vsub.f32 %v27921_v38, %v27922_v10  ;;  %v27926_v25 = vsub.f32 %v27924_v6, %v27925_v7  ;;  %v27928_v11 = vld [vmem:[#allocation157_spill] sm:$0xff]  ;;  %v27932_v22 = vsub.f32 %v27930_v36, %v27931_v19  ;;  %v27951_v54 = vld [vmem:[#allocation163_spill] sm:$0xff] }
 0x781   : > { %v17576_v47 = vmul.f32 %v17559_v59, %v27912_v49  ;;  %v17577_v63 = vmul.f32 %v17560_v16, %v27914_v31  ;;  %v17575_v60 = vmul.f32 %v17558_v8, %v27917_v43  ;;  %v17578_v58 = vmul.f32 %v17561_v51, %v27920_v53  ;;  %v27943_v8 = vld [vmem:[#allocation141_spill] sm:$0xff] }
 0x782   : > { %v17579_v27 = vmul.f32 %v17562_v35, %v27923_v42  ;;  %v17580_v50 = vmul.f32 %v17563_v17, %v27926_v25  ;;  %v27929_v4 = vsub.f32 %v27927_v23, %v27928_v11  ;;  %v17582_v3 = vmul.f32 %v17565_v5, %v27932_v22  ;;  %v27945_v16 = vld [vmem:[#allocation93_spill] sm:$0xff]  ;;  %v27948_v35 = vld [vmem:[#allocation116_spill] sm:$0xff] }
 0x783   : > { %v27935_v29 = vsub.f32 %v27933_v20, %v27934_v37  ;;  %v17573_v24 = vmul.f32 %v17541_v14, %v17525_v46  ;;  %v27938_v21 = vsub.f32 %v27936_v55, %v27937_v44  ;;  %v27941_v41 = vsub.f32 %v27939_v57, %v27940_v0  ;;  %v27946_v51 = vld [vmem:[#allocation161_spill] sm:$0xff]  ;;  %v27949_v17 = vld [vmem:[#allocation136_spill] sm:$0xff]  ;;  %v27954_v46 = vld [vmem:[#allocation155_spill] sm:$0xff]  ;;  %v17665_v37 = vpop.xlane.xlu0 %17664 }
 0x784   : > { %v17581_v15 = vmul.f32 %v17564_v2, %v27929_v4  ;;  %v27944_v39 = vsub.f32 %v27942_v62, %v27943_v8  ;;  %v27947_v12 = vsub.f32 %v27945_v16, %v27946_v51  ;;  %v27950_v2 = vsub.f32 %v27948_v35, %v27949_v17 }
 0x785   : > { %v17583_v1 = vmul.f32 %v17566_v30, %v27935_v29  ;;  %v17584_v52 = vmul.f32 %v17567_v26, %v27938_v21  ;;  %v17585_v48 = vmul.f32 %v17568_v9, %v27941_v41  ;;  %v17607_v5 = vrot.slane %v17576_v47, 7  ;;  %v27952_v26 = vld [vmem:[#allocation168_spill] sm:$0xff] }
 0x786   : > { %v17586_v59 = vmul.f32 %v17569_v13, %v27944_v39  ;;  %v17587_v34 = vmul.f32 %v17570_v18, %v27947_v12  ;;  %v17588_v14 = vmul.f32 %v17571_v33, %v27950_v2  ;;  %v17610_v30 = vrot.slane %v17577_v63, 6 }
 0x787   : > { %v27953_v49 = vsub.f32 %v27951_v54, %v27952_v26  ;;  %vm17608_vm10 = vcmask 1041409   ;;  %v17613_v9 = vrot.slane %v17578_v58, 5  ;;  %v17616_v31 = vrot.slane %v17579_v27, 4 }
 0x788   : > { %v27956_v13 = vsub.f32 %v27954_v46, %v27955_v56  ;;  %v17609_v43 = vsel %vm17608_vm10, %v17607_v5, %v17575_v60  ;;  %v17619_v18 = vrot.slane %v17580_v50, 3  ;;  %v17622_v33 = vrot.slane %v17581_v15, 2 }
 0x789   : > { %v17589_v28 = vmul.f32 %v17572_v32, %v27953_v49  ;;  %v17612_v40 = vsel %vm17611_vm8, %v17610_v30, %v17609_v43  ;;  %v17625_v63 = vrot.slane %v17582_v3, 1  ;;  %v17628_v32 = vrot.slane %v17584_v52, 7 }
 0x78a   : > { %v17590_v45 = vmul.f32 %v17573_v24, %v27956_v13  ;;  %v17615_v47 = vsel %vm17614_vm9, %v17613_v9, %v17612_v40  ;;  %v17630_v61 = vrot.slane %v17585_v48, 6  ;;  %v17632_v58 = vrot.slane %v17586_v59, 5 }
 0x78b   : > { %v17618_v53 = vsel %vm17617_vm11, %v17616_v31, %v17615_v47  ;;  %v17634_v38 = vrot.slane %v17587_v34, 4  ;;  %v17629_v60 = vsel %vm17608_vm10, %v17628_v32, %v17583_v1  ;;  %v17636_v42 = vrot.slane %v17588_v14, 3 }
 0x78c   : > { %v17621_v10 = vsel %vm17620_vm12, %v17619_v18, %v17618_v53  ;;  %v17631_v6 = vsel %vm17611_vm8, %v17630_v61, %v17629_v60  ;;  %v17638_v7 = vrot.slane %v17589_v28, 2  ;;  %v17640_v23 = vrot.slane %v17590_v45, 1 }
 0x78d   : > { %v17624_v27 = vsel %vm17623_vm13, %v17622_v33, %v17621_v10  ;;  %v17633_v50 = vsel %vm17614_vm9, %v17632_v58, %v17631_v6  ;;  %v27957_v20 = vmov 0.0   ;;  %v17666_v29 = vrot.slane %v17665_v37, 4 }
 0x78e   : > { %v17627_v25 = vsel %vm17626_vm14, %v17625_v63, %v17624_v27  ;;  %v17635_v11 = vsel %vm17617_vm11, %v17634_v38, %v17633_v50  ;;  %403 = vst.msk [vmem:[%s393_s10] sm:$0x1] %vm402_vm15, %v27957_v20  ;;  %404 = vst.msk [vmem:[%s396_s22] sm:$0x1] %vm402_vm15, %v27957_v20 }
 0x78f   : > { %v17637_v4 = vsel %vm17620_vm12, %v17636_v42, %v17635_v11  ;;  %v17644_v36 = vsel %vm732_vm2, %v17627_v25, 0.0  ;;  %v17667_v1 = vadd.f32 %v17666_v29, %v17665_v37 }
 0x790   : > { %v17639_v15 = vsel %vm17623_vm13, %v17638_v7, %v17637_v4 }
 0x791   : > { %v17641_v19 = vsel %vm17626_vm14, %v17640_v23, %v17639_v15  ;;  %v17668_v24 = vrot.slane %v17667_v1, 2 }
 0x792   : > { %v17645_v22 = vsel %vm732_vm2, %v17641_v19, 0.0 }
 0x793   : > { %v17646_v3 = vadd.f32 %v17645_v22, %v17644_v36  ;;  %v17669_v52 = vadd.f32 %v17668_v24, %v17667_v1 }
 0x795   : > { %17647 = vadd.xlane.f32.xlu1 %v17646_v3  ;;  %v17670_v41 = vrot.slane %v17669_v52, 1  ;;  %v17574_v39 = vld [vmem:[%s393_s10] sm:$0x1] }
 0x796   : > { %v17660_v59 = vld [vmem:[%s396_s22] sm:$0x1] }
 0x797   : > { %v17671_v8 = vadd.f32 %v17670_v41, %v17669_v52 }
 0x81e   : > { %v17648_v55 = vpop.xlane.xlu1 %17647 }
 0x81f   : > { %v17649_v44 = vrot.slane %v17648_v55, 4 }
 0x821   : > { %v17650_v21 = vadd.f32 %v17649_v44, %v17648_v55 }
 0x823   : > { %v17651_v57 = vrot.slane %v17650_v21, 2 }
 0x825   : > { %v17652_v0 = vadd.f32 %v17651_v57, %v17650_v21 }
 0x827   : > { %v17653_v48 = vrot.slane %v17652_v0, 1 }
 0x829   : > { %v17654_v62 = vadd.f32 %v17653_v48, %v17652_v0 }
 0x82b   : > { %18126 = vpush %v17654_v62 }
 0x82c   : > { %18128 = vpush %v17671_v8 }
 0x85c   : > { %s18127_s13 = spop %18126 }
 0x85d   : > { %v17656_v16 = vstv %s18127_s13  ;;  %s18129_s23 = spop %18128 }
 0x85e   : > { %v17657_v51 = vadd.f32 %v17656_v16, %v17574_v39  ;;  %v17673_v12 = vstv %s18129_s23 }
 0x85f   : > { %v17674_v34 = vadd.f32 %v17673_v12, %v17660_v59 }
 0x860   : > { %17659 = vst.msk [vmem:[%s393_s10] sm:$0x1] %vm402_vm15, %v17657_v51 }
 0x861   : > { %17675 = vst.msk [vmem:[%s396_s22] sm:$0x1] %vm402_vm15, %v17674_v34 }
 0x862 PF: > { %s25_s12 = sadd.s32 1, %s18809_s12   ;;  %s27958_s10 = smov %s18805_s11 }
 0x863   : > { %p22_p11 = scmp.ge.s32.totalorder %s25_s12, 16   ;;  %s27959_s11 = smov %s27961_s0 }
 0x865   :  { %24 = sbr.rel (!%p22_p11) target bundleno = 17 (0x11), region = 99 }

</bundles_post_ra>
